<compile_context>
chip_gen: v7x
topology: tpu7x:2x2x1
jax: 0.10.0
libtpu: 0.0.40
codegen_flags: <defaults>
</compile_context>

<pallas_src>
import functools

import jax
import jax.numpy as jnp
import numpy as np
from jax.experimental import pallas as pl
from jax.experimental.pallas import tpu as pltpu

EPS = 1e-5
VMEM_LIMIT = 32 * 1024 * 1024


# ----------------------- Kernel 1: fused MLP head (l1+l2+l3) ----------------------- #

def _mlp_head_kernel(z_ref, w1_ref, b1_ref, g1_ref, be1_ref,
                     w2_ref, b2_ref, g2_ref, be2_ref,
                     w3_ref, b3_ref, o_ref):
    def bn_relu(h, g, be):
        # BatchNorm1d, training mode, biased variance, one-pass E[x^2]-mean^2.
        mean = jnp.mean(h, axis=0, keepdims=True)
        var = jnp.mean(h * h, axis=0, keepdims=True) - mean * mean
        hn = (h - mean) * jax.lax.rsqrt(var + EPS) * g + be
        return jnp.maximum(hn, 0.0)

    # l1 / l2 are tiny; recomputing them per grid step keeps the grid fully parallel
    # (no cross-iteration scratch carry) at negligible cost.
    z = z_ref[...]
    h = jnp.dot(z, w1_ref[...], preferred_element_type=jnp.float32) + b1_ref[...]
    h = bn_relu(h, g1_ref[...], be1_ref[...])
    h = jnp.dot(h, w2_ref[...], preferred_element_type=jnp.float32) + b2_ref[...]
    h = bn_relu(h, g2_ref[...], be2_ref[...])
    # l3: this grid step's column tile of the (pre-permuted) big projection.
    o_ref[...] = (jnp.dot(h.astype(jnp.bfloat16), w3_ref[...],
                          preferred_element_type=jnp.float32) + b3_ref[...])


def mlp_head(z, w1, b1, g1, be1, w2, b2, g2, be2, w3, b3):
    B, latent = z.shape
    hidden = w1.shape[1]
    proj = w2.shape[1]
    d3 = w3.shape[1]
    tn = 512 if d3 % 512 == 0 else d3          # column tile of the l3 projection
    grid = (d3 // tn,)

    w3b = w3.astype(jnp.bfloat16)
    return pl.pallas_call(
        _mlp_head_kernel,
        out_shape=jax.ShapeDtypeStruct((B, d3), jnp.float32),
        grid_spec=pltpu.PrefetchScalarGridSpec(
            num_scalar_prefetch=0,
            grid=grid,
            in_specs=[
                pl.BlockSpec((B, latent), lambda j: (0, 0)),
                pl.BlockSpec((latent, hidden), lambda j: (0, 0)),
                pl.BlockSpec((1, hidden), lambda j: (0, 0)),
                pl.BlockSpec((1, hidden), lambda j: (0, 0)),
                pl.BlockSpec((1, hidden), lambda j: (0, 0)),
                pl.BlockSpec((hidden, proj), lambda j: (0, 0)),
                pl.BlockSpec((1, proj), lambda j: (0, 0)),
                pl.BlockSpec((1, proj), lambda j: (0, 0)),
                pl.BlockSpec((1, proj), lambda j: (0, 0)),
                pl.BlockSpec((latent, tn), lambda j: (0, j)),   # l3 weight column tile
                pl.BlockSpec((1, tn), lambda j: (0, j)),        # l3 bias column tile
            ],
            out_specs=pl.BlockSpec((B, tn), lambda j: (0, j)),
        ),
        compiler_params=pltpu.CompilerParams(
            dimension_semantics=("parallel",),
            vmem_limit_bytes=VMEM_LIMIT,
        ),
    )(z, w1, b1.reshape(1, -1), g1.reshape(1, -1), be1.reshape(1, -1),
      w2, b2.reshape(1, -1), g2.reshape(1, -1), be2.reshape(1, -1),
      w3b, b3)


# -------------- Kernels 2-4: fused BN2d + LeakyReLU + 3x3 conv (+tanh) ------------- #

def _conv_stage_kernel(xall_ref, xb_ref, g_ref, be_ref, w_ref, b_ref, o_ref,
                       *, apply_tanh):
    B, H, W, Cin = xall_ref.shape
    # --- BatchNorm2d statistics over (B, H, W), one-pass E[x^2]-mean^2, f32.
    #     Recomputed per (parallel) grid step: trivial vs the conv matmul and keeps
    #     grid iterations independent (megacore/v7x friendly).
    xf = xall_ref[...].reshape(B * H * W, Cin)
    mean = jnp.mean(xf, axis=0, keepdims=True)
    var = jnp.mean(xf * xf, axis=0, keepdims=True) - mean * mean
    scale2 = g_ref[...] * jax.lax.rsqrt(var + EPS)          # (1, Cin)
    shift2 = be_ref[...] - mean * scale2                    # (1, Cin)
    scale = scale2.reshape(1, 1, Cin)
    shift = shift2.reshape(1, 1, Cin)

    # --- Normalize + LeakyReLU(0.2) for this batch element (per-batch block).
    xb = xb_ref[0]                                          # (H, W, Cin)
    y = xb * scale + shift
    y = jnp.where(y > 0, y, 0.2 * y).astype(jnp.bfloat16)

    # --- Zero halo for the 'same' 3x3 conv, built inside the kernel (no XLA pad).
    zr = jnp.zeros((1, W, Cin), jnp.bfloat16)
    y = jnp.concatenate([zr, y, zr], axis=0)                # (H+2, W,   Cin)
    zc = jnp.zeros((H + 2, 1, Cin), jnp.bfloat16)
    y = jnp.concatenate([zc, y, zc], axis=1)                # (H+2, W+2, Cin)

    # --- im2col: 9 shifted windows lane-concatenated -> ONE K = 9*Cin MXU matmul.
    cols = [y[ky:ky + H, kx:kx + W, :].reshape(H * W, Cin)
            for ky in range(3) for kx in range(3)]
    m = jnp.concatenate(cols, axis=-1)                      # (H*W, 9*Cin) bf16
    acc = jnp.dot(m, w_ref[...], preferred_element_type=jnp.float32) + b_ref[...]
    if apply_tanh:
        acc = jnp.tanh(acc)
    o_ref[0] = acc                                          # lane-dense (H*W, Cout) store


def conv_stage(x, gamma, beta, w, b, apply_tanh=False):
    # x: NHWC conv input (already upsampled if the stage has an Upsample).
    B, H, W, Cin = x.shape
    Cout = w.shape[-1]
    w2d = w.reshape(9 * Cin, Cout).astype(jnp.bfloat16)     # (ky,kx,ci) row order
    kernel = functools.partial(_conv_stage_kernel, apply_tanh=apply_tanh)
    out = pl.pallas_call(
        kernel,
        out_shape=jax.ShapeDtypeStruct((B, H * W, Cout), jnp.float32),
        grid_spec=pltpu.PrefetchScalarGridSpec(
            num_scalar_prefetch=0,
            grid=(B,),
            in_specs=[
                pl.BlockSpec((B, H, W, Cin), lambda b: (0, 0, 0, 0)),  # full (BN stats)
                pl.BlockSpec((1, H, W, Cin), lambda b: (b, 0, 0, 0)),  # this batch
                pl.BlockSpec((1, Cin), lambda b: (0, 0)),
                pl.BlockSpec((1, Cin), lambda b: (0, 0)),
                pl.BlockSpec((9 * Cin, Cout), lambda b: (0, 0)),
                pl.BlockSpec((1, Cout), lambda b: (0, 0)),
            ],
            out_specs=pl.BlockSpec((1, H * W, Cout), lambda b: (b, 0, 0)),
        ),
        compiler_params=pltpu.CompilerParams(
            dimension_semantics=("parallel",),
            vmem_limit_bytes=VMEM_LIMIT,
        ),
    )(x, x, gamma.reshape(1, -1), beta.reshape(1, -1), w2d, b.reshape(1, -1))
    return out.reshape(B, H, W, Cout)


# ---------------------------------- JAX glue --------------------------------------- #

def upsample2x(x):  # nearest-neighbour, NHWC
    return jnp.repeat(jnp.repeat(x, 2, axis=1), 2, axis=2)


def init_params(key, latent_dim, hidden_dim, image_size):
    project_dim = latent_dim  # required for the reference forward to typecheck
    std = 0.02                # F_init='normal' style deterministic init
    ks = jax.random.split(key, 20)
    n = lambda k, shape: std * jax.random.normal(k, shape, jnp.float32)
    gm = lambda k, c: 1.0 + 0.1 * jax.random.normal(k, (c,), jnp.float32)
    bt = lambda k, c: 0.1 * jax.random.normal(k, (c,), jnp.float32)
    p = {
        # l1: Linear(latent, hidden) + BN1d + ReLU
        "w1": n(ks[0], (latent_dim, hidden_dim)), "b1": bt(ks[1], hidden_dim),
        "g1": gm(ks[2], hidden_dim), "be1": bt(ks[3], hidden_dim),
        # l2: Linear(hidden, project) + BN1d + ReLU
        "w2": n(ks[4], (hidden_dim, project_dim)), "b2": bt(ks[5], project_dim),
        "g2": gm(ks[6], project_dim), "be2": bt(ks[7], project_dim),
        # l3: Linear(latent, 128 * image_size**2)
        "w3": n(ks[8], (project_dim, 128 * image_size ** 2)),
        "b3": bt(ks[9], 128 * image_size ** 2),
        # conv_block
        "gA": gm(ks[10], 128), "bA": bt(ks[10], 128),
        "wc1": n(ks[11], (3, 3, 128, 128)), "bc1": bt(ks[12], 128),
        "gB": gm(ks[13], 128), "bB": bt(ks[13], 128),
        "wc2": n(ks[14], (3, 3, 128, 64)), "bc2": bt(ks[15], 64),
        "gC": gm(ks[16], 64), "bC": bt(ks[16], 64),
        "wc3": n(ks[17], (3, 3, 64, 3)), "bc3": bt(ks[18], 3),
    }
    return p


def generator_forward(z, p, image_size):
    B = z.shape[0]
    S = image_size

    # Pre-permute l3 weight columns (and bias) so the fused MLP kernel directly emits
    # an NHWC-flat activation: the reference's .view(B,128,S,S) + NCHW->NHWC transpose
    # becomes a free contiguous reshape of the kernel output.
    w3 = (p["w3"].reshape(-1, 128, S, S).transpose(0, 2, 3, 1)
          .reshape(-1, S * S * 128))
    b3 = p["b3"].reshape(128, S, S).transpose(1, 2, 0).reshape(1, -1)

    o1 = mlp_head(z, p["w1"], p["b1"], p["g1"], p["be1"],
                  p["w2"], p["b2"], p["g2"], p["be2"], w3, b3)
    x = o1.reshape(B, S, S, 128)                            # NHWC, free reshape

    # Stage 1: BN2d + LReLU + Upsample + Conv(128->128)
    # (upsample commutes exactly with BN affine + LReLU and leaves BN stats unchanged,
    #  so it is applied to the raw activation; BN+LReLU+conv fuse into one kernel.)
    x = upsample2x(x)
    x = conv_stage(x, p["gA"], p["bA"], p["wc1"], p["bc1"])

    # Stage 2: BN2d + LReLU + Upsample + Conv(128->64)
    x = upsample2x(x)
    x = conv_stage(x, p["gB"], p["bB"], p["wc2"], p["bc2"])

    # Stage 3: BN2d + LReLU + Conv(64->3) + tanh.  Output channels padded to 128 so
    # the kernel's stores are lane-dense; sliced back to 3 afterwards.
    wc3 = jnp.pad(p["wc3"], ((0, 0), (0, 0), (0, 0), (0, 128 - 3)))
    bc3 = jnp.pad(p["bc3"], ((0, 128 - 3),))
    x = conv_stage(x, p["gC"], p["bC"], wc3, bc3, apply_tanh=True)
    x = x[..., :3]
    return jnp.transpose(x, (0, 3, 1, 2))                   # NCHW (B, 3, 4S, 4S)


# ------------------------------ pure-JAX reference --------------------------------- #

def _ref_forward(z, p, image_size):
    def bn(x, g, b, axes):
        m = jnp.mean(x, axis=axes, keepdims=True)
        v = jnp.mean((x - m) ** 2, axis=axes, keepdims=True)
        return (x - m) / jnp.sqrt(v + EPS) * g + b

    def conv(x, w, b):  # NHWC, HWIO
        y = jax.lax.conv_general_dilated(
            x, w, (1, 1), "SAME", dimension_numbers=("NHWC", "HWIO", "NHWC"))
        return y + b

    B = z.shape[0]
    h = jnp.maximum(bn(z @ p["w1"] + p["b1"], p["g1"], p["be1"], (0,)), 0.0)
    h = jnp.maximum(bn(h @ p["w2"] + p["b2"], p["g2"], p["be2"], (0,)), 0.0)
    o1 = h @ p["w3"] + p["b3"]
    x = jnp.transpose(o1.reshape(B, 128, image_size, image_size), (0, 2, 3, 1))
    lrelu = lambda t: jnp.where(t > 0, t, 0.2 * t)
    x = lrelu(bn(x, p["gA"], p["bA"], (0, 1, 2)))
    x = upsample2x(x)
    x = conv(x, p["wc1"], p["bc1"])
    x = lrelu(bn(x, p["gB"], p["bB"], (0, 1, 2)))
    x = upsample2x(x)
    x = conv(x, p["wc2"], p["bc2"])
    x = lrelu(bn(x, p["gC"], p["bC"], (0, 1, 2)))
    x = jnp.tanh(conv(x, p["wc3"], p["bc3"]))
    return jnp.transpose(x, (0, 3, 1, 2))


# -------------------------------------- main ---------------------------------------- #

if __name__ == "__main__":
    B, latent_dim, hidden_dim, image_size = 2, 16, 32, 4

    key = jax.random.PRNGKey(0)
    kz, kp = jax.random.split(key)
    z = jax.random.normal(kz, (B, latent_dim), jnp.float32)
    params = init_params(kp, latent_dim, hidden_dim, image_size)

    fwd = jax.jit(functools.partial(generator_forward, image_size=image_size))
    img = jax.block_until_ready(fwd(z, params))
    assert img.shape == (B, 3, 4 * image_size, 4 * image_size), img.shape

    ref = jax.block_until_ready(_ref_forward(z, params, image_size))
    # bf16 MXU inputs (f32 accumulation) -> slightly looser tolerance than pure f32.
    np.testing.assert_allclose(np.asarray(img), np.asarray(ref), rtol=2e-2, atol=2e-2)

    print("KERNEL_OK")
</pallas_src>

<mosaic_0001>
module attributes {stable_mosaic.version = 11 : i64} {
  func.func @_mlp_head_kernel(%arg0: i32, %arg1: memref<2x16xf32, #tpu.memory_space<vmem>>, %arg2: memref<16x32xf32, #tpu.memory_space<vmem>>, %arg3: memref<1x32xf32, #tpu.memory_space<vmem>>, %arg4: memref<1x32xf32, #tpu.memory_space<vmem>>, %arg5: memref<1x32xf32, #tpu.memory_space<vmem>>, %arg6: memref<32x16xf32, #tpu.memory_space<vmem>>, %arg7: memref<1x16xf32, #tpu.memory_space<vmem>>, %arg8: memref<1x16xf32, #tpu.memory_space<vmem>>, %arg9: memref<1x16xf32, #tpu.memory_space<vmem>>, %arg10: memref<16x512xbf16, #tpu.memory_space<vmem>>, %arg11: memref<1x512xf32, #tpu.memory_space<vmem>>, %arg12: memref<2x512xf32, #tpu.memory_space<vmem>>) attributes {dimension_semantics = [#tpu.dimension_semantics<parallel>], iteration_bounds = array<i64: 4>, scalar_prefetch = 0 : i64, scratch_operands = 0 : i64, tpu.core_type = #tpu.core_type<tc>, window_params = [{pipeline_mode = #tpu.pipeline_mode<synchronous>, transform_indices = @transform_0, window_bounds = array<i64: 2, 16>}, {pipeline_mode = #tpu.pipeline_mode<synchronous>, transform_indices = @transform_1, window_bounds = array<i64: 16, 32>}, {pipeline_mode = #tpu.pipeline_mode<synchronous>, transform_indices = @transform_2, window_bounds = array<i64: 1, 32>}, {pipeline_mode = #tpu.pipeline_mode<synchronous>, transform_indices = @transform_3, window_bounds = array<i64: 1, 32>}, {pipeline_mode = #tpu.pipeline_mode<synchronous>, transform_indices = @transform_4, window_bounds = array<i64: 1, 32>}, {pipeline_mode = #tpu.pipeline_mode<synchronous>, transform_indices = @transform_5, window_bounds = array<i64: 32, 16>}, {pipeline_mode = #tpu.pipeline_mode<synchronous>, transform_indices = @transform_6, window_bounds = array<i64: 1, 16>}, {pipeline_mode = #tpu.pipeline_mode<synchronous>, transform_indices = @transform_7, window_bounds = array<i64: 1, 16>}, {pipeline_mode = #tpu.pipeline_mode<synchronous>, transform_indices = @transform_8, window_bounds = array<i64: 1, 16>}, {transform_indices = @transform_9, window_bounds = array<i64: 16, 512>}, {transform_indices = @transform_10, window_bounds = array<i64: 1, 512>}, {transform_indices = @transform_11, window_bounds = array<i64: 2, 512>}]} {
    %c0 = arith.constant 0 : index
    %c0_0 = arith.constant 0 : index
    %0 = vector.load %arg1[%c0, %c0_0] : memref<2x16xf32, #tpu.memory_space<vmem>>, vector<2x16xf32>
    %c0_1 = arith.constant 0 : index
    %c0_2 = arith.constant 0 : index
    %1 = vector.load %arg2[%c0_1, %c0_2] : memref<16x32xf32, #tpu.memory_space<vmem>>, vector<16x32xf32>
    %cst = arith.constant dense<0.000000e+00> : vector<2x32xf32>
    %2 = tpu.matmul %0, %1, %cst {dimension_numbers = #tpu.dot_dimension_numbers<[1], [0], [0], [1], [0, 0, 1, 1], [], []>} : vector<2x16xf32>, vector<16x32xf32>, vector<2x32xf32> -> vector<2x32xf32>
    %c0_3 = arith.constant 0 : index
    %c0_4 = arith.constant 0 : index
    %3 = vector.load %arg3[%c0_3, %c0_4] : memref<1x32xf32, #tpu.memory_space<vmem>>, vector<1x32xf32>
    %4 = vector.broadcast %3 : vector<1x32xf32> to vector<2x32xf32>
    %5 = arith.addf %2, %4 : vector<2x32xf32>
    %c0_5 = arith.constant 0 : index
    %c0_6 = arith.constant 0 : index
    %6 = vector.load %arg4[%c0_5, %c0_6] : memref<1x32xf32, #tpu.memory_space<vmem>>, vector<1x32xf32>
    %c0_7 = arith.constant 0 : index
    %c0_8 = arith.constant 0 : index
    %7 = vector.load %arg5[%c0_7, %c0_8] : memref<1x32xf32, #tpu.memory_space<vmem>>, vector<1x32xf32>
    %cst_9 = arith.constant dense<0.000000e+00> : vector<32xf32>
    %8 = vector.multi_reduction <add>, %5, %cst_9 [0] : vector<2x32xf32> to vector<32xf32>
    %9 = vector.shape_cast %8 : vector<32xf32> to vector<1x32xf32>
    %cst_10 = arith.constant 2.000000e+00 : f32
    %10 = vector.broadcast %cst_10 : f32 to vector<1x32xf32>
    %11 = arith.divf %9, %10 : vector<1x32xf32>
    %12 = arith.mulf %5, %5 : vector<2x32xf32>
    %cst_11 = arith.constant dense<0.000000e+00> : vector<32xf32>
    %13 = vector.multi_reduction <add>, %12, %cst_11 [0] : vector<2x32xf32> to vector<32xf32>
    %14 = vector.shape_cast %13 : vector<32xf32> to vector<1x32xf32>
    %cst_12 = arith.constant 2.000000e+00 : f32
    %15 = vector.broadcast %cst_12 : f32 to vector<1x32xf32>
    %16 = arith.divf %14, %15 : vector<1x32xf32>
    %17 = arith.mulf %11, %11 : vector<1x32xf32>
    %18 = arith.subf %16, %17 : vector<1x32xf32>
    %19 = vector.broadcast %11 : vector<1x32xf32> to vector<2x32xf32>
    %20 = arith.subf %5, %19 : vector<2x32xf32>
    %cst_13 = arith.constant 9.99999974E-6 : f32
    %21 = vector.broadcast %cst_13 : f32 to vector<1x32xf32>
    %22 = arith.addf %18, %21 : vector<1x32xf32>
    %23 = math.rsqrt %22 : vector<1x32xf32>
    %24 = vector.broadcast %23 : vector<1x32xf32> to vector<2x32xf32>
    %25 = arith.mulf %20, %24 : vector<2x32xf32>
    %26 = vector.broadcast %6 : vector<1x32xf32> to vector<2x32xf32>
    %27 = arith.mulf %25, %26 : vector<2x32xf32>
    %28 = vector.broadcast %7 : vector<1x32xf32> to vector<2x32xf32>
    %29 = arith.addf %27, %28 : vector<2x32xf32>
    %cst_14 = arith.constant 0.000000e+00 : f32
    %30 = vector.broadcast %cst_14 : f32 to vector<2x32xf32>
    %31 = arith.maximumf %29, %30 : vector<2x32xf32>
    %c0_15 = arith.constant 0 : index
    %c0_16 = arith.constant 0 : index
    %32 = vector.load %arg6[%c0_15, %c0_16] : memref<32x16xf32, #tpu.memory_space<vmem>>, vector<32x16xf32>
    %cst_17 = arith.constant dense<0.000000e+00> : vector<2x16xf32>
    %33 = tpu.matmul %31, %32, %cst_17 {dimension_numbers = #tpu.dot_dimension_numbers<[1], [0], [0], [1], [0, 0, 1, 1], [], []>} : vector<2x32xf32>, vector<32x16xf32>, vector<2x16xf32> -> vector<2x16xf32>
    %c0_18 = arith.constant 0 : index
    %c0_19 = arith.constant 0 : index
    %34 = vector.load %arg7[%c0_18, %c0_19] : memref<1x16xf32, #tpu.memory_space<vmem>>, vector<1x16xf32>
    %35 = vector.broadcast %34 : vector<1x16xf32> to vector<2x16xf32>
    %36 = arith.addf %33, %35 : vector<2x16xf32>
    %c0_20 = arith.constant 0 : index
    %c0_21 = arith.constant 0 : index
    %37 = vector.load %arg8[%c0_20, %c0_21] : memref<1x16xf32, #tpu.memory_space<vmem>>, vector<1x16xf32>
    %c0_22 = arith.constant 0 : index
    %c0_23 = arith.constant 0 : index
    %38 = vector.load %arg9[%c0_22, %c0_23] : memref<1x16xf32, #tpu.memory_space<vmem>>, vector<1x16xf32>
    %cst_24 = arith.constant dense<0.000000e+00> : vector<16xf32>
    %39 = vector.multi_reduction <add>, %36, %cst_24 [0] : vector<2x16xf32> to vector<16xf32>
    %40 = vector.shape_cast %39 : vector<16xf32> to vector<1x16xf32>
    %cst_25 = arith.constant 2.000000e+00 : f32
    %41 = vector.broadcast %cst_25 : f32 to vector<1x16xf32>
    %42 = arith.divf %40, %41 : vector<1x16xf32>
    %43 = arith.mulf %36, %36 : vector<2x16xf32>
    %cst_26 = arith.constant dense<0.000000e+00> : vector<16xf32>
    %44 = vector.multi_reduction <add>, %43, %cst_26 [0] : vector<2x16xf32> to vector<16xf32>
    %45 = vector.shape_cast %44 : vector<16xf32> to vector<1x16xf32>
    %cst_27 = arith.constant 2.000000e+00 : f32
    %46 = vector.broadcast %cst_27 : f32 to vector<1x16xf32>
    %47 = arith.divf %45, %46 : vector<1x16xf32>
    %48 = arith.mulf %42, %42 : vector<1x16xf32>
    %49 = arith.subf %47, %48 : vector<1x16xf32>
    %50 = vector.broadcast %42 : vector<1x16xf32> to vector<2x16xf32>
    %51 = arith.subf %36, %50 : vector<2x16xf32>
    %cst_28 = arith.constant 9.99999974E-6 : f32
    %52 = vector.broadcast %cst_28 : f32 to vector<1x16xf32>
    %53 = arith.addf %49, %52 : vector<1x16xf32>
    %54 = math.rsqrt %53 : vector<1x16xf32>
    %55 = vector.broadcast %54 : vector<1x16xf32> to vector<2x16xf32>
    %56 = arith.mulf %51, %55 : vector<2x16xf32>
    %57 = vector.broadcast %37 : vector<1x16xf32> to vector<2x16xf32>
    %58 = arith.mulf %56, %57 : vector<2x16xf32>
    %59 = vector.broadcast %38 : vector<1x16xf32> to vector<2x16xf32>
    %60 = arith.addf %58, %59 : vector<2x16xf32>
    %cst_29 = arith.constant 0.000000e+00 : f32
    %61 = vector.broadcast %cst_29 : f32 to vector<2x16xf32>
    %62 = arith.maximumf %60, %61 : vector<2x16xf32>
    %63 = arith.truncf %62 : vector<2x16xf32> to vector<2x16xbf16>
    %c0_30 = arith.constant 0 : index
    %c0_31 = arith.constant 0 : index
    %64 = vector.load %arg10[%c0_30, %c0_31] : memref<16x512xbf16, #tpu.memory_space<vmem>>, vector<16x512xbf16>
    %cst_32 = arith.constant dense<0.000000e+00> : vector<2x512xf32>
    %65 = tpu.matmul %63, %64, %cst_32 {dimension_numbers = #tpu.dot_dimension_numbers<[1], [0], [0], [1], [0, 0, 1, 1], [], []>} : vector<2x16xbf16>, vector<16x512xbf16>, vector<2x512xf32> -> vector<2x512xf32>
    %c0_33 = arith.constant 0 : index
    %c0_34 = arith.constant 0 : index
    %66 = vector.load %arg11[%c0_33, %c0_34] : memref<1x512xf32, #tpu.memory_space<vmem>>, vector<1x512xf32>
    %67 = vector.broadcast %66 : vector<1x512xf32> to vector<2x512xf32>
    %68 = arith.addf %65, %67 : vector<2x512xf32>
    %c0_35 = arith.constant 0 : index
    %c0_36 = arith.constant 0 : index
    %69 = vector.load %arg12[%c0_35, %c0_36] : memref<2x512xf32, #tpu.memory_space<vmem>>, vector<2x512xf32>
    tpu.vector_store %arg12[%c0_35, %c0_36], %68 {strides = array<i32>} : memref<2x512xf32, #tpu.memory_space<vmem>>, vector<2x512xf32>,
    return
  }
  func.func @transform_0(%arg0: i32) -> (i32, i32) {
    %c0_i32 = arith.constant 0 : i32
    %c0_i32_0 = arith.constant 0 : i32
    %c0_i32_1 = arith.constant 0 : i32
    return %c0_i32, %c0_i32_0 : i32, i32
  }
  func.func @transform_1(%arg0: i32) -> (i32, i32) {
    %c0_i32 = arith.constant 0 : i32
    %c0_i32_0 = arith.constant 0 : i32
    %c0_i32_1 = arith.constant 0 : i32
    return %c0_i32, %c0_i32_0 : i32, i32
  }
  func.func @transform_2(%arg0: i32) -> (i32, i32) {
    %c0_i32 = arith.constant 0 : i32
    %c0_i32_0 = arith.constant 0 : i32
    %c0_i32_1 = arith.constant 0 : i32
    return %c0_i32, %c0_i32_0 : i32, i32
  }
  func.func @transform_3(%arg0: i32) -> (i32, i32) {
    %c0_i32 = arith.constant 0 : i32
    %c0_i32_0 = arith.constant 0 : i32
    %c0_i32_1 = arith.constant 0 : i32
    return %c0_i32, %c0_i32_0 : i32, i32
  }
  func.func @transform_4(%arg0: i32) -> (i32, i32) {
    %c0_i32 = arith.constant 0 : i32
    %c0_i32_0 = arith.constant 0 : i32
    %c0_i32_1 = arith.constant 0 : i32
    return %c0_i32, %c0_i32_0 : i32, i32
  }
  func.func @transform_5(%arg0: i32) -> (i32, i32) {
    %c0_i32 = arith.constant 0 : i32
    %c0_i32_0 = arith.constant 0 : i32
    %c0_i32_1 = arith.constant 0 : i32
    return %c0_i32, %c0_i32_0 : i32, i32
  }
  func.func @transform_6(%arg0: i32) -> (i32, i32) {
    %c0_i32 = arith.constant 0 : i32
    %c0_i32_0 = arith.constant 0 : i32
    %c0_i32_1 = arith.constant 0 : i32
    return %c0_i32, %c0_i32_0 : i32, i32
  }
  func.func @transform_7(%arg0: i32) -> (i32, i32) {
    %c0_i32 = arith.constant 0 : i32
    %c0_i32_0 = arith.constant 0 : i32
    %c0_i32_1 = arith.constant 0 : i32
    return %c0_i32, %c0_i32_0 : i32, i32
  }
  func.func @transform_8(%arg0: i32) -> (i32, i32) {
    %c0_i32 = arith.constant 0 : i32
    %c0_i32_0 = arith.constant 0 : i32
    %c0_i32_1 = arith.constant 0 : i32
    return %c0_i32, %c0_i32_0 : i32, i32
  }
  func.func @transform_9(%arg0: i32) -> (i32, i32) {
    %c0_i32 = arith.constant 0 : i32
    %c0_i32_0 = arith.constant 0 : i32
    return %c0_i32, %arg0 : i32, i32
  }
  func.func @transform_10(%arg0: i32) -> (i32, i32) {
    %c0_i32 = arith.constant 0 : i32
    %c0_i32_0 = arith.constant 0 : i32
    return %c0_i32, %arg0 : i32, i32
  }
  func.func @transform_11(%arg0: i32) -> (i32, i32) {
    %c0_i32 = arith.constant 0 : i32
    %c0_i32_0 = arith.constant 0 : i32
    return %c0_i32, %arg0 : i32, i32
  }
}

module attributes {stable_mosaic.version = 11 : i64} {
  func.func @_conv_stage_kernel(%arg0: i32, %arg1: memref<2x8x8x128xf32, #tpu.memory_space<vmem>>, %arg2: memref<1x8x8x128xf32, #tpu.memory_space<vmem>>, %arg3: memref<1x128xf32, #tpu.memory_space<vmem>>, %arg4: memref<1x128xf32, #tpu.memory_space<vmem>>, %arg5: memref<1152x128xbf16, #tpu.memory_space<vmem>>, %arg6: memref<1x128xf32, #tpu.memory_space<vmem>>, %arg7: memref<1x64x128xf32, #tpu.memory_space<vmem>>) attributes {dimension_semantics = [#tpu.dimension_semantics<parallel>], iteration_bounds = array<i64: 2>, scalar_prefetch = 0 : i64, scratch_operands = 0 : i64, tpu.core_type = #tpu.core_type<tc>, window_params = [{pipeline_mode = #tpu.pipeline_mode<synchronous>, transform_indices = @transform_0, window_bounds = array<i64: 2, 8, 8, 128>}, {transform_indices = @transform_1, window_bounds = array<i64: 1, 8, 8, 128>}, {pipeline_mode = #tpu.pipeline_mode<synchronous>, transform_indices = @transform_2, window_bounds = array<i64: 1, 128>}, {pipeline_mode = #tpu.pipeline_mode<synchronous>, transform_indices = @transform_3, window_bounds = array<i64: 1, 128>}, {pipeline_mode = #tpu.pipeline_mode<synchronous>, transform_indices = @transform_4, window_bounds = array<i64: 1152, 128>}, {pipeline_mode = #tpu.pipeline_mode<synchronous>, transform_indices = @transform_5, window_bounds = array<i64: 1, 128>}, {transform_indices = @transform_6, window_bounds = array<i64: 1, 64, 128>}]} {
    %c0 = arith.constant 0 : index
    %c0_0 = arith.constant 0 : index
    %c0_1 = arith.constant 0 : index
    %c0_2 = arith.constant 0 : index
    %0 = vector.load %arg1[%c0, %c0_0, %c0_1, %c0_2] : memref<2x8x8x128xf32, #tpu.memory_space<vmem>>, vector<2x8x8x128xf32>
    %1 = vector.shape_cast %0 : vector<2x8x8x128xf32> to vector<128x128xf32>
    %cst = arith.constant dense<0.000000e+00> : vector<128xf32>
    %2 = vector.multi_reduction <add>, %1, %cst [0] : vector<128x128xf32> to vector<128xf32>
    %3 = vector.shape_cast %2 : vector<128xf32> to vector<1x128xf32>
    %cst_3 = arith.constant 1.280000e+02 : f32
    %4 = vector.broadcast %cst_3 : f32 to vector<1x128xf32>
    %5 = arith.divf %3, %4 : vector<1x128xf32>
    %6 = arith.mulf %1, %1 : vector<128x128xf32>
    %cst_4 = arith.constant dense<0.000000e+00> : vector<128xf32>
    %7 = vector.multi_reduction <add>, %6, %cst_4 [0] : vector<128x128xf32> to vector<128xf32>
    %8 = vector.shape_cast %7 : vector<128xf32> to vector<1x128xf32>
    %cst_5 = arith.constant 1.280000e+02 : f32
    %9 = vector.broadcast %cst_5 : f32 to vector<1x128xf32>
    %10 = arith.divf %8, %9 : vector<1x128xf32>
    %11 = arith.mulf %5, %5 : vector<1x128xf32>
    %12 = arith.subf %10, %11 : vector<1x128xf32>
    %c0_6 = arith.constant 0 : index
    %c0_7 = arith.constant 0 : index
    %13 = vector.load %arg3[%c0_6, %c0_7] : memref<1x128xf32, #tpu.memory_space<vmem>>, vector<1x128xf32>
    %cst_8 = arith.constant 9.99999974E-6 : f32
    %14 = vector.broadcast %cst_8 : f32 to vector<1x128xf32>
    %15 = arith.addf %12, %14 : vector<1x128xf32>
    %16 = math.rsqrt %15 : vector<1x128xf32>
    %17 = arith.mulf %13, %16 : vector<1x128xf32>
    %c0_9 = arith.constant 0 : index
    %c0_10 = arith.constant 0 : index
    %18 = vector.load %arg4[%c0_9, %c0_10] : memref<1x128xf32, #tpu.memory_space<vmem>>, vector<1x128xf32>
    %19 = arith.mulf %5, %17 : vector<1x128xf32>
    %20 = arith.subf %18, %19 : vector<1x128xf32>
    %21 = vector.shape_cast %17 : vector<1x128xf32> to vector<1x1x128xf32>
    %22 = vector.shape_cast %20 : vector<1x128xf32> to vector<1x1x128xf32>
    %c0_11 = arith.constant 0 : index
    %c0_12 = arith.constant 0 : index
    %c0_13 = arith.constant 0 : index
    %c0_14 = arith.constant 0 : index
    %23 = vector.load %arg2[%c0_11, %c0_12, %c0_13, %c0_14] : memref<1x8x8x128xf32, #tpu.memory_space<vmem>>, vector<1x8x8x128xf32>
    %24 = vector.shape_cast %23 : vector<1x8x8x128xf32> to vector<8x8x128xf32>
    %25 = vector.broadcast %21 : vector<1x1x128xf32> to vector<8x8x128xf32>
    %26 = arith.mulf %24, %25 : vector<8x8x128xf32>
    %27 = vector.broadcast %22 : vector<1x1x128xf32> to vector<8x8x128xf32>
    %28 = arith.addf %26, %27 : vector<8x8x128xf32>
    %cst_15 = arith.constant 0.000000e+00 : f32
    %29 = vector.broadcast %cst_15 : f32 to vector<8x8x128xf32>
    %30 = arith.cmpf ogt, %28, %29 : vector<8x8x128xf32>
    %cst_16 = arith.constant 2.000000e-01 : f32
    %31 = vector.broadcast %cst_16 : f32 to vector<8x8x128xf32>
    %32 = arith.mulf %31, %28 : vector<8x8x128xf32>
    %33 = arith.select %30, %28, %32 : vector<8x8x128xi1>, vector<8x8x128xf32>
    %34 = arith.truncf %33 : vector<8x8x128xf32> to vector<8x8x128xbf16>
    %cst_17 = arith.constant 0.000000e+00 : bf16
    %35 = vector.broadcast %cst_17 : bf16 to vector<1x8x128xbf16>
    %36 = tpu.concatenate %35, %34, %35 in 0 : vector<1x8x128xbf16>, vector<8x8x128xbf16>, vector<1x8x128xbf16> -> vector<10x8x128xbf16>
    %cst_18 = arith.constant 0.000000e+00 : bf16
    %37 = vector.broadcast %cst_18 : bf16 to vector<10x1x128xbf16>
    %38 = tpu.concatenate %37, %36, %37 in 1 : vector<10x1x128xbf16>, vector<10x8x128xbf16>, vector<10x1x128xbf16> -> vector<10x10x128xbf16>
    %39 = vector.extract_strided_slice %38 {offsets = [0, 0, 0], sizes = [8, 8, 128], strides = [1, 1, 1]} : vector<10x10x128xbf16> to vector<8x8x128xbf16>
    %40 = vector.shape_cast %39 : vector<8x8x128xbf16> to vector<64x128xbf16>
    %41 = vector.extract_strided_slice %38 {offsets = [0, 1, 0], sizes = [8, 8, 128], strides = [1, 1, 1]} : vector<10x10x128xbf16> to vector<8x8x128xbf16>
    %42 = vector.shape_cast %41 : vector<8x8x128xbf16> to vector<64x128xbf16>
    %43 = vector.extract_strided_slice %38 {offsets = [0, 2, 0], sizes = [8, 8, 128], strides = [1, 1, 1]} : vector<10x10x128xbf16> to vector<8x8x128xbf16>
    %44 = vector.shape_cast %43 : vector<8x8x128xbf16> to vector<64x128xbf16>
    %45 = vector.extract_strided_slice %38 {offsets = [1, 0, 0], sizes = [8, 8, 128], strides = [1, 1, 1]} : vector<10x10x128xbf16> to vector<8x8x128xbf16>
    %46 = vector.shape_cast %45 : vector<8x8x128xbf16> to vector<64x128xbf16>
    %47 = vector.extract_strided_slice %38 {offsets = [1, 1, 0], sizes = [8, 8, 128], strides = [1, 1, 1]} : vector<10x10x128xbf16> to vector<8x8x128xbf16>
    %48 = vector.shape_cast %47 : vector<8x8x128xbf16> to vector<64x128xbf16>
    %49 = vector.extract_strided_slice %38 {offsets = [1, 2, 0], sizes = [8, 8, 128], strides = [1, 1, 1]} : vector<10x10x128xbf16> to vector<8x8x128xbf16>
    %50 = vector.shape_cast %49 : vector<8x8x128xbf16> to vector<64x128xbf16>
    %51 = vector.extract_strided_slice %38 {offsets = [2, 0, 0], sizes = [8, 8, 128], strides = [1, 1, 1]} : vector<10x10x128xbf16> to vector<8x8x128xbf16>
    %52 = vector.shape_cast %51 : vector<8x8x128xbf16> to vector<64x128xbf16>
    %53 = vector.extract_strided_slice %38 {offsets = [2, 1, 0], sizes = [8, 8, 128], strides = [1, 1, 1]} : vector<10x10x128xbf16> to vector<8x8x128xbf16>
    %54 = vector.shape_cast %53 : vector<8x8x128xbf16> to vector<64x128xbf16>
    %55 = vector.extract_strided_slice %38 {offsets = [2, 2, 0], sizes = [8, 8, 128], strides = [1, 1, 1]} : vector<10x10x128xbf16> to vector<8x8x128xbf16>
    %56 = vector.shape_cast %55 : vector<8x8x128xbf16> to vector<64x128xbf16>
    %57 = tpu.concatenate %40, %42, %44, %46, %48, %50, %52, %54, %56 in 1 : vector<64x128xbf16>, vector<64x128xbf16>, vector<64x128xbf16>, vector<64x128xbf16>, vector<64x128xbf16>, vector<64x128xbf16>, vector<64x128xbf16>, vector<64x128xbf16>, vector<64x128xbf16> -> vector<64x1152xbf16>
    %c0_19 = arith.constant 0 : index
    %c0_20 = arith.constant 0 : index
    %58 = vector.load %arg5[%c0_19, %c0_20] : memref<1152x128xbf16, #tpu.memory_space<vmem>>, vector<1152x128xbf16>
    %cst_21 = arith.constant dense<0.000000e+00> : vector<64x128xf32>
    %59 = tpu.matmul %57, %58, %cst_21 {dimension_numbers = #tpu.dot_dimension_numbers<[1], [0], [0], [1], [0, 0, 1, 1], [], []>} : vector<64x1152xbf16>, vector<1152x128xbf16>, vector<64x128xf32> -> vector<64x128xf32>
    %c0_22 = arith.constant 0 : index
    %c0_23 = arith.constant 0 : index
    %60 = vector.load %arg6[%c0_22, %c0_23] : memref<1x128xf32, #tpu.memory_space<vmem>>, vector<1x128xf32>
    %61 = vector.broadcast %60 : vector<1x128xf32> to vector<64x128xf32>
    %62 = arith.addf %59, %61 : vector<64x128xf32>
    %c0_24 = arith.constant 0 : index
    %c0_25 = arith.constant 0 : index
    %c0_26 = arith.constant 0 : index
    %63 = vector.load %arg7[%c0_24, %c0_25, %c0_26] : memref<1x64x128xf32, #tpu.memory_space<vmem>>, vector<1x64x128xf32>
    %64 = vector.shape_cast %63 : vector<1x64x128xf32> to vector<64x128xf32>
    %65 = vector.shape_cast %62 : vector<64x128xf32> to vector<1x64x128xf32>
    tpu.vector_store %arg7[%c0_24, %c0_25, %c0_26], %65 {strides = array<i32>} : memref<1x64x128xf32, #tpu.memory_space<vmem>>, vector<1x64x128xf32>,
    return
  }
  func.func @transform_0(%arg0: i32) -> (i32, i32, i32, i32) {
    %c0_i32 = arith.constant 0 : i32
    %c0_i32_0 = arith.constant 0 : i32
    %c0_i32_1 = arith.constant 0 : i32
    %c0_i32_2 = arith.constant 0 : i32
    %c0_i32_3 = arith.constant 0 : i32
    return %c0_i32, %c0_i32_0, %c0_i32_1, %c0_i32_2 : i32, i32, i32, i32
  }
  func.func @transform_1(%arg0: i32) -> (i32, i32, i32, i32) {
    %c0_i32 = arith.constant 0 : i32
    %c0_i32_0 = arith.constant 0 : i32
    %c0_i32_1 = arith.constant 0 : i32
    %c0_i32_2 = arith.constant 0 : i32
    return %arg0, %c0_i32, %c0_i32_0, %c0_i32_1 : i32, i32, i32, i32
  }
  func.func @transform_2(%arg0: i32) -> (i32, i32) {
    %c0_i32 = arith.constant 0 : i32
    %c0_i32_0 = arith.constant 0 : i32
    %c0_i32_1 = arith.constant 0 : i32
    return %c0_i32, %c0_i32_0 : i32, i32
  }
  func.func @transform_3(%arg0: i32) -> (i32, i32) {
    %c0_i32 = arith.constant 0 : i32
    %c0_i32_0 = arith.constant 0 : i32
    %c0_i32_1 = arith.constant 0 : i32
    return %c0_i32, %c0_i32_0 : i32, i32
  }
  func.func @transform_4(%arg0: i32) -> (i32, i32) {
    %c0_i32 = arith.constant 0 : i32
    %c0_i32_0 = arith.constant 0 : i32
    %c0_i32_1 = arith.constant 0 : i32
    return %c0_i32, %c0_i32_0 : i32, i32
  }
  func.func @transform_5(%arg0: i32) -> (i32, i32) {
    %c0_i32 = arith.constant 0 : i32
    %c0_i32_0 = arith.constant 0 : i32
    %c0_i32_1 = arith.constant 0 : i32
    return %c0_i32, %c0_i32_0 : i32, i32
  }
  func.func @transform_6(%arg0: i32) -> (i32, i32, i32) {
    %c0_i32 = arith.constant 0 : i32
    %c0_i32_0 = arith.constant 0 : i32
    %c0_i32_1 = arith.constant 0 : i32
    return %arg0, %c0_i32, %c0_i32_0 : i32, i32, i32
  }
}

module attributes {stable_mosaic.version = 11 : i64} {
  func.func @_conv_stage_kernel(%arg0: i32, %arg1: memref<2x16x16x128xf32, #tpu.memory_space<vmem>>, %arg2: memref<1x16x16x128xf32, #tpu.memory_space<vmem>>, %arg3: memref<1x128xf32, #tpu.memory_space<vmem>>, %arg4: memref<1x128xf32, #tpu.memory_space<vmem>>, %arg5: memref<1152x64xbf16, #tpu.memory_space<vmem>>, %arg6: memref<1x64xf32, #tpu.memory_space<vmem>>, %arg7: memref<1x256x64xf32, #tpu.memory_space<vmem>>) attributes {dimension_semantics = [#tpu.dimension_semantics<parallel>], iteration_bounds = array<i64: 2>, scalar_prefetch = 0 : i64, scratch_operands = 0 : i64, tpu.core_type = #tpu.core_type<tc>, window_params = [{pipeline_mode = #tpu.pipeline_mode<synchronous>, transform_indices = @transform_0, window_bounds = array<i64: 2, 16, 16, 128>}, {transform_indices = @transform_1, window_bounds = array<i64: 1, 16, 16, 128>}, {pipeline_mode = #tpu.pipeline_mode<synchronous>, transform_indices = @transform_2, window_bounds = array<i64: 1, 128>}, {pipeline_mode = #tpu.pipeline_mode<synchronous>, transform_indices = @transform_3, window_bounds = array<i64: 1, 128>}, {pipeline_mode = #tpu.pipeline_mode<synchronous>, transform_indices = @transform_4, window_bounds = array<i64: 1152, 64>}, {pipeline_mode = #tpu.pipeline_mode<synchronous>, transform_indices = @transform_5, window_bounds = array<i64: 1, 64>}, {transform_indices = @transform_6, window_bounds = array<i64: 1, 256, 64>}]} {
    %c0 = arith.constant 0 : index
    %c0_0 = arith.constant 0 : index
    %c0_1 = arith.constant 0 : index
    %c0_2 = arith.constant 0 : index
    %0 = vector.load %arg1[%c0, %c0_0, %c0_1, %c0_2] : memref<2x16x16x128xf32, #tpu.memory_space<vmem>>, vector<2x16x16x128xf32>
    %1 = vector.shape_cast %0 : vector<2x16x16x128xf32> to vector<512x128xf32>
    %cst = arith.constant dense<0.000000e+00> : vector<128xf32>
    %2 = vector.multi_reduction <add>, %1, %cst [0] : vector<512x128xf32> to vector<128xf32>
    %3 = vector.shape_cast %2 : vector<128xf32> to vector<1x128xf32>
    %cst_3 = arith.constant 5.120000e+02 : f32
    %4 = vector.broadcast %cst_3 : f32 to vector<1x128xf32>
    %5 = arith.divf %3, %4 : vector<1x128xf32>
    %6 = arith.mulf %1, %1 : vector<512x128xf32>
    %cst_4 = arith.constant dense<0.000000e+00> : vector<128xf32>
    %7 = vector.multi_reduction <add>, %6, %cst_4 [0] : vector<512x128xf32> to vector<128xf32>
    %8 = vector.shape_cast %7 : vector<128xf32> to vector<1x128xf32>
    %cst_5 = arith.constant 5.120000e+02 : f32
    %9 = vector.broadcast %cst_5 : f32 to vector<1x128xf32>
    %10 = arith.divf %8, %9 : vector<1x128xf32>
    %11 = arith.mulf %5, %5 : vector<1x128xf32>
    %12 = arith.subf %10, %11 : vector<1x128xf32>
    %c0_6 = arith.constant 0 : index
    %c0_7 = arith.constant 0 : index
    %13 = vector.load %arg3[%c0_6, %c0_7] : memref<1x128xf32, #tpu.memory_space<vmem>>, vector<1x128xf32>
    %cst_8 = arith.constant 9.99999974E-6 : f32
    %14 = vector.broadcast %cst_8 : f32 to vector<1x128xf32>
    %15 = arith.addf %12, %14 : vector<1x128xf32>
    %16 = math.rsqrt %15 : vector<1x128xf32>
    %17 = arith.mulf %13, %16 : vector<1x128xf32>
    %c0_9 = arith.constant 0 : index
    %c0_10 = arith.constant 0 : index
    %18 = vector.load %arg4[%c0_9, %c0_10] : memref<1x128xf32, #tpu.memory_space<vmem>>, vector<1x128xf32>
    %19 = arith.mulf %5, %17 : vector<1x128xf32>
    %20 = arith.subf %18, %19 : vector<1x128xf32>
    %21 = vector.shape_cast %17 : vector<1x128xf32> to vector<1x1x128xf32>
    %22 = vector.shape_cast %20 : vector<1x128xf32> to vector<1x1x128xf32>
    %c0_11 = arith.constant 0 : index
    %c0_12 = arith.constant 0 : index
    %c0_13 = arith.constant 0 : index
    %c0_14 = arith.constant 0 : index
    %23 = vector.load %arg2[%c0_11, %c0_12, %c0_13, %c0_14] : memref<1x16x16x128xf32, #tpu.memory_space<vmem>>, vector<1x16x16x128xf32>
    %24 = vector.shape_cast %23 : vector<1x16x16x128xf32> to vector<16x16x128xf32>
    %25 = vector.broadcast %21 : vector<1x1x128xf32> to vector<16x16x128xf32>
    %26 = arith.mulf %24, %25 : vector<16x16x128xf32>
    %27 = vector.broadcast %22 : vector<1x1x128xf32> to vector<16x16x128xf32>
    %28 = arith.addf %26, %27 : vector<16x16x128xf32>
    %cst_15 = arith.constant 0.000000e+00 : f32
    %29 = vector.broadcast %cst_15 : f32 to vector<16x16x128xf32>
    %30 = arith.cmpf ogt, %28, %29 : vector<16x16x128xf32>
    %cst_16 = arith.constant 2.000000e-01 : f32
    %31 = vector.broadcast %cst_16 : f32 to vector<16x16x128xf32>
    %32 = arith.mulf %31, %28 : vector<16x16x128xf32>
    %33 = arith.select %30, %28, %32 : vector<16x16x128xi1>, vector<16x16x128xf32>
    %34 = arith.truncf %33 : vector<16x16x128xf32> to vector<16x16x128xbf16>
    %cst_17 = arith.constant 0.000000e+00 : bf16
    %35 = vector.broadcast %cst_17 : bf16 to vector<1x16x128xbf16>
    %36 = tpu.concatenate %35, %34, %35 in 0 : vector<1x16x128xbf16>, vector<16x16x128xbf16>, vector<1x16x128xbf16> -> vector<18x16x128xbf16>
    %cst_18 = arith.constant 0.000000e+00 : bf16
    %37 = vector.broadcast %cst_18 : bf16 to vector<18x1x128xbf16>
    %38 = tpu.concatenate %37, %36, %37 in 1 : vector<18x1x128xbf16>, vector<18x16x128xbf16>, vector<18x1x128xbf16> -> vector<18x18x128xbf16>
    %39 = vector.extract_strided_slice %38 {offsets = [0, 0, 0], sizes = [16, 16, 128], strides = [1, 1, 1]} : vector<18x18x128xbf16> to vector<16x16x128xbf16>
    %40 = vector.shape_cast %39 : vector<16x16x128xbf16> to vector<256x128xbf16>
    %41 = vector.extract_strided_slice %38 {offsets = [0, 1, 0], sizes = [16, 16, 128], strides = [1, 1, 1]} : vector<18x18x128xbf16> to vector<16x16x128xbf16>
    %42 = vector.shape_cast %41 : vector<16x16x128xbf16> to vector<256x128xbf16>
    %43 = vector.extract_strided_slice %38 {offsets = [0, 2, 0], sizes = [16, 16, 128], strides = [1, 1, 1]} : vector<18x18x128xbf16> to vector<16x16x128xbf16>
    %44 = vector.shape_cast %43 : vector<16x16x128xbf16> to vector<256x128xbf16>
    %45 = vector.extract_strided_slice %38 {offsets = [1, 0, 0], sizes = [16, 16, 128], strides = [1, 1, 1]} : vector<18x18x128xbf16> to vector<16x16x128xbf16>
    %46 = vector.shape_cast %45 : vector<16x16x128xbf16> to vector<256x128xbf16>
    %47 = vector.extract_strided_slice %38 {offsets = [1, 1, 0], sizes = [16, 16, 128], strides = [1, 1, 1]} : vector<18x18x128xbf16> to vector<16x16x128xbf16>
    %48 = vector.shape_cast %47 : vector<16x16x128xbf16> to vector<256x128xbf16>
    %49 = vector.extract_strided_slice %38 {offsets = [1, 2, 0], sizes = [16, 16, 128], strides = [1, 1, 1]} : vector<18x18x128xbf16> to vector<16x16x128xbf16>
    %50 = vector.shape_cast %49 : vector<16x16x128xbf16> to vector<256x128xbf16>
    %51 = vector.extract_strided_slice %38 {offsets = [2, 0, 0], sizes = [16, 16, 128], strides = [1, 1, 1]} : vector<18x18x128xbf16> to vector<16x16x128xbf16>
    %52 = vector.shape_cast %51 : vector<16x16x128xbf16> to vector<256x128xbf16>
    %53 = vector.extract_strided_slice %38 {offsets = [2, 1, 0], sizes = [16, 16, 128], strides = [1, 1, 1]} : vector<18x18x128xbf16> to vector<16x16x128xbf16>
    %54 = vector.shape_cast %53 : vector<16x16x128xbf16> to vector<256x128xbf16>
    %55 = vector.extract_strided_slice %38 {offsets = [2, 2, 0], sizes = [16, 16, 128], strides = [1, 1, 1]} : vector<18x18x128xbf16> to vector<16x16x128xbf16>
    %56 = vector.shape_cast %55 : vector<16x16x128xbf16> to vector<256x128xbf16>
    %57 = tpu.concatenate %40, %42, %44, %46, %48, %50, %52, %54, %56 in 1 : vector<256x128xbf16>, vector<256x128xbf16>, vector<256x128xbf16>, vector<256x128xbf16>, vector<256x128xbf16>, vector<256x128xbf16>, vector<256x128xbf16>, vector<256x128xbf16>, vector<256x128xbf16> -> vector<256x1152xbf16>
    %c0_19 = arith.constant 0 : index
    %c0_20 = arith.constant 0 : index
    %58 = vector.load %arg5[%c0_19, %c0_20] : memref<1152x64xbf16, #tpu.memory_space<vmem>>, vector<1152x64xbf16>
    %cst_21 = arith.constant dense<0.000000e+00> : vector<256x64xf32>
    %59 = tpu.matmul %57, %58, %cst_21 {dimension_numbers = #tpu.dot_dimension_numbers<[1], [0], [0], [1], [0, 0, 1, 1], [], []>} : vector<256x1152xbf16>, vector<1152x64xbf16>, vector<256x64xf32> -> vector<256x64xf32>
    %c0_22 = arith.constant 0 : index
    %c0_23 = arith.constant 0 : index
    %60 = vector.load %arg6[%c0_22, %c0_23] : memref<1x64xf32, #tpu.memory_space<vmem>>, vector<1x64xf32>
    %61 = vector.broadcast %60 : vector<1x64xf32> to vector<256x64xf32>
    %62 = arith.addf %59, %61 : vector<256x64xf32>
    %c0_24 = arith.constant 0 : index
    %c0_25 = arith.constant 0 : index
    %c0_26 = arith.constant 0 : index
    %63 = vector.load %arg7[%c0_24, %c0_25, %c0_26] : memref<1x256x64xf32, #tpu.memory_space<vmem>>, vector<1x256x64xf32>
    %64 = vector.shape_cast %63 : vector<1x256x64xf32> to vector<256x64xf32>
    %65 = vector.shape_cast %62 : vector<256x64xf32> to vector<1x256x64xf32>
    tpu.vector_store %arg7[%c0_24, %c0_25, %c0_26], %65 {strides = array<i32>} : memref<1x256x64xf32, #tpu.memory_space<vmem>>, vector<1x256x64xf32>,
    return
  }
  func.func @transform_0(%arg0: i32) -> (i32, i32, i32, i32) {
    %c0_i32 = arith.constant 0 : i32
    %c0_i32_0 = arith.constant 0 : i32
    %c0_i32_1 = arith.constant 0 : i32
    %c0_i32_2 = arith.constant 0 : i32
    %c0_i32_3 = arith.constant 0 : i32
    return %c0_i32, %c0_i32_0, %c0_i32_1, %c0_i32_2 : i32, i32, i32, i32
  }
  func.func @transform_1(%arg0: i32) -> (i32, i32, i32, i32) {
    %c0_i32 = arith.constant 0 : i32
    %c0_i32_0 = arith.constant 0 : i32
    %c0_i32_1 = arith.constant 0 : i32
    %c0_i32_2 = arith.constant 0 : i32
    return %arg0, %c0_i32, %c0_i32_0, %c0_i32_1 : i32, i32, i32, i32
  }
  func.func @transform_2(%arg0: i32) -> (i32, i32) {
    %c0_i32 = arith.constant 0 : i32
    %c0_i32_0 = arith.constant 0 : i32
    %c0_i32_1 = arith.constant 0 : i32
    return %c0_i32, %c0_i32_0 : i32, i32
  }
  func.func @transform_3(%arg0: i32) -> (i32, i32) {
    %c0_i32 = arith.constant 0 : i32
    %c0_i32_0 = arith.constant 0 : i32
    %c0_i32_1 = arith.constant 0 : i32
    return %c0_i32, %c0_i32_0 : i32, i32
  }
  func.func @transform_4(%arg0: i32) -> (i32, i32) {
    %c0_i32 = arith.constant 0 : i32
    %c0_i32_0 = arith.constant 0 : i32
    %c0_i32_1 = arith.constant 0 : i32
    return %c0_i32, %c0_i32_0 : i32, i32
  }
  func.func @transform_5(%arg0: i32) -> (i32, i32) {
    %c0_i32 = arith.constant 0 : i32
    %c0_i32_0 = arith.constant 0 : i32
    %c0_i32_1 = arith.constant 0 : i32
    return %c0_i32, %c0_i32_0 : i32, i32
  }
  func.func @transform_6(%arg0: i32) -> (i32, i32, i32) {
    %c0_i32 = arith.constant 0 : i32
    %c0_i32_0 = arith.constant 0 : i32
    %c0_i32_1 = arith.constant 0 : i32
    return %arg0, %c0_i32, %c0_i32_0 : i32, i32, i32
  }
}

module attributes {stable_mosaic.version = 11 : i64} {
  func.func @_conv_stage_kernel(%arg0: i32, %arg1: memref<2x16x16x64xf32, #tpu.memory_space<vmem>>, %arg2: memref<1x16x16x64xf32, #tpu.memory_space<vmem>>, %arg3: memref<1x64xf32, #tpu.memory_space<vmem>>, %arg4: memref<1x64xf32, #tpu.memory_space<vmem>>, %arg5: memref<576x128xbf16, #tpu.memory_space<vmem>>, %arg6: memref<1x128xf32, #tpu.memory_space<vmem>>, %arg7: memref<1x256x128xf32, #tpu.memory_space<vmem>>) attributes {dimension_semantics = [#tpu.dimension_semantics<parallel>], iteration_bounds = array<i64: 2>, scalar_prefetch = 0 : i64, scratch_operands = 0 : i64, tpu.core_type = #tpu.core_type<tc>, window_params = [{pipeline_mode = #tpu.pipeline_mode<synchronous>, transform_indices = @transform_0, window_bounds = array<i64: 2, 16, 16, 64>}, {transform_indices = @transform_1, window_bounds = array<i64: 1, 16, 16, 64>}, {pipeline_mode = #tpu.pipeline_mode<synchronous>, transform_indices = @transform_2, window_bounds = array<i64: 1, 64>}, {pipeline_mode = #tpu.pipeline_mode<synchronous>, transform_indices = @transform_3, window_bounds = array<i64: 1, 64>}, {pipeline_mode = #tpu.pipeline_mode<synchronous>, transform_indices = @transform_4, window_bounds = array<i64: 576, 128>}, {pipeline_mode = #tpu.pipeline_mode<synchronous>, transform_indices = @transform_5, window_bounds = array<i64: 1, 128>}, {transform_indices = @transform_6, window_bounds = array<i64: 1, 256, 128>}]} {
    %c0 = arith.constant 0 : index
    %c0_0 = arith.constant 0 : index
    %c0_1 = arith.constant 0 : index
    %c0_2 = arith.constant 0 : index
    %0 = vector.load %arg1[%c0, %c0_0, %c0_1, %c0_2] : memref<2x16x16x64xf32, #tpu.memory_space<vmem>>, vector<2x16x16x64xf32>
    %1 = vector.shape_cast %0 : vector<2x16x16x64xf32> to vector<512x64xf32>
    %cst = arith.constant dense<0.000000e+00> : vector<64xf32>
    %2 = vector.multi_reduction <add>, %1, %cst [0] : vector<512x64xf32> to vector<64xf32>
    %3 = vector.shape_cast %2 : vector<64xf32> to vector<1x64xf32>
    %cst_3 = arith.constant 5.120000e+02 : f32
    %4 = vector.broadcast %cst_3 : f32 to vector<1x64xf32>
    %5 = arith.divf %3, %4 : vector<1x64xf32>
    %6 = arith.mulf %1, %1 : vector<512x64xf32>
    %cst_4 = arith.constant dense<0.000000e+00> : vector<64xf32>
    %7 = vector.multi_reduction <add>, %6, %cst_4 [0] : vector<512x64xf32> to vector<64xf32>
    %8 = vector.shape_cast %7 : vector<64xf32> to vector<1x64xf32>
    %cst_5 = arith.constant 5.120000e+02 : f32
    %9 = vector.broadcast %cst_5 : f32 to vector<1x64xf32>
    %10 = arith.divf %8, %9 : vector<1x64xf32>
    %11 = arith.mulf %5, %5 : vector<1x64xf32>
    %12 = arith.subf %10, %11 : vector<1x64xf32>
    %c0_6 = arith.constant 0 : index
    %c0_7 = arith.constant 0 : index
    %13 = vector.load %arg3[%c0_6, %c0_7] : memref<1x64xf32, #tpu.memory_space<vmem>>, vector<1x64xf32>
    %cst_8 = arith.constant 9.99999974E-6 : f32
    %14 = vector.broadcast %cst_8 : f32 to vector<1x64xf32>
    %15 = arith.addf %12, %14 : vector<1x64xf32>
    %16 = math.rsqrt %15 : vector<1x64xf32>
    %17 = arith.mulf %13, %16 : vector<1x64xf32>
    %c0_9 = arith.constant 0 : index
    %c0_10 = arith.constant 0 : index
    %18 = vector.load %arg4[%c0_9, %c0_10] : memref<1x64xf32, #tpu.memory_space<vmem>>, vector<1x64xf32>
    %19 = arith.mulf %5, %17 : vector<1x64xf32>
    %20 = arith.subf %18, %19 : vector<1x64xf32>
    %21 = vector.shape_cast %17 : vector<1x64xf32> to vector<1x1x64xf32>
    %22 = vector.shape_cast %20 : vector<1x64xf32> to vector<1x1x64xf32>
    %c0_11 = arith.constant 0 : index
    %c0_12 = arith.constant 0 : index
    %c0_13 = arith.constant 0 : index
    %c0_14 = arith.constant 0 : index
    %23 = vector.load %arg2[%c0_11, %c0_12, %c0_13, %c0_14] : memref<1x16x16x64xf32, #tpu.memory_space<vmem>>, vector<1x16x16x64xf32>
    %24 = vector.shape_cast %23 : vector<1x16x16x64xf32> to vector<16x16x64xf32>
    %25 = vector.broadcast %21 : vector<1x1x64xf32> to vector<16x16x64xf32>
    %26 = arith.mulf %24, %25 : vector<16x16x64xf32>
    %27 = vector.broadcast %22 : vector<1x1x64xf32> to vector<16x16x64xf32>
    %28 = arith.addf %26, %27 : vector<16x16x64xf32>
    %cst_15 = arith.constant 0.000000e+00 : f32
    %29 = vector.broadcast %cst_15 : f32 to vector<16x16x64xf32>
    %30 = arith.cmpf ogt, %28, %29 : vector<16x16x64xf32>
    %cst_16 = arith.constant 2.000000e-01 : f32
    %31 = vector.broadcast %cst_16 : f32 to vector<16x16x64xf32>
    %32 = arith.mulf %31, %28 : vector<16x16x64xf32>
    %33 = arith.select %30, %28, %32 : vector<16x16x64xi1>, vector<16x16x64xf32>
    %34 = arith.truncf %33 : vector<16x16x64xf32> to vector<16x16x64xbf16>
    %cst_17 = arith.constant 0.000000e+00 : bf16
    %35 = vector.broadcast %cst_17 : bf16 to vector<1x16x64xbf16>
    %36 = tpu.concatenate %35, %34, %35 in 0 : vector<1x16x64xbf16>, vector<16x16x64xbf16>, vector<1x16x64xbf16> -> vector<18x16x64xbf16>
    %cst_18 = arith.constant 0.000000e+00 : bf16
    %37 = vector.broadcast %cst_18 : bf16 to vector<18x1x64xbf16>
    %38 = tpu.concatenate %37, %36, %37 in 1 : vector<18x1x64xbf16>, vector<18x16x64xbf16>, vector<18x1x64xbf16> -> vector<18x18x64xbf16>
    %39 = vector.extract_strided_slice %38 {offsets = [0, 0, 0], sizes = [16, 16, 64], strides = [1, 1, 1]} : vector<18x18x64xbf16> to vector<16x16x64xbf16>
    %40 = vector.shape_cast %39 : vector<16x16x64xbf16> to vector<256x64xbf16>
    %41 = vector.extract_strided_slice %38 {offsets = [0, 1, 0], sizes = [16, 16, 64], strides = [1, 1, 1]} : vector<18x18x64xbf16> to vector<16x16x64xbf16>
    %42 = vector.shape_cast %41 : vector<16x16x64xbf16> to vector<256x64xbf16>
    %43 = vector.extract_strided_slice %38 {offsets = [0, 2, 0], sizes = [16, 16, 64], strides = [1, 1, 1]} : vector<18x18x64xbf16> to vector<16x16x64xbf16>
    %44 = vector.shape_cast %43 : vector<16x16x64xbf16> to vector<256x64xbf16>
    %45 = vector.extract_strided_slice %38 {offsets = [1, 0, 0], sizes = [16, 16, 64], strides = [1, 1, 1]} : vector<18x18x64xbf16> to vector<16x16x64xbf16>
    %46 = vector.shape_cast %45 : vector<16x16x64xbf16> to vector<256x64xbf16>
    %47 = vector.extract_strided_slice %38 {offsets = [1, 1, 0], sizes = [16, 16, 64], strides = [1, 1, 1]} : vector<18x18x64xbf16> to vector<16x16x64xbf16>
    %48 = vector.shape_cast %47 : vector<16x16x64xbf16> to vector<256x64xbf16>
    %49 = vector.extract_strided_slice %38 {offsets = [1, 2, 0], sizes = [16, 16, 64], strides = [1, 1, 1]} : vector<18x18x64xbf16> to vector<16x16x64xbf16>
    %50 = vector.shape_cast %49 : vector<16x16x64xbf16> to vector<256x64xbf16>
    %51 = vector.extract_strided_slice %38 {offsets = [2, 0, 0], sizes = [16, 16, 64], strides = [1, 1, 1]} : vector<18x18x64xbf16> to vector<16x16x64xbf16>
    %52 = vector.shape_cast %51 : vector<16x16x64xbf16> to vector<256x64xbf16>
    %53 = vector.extract_strided_slice %38 {offsets = [2, 1, 0], sizes = [16, 16, 64], strides = [1, 1, 1]} : vector<18x18x64xbf16> to vector<16x16x64xbf16>
    %54 = vector.shape_cast %53 : vector<16x16x64xbf16> to vector<256x64xbf16>
    %55 = vector.extract_strided_slice %38 {offsets = [2, 2, 0], sizes = [16, 16, 64], strides = [1, 1, 1]} : vector<18x18x64xbf16> to vector<16x16x64xbf16>
    %56 = vector.shape_cast %55 : vector<16x16x64xbf16> to vector<256x64xbf16>
    %57 = tpu.concatenate %40, %42, %44, %46, %48, %50, %52, %54, %56 in 1 : vector<256x64xbf16>, vector<256x64xbf16>, vector<256x64xbf16>, vector<256x64xbf16>, vector<256x64xbf16>, vector<256x64xbf16>, vector<256x64xbf16>, vector<256x64xbf16>, vector<256x64xbf16> -> vector<256x576xbf16>
    %c0_19 = arith.constant 0 : index
    %c0_20 = arith.constant 0 : index
    %58 = vector.load %arg5[%c0_19, %c0_20] : memref<576x128xbf16, #tpu.memory_space<vmem>>, vector<576x128xbf16>
    %cst_21 = arith.constant dense<0.000000e+00> : vector<256x128xf32>
    %59 = tpu.matmul %57, %58, %cst_21 {dimension_numbers = #tpu.dot_dimension_numbers<[1], [0], [0], [1], [0, 0, 1, 1], [], []>} : vector<256x576xbf16>, vector<576x128xbf16>, vector<256x128xf32> -> vector<256x128xf32>
    %c0_22 = arith.constant 0 : index
    %c0_23 = arith.constant 0 : index
    %60 = vector.load %arg6[%c0_22, %c0_23] : memref<1x128xf32, #tpu.memory_space<vmem>>, vector<1x128xf32>
    %61 = vector.broadcast %60 : vector<1x128xf32> to vector<256x128xf32>
    %62 = arith.addf %59, %61 : vector<256x128xf32>
    %63 = math.tanh %62 : vector<256x128xf32>
    %c0_24 = arith.constant 0 : index
    %c0_25 = arith.constant 0 : index
    %c0_26 = arith.constant 0 : index
    %64 = vector.load %arg7[%c0_24, %c0_25, %c0_26] : memref<1x256x128xf32, #tpu.memory_space<vmem>>, vector<1x256x128xf32>
    %65 = vector.shape_cast %64 : vector<1x256x128xf32> to vector<256x128xf32>
    %66 = vector.shape_cast %63 : vector<256x128xf32> to vector<1x256x128xf32>
    tpu.vector_store %arg7[%c0_24, %c0_25, %c0_26], %66 {strides = array<i32>} : memref<1x256x128xf32, #tpu.memory_space<vmem>>, vector<1x256x128xf32>,
    return
  }
  func.func @transform_0(%arg0: i32) -> (i32, i32, i32, i32) {
    %c0_i32 = arith.constant 0 : i32
    %c0_i32_0 = arith.constant 0 : i32
    %c0_i32_1 = arith.constant 0 : i32
    %c0_i32_2 = arith.constant 0 : i32
    %c0_i32_3 = arith.constant 0 : i32
    return %c0_i32, %c0_i32_0, %c0_i32_1, %c0_i32_2 : i32, i32, i32, i32
  }
  func.func @transform_1(%arg0: i32) -> (i32, i32, i32, i32) {
    %c0_i32 = arith.constant 0 : i32
    %c0_i32_0 = arith.constant 0 : i32
    %c0_i32_1 = arith.constant 0 : i32
    %c0_i32_2 = arith.constant 0 : i32
    return %arg0, %c0_i32, %c0_i32_0, %c0_i32_1 : i32, i32, i32, i32
  }
  func.func @transform_2(%arg0: i32) -> (i32, i32) {
    %c0_i32 = arith.constant 0 : i32
    %c0_i32_0 = arith.constant 0 : i32
    %c0_i32_1 = arith.constant 0 : i32
    return %c0_i32, %c0_i32_0 : i32, i32
  }
  func.func @transform_3(%arg0: i32) -> (i32, i32) {
    %c0_i32 = arith.constant 0 : i32
    %c0_i32_0 = arith.constant 0 : i32
    %c0_i32_1 = arith.constant 0 : i32
    return %c0_i32, %c0_i32_0 : i32, i32
  }
  func.func @transform_4(%arg0: i32) -> (i32, i32) {
    %c0_i32 = arith.constant 0 : i32
    %c0_i32_0 = arith.constant 0 : i32
    %c0_i32_1 = arith.constant 0 : i32
    return %c0_i32, %c0_i32_0 : i32, i32
  }
  func.func @transform_5(%arg0: i32) -> (i32, i32) {
    %c0_i32 = arith.constant 0 : i32
    %c0_i32_0 = arith.constant 0 : i32
    %c0_i32_1 = arith.constant 0 : i32
    return %c0_i32, %c0_i32_0 : i32, i32
  }
  func.func @transform_6(%arg0: i32) -> (i32, i32, i32) {
    %c0_i32 = arith.constant 0 : i32
    %c0_i32_0 = arith.constant 0 : i32
    %c0_i32_1 = arith.constant 0 : i32
    return %arg0, %c0_i32, %c0_i32_0 : i32, i32, i32
  }
}

</mosaic_0001>

<bundles_post_ra>
// kernel: generator_forward.4
= control target key start
LH: loop header
LB: loop body
LE: loop exit
PB: predicated region body
PF: predicated region fallthrough
CT: control target
= control target key end

     0   :  { %s1105_s17 = smov 0   ;;  %s1107_s18 = smov 0   ;;  %s1206_s0 = inlined_call_operand.vmem [shape: f32[2,16], index: 0, kind: input, shape index: {}]   ;;  %s1207_s1 = inlined_call_operand.vmem [shape: f32[16,32], index: 1, kind: input, shape index: {}]   ;;  %s1208_s2 = inlined_call_operand.vmem [shape: f32[1,32], index: 2, kind: input, shape index: {}]   ;;  %s1209_s3 = inlined_call_operand.vmem [shape: f32[1,32], index: 3, kind: input, shape index: {}]   ;;  %s1210_s4 = inlined_call_operand.vmem [shape: f32[1,32], index: 4, kind: input, shape index: {}]   ;;  %s1211_s5 = inlined_call_operand.vmem [shape: f32[32,16], index: 5, kind: input, shape index: {}]   ;;  %s1212_s6 = inlined_call_operand.vmem [shape: f32[1,16], index: 6, kind: input, shape index: {}]   ;;  %s1213_s7 = inlined_call_operand.vmem [shape: f32[1,16], index: 7, kind: input, shape index: {}]   ;;  %s1214_s8 = inlined_call_operand.vmem [shape: f32[1,16], index: 8, kind: input, shape index: {}]   ;;  %s1215_s9 = inlined_call_operand.vmem [shape: bf16[16,2048], index: 9, kind: input, shape index: {}]   ;;  %s1216_s10 = inlined_call_operand.vmem [shape: f32[1,2048], index: 10, kind: input, shape index: {}]   ;;  %s1217_s11 = inlined_call_operand.vmem [shape: f32[2,2048], index: 11, kind: output, shape index: {}]  }
   0x1   :  { %s1109_s19 = smov 0  }
   0x2 LB: > { %s913_s20 = sadd.s32 4294967295, %s1038_s19   ;;  %s1122_s21 = sadd.s32 1, %s1038_s19   ;;  %s1038_s19 = sphi %s1109_s19, %s1220_s19   ;;  %s1034_s18 = sphi %s1107_s18, %s1219_s18   ;;  %s1030_s17 = sphi %s1105_s17, %s1218_s17  }
   0x3   : > { %s214_s22 = ssub.s32 %s1038_s19, %s1122_s21  ;;  %s217_s23 = sadd.s32 1, %s1034_s18 }
   0x4   : > { %p215_p0 = scmp.eq.s32.totalorder %s214_s22, 0  ;;  %p224_p1 = scmp.ne.s32.totalorder %s1034_s18, %s1030_s17 }
   0x5   : > { %p225_p2 = scmp.eq.s32.totalorder %s1038_s19, 0  ;;  %p916_p4 = scmp.ge.s32.totalorder %s1038_s19, 4 }
   0x6   : > { %s1131_s24 = scalar_select %p215_p0, %s1034_s18, %s217_s23  }
   0x7   : > { %p226_p3 = por %p225_p2, %p224_p1  ;;  %329 = sbr.rel (%p916_p4) target bundleno = 21 (0x15), region = 52 }
   0xe   : > { %332 = sbr.rel (!%p226_p3) target bundleno = 21 (0x15), region = 56  ;;  %s334_s25 = sand.u32 (%p226_p3), 1, %s1034_s18  }
   0xf   : > { %s941_s26 = sshll.u32 (%p226_p3), %s1038_s19, 4  ;;  %s917_s27 = sshll.u32 (%p226_p3), %s334_s25, 5 }
  0x10   : > { %s339_s30 = scalar_lea.vmem (%p226_p3), %s1215_s9, %s941_s26  ;;  %s336_s12 = scalar_lea.vmem (%p226_p3), [#allocation2], %s917_s27 }
  0x11   : > { %v352_v0 = vld [vmem:[%s339_s30] sm:$0xff] (%p226_p3)  ;;  %v354_v1 = vld [vmem:[%s339_s30 + $0x8] sm:$0xff] (%p226_p3) }
  0x12   : > { %v356_v2 = vld [vmem:[%s339_s30 + $0x40] sm:$0xff] (%p226_p3)  ;;  %353 = vst [vmem:[%s336_s12] sm:$0xff] (%p226_p3), %v352_v0  ;;  %355 = vst [vmem:[%s336_s12 + $0x8] sm:$0xff] (%p226_p3), %v354_v1  ;;  %v358_v3 = vld [vmem:[%s339_s30 + $0x48] sm:$0xff] (%p226_p3) }
  0x13   : > { %357 = vst [vmem:[%s336_s12 + $0x10] sm:$0xff] (%p226_p3), %v356_v2  ;;  %359 = vst [vmem:[%s336_s12 + $0x18] sm:$0xff] (%p226_p3), %v358_v3 }
  0x15 PF: > { %p920_p5 = scmp.ge.s32.totalorder %s1038_s19, 1  ;;  %p372_p6 = scmp.lt.s32.totalorder %s1038_s19, 5 }
  0x17   : > { %p373_p7 = pnand %p920_p5, %p372_p6 }
  0x18   : > { %v436_v4 = vld [vmem:[%s1207_s1] sm:$0xff] (!%p373_p7)  ;;  %v437_v5 = vld [vmem:[%s1207_s1 + $0x8] sm:$0xff] (!%p373_p7)  ;;  %v1040_v6 = vmov (!%p373_p7), 0.0|0.0   ;;  %vm1041_vm0 = vmmov (!%p373_p7), 0   ;;  %v1042_v8 = vmov (!%p373_p7), 0.0   ;;  %vm445_vm1 = vcmask (!%p373_p7), 130048  }
  0x19   : > { %376 = sbr.rel (%p373_p7) target bundleno = 762 (0x2fa), region = 83  ;;  %968 = vmatprep.subr.bf16.mxu0 (!%p373_p7), %v1040_v6  ;;  %v969_v7 = vpack.c.bf16 (!%p373_p7), %v437_v5, %v436_v4  ;;  %954 = vmatprep.mubr.msk.f32.mxu0 (!%p373_p7), %vm1041_vm0, %v1042_v8  ;;  %v435_v9 = vld [vmem:[%s1206_s0] sm:$0x3] (!%p373_p7)  ;;  %v562_v11 = vld [vmem:[%s1211_s5 + $0x8] sm:$0xff] (!%p373_p7)  ;;  %v563_v13 = vld [vmem:[%s1211_s5 + $0x10] sm:$0xff] (!%p373_p7)  ;;  %vm521_vm2 = vcmask (!%p373_p7), 254976  }
  0x1a   : > { %971 = vmatprep.subr.bf16.mxu1 (!%p373_p7), %v1040_v6  ;;  %965 = vmatprep.mubr.msk.f32.mxu1 (!%p373_p7), %vm1041_vm0, %v1042_v8  ;;  %v561_v10 = vld [vmem:[%s1211_s5] sm:$0xff] (!%p373_p7)  ;;  %v564_v14 = vld [vmem:[%s1211_s5 + $0x18] sm:$0xff] (!%p373_p7)  ;;  %vm572_vm3 = vcmask (!%p373_p7), 261120   ;;  %s379_s26 = sand.u32 (!%p373_p7), 1, %s1030_s17   ;;  %v1043_v52 = vmov (!%p373_p7), 0   ;;  %vm648_vm4 = vcmask (!%p373_p7), 123904  }
  0x1b   : > { %970 = vmatpush3.bf16.msra.mxu0 (!%p373_p7), %v969_v7  ;;  %v972_v12 = vpack.c.bf16 (!%p373_p7), %v562_v11, %v561_v10  ;;  %v975_v15 = vpack.c.bf16 (!%p373_p7), %v564_v14, %v563_v13  ;;  %v925_v16 = vld [vmem:[%s1208_s2] ss:$0 sm:$0xff] (!%p373_p7)  ;;  %s921_s27 = sshll.u32 (!%p373_p7), %s379_s26, 5  ;;  %s922_s15 = sshll.u32 (!%p373_p7), %s913_s20, 2 }
  0x1c   : > { %v927_v42 = vld [vmem:[%s1209_s3] ss:$0 sm:$0xff] (!%p373_p7)  ;;  %s381_s28 = scalar_lea.vmem (!%p373_p7), [#allocation2], %s921_s27  ;;  %p424_p8 = scmp.lt.s32.totalorder (!%p373_p7), %s922_s15, 15 }
  0x1d   : > { %973 = vmatpush3.bf16.msra.mxu1 (!%p373_p7), %v972_v12  ;;  %v928_v44 = vld [vmem:[%s1210_s4] ss:$0 sm:$0xff] (!%p373_p7)  ;;  %v1008_v48 = vld [vmem:[%s381_s28 + $0x4] ss:$16 sps:$4 sm:$0xff] (!%p373_p7)   ;;  %v1009_v50 = vld [vmem:[%s381_s28 + $0x8] ss:$16 sps:$4 sm:$0xff] (!%p373_p7)  }
  0x1e   : > { %955 = vmatmul.mubr.msk.f32.vlgmr.msra.gmra.mrb[0].mxu0 (!%p373_p7), %vm445_vm1, %v435_v9  ;;  %974 = vmatprep.subr.bf16.mxu1 (!%p373_p7), %v1040_v6  ;;  %v1006_v49 = vld [vmem:[%s381_s28] ss:$16 sps:$4 sm:$0xff] (!%p373_p7)   ;;  %v1011_v51 = vld [vmem:[%s381_s28 + $0xc] ss:$16 sps:$4 sm:$0xff] (!%p373_p7)  }
  0x1f   : > { %737 = vmatprep.subr.bf16.mxu0 (!%p373_p7), %v1008_v48  ;;  %769 = vmatprep.mubr.bf16.mxu0 (!%p373_p7), %v1043_v52  ;;  %v929_v53 = vld [vmem:[%s1212_s6] ss:$0 sm:$0xff] (!%p373_p7) }
  0x20   : > { %738 = vmatpush1.bf16.msra.mxu0 %v1006_v49  ;;  %s1222_s15 = smov (!%p424_p8, %s922_s15), 15 }
  0x21   : > { %976 = vmatpush3.bf16.msra.mxu1 %v975_v15  ;;  %v931_v15 = vld [vmem:[%s1213_s7] ss:$0 sm:$0xff]  ;;  %s426_s23 = scalar_lea.vmem %s1216_s10, %s1222_s15  ;;  %s924_s19 = sshll.u32 %s1222_s15, 1 }
  0x22   : > { %778 = vmatprep.subr.bf16.mxu1 %v1011_v51  ;;  %s432_s26 = scalar_lea.vmem %s1217_s11, %s924_s19 }
  0xf1   : > { %v515_v17 = vpop.f32.mrb[0].mxu0 }
  0xf2   : > { %v516_v18 = vadd.f32 %v925_v16, %v515_v17  ;;  %v956_v19 = vpop.f32.mrb[1].mxu0  ;;  %v932_v17 = vld [vmem:[%s1214_s8] ss:$0 sm:$0xff] }
  0xf4   : > { %v522_v20 = vsel %vm521_vm2, %v516_v18, 0.0  ;;  %v531_v21 = vmul.f32 %v516_v18, %v516_v18 }
  0xf5   : > { %v523_v22 = vrot.slane %v522_v20, 4 }
  0xf6   : > { %v532_v23 = vsel %vm521_vm2, %v531_v21, 0.0 }
  0xf7   : > { %v524_v24 = vadd.f32 %v523_v22, %v522_v20  ;;  %v533_v25 = vrot.slane %v532_v23, 4  ;;  %v694_v22 = vlaneseq }
  0xf9   : > { %v525_v26 = vrot.slane %v524_v24, 2  ;;  %v534_v27 = vadd.f32 %v533_v25, %v532_v23  ;;  %v695_v23 = vshrl.u32 %v694_v22, 7 }
  0xfb   : > { %v526_v28 = vadd.f32 %v525_v26, %v524_v24  ;;  %v535_v29 = vrot.slane %v534_v27, 2  ;;  %v696_v24 = vsub.s32 0, %v695_v23  ;;  %v704_v25 = vsub.s32 2, %v695_v23  ;;  %v692_v26 = vld [vmem:[%s426_s23] sm:$0xf] }
  0xfd   : > { %v527_v30 = vrot.slane %v526_v28, 1  ;;  %v536_v31 = vadd.f32 %v535_v29, %v534_v27  ;;  %v700_v27 = vsub.s32 1, %v695_v23 }
  0xff   : > { %v528_v32 = vadd.f32 %v527_v30, %v526_v28  ;;  %v537_v33 = vrot.slane %v536_v31, 1  ;;  %v1044_v28 = vmov 1983009808   ;;  %v708_v30 = vsub.s32 3, %v695_v23 }
 0x100   : > { %v826_v29 = vunpack.c.l.s4 %v1044_v28 }
 0x101   : > { %v530_v34 = vmul.f32 0.5, %v528_v32  ;;  %v538_v35 = vadd.f32 %v537_v33, %v536_v31  ;;  %v697_v31 = vrot.slane %v692_v26, %v696_v24  ;;  %v705_v32 = vrot.slane %v692_v26, %v704_v25 }
 0x102   : > { %v701_v33 = vrot.slane %v692_v26, %v700_v27 }
 0x103   : > { %v539_v36 = vmul.f32 0.5, %v538_v35  ;;  %v540_v37 = vmul.f32 %v530_v34, %v530_v34  ;;  %v542_v40 = vsub.f32 %v516_v18, %v530_v34  ;;  %v827_v34 = vunpack.c.0.s8 %v826_v29 }
 0x104   : > { %v709_v35 = vrot.slane %v692_v26, %v708_v30 }
 0x105   : > { %v541_v38 = vsub.f32 %v539_v36, %v540_v37 }
 0x107   : > { %v543_v39 = vadd.f32 1e-05, %v541_v38 }
 0x109   : > { %1012 = vrsqrt.f32 %v543_v39 }
 0x113   : > { %v1013_v41 = vpop.eup %1012 }
 0x114   : > { %v545_v43 = vmul.f32 %v1013_v41, %v542_v40 }
 0x116   : > { %v552_v45 = vmul.f32 %v927_v42, %v545_v43  ;;  %v830_v43 = vsub.s32 %v827_v34, %v695_v23 }
 0x118   : > { %v559_v46 = vadd.f32 %v928_v44, %v552_v45 }
 0x11a   : > { %v560_v47 = vmax.f32 %v559_v46, 0.0 }
 0x11c   : > { %966 = vmatmul.mubr.msk.f32.vlgmr.msra.gmra.mrb[0].mxu1 %vm572_vm3, %v560_v47 }
 0x11d   : > { %810 = vmatprep.mubr.bf16.mxu1 %v1043_v52  ;;  %779 = vmatpush1.bf16.msra.mxu1 %v1009_v50 }
 0x1ef   : > { %v642_v54 = vpop.f32.mrb[0].mxu1 }
 0x1f0   : > { %v643_v55 = vadd.f32 %v929_v53, %v642_v54  ;;  %v967_v56 = vpop.f32.mrb[1].mxu1 }
 0x1f2   : > { %v649_v57 = vsel %vm648_vm4, %v643_v55, 0.0  ;;  %v657_v58 = vmul.f32 %v643_v55, %v643_v55 }
 0x1f3   : > { %v650_v59 = vrot.slane %v649_v57, 4 }
 0x1f4   : > { %v658_v60 = vsel %vm648_vm4, %v657_v58, 0.0 }
 0x1f5   : > { %v651_v61 = vadd.f32 %v650_v59, %v649_v57  ;;  %v659_v62 = vrot.slane %v658_v60, 4 }
 0x1f7   : > { %v652_v63 = vrot.slane %v651_v61, 2  ;;  %v660_v0 = vadd.f32 %v659_v62, %v658_v60 }
 0x1f9   : > { %v653_v1 = vadd.f32 %v652_v63, %v651_v61  ;;  %v661_v2 = vrot.slane %v660_v0, 2 }
 0x1fb   : > { %v654_v3 = vrot.slane %v653_v1, 1  ;;  %v662_v4 = vadd.f32 %v661_v2, %v660_v0 }
 0x1fd   : > { %v655_v5 = vadd.f32 %v654_v3, %v653_v1  ;;  %v663_v6 = vrot.slane %v662_v4, 1 }
 0x1ff   : > { %v656_v7 = vmul.f32 0.5, %v655_v5  ;;  %v664_v8 = vadd.f32 %v663_v6, %v662_v4 }
 0x201   : > { %v665_v9 = vmul.f32 0.5, %v664_v8  ;;  %v666_v10 = vmul.f32 %v656_v7, %v656_v7  ;;  %v668_v13 = vsub.f32 %v643_v55, %v656_v7 }
 0x203   : > { %v667_v11 = vsub.f32 %v665_v9, %v666_v10 }
 0x205   : > { %v669_v12 = vadd.f32 1e-05, %v667_v11 }
 0x207   : > { %1014 = vrsqrt.f32 %v669_v12 }
 0x211   : > { %v1015_v14 = vpop.eup %1014 }
 0x212   : > { %v671_v16 = vmul.f32 %v1015_v14, %v668_v13 }
 0x214   : > { %v678_v18 = vmul.f32 %v931_v15, %v671_v16 }
 0x216   : > { %v685_v19 = vadd.f32 %v932_v17, %v678_v18 }
 0x218   : > { %v686_v20 = vmax.f32 %v685_v19, 0.0 }
 0x21a   : > { %v687_v21 = vpack.c.bf16 %v686_v20, %v686_v20 }
 0x21c   : > { %937 = vmatmul.mubr.msk.bf16.vlgmr.msra.gmra.mrb[4].mxu0 %vm445_vm1, %v687_v21  ;;  %938 = vmatmul.mubr.msk.bf16.vlgmr.msra.gmra.mrb[4].mxu1 %vm445_vm1, %v687_v21 }
 0x2ef   : > { %v771_v36 = vpop.f32.mrb[4].mxu0  ;;  %v812_v37 = vpop.f32.mrb[4].mxu1 }
 0x2f0   : > { %v772_v38 = vadd.f32 %v771_v36, %v697_v31  ;;  %v813_v39 = vadd.f32 %v812_v37, %v705_v32  ;;  %v773_v40 = vpop.f32.mrb[5].mxu0  ;;  %v814_v41 = vpop.f32.mrb[5].mxu1 }
 0x2f1   : > { %v774_v42 = vadd.f32 %v773_v40, %v701_v33  ;;  %v815_v44 = vadd.f32 %v814_v41, %v709_v35  ;;  %v775_v45 = vpop.f32.mrb[6].mxu0  ;;  %v816_v46 = vpop.f32.mrb[6].mxu1 }
 0x2f2   : > { %v776_v47 = vpop.f32.mrb[7].mxu0  ;;  %v817_v48 = vpop.f32.mrb[7].mxu1 }
 0x2f3   : > { %v823_v49 = vcombine.low %v772_v38, %v774_v42  ;;  %v824_v50 = vcombine.low %v813_v39, %v815_v44 }
 0x2f5   : > { %v831_v51 = vrot.slane %v823_v49, %v830_v43  ;;  %v838_v52 = vrot.slane %v824_v50, %v830_v43 }
 0x2f7   : > { %v839_v53 = vcombine.low %v831_v51, %v838_v52 }
 0x2f9   : > { %841 = vst [vmem:[%s432_s26] sm:$0xff] %v839_v53 }
 0x2fa PF: > { %p18_p9 = scmp.ge.s32.totalorder %s1122_s21, 6   ;;  %s1218_s17 = smov %s1034_s18 }
 0x2fb   : > { %s1219_s18 = smov %s1131_s24  ;;  %s1220_s19 = smov %s1122_s21 }
 0x2fc   :  { %20 = sbr.rel (!%p18_p9) target bundleno = 2 (0x2), region = 125 }

// kernel: generator_forward.5
= control target key start
LH: loop header
LB: loop body
LE: loop exit
PB: predicated region body
PF: predicated region fallthrough
CT: control target
= control target key end

     0   :  { %s2238_s21 = smov 0   ;;  %s2862_s0 = inlined_call_operand.vmem [shape: f32[2,8,8,128], index: 0, kind: input, shape index: {}, may-alias: {0,1}]   ;;  %s2863_s1 = inlined_call_operand.vmem [shape: f32[2,8,8,128], index: 1, kind: input, shape index: {}, may-alias: {0,1}]   ;;  %s2864_s2 = inlined_call_operand.vmem [shape: f32[1,128], index: 2, kind: input, shape index: {}]   ;;  %s2865_s3 = inlined_call_operand.vmem [shape: f32[1,128], index: 3, kind: input, shape index: {}]   ;;  %s2866_s4 = inlined_call_operand.vmem [shape: bf16[1152,128], index: 4, kind: input, shape index: {}]   ;;  %s2867_s5 = inlined_call_operand.vmem [shape: f32[1,128], index: 5, kind: input, shape index: {}]   ;;  %s2868_s6 = inlined_call_operand.vmem [shape: f32[2,64,128], index: 6, kind: output, shape index: {}]  }
   0x1 LB: > { %s1759_s22 = sadd.s32 4294967295, %s2200_s21   ;;  %p1763_p0 = scmp.ge.s32.totalorder %s2200_s21, 1  ;;  %s2200_s21 = sphi %s2238_s21, %s16_s21  }
   0x2   : > { %p212_p1 = scmp.lt.s32.totalorder %s2200_s21, 3 }
   0x4   : > { %p213_p2 = pnand %p1763_p0, %p212_p1 }
   0x5   : > { %v2120_v0 = vld [vmem:[%s2866_s4 + $0xc0] sm:$0xff] (!%p213_p2)   ;;  %v2122_v2 = vld [vmem:[%s2866_s4 + $0xc8] sm:$0xff] (!%p213_p2)   ;;  %v2126_v6 = vld [vmem:[%s2866_s4 + $0xd0] sm:$0xff] (!%p213_p2)   ;;  %p242_p3 = scmp.lt.s32.totalorder (!%p213_p2), %s1759_s22, 1  ;;  %vm479_vm0 = vcmask (!%p213_p2), 1040384   ;;  %vm491_vm3 = vcmask (!%p213_p2), 1044480  }
   0x6   : > { %216 = sbr.rel (%p213_p2) target bundleno = 404 (0x194), region = 44  ;;  %v2121_v1 = vld [vmem:[%s2866_s4 + $0x80] sm:$0xff] (!%p213_p2)   ;;  %1939 = vmatprep.subr.bf16.mxu1 (!%p213_p2), %v2120_v0  ;;  %v2123_v3 = vld [vmem:[%s2866_s4 + $0x88] sm:$0xff] (!%p213_p2)   ;;  %v2127_v7 = vld [vmem:[%s2866_s4 + $0x90] sm:$0xff] (!%p213_p2)   ;;  %vm480_vm1 = vsmask.f32 (!%p213_p2), 256 }
   0x7   : > { %1940 = vmatpush3.bf16.msra.mxu1 (!%p213_p2), %v2121_v1  ;;  %v2124_v4 = vld [vmem:[%s2866_s4 + $0x40] sm:$0xff] (!%p213_p2)   ;;  %v2128_v8 = vld [vmem:[%s2866_s4 + $0x48] sm:$0xff] (!%p213_p2)   ;;  %v2130_v10 = vld [vmem:[%s2866_s4 + $0xd8] sm:$0xff] (!%p213_p2)   ;;  %vm492_vm4 = vsmask.f32 (!%p213_p2), 4352  ;;  %vm658_vm6 = vcmask (!%p213_p2), 1042432  }
   0x8   : > { %1941 = vmatprep.subr.bf16.mxu1 (!%p213_p2), %v2122_v2  ;;  %v2125_v5 = vld [vmem:[%s2866_s4] sm:$0xff] (!%p213_p2)   ;;  %1899 = vmatprep.subr.bf16.mxu0 (!%p213_p2), %v2124_v4  ;;  %v2129_v9 = vld [vmem:[%s2866_s4 + $0x8] sm:$0xff] (!%p213_p2)   ;;  %v2131_v11 = vld [vmem:[%s2866_s4 + $0x98] sm:$0xff] (!%p213_p2)   ;;  %vm659_vm7 = vcmask (!%p213_p2), 1046532   ;;  %vm543_vm13 = vsmask.f32 (!%p213_p2), 3328 }
   0x9   : > { %1900 = vmatpush3.bf16.msra.mxu0 (!%p213_p2), %v2125_v5  ;;  %v2132_v12 = vld [vmem:[%s2866_s4 + $0x50] sm:$0xff] (!%p213_p2)   ;;  %v2134_v14 = vld [vmem:[%s2866_s4 + $0xe0] sm:$0xff] (!%p213_p2)   ;;  %v2136_v16 = vld [vmem:[%s2866_s4 + $0x58] sm:$0xff] (!%p213_p2)   ;;  %vm544_vm14 = vsmask.f32 (!%p213_p2), 7440 }
   0xa   : > { %1901 = vmatprep.subr.bf16.mxu0 (!%p213_p2), %v2128_v8  ;;  %v2133_v13 = vld [vmem:[%s2866_s4 + $0x10] sm:$0xff] (!%p213_p2)   ;;  %v2135_v15 = vld [vmem:[%s2866_s4 + $0xa0] sm:$0xff] (!%p213_p2)   ;;  %v2137_v17 = vld [vmem:[%s2866_s4 + $0x18] sm:$0xff] (!%p213_p2)  }
   0xb   : > { %1942 = vmatpush3.bf16.msra.mxu1 (!%p213_p2), %v2123_v3  ;;  %v2138_v18 = vld [vmem:[%s2866_s4 + $0xe8] sm:$0xff] (!%p213_p2)   ;;  %v2140_v20 = vld [vmem:[%s2866_s4 + $0x60] sm:$0xff] (!%p213_p2)   ;;  %v2142_v22 = vld [vmem:[%s2866_s4 + $0xf0] sm:$0xff] (!%p213_p2)  }
   0xc   : > { %1943 = vmatprep.subr.bf16.mxu1 (!%p213_p2), %v2126_v6  ;;  %v2139_v19 = vld [vmem:[%s2866_s4 + $0xa8] sm:$0xff] (!%p213_p2)   ;;  %v2141_v21 = vld [vmem:[%s2866_s4 + $0x20] sm:$0xff] (!%p213_p2)   ;;  %v2143_v23 = vld [vmem:[%s2866_s4 + $0xb0] sm:$0xff] (!%p213_p2)  }
   0xd   : > { %1902 = vmatpush3.bf16.msra.mxu0 %v2129_v9  ;;  %v2144_v24 = vld [vmem:[%s2866_s4 + $0x68] sm:$0xff]   ;;  %v2146_v26 = vld [vmem:[%s2866_s4 + $0xf8] sm:$0xff]   ;;  %v2148_v28 = vld [vmem:[%s2866_s4 + $0x70] sm:$0xff]   ;;  %s2878_s22 = smov (!%p242_p3, %s1759_s22), 1 }
   0xe   : > { %1903 = vmatprep.subr.bf16.mxu0 %v2132_v12  ;;  %v2145_v25 = vld [vmem:[%s2866_s4 + $0x28] sm:$0xff]   ;;  %v2147_v27 = vld [vmem:[%s2866_s4 + $0xb8] sm:$0xff]   ;;  %v2149_v29 = vld [vmem:[%s2866_s4 + $0x30] sm:$0xff]   ;;  %s1897_s11 = sshll.u32 %s2878_s22, 6 }
   0xf   : > { %1944 = vmatpush3.bf16.msra.mxu1 %v2127_v7  ;;  %v253_v30 = vld [vmem:[%s2862_s0] sm:$0xff]  ;;  %v254_v31 = vld [vmem:[%s2862_s0 + $0x8] sm:$0xff]  ;;  %v255_v32 = vld [vmem:[%s2862_s0 + $0x10] sm:$0xff]  ;;  %s2421_s16 = scalar_lea.vmem %s2863_s1, %s1897_s11  ;;  %s251_s15 = scalar_lea.vmem %s2868_s6, %s1897_s11 }
  0x10   : > { %1945 = vmatprep.subr.bf16.mxu1 %v2130_v10  ;;  %v256_v33 = vld [vmem:[%s2862_s0 + $0x18] sm:$0xff]  ;;  %v269_v34 = vadd.f32 %v254_v31, %v253_v30  ;;  %v292_v35 = vmul.f32 %v253_v30, %v253_v30  ;;  %v293_v36 = vmul.f32 %v254_v31, %v254_v31  ;;  %v294_v37 = vmul.f32 %v255_v32, %v255_v32  ;;  %v257_v38 = vld [vmem:[%s2862_s0 + $0x20] sm:$0xff]  ;;  %v258_v42 = vld [vmem:[%s2862_s0 + $0x28] sm:$0xff] }
  0x11   : > { %1904 = vmatpush3.bf16.msra.mxu0 %v2133_v13  ;;  %v295_v40 = vmul.f32 %v256_v33, %v256_v33  ;;  %v296_v44 = vmul.f32 %v257_v38, %v257_v38  ;;  %v259_v46 = vld [vmem:[%s2862_s0 + $0x30] sm:$0xff]  ;;  %v297_v48 = vmul.f32 %v258_v42, %v258_v42  ;;  %v2150_v50 = vld [vmem:[%s2866_s4 + $0x1c0] sm:$0xff]   ;;  %v260_v51 = vld [vmem:[%s2862_s0 + $0x38] sm:$0xff] }
  0x12   : > { %1905 = vmatprep.subr.bf16.mxu0 %v2136_v16  ;;  %v270_v39 = vadd.f32 %v269_v34, %v255_v32  ;;  %v308_v41 = vadd.f32 %v293_v36, %v292_v35  ;;  %v298_v53 = vmul.f32 %v259_v46, %v259_v46  ;;  %v2152_v55 = vld [vmem:[%s2866_s4 + $0x78] sm:$0xff]   ;;  %v261_v56 = vld [vmem:[%s2862_s0 + $0x40] sm:$0xff]  ;;  %v299_v59 = vmul.f32 %v260_v51, %v260_v51  ;;  %v262_v61 = vld [vmem:[%s2862_s0 + $0x48] sm:$0xff] }
  0x13   : > { %1946 = vmatpush3.bf16.msra.mxu1 %v2131_v11  ;;  %v2153_v58 = vld [vmem:[%s2866_s4 + $0x38] sm:$0xff]   ;;  %v300_v63 = vmul.f32 %v261_v56, %v261_v56  ;;  %v263_v1 = vld [vmem:[%s2862_s0 + $0x50] sm:$0xff]  ;;  %v2156_v3 = vld [vmem:[%s2866_s4 + $0x140] sm:$0xff]   ;;  %v301_v4 = vmul.f32 %v262_v61, %v262_v61 }
  0x14   : > { %1947 = vmatprep.subr.bf16.mxu1 %v2134_v14  ;;  %v271_v43 = vadd.f32 %v270_v39, %v256_v33  ;;  %v309_v45 = vadd.f32 %v308_v41, %v294_v37  ;;  %v264_v6 = vld [vmem:[%s2862_s0 + $0x58] sm:$0xff]  ;;  %v302_v8 = vmul.f32 %v263_v1, %v263_v1  ;;  %v265_v10 = vld [vmem:[%s2862_s0 + $0x60] sm:$0xff]  ;;  %v266_v14 = vld [vmem:[%s2862_s0 + $0x68] sm:$0xff] }
  0x15   : > { %1906 = vmatpush3.bf16.msra.mxu0 %v2137_v17  ;;  %v303_v12 = vmul.f32 %v264_v6, %v264_v6  ;;  %v304_v16 = vmul.f32 %v265_v10, %v265_v10  ;;  %vm2402_vm2 = vmand %vm479_vm0, %vm480_vm1 }
  0x16   : > { %1907 = vmatprep.subr.bf16.mxu0 %v2140_v20  ;;  %v272_v47 = vadd.f32 %v271_v43, %v257_v38  ;;  %v310_v49 = vadd.f32 %v309_v45, %v295_v40  ;;  %v305_v20 = vmul.f32 %v266_v14, %v266_v14  ;;  %vm2410_vm5 = vmand %vm491_vm3, %vm492_vm4 }
  0x17   : > { %1948 = vmatpush3.bf16.msra.mxu1 %v2135_v15  ;;  %vm2458_vm12 = vmor %vm658_vm6, %vm659_vm7 }
  0x18   : > { %1949 = vmatprep.subr.bf16.mxu1 %v2138_v18  ;;  %v273_v52 = vadd.f32 %v272_v47, %v258_v42  ;;  %v311_v54 = vadd.f32 %v310_v49, %v296_v44  ;;  %v267_v18 = vld [vmem:[%s2862_s0 + $0x70] sm:$0xff]  ;;  %v348_v49 = vlaneseq  ;;  %vm2497_vm1 = vmor %vm543_vm13, %vm544_vm14 }
  0x19   : > { %1908 = vmatpush3.bf16.msra.mxu0 %v2141_v21 }
  0x1a   : > { %1909 = vmatprep.subr.bf16.mxu0 %v2144_v24  ;;  %v274_v57 = vadd.f32 %v273_v52, %v259_v46  ;;  %v312_v60 = vadd.f32 %v311_v54, %v297_v48  ;;  %v306_v24 = vmul.f32 %v267_v18, %v267_v18  ;;  %v349_v52 = vshrl.u32 %v348_v49, 7  ;;  %v332_v54 = vld [vmem:[%s2864_s2] sm:$0x1] }
  0x1b   : > { %1950 = vmatpush3.bf16.msra.mxu1 %v2139_v19 }
  0x1c   : > { %1951 = vmatprep.subr.bf16.mxu1 %v2142_v22  ;;  %v275_v62 = vadd.f32 %v274_v57, %v260_v51  ;;  %v313_v0 = vadd.f32 %v312_v60, %v298_v53  ;;  %v268_v22 = vld [vmem:[%s2862_s0 + $0x78] sm:$0xff]  ;;  %v350_v57 = vsub.s32 0, %v349_v52 }
  0x1d   : > { %1910 = vmatpush3.bf16.msra.mxu0 %v2145_v25 }
  0x1e   : > { %1911 = vmatprep.subr.bf16.mxu0 %v2148_v28  ;;  %v276_v2 = vadd.f32 %v275_v62, %v261_v56  ;;  %v314_v5 = vadd.f32 %v313_v0, %v299_v59  ;;  %v339_v62 = vld [vmem:[%s2421_s16] sm:$0xff] }
  0x1f   : > { %1952 = vmatpush3.bf16.msra.mxu1 %v2143_v23 }
  0x20   : > { %1953 = vmatprep.subr.bf16.mxu1 %v2146_v26  ;;  %v277_v7 = vadd.f32 %v276_v2, %v262_v61  ;;  %v315_v9 = vadd.f32 %v314_v5, %v300_v63  ;;  %v336_v61 = vld [vmem:[%s2865_s3] sm:$0x1]  ;;  %v340_v63 = vld [vmem:[%s2421_s16 + $0x8] sm:$0xff]  ;;  %v341_v2 = vld [vmem:[%s2421_s16 + $0x10] sm:$0xff] }
  0x21   : > { %1912 = vmatpush3.bf16.msra.mxu0 %v2149_v29 }
  0x22   : > { %1913 = vmatprep.subr.bf16.mxu0 %v2152_v55  ;;  %v278_v11 = vadd.f32 %v277_v7, %v263_v1  ;;  %v316_v13 = vadd.f32 %v315_v9, %v301_v4 }
  0x23   : > { %1954 = vmatpush3.bf16.msra.mxu1 %v2147_v27  ;;  %v307_v27 = vmul.f32 %v268_v22, %v268_v22 }
  0x24   : > { %2019 = vmatprep.subr.bf16.mxu1 %v2150_v50  ;;  %v279_v15 = vadd.f32 %v278_v11, %v264_v6  ;;  %v317_v17 = vadd.f32 %v316_v13, %v302_v8  ;;  %v2202_v50 = vmov 0   ;;  %v346_v11 = vld [vmem:[%s2421_s16 + $0x38] sm:$0xff] }
  0x25   : > { %1914 = vmatpush3.bf16.msra.mxu0 %v2153_v58  ;;  %v410_v51 = vrot.slane %v2202_v50, 7 }
  0x26   : > { %1979 = vmatprep.subr.bf16.mxu0 %v2156_v3  ;;  %v280_v19 = vadd.f32 %v279_v15, %v265_v10  ;;  %v318_v21 = vadd.f32 %v317_v17, %v303_v12  ;;  %v342_v3 = vld [vmem:[%s2421_s16 + $0x18] sm:$0xff] }
  0x27   : > { %v482_v56 = vsel %vm2402_vm2, 0, %v410_v51  ;;  %v345_v51 = vld [vmem:[%s2421_s16 + $0x30] sm:$0xff] }
  0x28   : > { %v281_v23 = vadd.f32 %v280_v19, %v266_v14  ;;  %v319_v25 = vadd.f32 %v318_v21, %v304_v16  ;;  %v2425_v60 = vsel %vm2410_vm5, %v482_v56, 0 }
  0x29   : > { %v1768_v4 = vcombine.low %v2425_v60, %v2425_v60  ;;  %v1769_v17 = vcombine.high %v2425_v60, %v2425_v60 }
  0x2a   : > { %v282_v26 = vadd.f32 %v281_v23, %v267_v18  ;;  %v320_v28 = vadd.f32 %v319_v25, %v305_v20  ;;  %v343_v25 = vld [vmem:[%s2421_s16 + $0x20] sm:$0xff] }
  0x2b   : > { %v547_v12 = vshrl.u32 %v1768_v4, 16  ;;  %v550_v13 = vshll.u32 %v1768_v4, 16  ;;  %v1784_v18 = vrot.slane %v1768_v4, 9 }
  0x2c   : > { %v283_v29 = vadd.f32 %v282_v26, %v268_v22  ;;  %v321_v30 = vadd.f32 %v320_v28, %v306_v24 }
  0x2d   : > { %v549_v23 = vrot.slane %v547_v12, 4  ;;  %v552_v24 = vrot.slane %v550_v13, 5 }
  0x2e   : > { %v284_v31 = vrot.slane %v283_v29, 4  ;;  %v322_v32 = vadd.f32 %v321_v30, %v307_v27 }
  0x30   : > { %v285_v33 = vadd.f32 %v284_v31, %v283_v29  ;;  %v323_v34 = vrot.slane %v322_v32, 4 }
  0x32   : > { %v286_v35 = vrot.slane %v285_v33, 2  ;;  %v324_v36 = vadd.f32 %v323_v34, %v322_v32  ;;  %v663_v32 = vrot.slane %v1769_v17, 5  ;;  %v556_v34 = vshll.u32 %v1769_v17, 16 }
  0x34   : > { %v287_v37 = vadd.f32 %v286_v35, %v285_v33  ;;  %v325_v38 = vrot.slane %v324_v36, 2  ;;  %v2466_v52 = vsel %vm2458_vm12, %v1784_v18, %v663_v32 }
  0x36   : > { %v288_v39 = vrot.slane %v287_v37, 1  ;;  %v326_v40 = vadd.f32 %v325_v38, %v324_v36 }
  0x38   : > { %v289_v41 = vadd.f32 %v288_v39, %v287_v37  ;;  %v327_v42 = vrot.slane %v326_v40, 1  ;;  %v344_v37 = vld [vmem:[%s2421_s16 + $0x28] sm:$0xff] }
  0x3a   : > { %v291_v43 = vmul.f32 0.0078125, %v289_v41  ;;  %v328_v44 = vadd.f32 %v327_v42, %v326_v40 }
  0x3c   : > { %v330_v45 = vmul.f32 %v291_v43, %v291_v43  ;;  %v329_v46 = vmul.f32 0.0078125, %v328_v44  ;;  %v553_v44 = vor.u32 %v552_v24, %v549_v23 }
  0x3e   : > { %v331_v47 = vsub.f32 %v329_v46, %v330_v45 }
  0x40   : > { %v333_v48 = vadd.f32 1e-05, %v331_v47 }
  0x42   : > { %2192 = vrsqrt.f32 %v333_v48 }
  0x4c   : > { %v2193_v58 = vpop.eup %2192 }
  0x4d   : > { %v335_v59 = vmul.f32 %v2193_v58, %v332_v54 }
  0x4f   : > { %v337_v0 = vmul.f32 %v335_v59, %v291_v43  ;;  %v2432_v1 = vrot.slane %v335_v59, %v350_v57  ;;  %v558_v59 = vrot.slane %v556_v34, 5  ;;  %v2154_v34 = vld [vmem:[%s2866_s4 + $0x1c8] sm:$0xff]  }
  0x51   : > { %v338_v5 = vsub.f32 %v336_v61, %v337_v0  ;;  %v353_v6 = vmul.f32 %v2432_v1, %v339_v62  ;;  %v354_v7 = vmul.f32 %v2432_v1, %v340_v63  ;;  %v355_v8 = vmul.f32 %v2432_v1, %v341_v2 }
  0x52   : > { %v356_v9 = vmul.f32 %v2432_v1, %v342_v3  ;;  %v360_v19 = vmul.f32 %v2432_v1, %v346_v11  ;;  %v357_v38 = vmul.f32 %v2432_v1, %v343_v25  ;;  %v358_v50 = vmul.f32 %v2432_v1, %v344_v37 }
  0x53   : > { %v2442_v10 = vrot.slane %v338_v5, %v350_v57  ;;  %v554_v62 = vrot.slane %v553_v44, 4  ;;  %v359_v2 = vmul.f32 %v2432_v1, %v345_v51 }
  0x55   : > { %v367_v14 = vadd.f32 %v2442_v10, %v353_v6  ;;  %v368_v15 = vadd.f32 %v2442_v10, %v354_v7  ;;  %v369_v16 = vadd.f32 %v2442_v10, %v355_v8  ;;  %v370_v20 = vadd.f32 %v2442_v10, %v356_v9 }
  0x56   : > { %v374_v33 = vadd.f32 %v2442_v10, %v360_v19  ;;  %v371_v61 = vadd.f32 %v2442_v10, %v357_v38  ;;  %v372_v6 = vadd.f32 %v2442_v10, %v358_v50  ;;  %v2519_v37 = vsel %vm2497_vm1, %v554_v62, %v558_v59 }
  0x57   : > { %vm375_vm8 = vcmp.gt.f32.partialorder %v367_v14, 0.0  ;;  %vm376_vm9 = vcmp.gt.f32.partialorder %v368_v15, 0.0  ;;  %v383_v21 = vmul.f32 0.2, %v367_v14  ;;  %v384_v22 = vmul.f32 0.2, %v368_v15 }
  0x58   : > { %vm377_vm10 = vcmp.gt.f32.partialorder %v369_v16, 0.0  ;;  %vm378_vm11 = vcmp.gt.f32.partialorder %v370_v20, 0.0  ;;  %v385_v28 = vmul.f32 0.2, %v369_v16  ;;  %v386_v29 = vmul.f32 0.2, %v370_v20 }
  0x59   : > { %v391_v26 = vsel %vm375_vm8, %v367_v14, %v383_v21  ;;  %v392_v27 = vsel %vm376_vm9, %v368_v15, %v384_v22  ;;  %v390_v49 = vmul.f32 0.2, %v374_v33  ;;  %vm382_vm15 = vcmp.gt.f32.partialorder %v374_v33, 0.0  ;;  %v2190_v22 = vld [vmem:[%s2866_s4 + $0x230] sm:$0xff]  }
  0x5a   : > { %v399_v30 = vpack.c.bf16 %v391_v26, %v391_v26  ;;  %v400_v31 = vpack.c.bf16 %v392_v27, %v392_v27  ;;  %v393_v35 = vsel %vm377_vm10, %v369_v16, %v385_v28  ;;  %v394_v36 = vsel %vm378_vm11, %v370_v20, %v386_v29  ;;  %v2151_v28 = vld [vmem:[%s2866_s4 + $0x180] sm:$0xff]  }
  0x5b   : > { %v401_v45 = vpack.c.bf16 %v393_v35, %v393_v35  ;;  %v402_v46 = vpack.c.bf16 %v394_v36, %v394_v36  ;;  %v398_v5 = vsel %vm382_vm15, %v374_v33, %v390_v49  ;;  %vm379_vm0 = vcmp.gt.f32.partialorder %v371_v61, 0.0 }
  0x5c   : > { %v415_v39 = vshrl.u32 %v399_v30, 16  ;;  %v418_v40 = vshll.u32 %v399_v30, 16  ;;  %v422_v41 = vshrl.u32 %v400_v31, 16  ;;  %v425_v42 = vshll.u32 %v400_v31, 16 }
  0x5d   : > { %v429_v54 = vshrl.u32 %v401_v45, 16  ;;  %v436_v56 = vshrl.u32 %v402_v46, 16  ;;  %v432_v0 = vshll.u32 %v401_v45, 16  ;;  %v439_v11 = vshll.u32 %v402_v46, 16  ;;  %v2155_v45 = vld [vmem:[%s2866_s4 + $0x188] sm:$0xff]  }
  0x5e   : > { %v417_v47 = vrot.slane %v415_v39, 7  ;;  %v424_v48 = vrot.slane %v422_v41, 7  ;;  %v2493_v15 = vpack.c.bf16 %v398_v5, %v398_v5  ;;  %v387_v17 = vmul.f32 0.2, %v371_v61 }
  0x5f   : > { %v431_v63 = vrot.slane %v429_v54, 7  ;;  %v438_v9 = vrot.slane %v436_v56, 7  ;;  %v388_v31 = vmul.f32 0.2, %v372_v6  ;;  %vm380_vm3 = vcmp.gt.f32.partialorder %v372_v6, 0.0  ;;  %v2158_v56 = vld [vmem:[%s2866_s4 + $0x1d0] sm:$0xff]  }
  0x60   : > { %v420_v57 = vor.u32 %v418_v40, %v417_v47  ;;  %v427_v58 = vor.u32 %v425_v42, %v424_v48  ;;  %v395_v44 = vsel %vm379_vm0, %v371_v61, %v387_v17  ;;  %v2532_v49 = vadd.f32 %v2442_v10, %v359_v2  ;;  %v2157_v2 = vld [vmem:[%s2866_s4 + $0x100] sm:$0xff]  }
  0x61   : > { %v434_v16 = vor.u32 %v432_v0, %v431_v63  ;;  %v441_v26 = vor.u32 %v439_v11, %v438_v9  ;;  %v464_v50 = vshrl.u32 %v2493_v15, 16  ;;  %v403_v61 = vpack.c.bf16 %v395_v44, %v395_v44  ;;  %v2159_v9 = vld [vmem:[%s2866_s4 + $0x190] sm:$0xff]   ;;  %v2160_v11 = vld [vmem:[%s2866_s4 + $0x148] sm:$0xff]  }
  0x62   : > { %v483_v3 = vsel %vm2402_vm2, 0, %v420_v57  ;;  %v484_v4 = vsel %vm2402_vm2, 0, %v427_v58  ;;  %v396_v57 = vsel %vm380_vm3, %v372_v6, %v388_v31  ;;  %v467_v62 = vshll.u32 %v2493_v15, 16 }
  0x63   : > { %v2477_v7 = vsel %vm2410_vm5, %v483_v3, 0  ;;  %v2481_v8 = vsel %vm2410_vm5, %v484_v4, 0  ;;  %v485_v41 = vsel %vm2402_vm2, 0, %v434_v16  ;;  %v486_v42 = vsel %vm2402_vm2, 0, %v441_v26 }
  0x64   : > { %v1770_v1 = vcombine.low %v2477_v7, %v2477_v7  ;;  %v1771_v12 = vcombine.high %v2477_v7, %v2477_v7  ;;  %v2489_v13 = vcombine.low %v2481_v8, %v2481_v8  ;;  %v1807_v14 = vcombine.low %v2477_v7, %v2481_v8 }
  0x65   : > { %v1773_v32 = vcombine.high %v2481_v8, %v2481_v8  ;;  %v497_v48 = vsel %vm2410_vm5, %v485_v41, 0  ;;  %v2537_v51 = vsel %vm2410_vm5, %v486_v42, 0  ;;  %v1795_v10 = vcombine.low %v2425_v60, %v2477_v7 }
  0x66   : > { %v1785_v18 = vrot.slane %v1770_v1, 9  ;;  %v667_v19 = vrot.slane %v1771_v12, 5  ;;  %v561_v20 = vshrl.u32 %v1770_v1, 16  ;;  %v564_v21 = vshll.u32 %v1770_v1, 16  ;;  %1468 = vmatprep.mubr.bf16.mxu1 %v1807_v14 }
  0x67   : > { %v570_v23 = vshll.u32 %v1771_v12, 16  ;;  %v575_v24 = vshrl.u32 %v2489_v13, 16  ;;  %v578_v25 = vshll.u32 %v2489_v13, 16  ;;  %v584_v40 = vshll.u32 %v1773_v32, 16  ;;  %v2162_v12 = vld [vmem:[%s2866_s4 + $0x1d8] sm:$0xff]  }
  0x68   : > { %v2505_v27 = vsel %vm2458_vm12, %v1785_v18, %v667_v19  ;;  %v563_v29 = vrot.slane %v561_v20, 4  ;;  %v566_v30 = vrot.slane %v564_v21, 5  ;;  %v1774_v54 = vcombine.low %v497_v48, %v497_v48 }
  0x69   : > { %v1803_v33 = vcombine.low %v2466_v52, %v2505_v27  ;;  %v577_v35 = vrot.slane %v575_v24, 4  ;;  %v580_v36 = vrot.slane %v578_v25, 5  ;;  %v572_v39 = vrot.slane %v570_v23, 5  ;;  %v2161_v24 = vld [vmem:[%s2866_s4 + $0x108] sm:$0xff]  }
  0x6a   : > { %v567_v38 = vor.u32 %v566_v30, %v563_v29  ;;  %v1808_v59 = vcombine.low %v497_v48, %v2537_v51  ;;  %v586_v63 = vrot.slane %v584_v40, 5  ;;  %v1775_v3 = vcombine.high %v497_v48, %v497_v48  ;;  %v2163_v30 = vld [vmem:[%s2866_s4 + $0x198] sm:$0xff]  }
  0x6b   : > { %1469 = vmatmul.mubr.bf16.vlgmr.msra.gmra.mrb[0].mxu1 %v1803_v33  ;;  %v581_v47 = vor.u32 %v580_v36, %v577_v35  ;;  %v1786_v5 = vrot.slane %v2489_v13, 9  ;;  %v671_v6 = vrot.slane %v1773_v32, 5  ;;  %v1787_v7 = vrot.slane %v1774_v54, 9  ;;  %v2164_v32 = vld [vmem:[%s2866_s4 + $0x150] sm:$0xff]  }
  0x6c   : > { %2020 = vmatpush3.bf16.msra.mxu1 %v2151_v28  ;;  %v568_v46 = vrot.slane %v567_v38, 4  ;;  %1476 = vmatprep.mubr.bf16.mxu1 %v1808_v59  ;;  %v675_v1 = vrot.slane %v1775_v3, 5  ;;  %v589_v14 = vshrl.u32 %v1774_v54, 16  ;;  %v592_v16 = vshll.u32 %v1774_v54, 16 }
  0x6d   : > { %2021 = vmatprep.subr.bf16.mxu1 %v2154_v34  ;;  %v582_v4 = vrot.slane %v581_v47, 4  ;;  %v404_v13 = vpack.c.bf16 %v396_v57, %v396_v57  ;;  %v1776_v17 = vcombine.low %v2537_v51, %v2537_v51  ;;  %v2570_v18 = vsel %vm2458_vm12, %v1786_v5, %v671_v6  ;;  %v2170_v5 = vld [vmem:[%s2866_s4 + $0x1e8] sm:$0xff]  }
  0x6e   : > { %v2545_v58 = vsel %vm2497_vm1, %v568_v46, %v572_v39  ;;  %v598_v19 = vshll.u32 %v1775_v3, 16  ;;  %v443_v20 = vshrl.u32 %v403_v61, 16  ;;  %v466_v21 = vrot.slane %v464_v50, 7  ;;  %v2166_v39 = vld [vmem:[%s2866_s4 + $0x1e0] sm:$0xff]   ;;  %v2165_v50 = vld [vmem:[%s2866_s4 + $0x110] sm:$0xff]  }
  0x6f   : > { %v1799_v0 = vcombine.low %v2519_v37, %v2545_v58  ;;  %v2574_v23 = vsel %vm2458_vm12, %v1787_v7, %v675_v1  ;;  %v591_v25 = vrot.slane %v589_v14, 4  ;;  %v594_v26 = vrot.slane %v592_v16, 5  ;;  %v2169_v7 = vld [vmem:[%s2866_s4 + $0x118] sm:$0xff]   ;;  %v2172_v16 = vld [vmem:[%s2866_s4 + $0x160] sm:$0xff]  }
  0x70   : > { %2022 = vmatpush3.bf16.msra.mxu1 %v2155_v45  ;;  %v2581_v28 = vsel %vm2497_vm1, %v582_v4, %v586_v63  ;;  %v2585_v29 = vcombine.low %v2570_v18, %v2574_v23  ;;  %v600_v31 = vrot.slane %v598_v19, 5  ;;  %v445_v33 = vrot.slane %v443_v20, 7  ;;  %v2168_v63 = vld [vmem:[%s2866_s4 + $0x158] sm:$0xff]  }
  0x71   : > { %1403 = vmatprep.mubr.bf16.mxu0 %v1799_v0  ;;  %2023 = vmatprep.subr.bf16.mxu1 %v2158_v56  ;;  %v595_v34 = vor.u32 %v594_v26, %v591_v25  ;;  %v446_v35 = vshll.u32 %v403_v61, 16  ;;  %v450_v36 = vshrl.u32 %v404_v13, 16  ;;  %v453_v38 = vshll.u32 %v404_v13, 16 }
  0x72   : > { %1404 = vmatmul.mubr.bf16.vlgmr.msra.gmra.mrb[0].mxu0 %v1795_v10  ;;  %v2598_v40 = vcombine.low %v2481_v8, %v497_v48  ;;  %v1777_v41 = vcombine.high %v2537_v51, %v2537_v51  ;;  %v603_v42 = vshrl.u32 %v1776_v17, 16  ;;  %v606_v44 = vshll.u32 %v1776_v17, 16  ;;  %v2167_v8 = vld [vmem:[%s2866_s4 + $0x1a0] sm:$0xff]  }
  0x73   : > { %1980 = vmatpush3.bf16.msra.mxu0 %v2157_v2  ;;  %1477 = vmatmul.mubr.bf16.gmra.mrb[4].mxu1 %v2585_v29  ;;  %v596_v45 = vrot.slane %v595_v34, 4  ;;  %v448_v46 = vor.u32 %v446_v35, %v445_v33  ;;  %v452_v47 = vrot.slane %v450_v36, 7  ;;  %v1788_v54 = vrot.slane %v1776_v17, 9  ;;  %v2173_v33 = vld [vmem:[%s2866_s4 + $0x120] sm:$0xff]  }
  0x74   : > { %2024 = vmatpush3.bf16.msra.mxu1 %v2159_v9  ;;  %1981 = vmatprep.subr.bf16.mxu0 %v2160_v11  ;;  %v679_v56 = vrot.slane %v1777_v41, 5  ;;  %v605_v48 = vrot.slane %v603_v42, 4  ;;  %v608_v57 = vrot.slane %v606_v44, 5  ;;  %vm381_vm4 = vcmp.gt.f32.partialorder %v2532_v49, 0.0 }
  0x75   : > { %2025 = vmatprep.subr.bf16.mxu1 %v2162_v12  ;;  %v2611_v10 = vsel %vm2497_vm1, %v596_v45, %v600_v31  ;;  %v455_v59 = vor.u32 %v453_v38, %v452_v47  ;;  %v487_v61 = vsel %vm2402_vm2, 0, %v448_v46  ;;  %v389_v0 = vmul.f32 0.2, %v2532_v49  ;;  %v2171_v12 = vld [vmem:[%s2866_s4 + $0x1a8] sm:$0xff]   ;;  %v2178_v46 = vld [vmem:[%s2866_s4 + $0x1f8] sm:$0xff]  }
  0x76   : > { %v2621_v2 = vor.u32 %v467_v62, %v466_v21  ;;  %v2625_v3 = vcombine.low %v2581_v28, %v2611_v10  ;;  %v2629_v4 = vsel %vm2410_vm5, %v487_v61, 0  ;;  %v612_v9 = vshll.u32 %v1777_v41, 16  ;;  %v2176_v41 = vld [vmem:[%s2866_s4 + $0x168] sm:$0xff]  }
  0x77   : > { %1982 = vmatpush3.bf16.msra.mxu0 %v2161_v24  ;;  %v488_v6 = vsel %vm2402_vm2, 0, %v455_v59  ;;  %v1778_v15 = vcombine.low %v2629_v4, %v2629_v4  ;;  %v1779_v62 = vcombine.high %v2629_v4, %v2629_v4  ;;  %v2650_v1 = vsel %vm2458_vm12, %v1788_v54, %v679_v56  ;;  %v2174_v24 = vld [vmem:[%s2866_s4 + $0x1f0] sm:$0xff]  }
  0x78   : > { %2026 = vmatpush3.bf16.msra.mxu1 %v2163_v30  ;;  %1983 = vmatprep.subr.bf16.mxu0 %v2164_v32  ;;  %v2646_v11 = vsel %vm2410_vm5, %v488_v6, 0  ;;  %v609_v14 = vor.u32 %v608_v57, %v605_v48  ;;  %v397_v13 = vsel %vm381_vm4, %v2532_v49, %v389_v0  ;;  %v614_v31 = vrot.slane %v612_v9, 5  ;;  %v2177_v57 = vld [vmem:[%s2866_s4 + $0x128] sm:$0xff]   ;;  %v2180_v0 = vld [vmem:[%s2866_s4 + $0x170] sm:$0xff]  }
  0x79   : > { %2027 = vmatprep.subr.bf16.mxu1 %v2166_v39  ;;  %1411 = vmatprep.mubr.bf16.mxu0 %v2625_v3  ;;  %v2664_v17 = vcombine.low %v2646_v11, %v2646_v11  ;;  %v1809_v19 = vcombine.low %v2629_v4, %v2646_v11  ;;  %v1789_v20 = vrot.slane %v1778_v15, 9  ;;  %v683_v21 = vrot.slane %v1779_v62, 5  ;;  %v2175_v39 = vld [vmem:[%s2866_s4 + $0x1b0] sm:$0xff]  }
  0x7a   : > { %1412 = vmatmul.mubr.bf16.gmra.mrb[4].mxu0 %v2598_v40  ;;  %v617_v25 = vshrl.u32 %v1778_v15, 16  ;;  %v620_v26 = vshll.u32 %v1778_v15, 16  ;;  %v626_v49 = vshll.u32 %v1779_v62, 16  ;;  %v405_v32 = vpack.c.bf16 %v397_v13, %v397_v13 }
  0x7b   : > { %1984 = vmatpush3.bf16.msra.mxu0 %v2165_v50  ;;  %1484 = vmatprep.mubr.bf16.mxu1 %v1809_v19  ;;  %v2673_v30 = vsel %vm2458_vm12, %v1789_v20, %v683_v21  ;;  %v610_v35 = vrot.slane %v609_v14, 4  ;;  %v490_v42 = vsel %vm2402_vm2, 0, %v2621_v2  ;;  %v631_v47 = vshrl.u32 %v2664_v17, 16  ;;  %v2728_v14 = vld [vmem:[%s2866_s4 + $0x200] sm:$0xff]   ;;  %v2183_v19 = vld [vmem:[%s2866_s4 + $0x178] sm:$0xff]  }
  0x7c   : > { %2028 = vmatpush3.bf16.msra.mxu1 %v2167_v8  ;;  %1985 = vmatprep.subr.bf16.mxu0 %v2168_v63  ;;  %v2680_v34 = vcombine.low %v2650_v1, %v2673_v30  ;;  %v619_v36 = vrot.slane %v617_v25, 4  ;;  %v622_v38 = vrot.slane %v620_v26, 5  ;;  %v457_v44 = vshrl.u32 %v405_v32, 16  ;;  %v2179_v63 = vld [vmem:[%s2866_s4 + $0x1b8] sm:$0xff]  }
  0x7d   : > { %2029 = vmatprep.subr.bf16.mxu1 %v2170_v5  ;;  %v460_v45 = vshll.u32 %v405_v32, 16  ;;  %v628_v54 = vrot.slane %v626_v49, 5  ;;  %v1781_v56 = vcombine.high %v2646_v11, %v2646_v11  ;;  %v634_v8 = vshll.u32 %v2664_v17, 16  ;;  %v2184_v32 = vld [vmem:[%s2866_s4 + $0x138] sm:$0xff]  }
  0x7e   : > { %1485 = vmatmul.mubr.bf16.gmra.mrb[8].mxu1 %v2680_v34  ;;  %v623_v50 = vor.u32 %v622_v38, %v619_v36  ;;  %v459_v48 = vrot.slane %v457_v44, 7  ;;  %v2704_v59 = vsel %vm2497_vm1, %v610_v35, %v614_v31  ;;  %v2714_v2 = vsel %vm2410_vm5, %v490_v42, 0 }
  0x7f   : > { %1986 = vmatpush3.bf16.msra.mxu0 %v2169_v7  ;;  %v633_v6 = vrot.slane %v631_v47, 4  ;;  %v636_v15 = vrot.slane %v634_v8, 5  ;;  %v2722_v7 = vcombine.low %v2537_v51, %v2629_v4  ;;  %v1790_v9 = vrot.slane %v2664_v17, 9  ;;  %v2181_v51 = vld [vmem:[%s2866_s4 + $0x130] sm:$0xff]  }
  0x80   : > { %2030 = vmatpush3.bf16.msra.mxu1 %v2171_v12  ;;  %1987 = vmatprep.subr.bf16.mxu0 %v2172_v16  ;;  %v624_v61 = vrot.slane %v623_v50, 4  ;;  %v462_v5 = vor.u32 %v460_v45, %v459_v48  ;;  %v687_v12 = vrot.slane %v1781_v56, 5  ;;  %v640_v17 = vshll.u32 %v1781_v56, 16 }
  0x81   : > { %2031 = vmatprep.subr.bf16.mxu1 %v2174_v24  ;;  %v637_v24 = vor.u32 %v636_v15, %v633_v6  ;;  %v1816_v15 = vcombine.low %v2574_v23, %v2650_v1  ;;  %v2189_v1 = vld [vmem:[%s2866_s4 + $0x228] sm:$0xff]  }
  0x82   : > { %v2718_v62 = vsel %vm2497_vm1, %v624_v61, %v628_v54  ;;  %v489_v13 = vsel %vm2402_vm2, 0, %v462_v5  ;;  %v2746_v25 = vsel %vm2458_vm12, %v1790_v9, %v687_v12  ;;  %v1815_v61 = vcombine.low %v2505_v27, %v2570_v18  ;;  %v2186_v27 = vld [vmem:[%s2866_s4 + $0x210] sm:$0xff]  }
  0x83   : > { %1988 = vmatpush3.bf16.msra.mxu0 %v2173_v33  ;;  %v1801_v16 = vcombine.low %v2704_v59, %v2718_v62  ;;  %v501_v4 = vsel %vm2410_vm5, %v489_v13, 0  ;;  %v642_v33 = vrot.slane %v640_v17, 5  ;;  %v638_v38 = vrot.slane %v637_v24, 4  ;;  %v2191_v13 = vld [vmem:[%s2866_s4 + $0x238] sm:$0xff]  }
  0x84   : > { %2032 = vmatpush3.bf16.msra.mxu1 %v2175_v39  ;;  %1989 = vmatprep.subr.bf16.mxu0 %v2176_v41  ;;  %v1782_v20 = vcombine.low %v501_v4, %v501_v4  ;;  %v1810_v53 = vcombine.low %v501_v4, %v2714_v2  ;;  %v1783_v21 = vcombine.high %v501_v4, %v501_v4 }
  0x85   : > { %2033 = vmatprep.subr.bf16.mxu1 %v2178_v46  ;;  %1419 = vmatprep.mubr.bf16.mxu0 %v1801_v16  ;;  %v2762_v46 = vcombine.low %v2714_v2, %v2714_v2  ;;  %v2768_v47 = vsel %vm2497_vm1, %v638_v38, %v642_v33  ;;  %v1798_v56 = vcombine.low %v2646_v11, %v501_v4 }
  0x86   : > { %1420 = vmatmul.mubr.bf16.gmra.mrb[8].mxu0 %v2722_v7  ;;  %1492 = vmatprep.mubr.bf16.mxu1 %v1810_v53  ;;  %v1791_v55 = vrot.slane %v1782_v20, 9  ;;  %v691_v26 = vrot.slane %v1783_v21, 5  ;;  %v645_v49 = vshrl.u32 %v1782_v20, 16  ;;  %v648_v31 = vshll.u32 %v1782_v20, 16 }
  0x87   : > { %1990 = vmatpush3.bf16.msra.mxu0 %v2177_v57  ;;  %v654_v35 = vshll.u32 %v1783_v21, 16  ;;  %v699_v8 = vshrl.u32 %v2762_v46, 16  ;;  %v702_v48 = vshll.u32 %v2762_v46, 16  ;;  %v1811_v18 = vcombine.low %v2545_v58, %v2581_v28  ;;  %v2188_v58 = vld [vmem:[%s2866_s4 + $0x220] sm:$0xff]  }
  0x88   : > { %2034 = vmatpush3.bf16.msra.mxu1 %v2179_v63  ;;  %1991 = vmatprep.subr.bf16.mxu0 %v2180_v0  ;;  %v2754_v36 = vsel %vm2458_vm12, %v1791_v55, %v691_v26  ;;  %v647_v39 = vrot.slane %v645_v49, 4  ;;  %v650_v41 = vrot.slane %v648_v31, 5  ;;  %v1793_v63 = vcombine.high %v2714_v2, %v2714_v2 }
  0x89   : > { %2095 = vmatprep.subr.bf16.mxu1 %v2728_v14  ;;  %v2758_v42 = vcombine.low %v2746_v25, %v2754_v36  ;;  %v656_v45 = vrot.slane %v654_v35, 5  ;;  %v701_v11 = vrot.slane %v699_v8, 4  ;;  %v704_v0 = vrot.slane %v702_v48, 5 }
  0x8a   : > { %v651_v44 = vor.u32 %v650_v41, %v647_v39  ;;  %v708_v6 = vshll.u32 %v1793_v63, 16  ;;  %v1812_v28 = vcombine.low %v2611_v10, %v2704_v59  ;;  %v1794_v10 = vrot.slane %v2762_v46, 9 }
  0x8b   : > { %1992 = vmatpush3.bf16.msra.mxu0 %v2181_v51  ;;  %1493 = vmatmul.mubr.bf16.gmra.mrb[12].mxu1 %v2758_v42  ;;  %v705_v5 = vor.u32 %v704_v0, %v701_v11  ;;  %v714_v59 = vrot.slane %v1793_v63, 5 }
  0x8c   : > { %1993 = vmatprep.subr.bf16.mxu0 %v2183_v19  ;;  %v652_v50 = vrot.slane %v651_v44, 4  ;;  %1598 = vmatprep.mubr.bf16.mxu1 %v2625_v3  ;;  %v2185_v3 = vld [vmem:[%s2866_s4 + $0x208] sm:$0xff]   ;;  %v710_v12 = vrot.slane %v708_v6, 5 }
  0x8d   : > { %v706_v9 = vrot.slane %v705_v5, 4 }
  0x8e   : > { %v2773_v54 = vsel %vm2497_vm1, %v652_v50, %v656_v45 }
  0x8f   : > { %1994 = vmatpush3.bf16.msra.mxu0 %v2184_v32  ;;  %v1802_v57 = vcombine.low %v2768_v47, %v2773_v54  ;;  %v711_v23 = vsel %vm2497_vm1, %v706_v9, %v710_v12 }
  0x90   : > { %2071 = vmatprep.subr.bf16.mxu0 %v2728_v14  ;;  %v1814_v43 = vcombine.low %v2773_v54, %v711_v23 }
  0x91   : > { %1427 = vmatprep.mubr.bf16.mxu0 %v1802_v57 }
  0x92   : > { %1428 = vmatmul.mubr.bf16.gmra.mrb[12].mxu0 %v1798_v56 }
  0x93   : > { %1599 = vmatmul.mubr.bf16.vlgmr.msra.gmra.mrb[16].mxu1 %v2598_v40  ;;  %1533 = vmatprep.mubr.bf16.mxu0 %v1815_v61  ;;  %v2187_v40 = vld [vmem:[%s2866_s4 + $0x218] sm:$0xff]  }
  0x94   : > { %2103 = vmatpush3.bf16.msra.mxu1 %v2728_v14  ;;  %1606 = vmatprep.mubr.bf16.mxu1 %v1801_v16  ;;  %v1813_v16 = vcombine.low %v2718_v62, %v2768_v47 }
  0x95   : > { %2096 = vmatprep.subr.bf16.mxu1 %v2185_v3 }
  0x98   : > { %2104 = vmatpush3.bf16.msra.mxu1 %v2185_v3 }
  0x99   : > { %2097 = vmatprep.subr.bf16.mxu1 %v2186_v27 }
  0x9a   : > { %1534 = vmatmul.mubr.bf16.vlgmr.msra.gmra.mrb[16].mxu0 %v1811_v18 }
  0x9b   : > { %2072 = vmatpush3.bf16.msra.mxu0 %v2728_v14  ;;  %1607 = vmatmul.mubr.bf16.gmra.mrb[20].mxu1 %v2722_v7  ;;  %v1817_v7 = vcombine.low %v2673_v30, %v2746_v25  ;;  %v1820_v14 = vcombine.low %v711_v23, %v2519_v37  ;;  %v715_v37 = vsel %vm2458_vm12, %v1794_v10, %v714_v59 }
  0x9c   : > { %2105 = vmatpush3.bf16.msra.mxu1 %v2186_v27  ;;  %2073 = vmatprep.subr.bf16.mxu0 %v2185_v3  ;;  %v1819_v30 = vcombine.low %v2714_v2, %v2425_v60  ;;  %v1818_v51 = vcombine.low %v2754_v36, %v715_v37  ;;  %v1821_v60 = vcombine.low %v715_v37, %v2466_v52  ;;  %v1822_v52 = vld [vmem:[%s2867_s5] ss:$0 sm:$0xff] }
  0x9d   : > { %2098 = vmatprep.subr.bf16.mxu1 %v2187_v40  ;;  %1541 = vmatprep.mubr.bf16.mxu0 %v1816_v15 }
  0x9e   : > { %1614 = vmatprep.mubr.bf16.mxu1 %v1802_v57 }
  0x9f   : > { %2074 = vmatpush3.bf16.msra.mxu0 %v2185_v3 }
  0xa0   : > { %2106 = vmatpush3.bf16.msra.mxu1 %v2187_v40  ;;  %2075 = vmatprep.subr.bf16.mxu0 %v2186_v27 }
  0xa1   : > { %2099 = vmatprep.subr.bf16.mxu1 %v2188_v58 }
  0xa2   : > { %1542 = vmatmul.mubr.bf16.gmra.mrb[20].mxu0 %v1812_v28 }
  0xa3   : > { %2076 = vmatpush3.bf16.msra.mxu0 %v2186_v27  ;;  %1615 = vmatmul.mubr.bf16.gmra.mrb[24].mxu1 %v1798_v56 }
  0xa4   : > { %2107 = vmatpush3.bf16.msra.mxu1 %v2188_v58  ;;  %2077 = vmatprep.subr.bf16.mxu0 %v2187_v40 }
  0xa5   : > { %2100 = vmatprep.subr.bf16.mxu1 %v2189_v1  ;;  %1549 = vmatprep.mubr.bf16.mxu0 %v1817_v7 }
  0xa6   : > { %1622 = vmatprep.mubr.bf16.mxu1 %v1820_v14 }
  0xa7   : > { %2078 = vmatpush3.bf16.msra.mxu0 %v2187_v40 }
  0xa8   : > { %2108 = vmatpush3.bf16.msra.mxu1 %v2189_v1  ;;  %2079 = vmatprep.subr.bf16.mxu0 %v2188_v58 }
  0xa9   : > { %2101 = vmatprep.subr.bf16.mxu1 %v2190_v22 }
  0xaa   : > { %1550 = vmatmul.mubr.bf16.gmra.mrb[24].mxu0 %v1813_v16 }
  0xab   : > { %2080 = vmatpush3.bf16.msra.mxu0 %v2188_v58  ;;  %1623 = vmatmul.mubr.bf16.gmra.mrb[28].mxu1 %v1819_v30 }
  0xac   : > { %2109 = vmatpush3.bf16.msra.mxu1 %v2190_v22  ;;  %2081 = vmatprep.subr.bf16.mxu0 %v2189_v1 }
  0xad   : > { %2102 = vmatprep.subr.bf16.mxu1 %v2191_v13  ;;  %1557 = vmatprep.mubr.bf16.mxu0 %v1818_v51 }
  0xae   : > { %2091 = vmatprep.mubr.bf16.mxu1 %v2758_v42 }
  0xaf   : > { %2082 = vmatpush3.bf16.msra.mxu0 %v2189_v1 }
  0xb0   : > { %2110 = vmatpush3.bf16.msra.mxu1 %v2191_v13  ;;  %2083 = vmatprep.subr.bf16.mxu0 %v2190_v22 }
  0xb2   : > { %1558 = vmatmul.mubr.bf16.gmra.mrb[28].mxu0 %v1814_v43 }
  0xb3   : > { %2084 = vmatpush3.bf16.msra.mxu0 %v2190_v22  ;;  %2092 = vmatmul.mubr.bf16.vlgmr.msra.gmra.mrb[32].mxu1 %v1821_v60 }
  0xb4   : > { %2085 = vmatprep.subr.bf16.mxu0 %v2191_v13  ;;  %2087 = vmatprep.mubr.bf16.mxu0 %v2585_v29 }
  0xb7   : > { %2086 = vmatpush3.bf16.msra.mxu0 %v2191_v13 }
  0xba   : > { %2088 = vmatmul.mubr.bf16.vlgmr.msra.gmra.mrb[32].mxu0 %v2680_v34 }
 0x13e   : > { %v1955_v2 = vpop.f32.mrb[0].mxu1 }
 0x13f   : > { %v1956_v62 = vpop.f32.mrb[1].mxu1 }
 0x140   : > { %v1957_v4 = vadd.f32 %v1956_v62, %v1955_v2  ;;  %v1958_v17 = vpop.f32.mrb[2].mxu1 }
 0x141   : > { %v1959_v19 = vpop.f32.mrb[3].mxu1 }
 0x142   : > { %v1960_v20 = vadd.f32 %v1959_v19, %v1958_v17 }
 0x145   : > { %v1915_v53 = vpop.f32.mrb[0].mxu0 }
 0x146   : > { %v1916_v21 = vpop.f32.mrb[1].mxu0  ;;  %v1961_v49 = vpop.f32.mrb[4].mxu1 }
 0x147   : > { %v1917_v24 = vadd.f32 %v1916_v21, %v1915_v53  ;;  %v1918_v25 = vpop.f32.mrb[2].mxu0  ;;  %v1962_v31 = vpop.f32.mrb[5].mxu1 }
 0x148   : > { %v1919_v55 = vpop.f32.mrb[3].mxu0  ;;  %v1963_v32 = vadd.f32 %v1962_v31, %v1961_v49  ;;  %v1964_v33 = vpop.f32.mrb[6].mxu1 }
 0x149   : > { %v1406_v26 = vadd.f32 %v1917_v24, %v1822_v52  ;;  %v1920_v29 = vadd.f32 %v1919_v55, %v1918_v25  ;;  %v1965_v36 = vpop.f32.mrb[7].mxu1 }
 0x14a   : > { %v1966_v38 = vadd.f32 %v1965_v36, %v1964_v33 }
 0x14b   : > { %v1409_v34 = vadd.f32 %v1920_v29, %v1822_v52  ;;  %v1471_v35 = vadd.f32 %v1957_v4, %v1406_v26 }
 0x14d   : > { %v1474_v39 = vadd.f32 %v1960_v20, %v1409_v34  ;;  %v1921_v41 = vpop.f32.mrb[4].mxu0 }
 0x14e   : > { %v1922_v42 = vpop.f32.mrb[5].mxu0 }
 0x14f   : > { %v1923_v44 = vadd.f32 %v1922_v42, %v1921_v41  ;;  %v1924_v45 = vpop.f32.mrb[6].mxu0 }
 0x150   : > { %v1925_v46 = vpop.f32.mrb[7].mxu0 }
 0x151   : > { %v1414_v47 = vadd.f32 %v1923_v44, %v1822_v52  ;;  %v1926_v50 = vadd.f32 %v1925_v46, %v1924_v45  ;;  %v1967_v54 = vpop.f32.mrb[8].mxu1 }
 0x152   : > { %v1968_v8 = vpop.f32.mrb[9].mxu1 }
 0x153   : > { %v1417_v56 = vadd.f32 %v1926_v50, %v1822_v52  ;;  %v2836_v48 = vadd.f32 %v1963_v32, %v1414_v47  ;;  %v1969_v57 = vadd.f32 %v1968_v8, %v1967_v54  ;;  %v1970_v61 = vpop.f32.mrb[10].mxu1 }
 0x154   : > { %v1971_v3 = vpop.f32.mrb[11].mxu1 }
 0x155   : > { %v2838_v63 = vadd.f32 %v1966_v38, %v1417_v56  ;;  %v1972_v11 = vadd.f32 %v1971_v3, %v1970_v61 }
 0x159   : > { %v1927_v0 = vpop.f32.mrb[8].mxu0 }
 0x15a   : > { %v1928_v27 = vpop.f32.mrb[9].mxu0 }
 0x15b   : > { %v1929_v18 = vadd.f32 %v1928_v27, %v1927_v0  ;;  %v1930_v5 = vpop.f32.mrb[10].mxu0 }
 0x15c   : > { %v1931_v6 = vpop.f32.mrb[11].mxu0 }
 0x15d   : > { %v1422_v40 = vadd.f32 %v1929_v18, %v1822_v52  ;;  %v1932_v15 = vadd.f32 %v1931_v6, %v1930_v5 }
 0x15e   : > { %v1973_v12 = vpop.f32.mrb[12].mxu1 }
 0x15f   : > { %v1425_v9 = vadd.f32 %v1932_v15, %v1822_v52  ;;  %v2840_v58 = vadd.f32 %v1969_v57, %v1422_v40  ;;  %v1974_v28 = vpop.f32.mrb[13].mxu1 }
 0x160   : > { %v1975_v23 = vadd.f32 %v1974_v28, %v1973_v12  ;;  %v1976_v1 = vpop.f32.mrb[14].mxu1 }
 0x161   : > { %v2842_v7 = vadd.f32 %v1972_v11, %v1425_v9  ;;  %v1977_v14 = vpop.f32.mrb[15].mxu1 }
 0x162   : > { %v1978_v10 = vadd.f32 %v1977_v14, %v1976_v1 }
 0x165   : > { %v1933_v59 = vpop.f32.mrb[12].mxu0 }
 0x166   : > { %v1934_v22 = vpop.f32.mrb[13].mxu0  ;;  %v2035_v16 = vpop.f32.mrb[16].mxu1 }
 0x167   : > { %v1935_v37 = vadd.f32 %v1934_v22, %v1933_v59  ;;  %v1936_v30 = vpop.f32.mrb[14].mxu0  ;;  %v2036_v13 = vpop.f32.mrb[17].mxu1 }
 0x168   : > { %v1937_v51 = vpop.f32.mrb[15].mxu0  ;;  %v2037_v43 = vadd.f32 %v2036_v13, %v2035_v16  ;;  %v2038_v60 = vpop.f32.mrb[18].mxu1 }
 0x169   : > { %v1430_v2 = vadd.f32 %v1935_v37, %v1822_v52  ;;  %v1938_v62 = vadd.f32 %v1937_v51, %v1936_v30  ;;  %v2039_v4 = vpop.f32.mrb[19].mxu1 }
 0x16a   : > { %v2040_v17 = vadd.f32 %v2039_v4, %v2038_v60 }
 0x16b   : > { %v1433_v19 = vadd.f32 %v1938_v62, %v1822_v52  ;;  %v1495_v20 = vadd.f32 %v1975_v23, %v1430_v2 }
 0x16d   : > { %v1995_v53 = vpop.f32.mrb[16].mxu0  ;;  %v2844_v21 = vadd.f32 %v1978_v10, %v1433_v19 }
 0x16e   : > { %v1996_v24 = vpop.f32.mrb[17].mxu0  ;;  %v2041_v25 = vpop.f32.mrb[20].mxu1 }
 0x16f   : > { %v1997_v55 = vadd.f32 %v1996_v24, %v1995_v53  ;;  %v1998_v26 = vpop.f32.mrb[18].mxu0  ;;  %v2042_v29 = vpop.f32.mrb[21].mxu1 }
 0x170   : > { %v1999_v49 = vpop.f32.mrb[19].mxu0  ;;  %v2043_v31 = vadd.f32 %v2042_v29, %v2041_v25  ;;  %v2044_v34 = vpop.f32.mrb[22].mxu1 }
 0x171   : > { %v1536_v32 = vadd.f32 %v1997_v55, %v1471_v35  ;;  %v2000_v33 = vadd.f32 %v1999_v49, %v1998_v26  ;;  %v2045_v36 = vpop.f32.mrb[23].mxu1 }
 0x172   : > { %v2046_v38 = vadd.f32 %v2045_v36, %v2044_v34 }
 0x173   : > { %v1539_v41 = vadd.f32 %v2000_v33, %v1474_v39  ;;  %v1601_v42 = vadd.f32 %v2037_v43, %v1536_v32 }
 0x175   : > { %v2001_v44 = vpop.f32.mrb[20].mxu0  ;;  %v2846_v52 = vadd.f32 %v2040_v17, %v1539_v41 }
 0x176   : > { %v2002_v45 = vpop.f32.mrb[21].mxu0  ;;  %v2047_v46 = vpop.f32.mrb[24].mxu1 }
 0x177   : > { %v2003_v47 = vadd.f32 %v2002_v45, %v2001_v44  ;;  %v2004_v50 = vpop.f32.mrb[22].mxu0  ;;  %v2048_v54 = vpop.f32.mrb[25].mxu1 }
 0x178   : > { %v2005_v56 = vpop.f32.mrb[23].mxu0  ;;  %v2049_v8 = vadd.f32 %v2048_v54, %v2047_v46  ;;  %v2050_v57 = vpop.f32.mrb[26].mxu1 }
 0x179   : > { %v1544_v61 = vadd.f32 %v2003_v47, %v2836_v48  ;;  %v2006_v3 = vadd.f32 %v2005_v56, %v2004_v50  ;;  %v2051_v35 = vpop.f32.mrb[27].mxu1 }
 0x17a   : > { %v2052_v11 = vadd.f32 %v2051_v35, %v2050_v57 }
 0x17b   : > { %v1547_v0 = vadd.f32 %v2006_v3, %v2838_v63  ;;  %v1609_v39 = vadd.f32 %v2043_v31, %v1544_v61 }
 0x17d   : > { %v2007_v27 = vpop.f32.mrb[24].mxu0  ;;  %v1612_v18 = vadd.f32 %v2046_v38, %v1547_v0 }
 0x17e   : > { %v2008_v5 = vpop.f32.mrb[25].mxu0  ;;  %v2053_v6 = vpop.f32.mrb[28].mxu1 }
 0x17f   : > { %v2009_v40 = vadd.f32 %v2008_v5, %v2007_v27  ;;  %v2010_v15 = vpop.f32.mrb[26].mxu0  ;;  %v2054_v9 = vpop.f32.mrb[29].mxu1 }
 0x180   : > { %v2011_v12 = vpop.f32.mrb[27].mxu0  ;;  %v2055_v28 = vadd.f32 %v2054_v9, %v2053_v6  ;;  %v2056_v23 = vpop.f32.mrb[30].mxu1 }
 0x181   : > { %v1552_v1 = vadd.f32 %v2009_v40, %v2840_v58  ;;  %v2012_v48 = vadd.f32 %v2011_v12, %v2010_v15  ;;  %v2057_v14 = vpop.f32.mrb[31].mxu1 }
 0x182   : > { %v2058_v10 = vadd.f32 %v2057_v14, %v2056_v23 }
 0x183   : > { %v1555_v59 = vadd.f32 %v2012_v48, %v2842_v7  ;;  %v1617_v63 = vadd.f32 %v2049_v8, %v1552_v1 }
 0x185   : > { %v2013_v22 = vpop.f32.mrb[28].mxu0  ;;  %v1620_v16 = vadd.f32 %v2052_v11, %v1555_v59 }
 0x186   : > { %v2014_v37 = vpop.f32.mrb[29].mxu0  ;;  %v2093_v30 = vpop.f32.mrb[32].mxu1 }
 0x187   : > { %v2015_v13 = vadd.f32 %v2014_v37, %v2013_v22  ;;  %v2016_v51 = vpop.f32.mrb[30].mxu0  ;;  %v1681_v43 = vpop.f32.mrb[33].mxu1 }
 0x188   : > { %v1682_v60 = vadd.f32 %v1681_v43, %v1617_v63  ;;  %v2017_v58 = vpop.f32.mrb[31].mxu0  ;;  %v2094_v2 = vpop.f32.mrb[34].mxu1 }
 0x189   : > { %v1560_v62 = vadd.f32 %v2015_v13, %v1495_v20  ;;  %v2018_v4 = vadd.f32 %v2017_v58, %v2016_v51  ;;  %v1684_v17 = vpop.f32.mrb[35].mxu1 }
 0x18a   : > { %1700 = vst [vmem:[%s251_s15 + $0x20] sm:$0xff] %v1682_v60  ;;  %v1685_v7 = vadd.f32 %v1684_v17, %v1620_v16 }
 0x18b   : > { %v1625_v19 = vadd.f32 %v2055_v28, %v1560_v62  ;;  %v1563_v53 = vadd.f32 %v2018_v4, %v2844_v21 }
 0x18c   : > { %1701 = vst [vmem:[%s251_s15 + $0x28] sm:$0xff] %v1685_v7 }
 0x18d   : > { %v1690_v24 = vadd.f32 %v2093_v30, %v1625_v19  ;;  %v1628_v25 = vadd.f32 %v2058_v10, %v1563_v53  ;;  %v2089_v55 = vpop.f32.mrb[32].mxu0 }
 0x18e   : > { %v1674_v26 = vadd.f32 %v2089_v55, %v1609_v39  ;;  %v1665_v29 = vpop.f32.mrb[33].mxu0 }
 0x18f   : > { %1702 = vst [vmem:[%s251_s15 + $0x30] sm:$0xff] %v1690_v24  ;;  %v1693_v49 = vadd.f32 %v2094_v2, %v1628_v25  ;;  %v1666_v31 = vadd.f32 %v1665_v29, %v1601_v42  ;;  %v2090_v34 = vpop.f32.mrb[34].mxu0 }
 0x190   : > { %1698 = vst [vmem:[%s251_s15 + $0x10] sm:$0xff] %v1674_v26  ;;  %v1677_v32 = vadd.f32 %v2090_v34, %v1612_v18  ;;  %v1668_v20 = vpop.f32.mrb[35].mxu0 }
 0x191   : > { %1703 = vst [vmem:[%s251_s15 + $0x38] sm:$0xff] %v1693_v49  ;;  %1696 = vst [vmem:[%s251_s15] sm:$0xff] %v1666_v31  ;;  %v1669_v33 = vadd.f32 %v1668_v20, %v2846_v52 }
 0x192   : > { %1699 = vst [vmem:[%s251_s15 + $0x18] sm:$0xff] %v1677_v32 }
 0x193   : > { %1697 = vst [vmem:[%s251_s15 + $0x8] sm:$0xff] %v1669_v33 }
 0x194 PF: > { %s16_s21 = sadd.s32 1, %s2200_s21  }
 0x195   : > { %p13_p4 = scmp.ge.s32.totalorder %s16_s21, 4  }
 0x197   :  { %15 = sbr.rel (!%p13_p4) target bundleno = 1 (0x1), region = 74 }

// kernel: generator_forward.6
= control target key start
LH: loop header
LB: loop body
LE: loop exit
PB: predicated region body
PF: predicated region fallthrough
CT: control target
= control target key end

     0   :  { %s3491_s21 = smov 0   ;;  %s4968_s0 = inlined_call_operand.vmem [shape: f32[2,16,16,128], index: 0, kind: input, shape index: {}, may-alias: {0,1}]   ;;  %s4969_s1 = inlined_call_operand.vmem [shape: f32[2,16,16,128], index: 1, kind: input, shape index: {}, may-alias: {0,1}]   ;;  %s4970_s2 = inlined_call_operand.vmem [shape: f32[1,128], index: 2, kind: input, shape index: {}]   ;;  %s4971_s3 = inlined_call_operand.vmem [shape: f32[1,128], index: 3, kind: input, shape index: {}]   ;;  %s4972_s4 = inlined_call_operand.vmem [shape: bf16[1152,64], index: 4, kind: input, shape index: {}]   ;;  %s4973_s5 = inlined_call_operand.vmem [shape: f32[1,64], index: 5, kind: input, shape index: {}]   ;;  %s4974_s6 = inlined_call_operand.vmem [shape: f32[2,256,64], index: 6, kind: output, shape index: {}]  }
   0x1 LB: > { %s2742_s22 = sadd.s32 4294967295, %s3453_s21   ;;  %p2746_p0 = scmp.ge.s32.totalorder %s3453_s21, 1  ;;  %s3453_s21 = sphi %s3491_s21, %s16_s21  }
   0x2   : > { %p212_p1 = scmp.lt.s32.totalorder %s3453_s21, 3 }
   0x4   : > { %p213_p2 = pnand %p2746_p0, %p212_p1 }
   0x6   : > { %216 = sbr.rel (%p213_p2) target bundleno = 719 (0x2cf), region = 44 }
   0xd   : > { %v3373_v0 = vld [vmem:[%s4972_s4 + $0x40] sm:$0xff]   ;;  %v3375_v2 = vld [vmem:[%s4972_s4 + $0x48] sm:$0xff]   ;;  %v3377_v4 = vld [vmem:[%s4972_s4 + $0x50] sm:$0xff]   ;;  %v3455_v9 = vmov 0   ;;  %vm904_vm0 = vcmask 1040384   ;;  %p242_p3 = scmp.lt.s32.totalorder %s2742_s22, 1 }
   0xe   : > { %v3374_v1 = vld [vmem:[%s4972_s4] sm:$0xff]   ;;  %2828 = vmatprep.subr.bf16.mxu0 %v3373_v0  ;;  %3348 = vmatprep.subr.bf16.mxu1 %v3373_v0  ;;  %v3376_v3 = vld [vmem:[%s4972_s4 + $0x8] sm:$0xff]   ;;  %v3378_v5 = vld [vmem:[%s4972_s4 + $0x10] sm:$0xff]   ;;  %v754_v10 = vrot.slane %v3455_v9, 7  ;;  %vm905_vm1 = vsmask.f32 256 }
   0xf   : > { %2829 = vmatpush3.bf16.msra.mxu0 %v3374_v1  ;;  %3356 = vmatpush3.bf16.msra.mxu1 %v3374_v1  ;;  %v3379_v6 = vld [vmem:[%s4972_s4 + $0x58] sm:$0xff]   ;;  %v3381_v8 = vld [vmem:[%s4972_s4 + $0x60] sm:$0xff]   ;;  %v3383_v12 = vld [vmem:[%s4972_s4 + $0x68] sm:$0xff]   ;;  %vm941_vm3 = vsmask.f32 7424  ;;  %s4981_s22 = smov (!%p242_p3, %s2742_s22), 1 }
  0x10   : > { %2830 = vmatprep.subr.bf16.mxu0 %v3375_v2  ;;  %3349 = vmatprep.subr.bf16.mxu1 %v3375_v2  ;;  %v3380_v7 = vld [vmem:[%s4972_s4 + $0x18] sm:$0xff]   ;;  %v3382_v11 = vld [vmem:[%s4972_s4 + $0x20] sm:$0xff]   ;;  %v254_v14 = vld [vmem:[%s4968_s0 + $0x8] sm:$0xff]  ;;  %s2826_s17 = sshll.u32 %s4981_s22, 8 }
  0x11   : > { %v253_v13 = vld [vmem:[%s4968_s0] sm:$0xff]  ;;  %vm3538_vm2 = vmand %vm904_vm0, %vm905_vm1  ;;  %v255_v16 = vld [vmem:[%s4968_s0 + $0x10] sm:$0xff]  ;;  %v389_v51 = vmul.f32 %v254_v14, %v254_v14  ;;  %s3822_s20 = scalar_lea.vmem %s4969_s1, %s2826_s17  ;;  %s4867_s28 = scalar_lea.vmem %s4974_s6, %s2826_s17 }
  0x12   : > { %v317_v17 = vadd.f32 %v254_v14, %v253_v13  ;;  %v3547_v18 = vsel %vm3538_vm2, 0, %v754_v10  ;;  %v3551_v19 = vsel %vm3538_vm2, %v754_v10, 0  ;;  %v3384_v20 = vld [vmem:[%s4972_s4 + $0x28] sm:$0xff]   ;;  %v256_v24 = vld [vmem:[%s4968_s0 + $0x18] sm:$0xff]  ;;  %v3385_v25 = vld [vmem:[%s4972_s4 + $0x70] sm:$0xff]   ;;  %v388_v50 = vmul.f32 %v253_v13, %v253_v13 }
  0x13   : > { %2831 = vmatpush3.bf16.msra.mxu0 %v3376_v3  ;;  %3357 = vmatpush3.bf16.msra.mxu1 %v3376_v3  ;;  %4978 = vst [vmem:[#allocation2_spill] sm:$0xff] %v3547_v18  ;;  %v943_v21 = vshrl.u32 %v3547_v18, 16  ;;  %v945_v22 = vshll.u32 %v3547_v18, 16  ;;  %v950_v23 = vshll.u32 %v3551_v19, 16  ;;  %v257_v29 = vld [vmem:[%s4968_s0 + $0x20] sm:$0xff]  ;;  %v3386_v31 = vld [vmem:[%s4972_s4 + $0x30] sm:$0xff]   ;;  %v390_v55 = vmul.f32 %v255_v16, %v255_v16 }
  0x14   : > { %2832 = vmatprep.subr.bf16.mxu0 %v3377_v4  ;;  %3350 = vmatprep.subr.bf16.mxu1 %v3377_v4  ;;  %v318_v26 = vadd.f32 %v317_v17, %v255_v16  ;;  %v258_v33 = vld [vmem:[%s4968_s0 + $0x28] sm:$0xff]  ;;  %v3387_v34 = vld [vmem:[%s4972_s4 + $0x78] sm:$0xff]   ;;  %v259_v37 = vld [vmem:[%s4968_s0 + $0x30] sm:$0xff]  ;;  %v391_v58 = vmul.f32 %v256_v24, %v256_v24  ;;  %v452_v59 = vadd.f32 %v389_v51, %v388_v50 }
  0x15   : > { %v947_v27 = vrot.slane %v945_v22, 1  ;;  %v952_v28 = vrot.slane %v950_v23, 1  ;;  %v3388_v39 = vld [vmem:[%s4972_s4 + $0x38] sm:$0xff]   ;;  %v261_v42 = vld [vmem:[%s4968_s0 + $0x40] sm:$0xff]  ;;  %v262_v44 = vld [vmem:[%s4968_s0 + $0x48] sm:$0xff]  ;;  %v392_v62 = vmul.f32 %v257_v29, %v257_v29  ;;  %v393_v2 = vmul.f32 %v258_v33, %v258_v33 }
  0x16   : > { %v319_v30 = vadd.f32 %v318_v26, %v256_v24  ;;  %v260_v40 = vld [vmem:[%s4968_s0 + $0x38] sm:$0xff]  ;;  %v263_v46 = vld [vmem:[%s4968_s0 + $0x50] sm:$0xff]  ;;  %v265_v52 = vld [vmem:[%s4968_s0 + $0x60] sm:$0xff]  ;;  %v453_v63 = vadd.f32 %v452_v59, %v390_v55  ;;  %v396_v14 = vmul.f32 %v261_v42, %v261_v42 }
  0x17   : > { %2833 = vmatpush3.bf16.msra.mxu0 %v3378_v5  ;;  %3358 = vmatpush3.bf16.msra.mxu1 %v3378_v5  ;;  %v948_v32 = vor.u32 %v947_v27, %v943_v21  ;;  %v264_v48 = vld [vmem:[%s4968_s0 + $0x58] sm:$0xff]  ;;  %v266_v53 = vld [vmem:[%s4968_s0 + $0x68] sm:$0xff]  ;;  %v267_v56 = vld [vmem:[%s4968_s0 + $0x70] sm:$0xff]  ;;  %v395_v10 = vmul.f32 %v260_v40, %v260_v40  ;;  %v397_v21 = vmul.f32 %v262_v44, %v262_v44 }
  0x18   : > { %2834 = vmatprep.subr.bf16.mxu0 %v3379_v6  ;;  %3351 = vmatprep.subr.bf16.mxu1 %v3379_v6  ;;  %v320_v35 = vadd.f32 %v319_v30, %v257_v29  ;;  %v268_v60 = vld [vmem:[%s4968_s0 + $0x78] sm:$0xff]  ;;  %v269_v0 = vld [vmem:[%s4968_s0 + $0x80] sm:$0xff]  ;;  %v454_v3 = vadd.f32 %v453_v63, %v391_v58  ;;  %v270_v4 = vld [vmem:[%s4968_s0 + $0x88] sm:$0xff]  ;;  %v394_v6 = vmul.f32 %v259_v37, %v259_v37 }
  0x19   : > { %v3578_v36 = vsel %vm941_vm3, %v948_v32, %v952_v28  ;;  %v273_v17 = vld [vmem:[%s4968_s0 + $0xa0] sm:$0xff]  ;;  %v274_v23 = vld [vmem:[%s4968_s0 + $0xa8] sm:$0xff]  ;;  %v275_v27 = vld [vmem:[%s4968_s0 + $0xb0] sm:$0xff]  ;;  %v399_v29 = vmul.f32 %v264_v48, %v264_v48 }
  0x1a   : > { %1881 = vmatprep.mubr.bf16.mxu0 %v3578_v36  ;;  %v321_v38 = vadd.f32 %v320_v35, %v258_v33  ;;  %v400_v33 = vmul.f32 %v265_v52, %v265_v52  ;;  %v277_v35 = vld [vmem:[%s4968_s0 + $0xc0] sm:$0xff]  ;;  %v280_v51 = vld [vmem:[%s4968_s0 + $0xd8] sm:$0xff]  ;;  %v282_v59 = vld [vmem:[%s4968_s0 + $0xe8] sm:$0xff] }
  0x1b   : > { %2835 = vmatpush3.bf16.msra.mxu0 %v3380_v7  ;;  %3359 = vmatpush3.bf16.msra.mxu1 %v3380_v7  ;;  %v455_v7 = vadd.f32 %v454_v3, %v392_v62  ;;  %v281_v55 = vld [vmem:[%s4968_s0 + $0xe0] sm:$0xff] }
  0x1c   : > { %2836 = vmatprep.subr.bf16.mxu0 %v3381_v8  ;;  %3352 = vmatprep.subr.bf16.mxu1 %v3381_v8  ;;  %v322_v41 = vadd.f32 %v321_v38, %v259_v37  ;;  %v271_v8 = vld [vmem:[%s4968_s0 + $0x90] sm:$0xff]  ;;  %v401_v38 = vmul.f32 %v266_v53, %v266_v53 }
  0x1e   : > { %v323_v43 = vadd.f32 %v322_v41, %v260_v40  ;;  %v278_v40 = vld [vmem:[%s4968_s0 + $0xc8] sm:$0xff] }
  0x1f   : > { %2837 = vmatpush3.bf16.msra.mxu0 %v3382_v11  ;;  %3360 = vmatpush3.bf16.msra.mxu1 %v3382_v11  ;;  %v456_v11 = vadd.f32 %v455_v7, %v393_v2  ;;  %v408_v2 = vmul.f32 %v273_v17, %v273_v17 }
  0x20   : > { %2838 = vmatprep.subr.bf16.mxu0 %v3383_v12  ;;  %3353 = vmatprep.subr.bf16.mxu1 %v3383_v12  ;;  %v324_v45 = vadd.f32 %v323_v43, %v261_v42  ;;  %v272_v12 = vld [vmem:[%s4968_s0 + $0x98] sm:$0xff]  ;;  %v402_v42 = vmul.f32 %v267_v56, %v267_v56 }
  0x21   : > { %v457_v16 = vadd.f32 %v456_v11, %v394_v6  ;;  %v407_v62 = vmul.f32 %v272_v12, %v272_v12  ;;  %v409_v6 = vmul.f32 %v274_v23, %v274_v23  ;;  %v286_v11 = vld [vmem:[%s4968_s0 + $0x108] sm:$0xff] }
  0x22   : > { %v325_v47 = vadd.f32 %v324_v45, %v262_v44  ;;  %v279_v44 = vld [vmem:[%s4968_s0 + $0xd0] sm:$0xff] }
  0x23   : > { %2839 = vmatpush3.bf16.msra.mxu0 %v3384_v20  ;;  %3361 = vmatpush3.bf16.msra.mxu1 %v3384_v20  ;;  %v458_v22 = vadd.f32 %v457_v16, %v395_v10  ;;  %v287_v16 = vld [vmem:[%s4968_s0 + $0x110] sm:$0xff] }
  0x24   : > { %2840 = vmatprep.subr.bf16.mxu0 %v3385_v25  ;;  %3354 = vmatprep.subr.bf16.mxu1 %v3385_v25  ;;  %v326_v49 = vadd.f32 %v325_v47, %v263_v46  ;;  %v398_v25 = vmul.f32 %v263_v46, %v263_v46  ;;  %v403_v46 = vmul.f32 %v268_v60, %v268_v60 }
  0x25   : > { %v459_v26 = vadd.f32 %v458_v22, %v396_v14  ;;  %v288_v22 = vld [vmem:[%s4968_s0 + $0x118] sm:$0xff] }
  0x26   : > { %v327_v54 = vadd.f32 %v326_v49, %v264_v48  ;;  %v404_v49 = vmul.f32 %v269_v0, %v269_v0 }
  0x27   : > { %2841 = vmatpush3.bf16.msra.mxu0 %v3386_v31  ;;  %3362 = vmatpush3.bf16.msra.mxu1 %v3386_v31  ;;  %v460_v30 = vadd.f32 %v459_v26, %v397_v21  ;;  %v276_v31 = vld [vmem:[%s4968_s0 + $0xb8] sm:$0xff]  ;;  %v289_v26 = vld [vmem:[%s4968_s0 + $0x120] sm:$0xff] }
  0x28   : > { %2842 = vmatprep.subr.bf16.mxu0 %v3387_v34  ;;  %3355 = vmatprep.subr.bf16.mxu1 %v3387_v34  ;;  %v328_v57 = vadd.f32 %v327_v54, %v265_v52 }
  0x29   : > { %v461_v34 = vadd.f32 %v460_v30, %v398_v25  ;;  %v290_v30 = vld [vmem:[%s4968_s0 + $0x128] sm:$0xff] }
  0x2a   : > { %v329_v61 = vadd.f32 %v328_v57, %v266_v53  ;;  %v405_v53 = vmul.f32 %v270_v4, %v270_v4  ;;  %v406_v57 = vmul.f32 %v271_v8, %v271_v8 }
  0x2b   : > { %2843 = vmatpush3.bf16.msra.mxu0 %v3388_v39  ;;  %3363 = vmatpush3.bf16.msra.mxu1 %v3388_v39  ;;  %v462_v39 = vadd.f32 %v461_v34, %v399_v29  ;;  %v291_v34 = vld [vmem:[%s4968_s0 + $0x130] sm:$0xff] }
  0x2c   : > { %v330_v1 = vadd.f32 %v329_v61, %v267_v56 }
  0x2d   : > { %v463_v43 = vadd.f32 %v462_v39, %v400_v33  ;;  %v292_v39 = vld [vmem:[%s4968_s0 + $0x138] sm:$0xff] }
  0x2e   : > { %1882 = vmatmul.mubr.bf16.vlgmr.msra.gmra.mrb[0].mxu0 %v3547_v18  ;;  %v331_v5 = vadd.f32 %v330_v1, %v268_v60  ;;  %v283_v60 = vld [vmem:[%s4968_s0 + $0xf0] sm:$0xff] }
  0x2f   : > { %v464_v47 = vadd.f32 %v463_v43, %v401_v38  ;;  %v293_v43 = vld [vmem:[%s4968_s0 + $0x140] sm:$0xff] }
  0x30   : > { %v332_v9 = vadd.f32 %v331_v5, %v269_v0  ;;  %v284_v0 = vld [vmem:[%s4968_s0 + $0xf8] sm:$0xff] }
  0x31   : > { %v465_v50 = vadd.f32 %v464_v47, %v402_v42  ;;  %v294_v47 = vld [vmem:[%s4968_s0 + $0x148] sm:$0xff] }
  0x32   : > { %v333_v13 = vadd.f32 %v332_v9, %v270_v4  ;;  %v285_v4 = vld [vmem:[%s4968_s0 + $0x100] sm:$0xff]  ;;  %v410_v9 = vmul.f32 %v275_v27, %v275_v27 }
  0x33   : > { %v466_v54 = vadd.f32 %v465_v50, %v403_v46 }
  0x34   : > { %v334_v20 = vadd.f32 %v333_v13, %v271_v8  ;;  %v411_v13 = vmul.f32 %v276_v31, %v276_v31 }
  0x35   : > { %v467_v58 = vadd.f32 %v466_v54, %v404_v49  ;;  %v419_v49 = vmul.f32 %v284_v0, %v284_v0  ;;  %v420_v54 = vmul.f32 %v285_v4, %v285_v4 }
  0x36   : > { %v335_v24 = vadd.f32 %v334_v20, %v272_v12  ;;  %v412_v20 = vmul.f32 %v277_v35, %v277_v35 }
  0x37   : > { %v468_v63 = vadd.f32 %v467_v58, %v405_v53  ;;  %v421_v58 = vmul.f32 %v286_v11, %v286_v11 }
  0x38   : > { %v336_v28 = vadd.f32 %v335_v24, %v273_v17  ;;  %v413_v24 = vmul.f32 %v278_v40, %v278_v40 }
  0x39   : > { %v469_v3 = vadd.f32 %v468_v63, %v406_v57  ;;  %v422_v63 = vmul.f32 %v287_v16, %v287_v16 }
  0x3a   : > { %v337_v32 = vadd.f32 %v336_v28, %v274_v23  ;;  %v414_v28 = vmul.f32 %v279_v44, %v279_v44 }
  0x3b   : > { %v470_v7 = vadd.f32 %v469_v3, %v407_v62 }
  0x3c   : > { %v338_v37 = vadd.f32 %v337_v32, %v275_v27  ;;  %v415_v32 = vmul.f32 %v280_v51, %v280_v51 }
  0x3d   : > { %v471_v10 = vadd.f32 %v470_v7, %v408_v2  ;;  %v3394_v2 = vld [vmem:[%s4972_s4 + $0x100] sm:$0xff]  }
  0x3e   : > { %v339_v41 = vadd.f32 %v338_v37, %v276_v31  ;;  %v416_v37 = vmul.f32 %v281_v55, %v281_v55 }
  0x3f   : > { %v472_v14 = vadd.f32 %v471_v10, %v409_v6  ;;  %v299_v6 = vld [vmem:[%s4968_s0 + $0x170] sm:$0xff]  ;;  %v300_v10 = vld [vmem:[%s4968_s0 + $0x178] sm:$0xff] }
  0x40   : > { %v340_v45 = vadd.f32 %v339_v41, %v277_v35  ;;  %v417_v41 = vmul.f32 %v282_v59, %v282_v59 }
  0x41   : > { %v473_v21 = vadd.f32 %v472_v14, %v410_v9  ;;  %v301_v14 = vld [vmem:[%s4968_s0 + $0x180] sm:$0xff] }
  0x42   : > { %v341_v48 = vadd.f32 %v340_v45, %v278_v40  ;;  %v418_v45 = vmul.f32 %v283_v60, %v283_v60 }
  0x43   : > { %v474_v25 = vadd.f32 %v473_v21, %v411_v13  ;;  %v302_v21 = vld [vmem:[%s4968_s0 + $0x188] sm:$0xff] }
  0x44   : > { %v342_v52 = vadd.f32 %v341_v48, %v279_v44 }
  0x45   : > { %v475_v29 = vadd.f32 %v474_v25, %v412_v20  ;;  %v303_v25 = vld [vmem:[%s4968_s0 + $0x190] sm:$0xff] }
  0x46   : > { %v343_v56 = vadd.f32 %v342_v52, %v280_v51  ;;  %v3389_v51 = vld [vmem:[%s4972_s4 + $0xc0] sm:$0xff]   ;;  %v295_v52 = vld [vmem:[%s4968_s0 + $0x150] sm:$0xff] }
  0x47   : > { %v476_v33 = vadd.f32 %v475_v29, %v413_v24  ;;  %2940 = vmatprep.subr.bf16.mxu1 %v3389_v51  ;;  %v304_v29 = vld [vmem:[%s4968_s0 + $0x198] sm:$0xff] }
  0x48   : > { %v344_v61 = vadd.f32 %v343_v56, %v281_v55  ;;  %v296_v56 = vld [vmem:[%s4968_s0 + $0x158] sm:$0xff] }
  0x49   : > { %v477_v38 = vadd.f32 %v476_v33, %v414_v28  ;;  %v305_v33 = vld [vmem:[%s4968_s0 + $0x1a0] sm:$0xff] }
  0x4a   : > { %v345_v1 = vadd.f32 %v344_v61, %v282_v59  ;;  %v297_v61 = vld [vmem:[%s4968_s0 + $0x160] sm:$0xff] }
  0x4b   : > { %v478_v42 = vadd.f32 %v477_v38, %v415_v32  ;;  %v306_v38 = vld [vmem:[%s4968_s0 + $0x1a8] sm:$0xff] }
  0x4c   : > { %v346_v5 = vadd.f32 %v345_v1, %v283_v60  ;;  %v3392_v60 = vld [vmem:[%s4972_s4 + $0x140] sm:$0xff]   ;;  %v298_v1 = vld [vmem:[%s4968_s0 + $0x168] sm:$0xff] }
  0x4d   : > { %v479_v46 = vadd.f32 %v478_v42, %v416_v37  ;;  %3052 = vmatprep.subr.bf16.mxu0 %v3392_v60  ;;  %v311_v60 = vld [vmem:[%s4968_s0 + $0x1d0] sm:$0xff] }
  0x4e   : > { %v347_v8 = vadd.f32 %v346_v5, %v284_v0  ;;  %3053 = vmatpush3.bf16.msra.mxu0 %v3394_v2  ;;  %v3410_v2 = vld [vmem:[%s4972_s4 + $0x110] sm:$0xff]  }
  0x4f   : > { %v480_v50 = vadd.f32 %v479_v46, %v417_v41  ;;  %v431_v41 = vmul.f32 %v296_v56, %v296_v56  ;;  %v432_v46 = vmul.f32 %v297_v61, %v297_v61 }
  0x50   : > { %v348_v12 = vadd.f32 %v347_v8, %v285_v4  ;;  %v423_v4 = vmul.f32 %v288_v22, %v288_v22  ;;  %v424_v8 = vmul.f32 %v289_v26, %v289_v26 }
  0x51   : > { %v481_v55 = vadd.f32 %v480_v50, %v418_v45  ;;  %v433_v50 = vmul.f32 %v298_v1, %v298_v1 }
  0x52   : > { %v349_v17 = vadd.f32 %v348_v12, %v286_v11  ;;  %v425_v12 = vmul.f32 %v290_v30, %v290_v30 }
  0x53   : > { %v482_v59 = vadd.f32 %v481_v55, %v419_v49 }
  0x54   : > { %v350_v23 = vadd.f32 %v349_v17, %v287_v16  ;;  %v426_v17 = vmul.f32 %v291_v34, %v291_v34 }
  0x55   : > { %v483_v0 = vadd.f32 %v482_v59, %v420_v54  ;;  %v434_v54 = vmul.f32 %v299_v6, %v299_v6 }
  0x56   : > { %v351_v27 = vadd.f32 %v350_v23, %v288_v22  ;;  %v427_v23 = vmul.f32 %v292_v39, %v292_v39 }
  0x57   : > { %v484_v5 = vadd.f32 %v483_v0, %v421_v58  ;;  %v435_v58 = vmul.f32 %v300_v10, %v300_v10  ;;  %v3408_v0 = vld [vmem:[%s4972_s4 + $0x150] sm:$0xff]  }
  0x58   : > { %v352_v31 = vadd.f32 %v351_v27, %v289_v26  ;;  %v428_v27 = vmul.f32 %v293_v43, %v293_v43 }
  0x59   : > { %v485_v9 = vadd.f32 %v484_v5, %v422_v63 }
  0x5a   : > { %v353_v35 = vadd.f32 %v352_v31, %v290_v30  ;;  %v429_v31 = vmul.f32 %v294_v47, %v294_v47 }
  0x5b   : > { %v486_v13 = vadd.f32 %v485_v9, %v423_v4  ;;  %v437_v4 = vmul.f32 %v302_v21, %v302_v21 }
  0x5c   : > { %v354_v40 = vadd.f32 %v353_v35, %v291_v34  ;;  %v430_v35 = vmul.f32 %v295_v52, %v295_v52 }
  0x5d   : > { %v487_v20 = vadd.f32 %v486_v13, %v424_v8  ;;  %v438_v8 = vmul.f32 %v303_v25, %v303_v25 }
  0x5e   : > { %v355_v44 = vadd.f32 %v354_v40, %v292_v39  ;;  %v3400_v39 = vld [vmem:[%s4972_s4 + $0x148] sm:$0xff]  }
  0x5f   : > { %v488_v24 = vadd.f32 %v487_v20, %v425_v12  ;;  %3054 = vmatprep.subr.bf16.mxu0 %v3400_v39  ;;  %v439_v12 = vmul.f32 %v304_v29, %v304_v29 }
  0x60   : > { %v356_v48 = vadd.f32 %v355_v44, %v293_v43  ;;  %v3402_v43 = vld [vmem:[%s4972_s4 + $0x108] sm:$0xff]   ;;  %v307_v44 = vld [vmem:[%s4968_s0 + $0x1b0] sm:$0xff] }
  0x61   : > { %v489_v28 = vadd.f32 %v488_v24, %v426_v17  ;;  %3055 = vmatpush3.bf16.msra.mxu0 %v3402_v43  ;;  %v440_v17 = vmul.f32 %v305_v33, %v305_v33  ;;  %v316_v24 = vld [vmem:[%s4968_s0 + $0x1f8] sm:$0xff] }
  0x62   : > { %v357_v53 = vadd.f32 %v356_v48, %v294_v47  ;;  %v308_v48 = vld [vmem:[%s4968_s0 + $0x1b8] sm:$0xff]  ;;  %3056 = vmatprep.subr.bf16.mxu0 %v3408_v0 }
  0x63   : > { %v490_v32 = vadd.f32 %v489_v28, %v427_v23 }
  0x64   : > { %v358_v57 = vadd.f32 %v357_v53, %v295_v52  ;;  %v309_v52 = vld [vmem:[%s4968_s0 + $0x1c0] sm:$0xff] }
  0x65   : > { %v491_v37 = vadd.f32 %v490_v32, %v428_v27  ;;  %3057 = vmatpush3.bf16.msra.mxu0 %v3410_v2  ;;  %v3413_v27 = vld [vmem:[%s4972_s4 + $0x158] sm:$0xff]  }
  0x66   : > { %v359_v62 = vadd.f32 %v358_v57, %v296_v56  ;;  %v310_v56 = vld [vmem:[%s4968_s0 + $0x1c8] sm:$0xff]  ;;  %3058 = vmatprep.subr.bf16.mxu0 %v3413_v27 }
  0x67   : > { %v492_v42 = vadd.f32 %v491_v37, %v429_v31  ;;  %v444_v31 = vmul.f32 %v309_v52, %v309_v52 }
  0x68   : > { %v360_v3 = vadd.f32 %v359_v62, %v297_v61  ;;  %v436_v62 = vmul.f32 %v301_v14, %v301_v14 }
  0x69   : > { %v493_v47 = vadd.f32 %v492_v42, %v430_v35  ;;  %v445_v35 = vmul.f32 %v310_v56, %v310_v56 }
  0x6a   : > { %v361_v7 = vadd.f32 %v360_v3, %v298_v1  ;;  %v312_v1 = vld [vmem:[%s4968_s0 + $0x1d8] sm:$0xff] }
  0x6b   : > { %v494_v51 = vadd.f32 %v493_v47, %v431_v41  ;;  %v447_v41 = vmul.f32 %v312_v1, %v312_v1 }
  0x6c   : > { %v362_v11 = vadd.f32 %v361_v7, %v299_v6  ;;  %v313_v6 = vld [vmem:[%s4968_s0 + $0x1e0] sm:$0xff] }
  0x6d   : > { %v495_v55 = vadd.f32 %v494_v51, %v432_v46  ;;  %v448_v43 = vmul.f32 %v313_v6, %v313_v6  ;;  %v3418_v46 = vld [vmem:[%s4972_s4 + $0x120] sm:$0xff]  }
  0x6e   : > { %v363_v16 = vadd.f32 %v362_v11, %v300_v10  ;;  %v314_v10 = vld [vmem:[%s4968_s0 + $0x1e8] sm:$0xff] }
  0x6f   : > { %v496_v59 = vadd.f32 %v495_v55, %v433_v50 }
  0x70   : > { %v364_v22 = vadd.f32 %v363_v16, %v301_v14  ;;  %v315_v14 = vld [vmem:[%s4968_s0 + $0x1f0] sm:$0xff] }
  0x71   : > { %v497_v63 = vadd.f32 %v496_v59, %v434_v54  ;;  %v450_v50 = vmul.f32 %v315_v14, %v315_v14 }
  0x72   : > { %v365_v26 = vadd.f32 %v364_v22, %v302_v21  ;;  %v441_v22 = vmul.f32 %v306_v38, %v306_v38 }
  0x73   : > { %v498_v5 = vadd.f32 %v497_v63, %v435_v58  ;;  %v3421_v63 = vld [vmem:[%s4972_s4 + $0x128] sm:$0xff]  }
  0x74   : > { %v366_v30 = vadd.f32 %v365_v26, %v303_v25  ;;  %v442_v25 = vmul.f32 %v307_v44, %v307_v44 }
  0x75   : > { %v499_v9 = vadd.f32 %v498_v5, %v436_v62 }
  0x76   : > { %v367_v34 = vadd.f32 %v366_v30, %v304_v29  ;;  %v443_v29 = vmul.f32 %v308_v48, %v308_v48 }
  0x77   : > { %v500_v13 = vadd.f32 %v499_v9, %v437_v4 }
  0x78   : > { %v368_v40 = vadd.f32 %v367_v34, %v305_v33  ;;  %v3414_v33 = vld [vmem:[%s4972_s4 + $0x118] sm:$0xff]  }
  0x79   : > { %v501_v20 = vadd.f32 %v500_v13, %v438_v8  ;;  %3059 = vmatpush3.bf16.msra.mxu0 %v3414_v33  ;;  %v536_v33 = vld [vmem:[%s3822_s20 + $0x28] sm:$0xff] }
  0x7a   : > { %v369_v45 = vadd.f32 %v368_v40, %v306_v38  ;;  %v446_v38 = vmul.f32 %v311_v60, %v311_v60 }
  0x7b   : > { %v502_v23 = vadd.f32 %v501_v20, %v439_v12  ;;  %v3428_v12 = vld [vmem:[%s4972_s4 + $0x138] sm:$0xff]  }
  0x7c   : > { %v370_v49 = vadd.f32 %v369_v45, %v307_v44  ;;  %v3417_v45 = vld [vmem:[%s4972_s4 + $0x160] sm:$0xff]  }
  0x7d   : > { %v503_v26 = vadd.f32 %v502_v23, %v440_v17  ;;  %3060 = vmatprep.subr.bf16.mxu0 %v3417_v45  ;;  %v532_v23 = vld [vmem:[%s3822_s20 + $0x8] sm:$0xff] }
  0x7e   : > { %v371_v53 = vadd.f32 %v370_v49, %v308_v48  ;;  %v449_v48 = vmul.f32 %v314_v10, %v314_v10  ;;  %3061 = vmatpush3.bf16.msra.mxu0 %v3418_v46 }
  0x7f   : > { %v504_v30 = vadd.f32 %v503_v26, %v441_v22  ;;  %v531_v22 = vld [vmem:[%s3822_s20] sm:$0xff]  ;;  %v533_v26 = vld [vmem:[%s3822_s20 + $0x10] sm:$0xff] }
  0x80   : > { %v372_v57 = vadd.f32 %v371_v53, %v309_v52  ;;  %v451_v53 = vmul.f32 %v316_v24, %v316_v24 }
  0x81   : > { %v505_v32 = vadd.f32 %v504_v30, %v442_v25  ;;  %v554_v25 = vld [vmem:[%s3822_s20 + $0xb8] sm:$0xff]  ;;  %v555_v30 = vld [vmem:[%s3822_s20 + $0xc0] sm:$0xff] }
  0x82   : > { %v373_v61 = vadd.f32 %v372_v57, %v310_v56  ;;  %v3419_v56 = vld [vmem:[%s4972_s4 + $0x168] sm:$0xff]  }
  0x83   : > { %v506_v37 = vadd.f32 %v505_v32, %v443_v29  ;;  %3062 = vmatprep.subr.bf16.mxu0 %v3419_v56  ;;  %v534_v29 = vld [vmem:[%s3822_s20 + $0x18] sm:$0xff]  ;;  %v535_v32 = vld [vmem:[%s3822_s20 + $0x20] sm:$0xff] }
  0x84   : > { %v374_v3 = vadd.f32 %v373_v61, %v311_v60  ;;  %3063 = vmatpush3.bf16.msra.mxu0 %v3421_v63 }
  0x85   : > { %v507_v39 = vadd.f32 %v506_v37, %v444_v31  ;;  %v556_v31 = vld [vmem:[%s3822_s20 + $0xc8] sm:$0xff] }
  0x86   : > { %v375_v7 = vadd.f32 %v374_v3, %v312_v1 }
  0x87   : > { %v508_v42 = vadd.f32 %v507_v39, %v445_v35 }
  0x88   : > { %v376_v11 = vadd.f32 %v375_v7, %v313_v6  ;;  %v3423_v6 = vld [vmem:[%s4972_s4 + $0x170] sm:$0xff]  }
  0x89   : > { %v509_v44 = vadd.f32 %v508_v42, %v446_v38  ;;  %v3424_v7 = vld [vmem:[%s4972_s4 + $0x130] sm:$0xff]   ;;  %3064 = vmatprep.subr.bf16.mxu0 %v3423_v6  ;;  %v538_v42 = vld [vmem:[%s3822_s20 + $0x38] sm:$0xff] }
  0x8a   : > { %v377_v16 = vadd.f32 %v376_v11, %v314_v10  ;;  %3065 = vmatpush3.bf16.msra.mxu0 %v3424_v7  ;;  %v564_v10 = vlaneseq  ;;  %v3427_v11 = vld [vmem:[%s4972_s4 + $0x178] sm:$0xff]  }
  0x8b   : > { %v510_v49 = vadd.f32 %v509_v44, %v447_v41  ;;  %3066 = vmatprep.subr.bf16.mxu0 %v3427_v11  ;;  %v537_v41 = vld [vmem:[%s3822_s20 + $0x30] sm:$0xff] }
  0x8c   : > { %v378_v21 = vadd.f32 %v377_v16, %v315_v14  ;;  %v565_v13 = vshrl.u32 %v564_v10, 7  ;;  %v524_v14 = vld [vmem:[%s4970_s2] sm:$0x1] }
  0x8d   : > { %v511_v51 = vadd.f32 %v510_v49, %v448_v43 }
  0x8e   : > { %v379_v28 = vadd.f32 %v378_v21, %v316_v24  ;;  %3067 = vmatpush3.bf16.msra.mxu0 %v3428_v12  ;;  %v566_v16 = vsub.s32 0, %v565_v13  ;;  %v528_v21 = vld [vmem:[%s4971_s3] sm:$0x1]  ;;  %v553_v24 = vld [vmem:[%s3822_s20 + $0xb0] sm:$0xff] }
  0x8f   : > { %v512_v54 = vadd.f32 %v511_v51, %v449_v48 }
  0x90   : > { %v380_v34 = vrot.slane %v379_v28, 4 }
  0x91   : > { %v513_v55 = vadd.f32 %v512_v54, %v450_v50 }
  0x92   : > { %v381_v40 = vadd.f32 %v380_v34, %v379_v28  ;;  %v557_v34 = vld [vmem:[%s3822_s20 + $0xd0] sm:$0xff] }
  0x93   : > { %v514_v58 = vadd.f32 %v513_v55, %v451_v53  ;;  %v3871_v55 = vld [vmem:[%s4972_s4 + $0x200] sm:$0xff]  }
  0x94   : > { %v382_v47 = vrot.slane %v381_v40, 2  ;;  %3300 = vmatprep.subr.bf16.mxu0 %v3871_v55 }
  0x95   : > { %v515_v59 = vrot.slane %v514_v58, 4 }
  0x96   : > { %v383_v52 = vadd.f32 %v382_v47, %v381_v40  ;;  %v558_v40 = vld [vmem:[%s3822_s20 + $0xd8] sm:$0xff] }
  0x97   : > { %v516_v61 = vadd.f32 %v515_v59, %v514_v58 }
  0x98   : > { %v384_v57 = vrot.slane %v383_v52, 1 }
  0x99   : > { %v517_v62 = vrot.slane %v516_v61, 2 }
  0x9a   : > { %v385_v60 = vadd.f32 %v384_v57, %v383_v52 }
  0x9b   : > { %v518_v1 = vadd.f32 %v517_v62, %v516_v61 }
  0x9c   : > { %v387_v0 = vmul.f32 0.001953125, %v385_v60 }
  0x9d   : > { %v519_v2 = vrot.slane %v518_v1, 1 }
  0x9e   : > { %v522_v4 = vmul.f32 %v387_v0, %v387_v0 }
  0x9f   : > { %v520_v3 = vadd.f32 %v519_v2, %v518_v1 }
  0xa1   : > { %v521_v5 = vmul.f32 0.001953125, %v520_v3 }
  0xa3   : > { %v523_v8 = vsub.f32 %v521_v5, %v522_v4 }
  0xa5   : > { %v525_v9 = vadd.f32 1e-05, %v523_v8 }
  0xa7   : > { %3445 = vrsqrt.f32 %v525_v9 }
  0xb1   : > { %v3446_v17 = vpop.eup %3445 }
  0xb2   : > { %v527_v20 = vmul.f32 %v3446_v17, %v524_v14 }
  0xb4   : > { %v529_v27 = vmul.f32 %v527_v20, %v387_v0  ;;  %v3835_v28 = vrot.slane %v527_v20, %v566_v16 }
  0xb6   : > { %v530_v35 = vsub.f32 %v528_v21, %v529_v27  ;;  %v569_v37 = vmul.f32 %v3835_v28, %v531_v22  ;;  %v570_v38 = vmul.f32 %v3835_v28, %v532_v23  ;;  %v591_v39 = vmul.f32 %v3835_v28, %v553_v24 }
  0xb7   : > { %v592_v43 = vmul.f32 %v3835_v28, %v554_v25  ;;  %v571_v44 = vmul.f32 %v3835_v28, %v533_v26  ;;  %v572_v45 = vmul.f32 %v3835_v28, %v534_v29  ;;  %v593_v46 = vmul.f32 %v3835_v28, %v555_v30 }
  0xb8   : > { %v3853_v47 = vrot.slane %v530_v35, %v566_v16  ;;  %v594_v48 = vmul.f32 %v3835_v28, %v556_v31  ;;  %v573_v49 = vmul.f32 %v3835_v28, %v535_v32  ;;  %v574_v50 = vmul.f32 %v3835_v28, %v536_v33 }
  0xb9   : > { %v595_v51 = vmul.f32 %v3835_v28, %v557_v34  ;;  %v3860_v52 = vmul.f32 %v3835_v28, %v558_v40  ;;  %v3863_v53 = vmul.f32 %v3835_v28, %v537_v41  ;;  %v3866_v54 = vmul.f32 %v3835_v28, %v538_v42 }
  0xba   : > { %v607_v56 = vadd.f32 %v3853_v47, %v569_v37  ;;  %v608_v57 = vadd.f32 %v3853_v47, %v570_v38  ;;  %v629_v58 = vadd.f32 %v3853_v47, %v591_v39  ;;  %v630_v59 = vadd.f32 %v3853_v47, %v592_v43 }
  0xbb   : > { %v609_v60 = vadd.f32 %v3853_v47, %v571_v44  ;;  %v610_v61 = vadd.f32 %v3853_v47, %v572_v45  ;;  %v631_v62 = vadd.f32 %v3853_v47, %v593_v46  ;;  %v632_v63 = vadd.f32 %v3853_v47, %v594_v48 }
  0xbc   : > { %vm639_vm4 = vcmp.gt.f32.partialorder %v607_v56, 0.0  ;;  %vm640_vm5 = vcmp.gt.f32.partialorder %v608_v57, 0.0  ;;  %v671_v0 = vmul.f32 0.2, %v607_v56  ;;  %v672_v1 = vmul.f32 0.2, %v608_v57 }
  0xbd   : > { %vm661_vm6 = vcmp.gt.f32.partialorder %v629_v58, 0.0  ;;  %vm662_vm7 = vcmp.gt.f32.partialorder %v630_v59, 0.0  ;;  %v693_v2 = vmul.f32 0.2, %v629_v58  ;;  %v694_v3 = vmul.f32 0.2, %v630_v59 }
  0xbe   : > { %v703_v4 = vsel %vm639_vm4, %v607_v56, %v671_v0  ;;  %v704_v5 = vsel %vm640_vm5, %v608_v57, %v672_v1  ;;  %vm641_vm8 = vcmp.gt.f32.partialorder %v609_v60, 0.0  ;;  %vm642_vm9 = vcmp.gt.f32.partialorder %v610_v61, 0.0 }
  0xbf   : > { %v735_v6 = vpack.c.bf16 %v704_v5, %v703_v4  ;;  %v725_v7 = vsel %vm661_vm6, %v629_v58, %v693_v2  ;;  %v726_v8 = vsel %vm662_vm7, %v630_v59, %v694_v3  ;;  %v673_v9 = vmul.f32 0.2, %v609_v60 }
  0xc0   : > { %v746_v10 = vpack.c.bf16 %v726_v8, %v725_v7  ;;  %v674_v11 = vmul.f32 0.2, %v610_v61  ;;  %vm663_vm10 = vcmp.gt.f32.partialorder %v631_v62, 0.0  ;;  %vm664_vm11 = vcmp.gt.f32.partialorder %v632_v63, 0.0 }
  0xc1   : > { %v759_v12 = vshrl.u32 %v735_v6, 16  ;;  %v762_v13 = vshll.u32 %v735_v6, 16  ;;  %v705_v14 = vsel %vm641_vm8, %v609_v60, %v673_v9  ;;  %v695_v16 = vmul.f32 0.2, %v631_v62  ;;  %v3390_v9 = vld [vmem:[%s4972_s4 + $0x80] sm:$0xff]  }
  0xc2   : > { %v836_v17 = vshrl.u32 %v746_v10, 16  ;;  %v839_v20 = vshll.u32 %v746_v10, 16  ;;  %v706_v21 = vsel %vm642_vm9, %v610_v61, %v674_v11  ;;  %v696_v22 = vmul.f32 0.2, %v632_v63 }
  0xc3   : > { %v761_v23 = vrot.slane %v759_v12, 7  ;;  %v736_v24 = vpack.c.bf16 %v706_v21, %v705_v14  ;;  %v727_v25 = vsel %vm663_vm10, %v631_v62, %v695_v16  ;;  %v611_v26 = vadd.f32 %v3853_v47, %v573_v49  ;;  %v3391_v14 = vld [vmem:[%s4972_s4 + $0xc8] sm:$0xff]  }
  0xc4   : > { %v838_v27 = vrot.slane %v836_v17, 7  ;;  %v728_v29 = vsel %vm664_vm11, %v632_v63, %v696_v22  ;;  %v612_v30 = vadd.f32 %v3853_v47, %v574_v50  ;;  %v3885_v31 = vadd.f32 %v3853_v47, %v595_v51 }
  0xc5   : > { %v764_v32 = vor.u32 %v762_v13, %v761_v23  ;;  %v3889_v33 = vsel %vm3538_vm2, %v761_v23, 0  ;;  %v766_v34 = vshrl.u32 %v736_v24, 16  ;;  %v769_v35 = vshll.u32 %v736_v24, 16 }
  0xc6   : > { %v962_v37 = vshll.u32 %v3889_v33, 16  ;;  %v841_v38 = vor.u32 %v839_v20, %v838_v27  ;;  %v3894_v39 = vsel %vm3538_vm2, %v838_v27, 0  ;;  %v747_v40 = vpack.c.bf16 %v728_v29, %v727_v25  ;;  %v559_v29 = vld [vmem:[%s3822_s20 + $0xe0] sm:$0xff] }
  0xc7   : > { %v3898_v41 = vsel %vm3538_vm2, 0, %v764_v32  ;;  %v1094_v42 = vshll.u32 %v3894_v39, 16  ;;  %v768_v43 = vrot.slane %v766_v34, 7  ;;  %vm643_vm12 = vcmp.gt.f32.partialorder %v611_v26, 0.0  ;;  %v3393_v32 = vld [vmem:[%s4972_s4 + $0x88] sm:$0xff]  }
  0xc8   : > { %v955_v44 = vshrl.u32 %v3898_v41, 16  ;;  %v957_v45 = vshll.u32 %v3898_v41, 16  ;;  %v964_v46 = vrot.slane %v962_v37, 1  ;;  %v3905_v48 = vsel %vm3538_vm2, 0, %v841_v38  ;;  %v3395_v38 = vld [vmem:[%s4972_s4 + $0xd0] sm:$0xff]  }
  0xc9   : > { %v1087_v49 = vshrl.u32 %v3905_v48, 16  ;;  %v1089_v50 = vshll.u32 %v3905_v48, 16  ;;  %v1096_v51 = vrot.slane %v1094_v42, 1  ;;  %v771_v56 = vor.u32 %v769_v35, %v768_v43 }
  0xca   : > { %v959_v57 = vrot.slane %v957_v45, 1  ;;  %v3911_v58 = vsel %vm3538_vm2, %v768_v43, 0  ;;  %v843_v59 = vshrl.u32 %v747_v40, 16  ;;  %v846_v60 = vshll.u32 %v747_v40, 16 }
  0xcb   : > { %v1091_v61 = vrot.slane %v1089_v50, 1  ;;  %v3915_v62 = vsel %vm3538_vm2, 0, %v771_v56  ;;  %v974_v63 = vshll.u32 %v3911_v58, 16  ;;  %vm644_vm13 = vcmp.gt.f32.partialorder %v612_v30, 0.0 }
  0xcc   : > { %v960_v0 = vor.u32 %v959_v57, %v955_v44  ;;  %v967_v1 = vshrl.u32 %v3915_v62, 16  ;;  %v969_v2 = vshll.u32 %v3915_v62, 16  ;;  %v845_v3 = vrot.slane %v843_v59, 7 }
  0xcd   : > { %v1092_v4 = vor.u32 %v1091_v61, %v1087_v49  ;;  %v976_v5 = vrot.slane %v974_v63, 1  ;;  %v675_v6 = vmul.f32 0.2, %v611_v26  ;;  %v676_v7 = vmul.f32 0.2, %v612_v30 }
  0xce   : > { %v3921_v8 = vsel %vm941_vm3, %v960_v0, %v964_v46  ;;  %v971_v10 = vrot.slane %v969_v2, 1  ;;  %v848_v11 = vor.u32 %v846_v60, %v845_v3  ;;  %v3928_v12 = vsel %vm3538_vm2, %v845_v3, 0 }
  0xcf   : > { %1889 = vmatprep.mubr.bf16.mxu0 %v3921_v8  ;;  %v3932_v13 = vsel %vm941_vm3, %v1092_v4, %v1096_v51  ;;  %v1106_v16 = vshll.u32 %v3928_v12, 16  ;;  %v707_v17 = vsel %vm643_vm12, %v611_v26, %v675_v6  ;;  %v708_v20 = vsel %vm644_vm13, %v612_v30, %v676_v7  ;;  %v560_v30 = vld [vmem:[%s3822_s20 + $0xe8] sm:$0xff] }
  0xd0   : > { %1977 = vmatprep.mubr.bf16.mxu1 %v3932_v13  ;;  %1890 = vmatmul.mubr.bf16.gmra.mrb[4].mxu0 %v3898_v41  ;;  %v972_v21 = vor.u32 %v971_v10, %v967_v1  ;;  %v3944_v22 = vsel %vm3538_vm2, 0, %v848_v11  ;;  %v737_v23 = vpack.c.bf16 %v708_v20, %v707_v17  ;;  %v634_v24 = vadd.f32 %v3853_v47, %v3860_v52  ;;  %v3398_v11 = vld [vmem:[%s4972_s4 + $0x98] sm:$0xff]  }
  0xd1   : > { %1978 = vmatmul.mubr.bf16.vlgmr.msra.gmra.mrb[0].mxu1 %v3905_v48  ;;  %v1099_v25 = vshrl.u32 %v3944_v22, 16  ;;  %v1101_v26 = vshll.u32 %v3944_v22, 16  ;;  %v1108_v27 = vrot.slane %v1106_v16, 1  ;;  %vm665_vm14 = vcmp.gt.f32.partialorder %v3885_v31, 0.0 }
  0xd2   : > { %2941 = vmatpush3.bf16.msra.mxu1 %v3390_v9  ;;  %v3958_v34 = vsel %vm941_vm3, %v972_v21, %v976_v5  ;;  %v773_v52 = vshrl.u32 %v737_v23, 16  ;;  %v776_v35 = vshll.u32 %v737_v23, 16  ;;  %vm666_vm15 = vcmp.gt.f32.partialorder %v634_v24, 0.0  ;;  %v539_v5 = vld [vmem:[%s3822_s20 + $0x40] sm:$0xff] }
  0xd3   : > { %2942 = vmatprep.subr.bf16.mxu1 %v3391_v14  ;;  %1897 = vmatprep.mubr.bf16.mxu0 %v3958_v34  ;;  %v1103_v37 = vrot.slane %v1101_v26, 1  ;;  %v697_v40 = vmul.f32 0.2, %v3885_v31  ;;  %v698_v42 = vmul.f32 0.2, %v634_v24  ;;  %v613_v43 = vadd.f32 %v3853_v47, %v3863_v53  ;;  %v3396_v53 = vld [vmem:[%s4972_s4 + $0x90] sm:$0xff]  }
  0xd4   : > { %v775_v44 = vrot.slane %v773_v52, 7  ;;  %v614_v45 = vadd.f32 %v3853_v47, %v3866_v54  ;;  %v597_v46 = vmul.f32 %v3835_v28, %v559_v29  ;;  %v598_v49 = vmul.f32 %v3835_v28, %v560_v30  ;;  %v3399_v21 = vld [vmem:[%s4972_s4 + $0xe0] sm:$0xff]  }
  0xd5   : > { %v1104_v50 = vor.u32 %v1103_v37, %v1099_v25  ;;  %v729_v51 = vsel %vm665_vm14, %v3885_v31, %v697_v40  ;;  %v730_v56 = vsel %vm666_vm15, %v634_v24, %v698_v42  ;;  %vm645_vm0 = vcmp.gt.f32.partialorder %v613_v43, 0.0  ;;  %v3397_v31 = vld [vmem:[%s4972_s4 + $0xd8] sm:$0xff]   ;;  %v540_v25 = vld [vmem:[%s3822_s20 + $0x48] sm:$0xff]  ;;  %v3401_v40 = vld [vmem:[%s4972_s4 + $0xa0] sm:$0xff]  }
  0xd6   : > { %2943 = vmatpush3.bf16.msra.mxu1 %v3393_v32  ;;  %v778_v57 = vor.u32 %v776_v35, %v775_v44  ;;  %v3979_v54 = vsel %vm3538_vm2, %v775_v44, 0  ;;  %v748_v59 = vpack.c.bf16 %v730_v56, %v729_v51  ;;  %vm646_vm1 = vcmp.gt.f32.partialorder %v614_v45, 0.0  ;;  %v3403_v56 = vld [vmem:[%s4972_s4 + $0xe8] sm:$0xff]  }
  0xd7   : > { %v3982_v60 = vsel %vm941_vm3, %v1104_v50, %v1108_v27  ;;  %2944 = vmatprep.subr.bf16.mxu1 %v3395_v38  ;;  %v986_v61 = vshll.u32 %v3979_v54, 16  ;;  %v677_v63 = vmul.f32 0.2, %v613_v43  ;;  %v678_v0 = vmul.f32 0.2, %v614_v45 }
  0xd8   : > { %1985 = vmatprep.mubr.bf16.mxu1 %v3982_v60  ;;  %1898 = vmatmul.mubr.bf16.gmra.mrb[8].mxu0 %v3915_v62  ;;  %v3992_v1 = vsel %vm3538_vm2, 0, %v778_v57  ;;  %v850_v2 = vshrl.u32 %v748_v59, 16  ;;  %v853_v3 = vshll.u32 %v748_v59, 16  ;;  %v635_v4 = vadd.f32 %v3853_v47, %v597_v46  ;;  %v542_v46 = vld [vmem:[%s3822_s20 + $0x58] sm:$0xff] }
  0xd9   : > { %1986 = vmatmul.mubr.bf16.gmra.mrb[4].mxu1 %v3944_v22  ;;  %v979_v6 = vshrl.u32 %v3992_v1, 16  ;;  %v981_v7 = vshll.u32 %v3992_v1, 16  ;;  %v988_v9 = vrot.slane %v986_v61, 1  ;;  %v709_v10 = vsel %vm645_vm0, %v613_v43, %v677_v63 }
  0xda   : > { %2945 = vmatpush3.bf16.msra.mxu1 %v3396_v53  ;;  %v852_v14 = vrot.slane %v850_v2, 7  ;;  %v710_v16 = vsel %vm646_vm1, %v614_v45, %v678_v0  ;;  %v636_v17 = vadd.f32 %v3853_v47, %v598_v49  ;;  %vm667_vm4 = vcmp.gt.f32.partialorder %v635_v4, 0.0  ;;  %v541_v45 = vld [vmem:[%s3822_s20 + $0x50] sm:$0xff] }
  0xdb   : > { %2946 = vmatprep.subr.bf16.mxu1 %v3397_v31  ;;  %v983_v20 = vrot.slane %v981_v7, 1  ;;  %v738_v23 = vpack.c.bf16 %v710_v16, %v709_v10  ;;  %v699_v24 = vmul.f32 0.2, %v635_v4  ;;  %v577_v26 = vmul.f32 %v3835_v28, %v539_v5 }
  0xdc   : > { %v855_v27 = vor.u32 %v853_v3, %v852_v14  ;;  %v4012_v29 = vsel %vm3538_vm2, %v852_v14, 0  ;;  %vm668_vm5 = vcmp.gt.f32.partialorder %v636_v17, 0.0  ;;  %v700_v30 = vmul.f32 0.2, %v636_v17  ;;  %v3404_v3 = vld [vmem:[%s4972_s4 + $0xa8] sm:$0xff]  }
  0xdd   : > { %v984_v32 = vor.u32 %v983_v20, %v979_v6  ;;  %v1118_v52 = vshll.u32 %v4012_v29, 16  ;;  %v780_v35 = vshrl.u32 %v738_v23, 16  ;;  %v783_v37 = vshll.u32 %v738_v23, 16 }
  0xde   : > { %2947 = vmatpush3.bf16.msra.mxu1 %v3398_v11  ;;  %v4017_v38 = vsel %vm3538_vm2, 0, %v855_v27  ;;  %v731_v42 = vsel %vm667_vm4, %v635_v4, %v699_v24  ;;  %v732_v43 = vsel %vm668_vm5, %v636_v17, %v700_v30  ;;  %v578_v44 = vmul.f32 %v3835_v28, %v540_v25  ;;  %v3405_v11 = vld [vmem:[%s4972_s4 + $0xf0] sm:$0xff]  }
  0xdf   : > { %v4027_v49 = vsel %vm941_vm3, %v984_v32, %v988_v9  ;;  %v1111_v50 = vshrl.u32 %v4017_v38, 16  ;;  %v1113_v51 = vshll.u32 %v4017_v38, 16  ;;  %2948 = vmatprep.subr.bf16.mxu1 %v3399_v21  ;;  %v782_v53 = vrot.slane %v780_v35, 7  ;;  %v3406_v32 = vld [vmem:[%s4972_s4 + $0xb0] sm:$0xff]  }
  0xe0   : > { %1905 = vmatprep.mubr.bf16.mxu0 %v4027_v49  ;;  %v749_v57 = vpack.c.bf16 %v732_v43, %v731_v42  ;;  %v615_v59 = vadd.f32 %v3853_v47, %v577_v26  ;;  %v616_v31 = vadd.f32 %v3853_v47, %v578_v44  ;;  %v1120_v63 = vrot.slane %v1118_v52, 1  ;;  %v543_v26 = vld [vmem:[%s3822_s20 + $0x60] sm:$0xff]  ;;  %v3407_v42 = vld [vmem:[%s4972_s4 + $0xf8] sm:$0xff]  }
  0xe1   : > { %v1115_v61 = vrot.slane %v1113_v51, 1  ;;  %1906 = vmatmul.mubr.bf16.gmra.mrb[12].mxu0 %v3992_v1  ;;  %v579_v0 = vmul.f32 %v3835_v28, %v541_v45  ;;  %v580_v2 = vmul.f32 %v3835_v28, %v542_v46  ;;  %v785_v4 = vor.u32 %v783_v37, %v782_v53 }
  0xe2   : > { %2949 = vmatpush3.bf16.msra.mxu1 %v3401_v40  ;;  %v4045_v5 = vsel %vm3538_vm2, %v782_v53, 0  ;;  %v857_v6 = vshrl.u32 %v749_v57, 16  ;;  %v860_v7 = vshll.u32 %v749_v57, 16  ;;  %vm647_vm6 = vcmp.gt.f32.partialorder %v615_v59, 0.0 }
  0xe3   : > { %v1116_v9 = vor.u32 %v1115_v61, %v1111_v50  ;;  %2950 = vmatprep.subr.bf16.mxu1 %v3403_v56  ;;  %v998_v10 = vshll.u32 %v4045_v5, 16  ;;  %vm648_vm7 = vcmp.gt.f32.partialorder %v616_v31, 0.0  ;;  %v4053_v14 = vsel %vm3538_vm2, 0, %v785_v4 }
  0xe4   : > { %v859_v16 = vrot.slane %v857_v6, 7  ;;  %v679_v17 = vmul.f32 0.2, %v615_v59  ;;  %v680_v20 = vmul.f32 0.2, %v616_v31  ;;  %v991_v23 = vshrl.u32 %v4053_v14, 16 }
  0xe5   : > { %v4056_v21 = vsel %vm941_vm3, %v1116_v9, %v1120_v63  ;;  %v993_v24 = vshll.u32 %v4053_v14, 16  ;;  %v1000_v25 = vrot.slane %v998_v10, 1  ;;  %v617_v44 = vadd.f32 %v3853_v47, %v579_v0 }
  0xe6   : > { %1993 = vmatprep.mubr.bf16.mxu1 %v4056_v21  ;;  %2951 = vmatpush3.bf16.msra.mxu1 %v3404_v3  ;;  %v862_v27 = vor.u32 %v860_v7, %v859_v16  ;;  %v4064_v30 = vsel %vm3538_vm2, %v859_v16, 0  ;;  %v711_v52 = vsel %vm647_vm6, %v615_v59, %v679_v17  ;;  %v712_v35 = vsel %vm648_vm7, %v616_v31, %v680_v20  ;;  %v544_v59 = vld [vmem:[%s3822_s20 + $0x68] sm:$0xff]  ;;  %v3409_v31 = vld [vmem:[%s4972_s4 + $0xb8] sm:$0xff]   ;;  %v3411_v3 = vld [vmem:[%s4972_s4 + $0x1c0] sm:$0xff]  }
  0xe7   : > { %1994 = vmatmul.mubr.bf16.gmra.mrb[8].mxu1 %v4017_v38  ;;  %v995_v37 = vrot.slane %v993_v24, 1  ;;  %v1130_v40 = vshll.u32 %v4064_v30, 16  ;;  %2952 = vmatprep.subr.bf16.mxu1 %v3405_v11  ;;  %v739_v43 = vpack.c.bf16 %v712_v35, %v711_v52  ;;  %v618_v46 = vadd.f32 %v3853_v47, %v580_v2  ;;  %v545_v35 = vld [vmem:[%s3822_s20 + $0x70] sm:$0xff] }
  0xe8   : > { %v4079_v45 = vsel %vm3538_vm2, 0, %v862_v27  ;;  %v581_v50 = vmul.f32 %v3835_v28, %v543_v26  ;;  %vm649_vm8 = vcmp.gt.f32.partialorder %v617_v44, 0.0  ;;  %v681_v4 = vmul.f32 0.2, %v617_v44 }
  0xe9   : > { %v996_v51 = vor.u32 %v995_v37, %v991_v23  ;;  %v1123_v56 = vshrl.u32 %v4079_v45, 16  ;;  %v1125_v53 = vshll.u32 %v4079_v45, 16  ;;  %v1132_v57 = vrot.slane %v1130_v40, 1 }
  0xea   : > { %2953 = vmatpush3.bf16.msra.mxu1 %v3406_v32  ;;  %v787_v61 = vshrl.u32 %v739_v43, 16  ;;  %v790_v63 = vshll.u32 %v739_v43, 16  ;;  %vm650_vm9 = vcmp.gt.f32.partialorder %v618_v46, 0.0  ;;  %v682_v6 = vmul.f32 0.2, %v618_v46  ;;  %v546_v43 = vld [vmem:[%s3822_s20 + $0x78] sm:$0xff] }
  0xeb   : > { %v4090_v0 = vsel %vm941_vm3, %v996_v51, %v1000_v25  ;;  %v1127_v2 = vrot.slane %v1125_v53, 1  ;;  %2954 = vmatprep.subr.bf16.mxu1 %v3407_v42  ;;  %v1184_v7 = vrot.slane %v3551_v19, 1  ;;  %v582_v10 = vmul.f32 %v3835_v28, %v544_v59 }
  0xec   : > { %1913 = vmatprep.mubr.bf16.mxu0 %v4090_v0  ;;  %v789_v9 = vrot.slane %v787_v61, 7  ;;  %v619_v11 = vadd.f32 %v3853_v47, %v581_v50  ;;  %v1183_v17 = vrot.slane %v3547_v18, 1  ;;  %v713_v20 = vsel %vm649_vm8, %v617_v44, %v681_v4  ;;  %v3436_v18 = vld [vmem:[%s4972_s4 + $0x1b0] sm:$0xff]  }
  0xed   : > { %v1128_v16 = vor.u32 %v1127_v2, %v1123_v56  ;;  %1914 = vmatmul.mubr.bf16.gmra.mrb[16].mxu0 %v4053_v14  ;;  %v714_v23 = vsel %vm650_vm9, %v618_v46, %v682_v6  ;;  %v620_v26 = vadd.f32 %v3853_v47, %v582_v10  ;;  %vm1182_vm12 = vcmask 1046528  }
  0xee   : > { %2955 = vmatpush3.bf16.msra.mxu1 %v3409_v31  ;;  %v792_v19 = vor.u32 %v790_v63, %v789_v9  ;;  %v4105_v24 = vsel %vm3538_vm2, %v789_v9, 0  ;;  %v740_v25 = vpack.c.bf16 %v714_v23, %v713_v20  ;;  %vm651_vm10 = vcmp.gt.f32.partialorder %v619_v11, 0.0 }
  0xef   : > { %v4109_v27 = vsel %vm941_vm3, %v1128_v16, %v1132_v57  ;;  %v1010_v32 = vshll.u32 %v4105_v24, 16  ;;  %3164 = vmatprep.subr.bf16.mxu1 %v3411_v3  ;;  %v683_v52 = vmul.f32 0.2, %v619_v11  ;;  %vm652_vm11 = vcmp.gt.f32.partialorder %v620_v26, 0.0  ;;  %v3412_v16 = vld [vmem:[%s4972_s4 + $0x180] sm:$0xff]  }
  0xf0   : > { %2001 = vmatprep.mubr.bf16.mxu1 %v4109_v27  ;;  %v4116_v37 = vsel %vm3538_vm2, 0, %v792_v19  ;;  %v794_v40 = vshrl.u32 %v740_v25, 16  ;;  %v797_v42 = vshll.u32 %v740_v25, 16  ;;  %v684_v50 = vmul.f32 0.2, %v620_v26  ;;  %v547_v19 = vld [vmem:[%s3822_s20 + $0x80] sm:$0xff] }
  0xf1   : > { %2002 = vmatmul.mubr.bf16.gmra.mrb[12].mxu1 %v4079_v45  ;;  %v1003_v44 = vshrl.u32 %v4116_v37, 16  ;;  %v1005_v46 = vshll.u32 %v4116_v37, 16  ;;  %v715_v56 = vsel %vm651_vm10, %v619_v11, %v683_v52  ;;  %v583_v53 = vmul.f32 %v3835_v28, %v545_v35  ;;  %v3415_v35 = vld [vmem:[%s4972_s4 + $0x1c8] sm:$0xff]  }
  0xf2   : > { %2042 = vmatprep.mubr.bf16.mxu1 %v3898_v41  ;;  %v796_v51 = vrot.slane %v794_v40, 7  ;;  %v1012_v59 = vrot.slane %v1010_v32, 1  ;;  %v716_v31 = vsel %vm652_vm11, %v620_v26, %v684_v50  ;;  %v584_v61 = vmul.f32 %v3835_v28, %v546_v43  ;;  %v548_v40 = vld [vmem:[%s3822_s20 + $0x88] sm:$0xff] }
  0xf3   : > { %v1007_v57 = vrot.slane %v1005_v46, 1  ;;  %v4127_v63 = vsel %vm1182_vm12, %v1183_v17, %v1184_v7  ;;  %v741_v4 = vpack.c.bf16 %v716_v31, %v715_v56  ;;  %v621_v10 = vadd.f32 %v3853_v47, %v583_v53  ;;  %v3416_v56 = vld [vmem:[%s4972_s4 + $0x188] sm:$0xff]  }
  0xf4   : > { %v799_v2 = vor.u32 %v797_v42, %v796_v51  ;;  %v4131_v3 = vsel %vm3538_vm2, %v796_v51, 0  ;;  %v622_v11 = vadd.f32 %v3853_v47, %v584_v61  ;;  %v1186_v17 = vrot.slane %v3898_v41, 1 }
  0xf5   : > { %v1008_v6 = vor.u32 %v1007_v57, %v1003_v44  ;;  %v1022_v9 = vshll.u32 %v4131_v3, 16  ;;  %v801_v20 = vshrl.u32 %v741_v4, 16  ;;  %v804_v23 = vshll.u32 %v741_v4, 16  ;;  %v3420_v4 = vld [vmem:[%s4972_s4 + $0x1d0] sm:$0xff]  }
  0xf6   : > { %v4141_v7 = vsel %vm3538_vm2, 0, %v799_v2  ;;  %v1187_v52 = vrot.slane %v3889_v33, 1  ;;  %vm653_vm13 = vcmp.gt.f32.partialorder %v621_v10, 0.0  ;;  %vm654_vm14 = vcmp.gt.f32.partialorder %v622_v11, 0.0 }
  0xf7   : > { %v4146_v25 = vsel %vm941_vm3, %v1008_v6, %v1012_v59  ;;  %v1015_v26 = vshrl.u32 %v4141_v7, 16  ;;  %v1017_v32 = vshll.u32 %v4141_v7, 16  ;;  %v803_v41 = vrot.slane %v801_v20, 7 }
  0xf8   : > { %1921 = vmatprep.mubr.bf16.mxu0 %v4146_v25  ;;  %v685_v42 = vmul.f32 0.2, %v621_v10  ;;  %v1024_v44 = vrot.slane %v1022_v9, 1  ;;  %v686_v46 = vmul.f32 0.2, %v622_v11  ;;  %v585_v33 = vmul.f32 %v3835_v28, %v547_v19  ;;  %v549_v19 = vld [vmem:[%s3822_s20 + $0x90] sm:$0xff] }
  0xf9   : > { %1922 = vmatmul.mubr.bf16.gmra.mrb[20].mxu0 %v4116_v37  ;;  %2043 = vmatmul.mubr.bf16.vlgmr.msra.gmra.mrb[16].mxu1 %v4127_v63  ;;  %v1019_v43 = vrot.slane %v1017_v32, 1  ;;  %v806_v50 = vor.u32 %v804_v23, %v803_v41  ;;  %v4162_v51 = vsel %vm3538_vm2, %v803_v41, 0  ;;  %v586_v57 = vmul.f32 %v3835_v28, %v548_v40  ;;  %v3422_v40 = vld [vmem:[%s4972_s4 + $0x190] sm:$0xff]  }
  0xfa   : > { %3165 = vmatpush3.bf16.msra.mxu1 %v3412_v16  ;;  %2050 = vmatprep.mubr.bf16.mxu1 %v3915_v62  ;;  %v717_v53 = vsel %vm653_vm13, %v621_v10, %v685_v42  ;;  %v1034_v31 = vshll.u32 %v4162_v51, 16  ;;  %v718_v61 = vsel %vm654_vm14, %v622_v11, %v686_v46  ;;  %v623_v2 = vadd.f32 %v3853_v47, %v585_v33 }
  0xfb   : > { %v1020_v59 = vor.u32 %v1019_v43, %v1015_v26  ;;  %3166 = vmatprep.subr.bf16.mxu1 %v3415_v35  ;;  %v4176_v6 = vsel %vm3538_vm2, 0, %v806_v50  ;;  %v742_v9 = vpack.c.bf16 %v718_v61, %v717_v53  ;;  %v624_v10 = vadd.f32 %v3853_v47, %v586_v57  ;;  %v550_v26 = vld [vmem:[%s3822_s20 + $0x98] sm:$0xff] }
  0xfc   : > { %v4183_v20 = vsel %vm1182_vm12, %v1186_v17, %v1187_v52  ;;  %v1027_v11 = vshrl.u32 %v4176_v6, 16  ;;  %v1029_v23 = vshll.u32 %v4176_v6, 16  ;;  %vm655_vm15 = vcmp.gt.f32.partialorder %v623_v2, 0.0  ;;  %v3425_v17 = vld [vmem:[%s4972_s4 + $0x1d8] sm:$0xff]  }
  0xfd   : > { %v4180_v16 = vsel %vm941_vm3, %v1020_v59, %v1024_v44  ;;  %v808_v32 = vshrl.u32 %v742_v9, 16  ;;  %v811_v35 = vshll.u32 %v742_v9, 16  ;;  %vm656_vm0 = vcmp.gt.f32.partialorder %v624_v10, 0.0  ;;  %v3426_v9 = vld [vmem:[%s4972_s4 + $0x198] sm:$0xff]  }
  0xfe   : > { %1929 = vmatprep.mubr.bf16.mxu0 %v4180_v16  ;;  %3167 = vmatpush3.bf16.msra.mxu1 %v3416_v56  ;;  %v1031_v52 = vrot.slane %v1029_v23, 1  ;;  %v1036_v41 = vrot.slane %v1034_v31, 1  ;;  %v687_v42 = vmul.f32 0.2, %v623_v2  ;;  %v688_v43 = vmul.f32 0.2, %v624_v10 }
  0xff   : > { %3168 = vmatprep.subr.bf16.mxu1 %v3420_v4  ;;  %v1189_v44 = vrot.slane %v3915_v62, 1  ;;  %v810_v46 = vrot.slane %v808_v32, 7  ;;  %v587_v33 = vmul.f32 %v3835_v28, %v549_v19  ;;  %v588_v50 = vmul.f32 %v3835_v28, %v550_v26  ;;  %v3429_v23 = vld [vmem:[%s4972_s4 + $0x1e0] sm:$0xff]  }
 0x100   : > { %v1032_v56 = vor.u32 %v1031_v52, %v1027_v11  ;;  %v1190_v53 = vrot.slane %v3911_v58, 1  ;;  %v719_v57 = vsel %vm655_vm15, %v623_v2, %v687_v42  ;;  %v720_v59 = vsel %vm656_vm0, %v624_v10, %v688_v43  ;;  %v3430_v42 = vld [vmem:[%s4972_s4 + $0x1a0] sm:$0xff]  }
 0x101   : > { %1930 = vmatmul.mubr.bf16.gmra.mrb[24].mxu0 %v4141_v7  ;;  %2051 = vmatmul.mubr.bf16.gmra.mrb[20].mxu1 %v4183_v20  ;;  %v813_v31 = vor.u32 %v811_v35, %v810_v46  ;;  %v4207_v61 = vsel %vm3538_vm2, %v810_v46, 0  ;;  %v743_v4 = vpack.c.bf16 %v720_v59, %v719_v57  ;;  %v625_v10 = vadd.f32 %v3853_v47, %v587_v33  ;;  %v551_v35 = vld [vmem:[%s3822_s20 + $0xa0] sm:$0xff] }
 0x102   : > { %2058 = vmatprep.mubr.bf16.mxu1 %v3992_v1  ;;  %3169 = vmatpush3.bf16.msra.mxu1 %v3422_v40  ;;  %v4213_v58 = vsel %vm941_vm3, %v1032_v56, %v1036_v41  ;;  %v1046_v2 = vshll.u32 %v4207_v61, 16  ;;  %v626_v11 = vadd.f32 %v3853_v47, %v588_v50  ;;  %v552_v40 = vld [vmem:[%s3822_s20 + $0xa8] sm:$0xff]  ;;  %v4229_v52 = vsel %vm1182_vm12, %v1189_v44, %v1190_v53 }
 0x103   : > { %3170 = vmatprep.subr.bf16.mxu1 %v3425_v17  ;;  %1937 = vmatprep.mubr.bf16.mxu0 %v4213_v58  ;;  %v4224_v19 = vsel %vm3538_vm2, 0, %v813_v31  ;;  %v815_v26 = vshrl.u32 %v743_v4, 16  ;;  %v818_v32 = vshll.u32 %v743_v4, 16  ;;  %vm657_vm1 = vcmp.gt.f32.partialorder %v625_v10, 0.0  ;;  %v3432_v53 = vld [vmem:[%s4972_s4 + $0x1e8] sm:$0xff]  }
 0x104   : > { %v1039_v41 = vshrl.u32 %v4224_v19, 16  ;;  %v1041_v17 = vshll.u32 %v4224_v19, 16  ;;  %vm658_vm4 = vcmp.gt.f32.partialorder %v626_v11, 0.0  ;;  %v689_v46 = vmul.f32 0.2, %v625_v10 }
 0x105   : > { %v817_v43 = vrot.slane %v815_v26, 7  ;;  %v690_v33 = vmul.f32 0.2, %v626_v11  ;;  %v1048_v56 = vrot.slane %v1046_v2, 1  ;;  %v589_v57 = vmul.f32 %v3835_v28, %v551_v35 }
 0x106   : > { %3171 = vmatpush3.bf16.msra.mxu1 %v3426_v9  ;;  %v1043_v50 = vrot.slane %v1041_v17, 1  ;;  %v590_v44 = vmul.f32 %v3835_v28, %v552_v40  ;;  %v721_v4 = vsel %vm657_vm1, %v625_v10, %v689_v46  ;;  %v1193_v40 = vrot.slane %v3979_v54, 1  ;;  %v3435_v54 = vld [vmem:[%s4972_s4 + $0x1f0] sm:$0xff]  }
 0x107   : > { %3172 = vmatprep.subr.bf16.mxu1 %v3429_v23  ;;  %v820_v59 = vor.u32 %v818_v32, %v817_v43  ;;  %v4243_v31 = vsel %vm3538_vm2, %v817_v43, 0  ;;  %v722_v26 = vsel %vm658_vm4, %v626_v11, %v690_v33  ;;  %v627_v23 = vadd.f32 %v3853_v47, %v589_v57 }
 0x108   : > { %v1044_v9 = vor.u32 %v1043_v50, %v1039_v41  ;;  %v1058_v2 = vshll.u32 %v4243_v31, 16  ;;  %v744_v35 = vpack.c.bf16 %v722_v26, %v721_v4  ;;  %v1192_v32 = vrot.slane %v3992_v1, 1  ;;  %v3433_v41 = vld [vmem:[%s4972_s4 + $0x1a8] sm:$0xff]  }
 0x109   : > { %1938 = vmatmul.mubr.bf16.gmra.mrb[28].mxu0 %v4176_v6  ;;  %2059 = vmatmul.mubr.bf16.gmra.mrb[24].mxu1 %v4229_v52  ;;  %v4254_v10 = vsel %vm3538_vm2, 0, %v820_v59  ;;  %v628_v11 = vadd.f32 %v3853_v47, %v590_v44  ;;  %vm659_vm5 = vcmp.gt.f32.partialorder %v627_v23, 0.0  ;;  %v691_v44 = vmul.f32 0.2, %v627_v23 }
 0x10a   : > { %2066 = vmatprep.mubr.bf16.mxu1 %v4053_v14  ;;  %3173 = vmatpush3.bf16.msra.mxu1 %v3430_v42  ;;  %v4261_v17 = vsel %vm941_vm3, %v1044_v9, %v1048_v56  ;;  %v1051_v43 = vshrl.u32 %v4254_v10, 16  ;;  %v1053_v46 = vshll.u32 %v4254_v10, 16  ;;  %v822_v33 = vshrl.u32 %v744_v35, 16 }
 0x10b   : > { %3174 = vmatprep.subr.bf16.mxu1 %v3432_v53  ;;  %1945 = vmatprep.mubr.bf16.mxu0 %v4261_v17  ;;  %v825_v42 = vshll.u32 %v744_v35, 16  ;;  %vm660_vm6 = vcmp.gt.f32.partialorder %v628_v11, 0.0  ;;  %v1060_v57 = vrot.slane %v1058_v2, 1  ;;  %v692_v56 = vmul.f32 0.2, %v628_v11 }
 0x10c   : > { %v1055_v50 = vrot.slane %v1053_v46, 1  ;;  %v4270_v59 = vsel %vm1182_vm12, %v1192_v32, %v1193_v40  ;;  %v824_v4 = vrot.slane %v822_v33, 7  ;;  %v723_v26 = vsel %vm659_vm5, %v627_v23, %v691_v44  ;;  %v3438_v32 = vld [vmem:[%s4972_s4 + $0x1f8] sm:$0xff]  }
 0x10d   : > { %v724_v9 = vsel %vm660_vm6, %v628_v11, %v692_v56  ;;  %v1195_v40 = vrot.slane %v4053_v14, 1 }
 0x10e   : > { %3175 = vmatpush3.bf16.msra.mxu1 %v3433_v41  ;;  %v1056_v53 = vor.u32 %v1055_v50, %v1051_v43  ;;  %v827_v35 = vor.u32 %v825_v42, %v824_v4  ;;  %v4277_v46 = vsel %vm3538_vm2, %v824_v4, 0  ;;  %v745_v2 = vpack.c.bf16 %v724_v9, %v723_v26 }
 0x10f   : > { %3176 = vmatprep.subr.bf16.mxu1 %v3435_v54  ;;  %v1070_v11 = vshll.u32 %v4277_v46, 16  ;;  %v1196_v41 = vrot.slane %v4045_v5, 1 }
 0x110   : > { %v4285_v23 = vsel %vm941_vm3, %v1056_v53, %v1060_v57  ;;  %v4294_v43 = vsel %vm3538_vm2, 0, %v827_v35  ;;  %v829_v54 = vshrl.u32 %v745_v2, 16  ;;  %v832_v33 = vshll.u32 %v745_v2, 16  ;;  %v3439_v57 = vld [vmem:[%s4972_s4 + $0x1b8] sm:$0xff]  }
 0x111   : > { %1946 = vmatmul.mubr.bf16.gmra.mrb[32].mxu0 %v4224_v19  ;;  %2067 = vmatmul.mubr.bf16.gmra.mrb[28].mxu1 %v4270_v59  ;;  %v1063_v42 = vshrl.u32 %v4294_v43, 16  ;;  %v1065_v50 = vshll.u32 %v4294_v43, 16  ;;  %v1072_v4 = vrot.slane %v1070_v11, 1  ;;  %v4302_v5 = vsel %vm1182_vm12, %v1195_v40, %v1196_v41 }
 0x112   : > { %1953 = vmatprep.mubr.bf16.mxu0 %v4285_v23  ;;  %2074 = vmatprep.mubr.bf16.mxu1 %v4116_v37  ;;  %v831_v44 = vrot.slane %v829_v54, 7  ;;  %v1198_v11 = vrot.slane %v4116_v37, 1  ;;  %v1199_v41 = vrot.slane %v4105_v24, 1  ;;  %v1202_v24 = vrot.slane %v4131_v3, 1 }
 0x113   : > { %3177 = vmatpush3.bf16.msra.mxu1 %v3436_v18  ;;  %v1067_v56 = vrot.slane %v1065_v50, 1 }
 0x114   : > { %3178 = vmatprep.subr.bf16.mxu1 %v3438_v32  ;;  %v834_v53 = vor.u32 %v832_v33, %v831_v44  ;;  %v4306_v26 = vsel %vm3538_vm2, %v831_v44, 0  ;;  %v4325_v50 = vsel %vm1182_vm12, %v1198_v11, %v1199_v41  ;;  %v1201_v44 = vrot.slane %v4141_v7, 1 }
 0x115   : > { %v1068_v9 = vor.u32 %v1067_v56, %v1063_v42  ;;  %v1082_v35 = vshll.u32 %v4306_v26, 16 }
 0x116   : > { %v4311_v18 = vsel %vm3538_vm2, 0, %v834_v53  ;;  %v4337_v56 = vsel %vm1182_vm12, %v1201_v44, %v1202_v24  ;;  %v1204_v53 = vrot.slane %v4176_v6, 1  ;;  %v3441_v44 = vld [vmem:[%s4972_s4 + $0x220] sm:$0xff]  }
 0x117   : > { %3179 = vmatpush3.bf16.msra.mxu1 %v3439_v57  ;;  %v4316_v2 = vsel %vm941_vm3, %v1068_v9, %v1072_v4  ;;  %v1075_v32 = vshrl.u32 %v4311_v18, 16  ;;  %v1077_v40 = vshll.u32 %v4311_v18, 16  ;;  %v1084_v33 = vrot.slane %v1082_v35, 1  ;;  %v2844_v4 = vpop.f32.mrb[0].mxu0 }
 0x118   : > { %v1205_v9 = vrot.slane %v4162_v51, 1  ;;  %v2845_v35 = vpop.f32.mrb[1].mxu0  ;;  %v1207_v51 = vrot.slane %v4224_v19, 1 }
 0x119   : > { %1954 = vmatmul.mubr.bf16.gmra.mrb[36].mxu0 %v4254_v10  ;;  %2075 = vmatmul.mubr.bf16.gmra.mrb[32].mxu1 %v4302_v5  ;;  %v1079_v54 = vrot.slane %v1077_v40, 1  ;;  %v2847_v3 = vpop.f32.mrb[2].mxu0 }
 0x11a   : > { %1961 = vmatprep.mubr.bf16.mxu0 %v4316_v2  ;;  %2082 = vmatprep.mubr.bf16.mxu1 %v4141_v7  ;;  %v2848_v40 = vpop.f32.mrb[3].mxu0  ;;  %v4350_v41 = vsel %vm1182_vm12, %v1204_v53, %v1205_v9  ;;  %v1214_v53 = vrot.slane %v4277_v46, 1  ;;  %v3443_v9 = vld [vmem:[%s4972_s4 + $0x230] sm:$0xff]   ;;  %v3444_v46 = vld [vmem:[%s4972_s4 + $0x238] sm:$0xff]  }
 0x11b   : > { %v1080_v42 = vor.u32 %v1079_v54, %v1075_v32  ;;  %v4345_v32 = vadd.f32 %v2845_v35, %v2844_v4  ;;  %v4347_v11 = vadd.f32 %v2848_v40, %v2847_v3  ;;  %v3434_v54 = vld [vmem:[%s4972_s4 + $0x208] sm:$0xff]   ;;  %v561_v35 = vld [vmem:[%s3822_s20 + $0xf0] sm:$0xff]  ;;  %v562_v3 = vld [vmem:[%s3822_s20 + $0xf8] sm:$0xff] }
 0x11c   : > { %v3442_v4 = vld [vmem:[%s4972_s4 + $0x228] sm:$0xff]  }
 0x11d   : > { %v4328_v57 = vsel %vm941_vm3, %v1080_v42, %v1084_v33  ;;  %v3437_v33 = vld [vmem:[%s4972_s4 + $0x210] sm:$0xff]  }
 0x121   : > { %1962 = vmatmul.mubr.bf16.gmra.mrb[40].mxu0 %v4294_v43  ;;  %2083 = vmatmul.mubr.bf16.gmra.mrb[36].mxu1 %v4325_v50 }
 0x122   : > { %1969 = vmatprep.mubr.bf16.mxu0 %v4328_v57  ;;  %2090 = vmatprep.mubr.bf16.mxu1 %v4176_v6 }
 0x129   : > { %1970 = vmatmul.mubr.bf16.gmra.mrb[44].mxu0 %v4311_v18  ;;  %2091 = vmatmul.mubr.bf16.gmra.mrb[40].mxu1 %v4337_v56 }
 0x12a   : > { %2098 = vmatprep.mubr.bf16.mxu1 %v4224_v19  ;;  %2203 = vmatprep.mubr.bf16.mxu0 %v4183_v20  ;;  %v1208_v20 = vrot.slane %v4207_v61, 1  ;;  %v1211_v61 = vrot.slane %v4243_v31, 1  ;;  %v1213_v31 = vrot.slane %v4294_v43, 1 }
 0x12c   : > { %v4366_v42 = vsel %vm1182_vm12, %v1207_v51, %v1208_v20  ;;  %v4398_v40 = vsel %vm1182_vm12, %v1213_v31, %v1214_v53  ;;  %v600_v51 = vmul.f32 %v3835_v28, %v562_v3  ;;  %v1216_v20 = vrot.slane %v4311_v18, 1 }
 0x12d   : > { %v1223_v3 = vrot.slane %v3928_v12, 1 }
 0x131   : > { %2099 = vmatmul.mubr.bf16.gmra.mrb[44].mxu1 %v4350_v41  ;;  %2204 = vmatmul.mubr.bf16.vlgmr.msra.gmra.mrb[48].mxu0 %v3921_v8  ;;  %v3440_v8 = vld [vmem:[%s4972_s4 + $0x218] sm:$0xff]  }
 0x132   : > { %2106 = vmatprep.mubr.bf16.mxu1 %v4254_v10  ;;  %2211 = vmatprep.mubr.bf16.mxu0 %v4229_v52 }
 0x133   : > { %3301 = vmatpush3.bf16.msra.mxu0 %v3871_v55  ;;  %v1210_v55 = vrot.slane %v4254_v10, 1 }
 0x134   : > { %3302 = vmatprep.subr.bf16.mxu0 %v3434_v54 }
 0x135   : > { %v4381_v24 = vsel %vm1182_vm12, %v1210_v55, %v1211_v61 }
 0x137   : > { %3303 = vmatpush3.bf16.msra.mxu0 %v3434_v54  ;;  %v599_v54 = vmul.f32 %v3835_v28, %v561_v35  ;;  %v1222_v35 = vrot.slane %v3944_v22, 1 }
 0x138   : > { %3304 = vmatprep.subr.bf16.mxu0 %v3437_v33 }
 0x139   : > { %2107 = vmatmul.mubr.bf16.gmra.mrb[48].mxu1 %v4366_v42  ;;  %2212 = vmatmul.mubr.bf16.gmra.mrb[52].mxu0 %v3958_v34  ;;  %v637_v28 = vadd.f32 %v3853_v47, %v599_v54 }
 0x13a   : > { %2114 = vmatprep.mubr.bf16.mxu1 %v4294_v43  ;;  %2219 = vmatprep.mubr.bf16.mxu0 %v4270_v59 }
 0x13b   : > { %3305 = vmatpush3.bf16.msra.mxu0 %v3437_v33  ;;  %v1217_v33 = vrot.slane %v4306_v26, 1  ;;  %v701_v61 = vmul.f32 0.2, %v637_v28  ;;  %vm669_vm7 = vcmp.gt.f32.partialorder %v637_v28, 0.0  ;;  %v1219_v26 = vrot.slane %v3905_v48, 1 }
 0x13c   : > { %3306 = vmatprep.subr.bf16.mxu0 %v3440_v8 }
 0x13d   : > { %v4414_v55 = vsel %vm1182_vm12, %v1216_v20, %v1217_v33  ;;  %v1225_v20 = vrot.slane %v4017_v38, 1  ;;  %v1226_v33 = vrot.slane %v4012_v29, 1  ;;  %v1229_v29 = vrot.slane %v4064_v30, 1 }
 0x13f   : > { %3307 = vmatpush3.bf16.msra.mxu0 %v3440_v8  ;;  %v638_v8 = vadd.f32 %v3853_v47, %v600_v51  ;;  %v1220_v47 = vrot.slane %v3894_v39, 1  ;;  %v4432_v39 = vsel %vm1182_vm12, %v1222_v35, %v1223_v3  ;;  %v4441_v12 = vsel %vm1182_vm12, %v1225_v20, %v1226_v33 }
 0x140   : > { %3308 = vmatprep.subr.bf16.mxu0 %v3441_v44 }
 0x141   : > { %2115 = vmatmul.mubr.bf16.gmra.mrb[52].mxu1 %v4381_v24  ;;  %2220 = vmatmul.mubr.bf16.gmra.mrb[56].mxu0 %v4027_v49  ;;  %vm670_vm8 = vcmp.gt.f32.partialorder %v638_v8, 0.0  ;;  %v4423_v53 = vsel %vm1182_vm12, %v1219_v26, %v1220_v47 }
 0x142   : > { %2122 = vmatprep.mubr.bf16.mxu1 %v4311_v18  ;;  %2227 = vmatprep.mubr.bf16.mxu0 %v4302_v5 }
 0x143   : > { %3309 = vmatpush3.bf16.msra.mxu0 %v3441_v44  ;;  %v702_v44 = vmul.f32 0.2, %v638_v8 }
 0x144   : > { %3310 = vmatprep.subr.bf16.mxu0 %v3442_v4 }
 0x145   : > { %v734_v31 = vsel %vm670_vm8, %v638_v8, %v702_v44 }
 0x147   : > { %3311 = vmatpush3.bf16.msra.mxu0 %v3442_v4  ;;  %v733_v4 = vsel %vm669_vm7, %v637_v28, %v701_v61  ;;  %v1228_v61 = vrot.slane %v4079_v45, 1 }
 0x148   : > { %3312 = vmatprep.subr.bf16.mxu0 %v3443_v9 }
 0x149   : > { %2123 = vmatmul.mubr.bf16.gmra.mrb[56].mxu1 %v4398_v40  ;;  %2228 = vmatmul.mubr.bf16.gmra.mrb[60].mxu0 %v4090_v0  ;;  %v4454_v44 = vsel %vm1182_vm12, %v1228_v61, %v1229_v29 }
 0x14a   : > { %2130 = vmatprep.mubr.bf16.mxu1 %v3905_v48  ;;  %2235 = vmatprep.mubr.bf16.mxu0 %v4325_v50 }
 0x14b   : > { %3313 = vmatpush3.bf16.msra.mxu0 %v3443_v9  ;;  %v750_v9 = vpack.c.bf16 %v734_v31, %v733_v4 }
 0x14c   : > { %3314 = vmatprep.subr.bf16.mxu0 %v3444_v46 }
 0x14d   : > { %v864_v54 = vshrl.u32 %v750_v9, 16 }
 0x14f   : > { %3315 = vmatpush3.bf16.msra.mxu0 %v3444_v46  ;;  %v866_v51 = vrot.slane %v864_v54, 7  ;;  %v867_v46 = vshll.u32 %v750_v9, 16 }
 0x151   : > { %2131 = vmatmul.mubr.bf16.gmra.mrb[60].mxu1 %v4414_v55  ;;  %2236 = vmatmul.mubr.bf16.gmra.mrb[64].mxu0 %v4146_v25  ;;  %v869_v28 = vor.u32 %v867_v46, %v866_v51 }
 0x152   : > { %2138 = vmatprep.mubr.bf16.mxu1 %v3944_v22  ;;  %2243 = vmatprep.mubr.bf16.mxu0 %v4337_v56 }
 0x153   : > { %v4445_v8 = vsel %vm3538_vm2, 0, %v869_v28 }
 0x159   : > { %2139 = vmatmul.mubr.bf16.gmra.mrb[64].mxu1 %v4423_v53  ;;  %2244 = vmatmul.mubr.bf16.gmra.mrb[68].mxu0 %v4180_v16 }
 0x15a   : > { %2146 = vmatprep.mubr.bf16.mxu1 %v4017_v38  ;;  %2251 = vmatprep.mubr.bf16.mxu0 %v4350_v41 }
 0x161   : > { %2147 = vmatmul.mubr.bf16.gmra.mrb[68].mxu1 %v4432_v39  ;;  %2252 = vmatmul.mubr.bf16.gmra.mrb[72].mxu0 %v4213_v58 }
 0x162   : > { %2154 = vmatprep.mubr.bf16.mxu1 %v4079_v45  ;;  %2259 = vmatprep.mubr.bf16.mxu0 %v4366_v42 }
 0x169   : > { %2155 = vmatmul.mubr.bf16.gmra.mrb[72].mxu1 %v4441_v12  ;;  %2260 = vmatmul.mubr.bf16.gmra.mrb[76].mxu0 %v4261_v17 }
 0x16a   : > { %2162 = vmatprep.mubr.bf16.mxu1 %v4445_v8  ;;  %2267 = vmatprep.mubr.bf16.mxu0 %v4381_v24 }
 0x171   : > { %2163 = vmatmul.mubr.bf16.gmra.mrb[76].mxu1 %v4454_v44  ;;  %2268 = vmatmul.mubr.bf16.gmra.mrb[80].mxu0 %v4285_v23 }
 0x172   : > { %2275 = vmatprep.mubr.bf16.mxu0 %v4398_v40  ;;  %2364 = vmatprep.mubr.bf16.mxu1 %v3958_v34  ;;  %v1250_v34 = vshll.u32 %v4445_v8, 16 }
 0x174   : > { %v1252_v30 = vrot.slane %v1250_v34, 1 }
 0x179   : > { %2276 = vmatmul.mubr.bf16.gmra.mrb[84].mxu0 %v4316_v2  ;;  %2365 = vmatmul.mubr.bf16.vlgmr.msra.gmra.mrb[80].mxu1 %v3915_v62  ;;  %v940_v62 = vsel %vm3538_vm2, %v866_v51, 0  ;;  %vm2654_vm2 = vcmask 523264  }
 0x17a   : > { %2283 = vmatprep.mubr.bf16.mxu0 %v4414_v55  ;;  %2372 = vmatprep.mubr.bf16.mxu1 %v4027_v49  ;;  %v1263_v49 = vrot.slane %v940_v62, 1 }
 0x181   : > { %2284 = vmatmul.mubr.bf16.gmra.mrb[88].mxu0 %v4328_v57  ;;  %2373 = vmatmul.mubr.bf16.gmra.mrb[84].mxu1 %v3992_v1  ;;  %v1262_v1 = vrot.slane %v4445_v8, 1 }
 0x182   : > { %2291 = vmatprep.mubr.bf16.mxu0 %v4423_v53  ;;  %2380 = vmatprep.mubr.bf16.mxu1 %v4090_v0  ;;  %v1255_v0 = vshll.u32 %v940_v62, 16 }
 0x183   : > { %v4486_v15 = vsel %vm1182_vm12, %v1262_v1, %v1263_v49 }
 0x189   : > { %2292 = vmatmul.mubr.bf16.gmra.mrb[92].mxu0 %v3932_v13  ;;  %2381 = vmatmul.mubr.bf16.gmra.mrb[88].mxu1 %v4053_v14  ;;  %v1248_v14 = vshrl.u32 %v4445_v8, 16 }
 0x18a   : > { %2299 = vmatprep.mubr.bf16.mxu0 %v4432_v39  ;;  %2388 = vmatprep.mubr.bf16.mxu1 %v4146_v25 }
 0x191   : > { %2300 = vmatmul.mubr.bf16.gmra.mrb[96].mxu0 %v3982_v60  ;;  %2389 = vmatmul.mubr.bf16.gmra.mrb[92].mxu1 %v4116_v37  ;;  %v1253_v37 = vor.u32 %v1252_v30, %v1248_v14 }
 0x192   : > { %2307 = vmatprep.mubr.bf16.mxu0 %v4441_v12  ;;  %2396 = vmatprep.mubr.bf16.mxu1 %v4180_v16 }
 0x199   : > { %2308 = vmatmul.mubr.bf16.gmra.mrb[100].mxu0 %v4056_v21  ;;  %2397 = vmatmul.mubr.bf16.gmra.mrb[96].mxu1 %v4141_v7  ;;  %v1257_v7 = vrot.slane %v1255_v0, 1 }
 0x19a   : > { %2315 = vmatprep.mubr.bf16.mxu0 %v4454_v44  ;;  %2404 = vmatprep.mubr.bf16.mxu1 %v4213_v58 }
 0x19b   : > { %v4495_v31 = vsel %vm941_vm3, %v1253_v37, %v1257_v7 }
 0x1a1   : > { %2316 = vmatmul.mubr.bf16.gmra.mrb[104].mxu0 %v4109_v27  ;;  %2405 = vmatmul.mubr.bf16.gmra.mrb[100].mxu1 %v4176_v6 }
 0x1a2   : > { %2323 = vmatprep.mubr.bf16.mxu0 %v4486_v15  ;;  %2412 = vmatprep.mubr.bf16.mxu1 %v4261_v17 }
 0x1a3   : > { %v2850_v25 = vpop.f32.mrb[4].mxu0 }
 0x1a4   : > { %v2916_v16 = vpop.f32.mrb[0].mxu1  ;;  %v2851_v58 = vpop.f32.mrb[5].mxu0 }
 0x1a5   : > { %v2917_v26 = vpop.f32.mrb[1].mxu1  ;;  %v4492_v47 = vadd.f32 %v2851_v58, %v2850_v25  ;;  %v2853_v4 = vpop.f32.mrb[6].mxu0 }
 0x1a6   : > { %v4497_v9 = vadd.f32 %v2917_v26, %v2916_v16  ;;  %v2919_v35 = vpop.f32.mrb[2].mxu1  ;;  %v2854_v6 = vpop.f32.mrb[7].mxu0 }
 0x1a7   : > { %v2920_v3 = vpop.f32.mrb[3].mxu1  ;;  %v4499_v54 = vadd.f32 %v2854_v6, %v2853_v4 }
 0x1a8   : > { %v4501_v17 = vadd.f32 %v2920_v3, %v2919_v35 }
 0x1a9   : > { %2324 = vmatmul.mubr.bf16.gmra.mrb[108].mxu0 %v4495_v31  ;;  %2413 = vmatmul.mubr.bf16.gmra.mrb[104].mxu1 %v4224_v19 }
 0x1aa   : > { %2420 = vmatprep.mubr.bf16.mxu1 %v4285_v23  ;;  %3316 = vmatprep.mubr.bf16.mxu0 %v4229_v52 }
 0x1ab   : > { %v2856_v51 = vpop.f32.mrb[8].mxu0 }
 0x1ac   : > { %v2922_v46 = vpop.f32.mrb[4].mxu1  ;;  %v2857_v20 = vpop.f32.mrb[9].mxu0 }
 0x1ad   : > { %v2923_v33 = vpop.f32.mrb[5].mxu1  ;;  %v4507_v28 = vadd.f32 %v2857_v20, %v2856_v51  ;;  %v2859_v61 = vpop.f32.mrb[10].mxu0 }
 0x1ae   : > { %v4509_v29 = vadd.f32 %v2923_v33, %v2922_v46  ;;  %v2925_v62 = vpop.f32.mrb[6].mxu1  ;;  %v2860_v34 = vpop.f32.mrb[11].mxu0 }
 0x1af   : > { %v2926_v1 = vpop.f32.mrb[7].mxu1  ;;  %v4511_v49 = vadd.f32 %v2860_v34, %v2859_v61 }
 0x1b0   : > { %v4513_v14 = vadd.f32 %v2926_v1, %v2925_v62 }
 0x1b1   : > { %2421 = vmatmul.mubr.bf16.gmra.mrb[108].mxu1 %v4254_v10  ;;  %3317 = vmatmul.mubr.bf16.vlgmr.msra.gmra.mrb[112].mxu0 %v4270_v59 }
 0x1b2   : > { %2428 = vmatprep.mubr.bf16.mxu1 %v4316_v2  ;;  %3320 = vmatprep.mubr.bf16.mxu0 %v4302_v5 }
 0x1b4   : > { %v2862_v19 = vpop.f32.mrb[12].mxu0 }
 0x1b5   : > { %v2863_v52 = vpop.f32.mrb[13].mxu0 }
 0x1b6   : > { %v4519_v23 = vadd.f32 %v2863_v52, %v2862_v19  ;;  %v2865_v30 = vpop.f32.mrb[14].mxu0 }
 0x1b7   : > { %v2866_v0 = vpop.f32.mrb[15].mxu0 }
 0x1b8   : > { %v4521_v37 = vadd.f32 %v2866_v0, %v2865_v30 }
 0x1b9   : > { %2429 = vmatmul.mubr.bf16.gmra.mrb[112].mxu1 %v4294_v43  ;;  %3321 = vmatmul.mubr.bf16.gmra.mrb[116].mxu0 %v4325_v50 }
 0x1ba   : > { %v2928_v7 = vpop.f32.mrb[8].mxu1  ;;  %2436 = vmatprep.mubr.bf16.mxu1 %v4328_v57  ;;  %3324 = vmatprep.mubr.bf16.mxu0 %v4337_v56 }
 0x1bb   : > { %v2929_v10 = vpop.f32.mrb[9].mxu1 }
 0x1bc   : > { %v4527_v59 = vadd.f32 %v2929_v10, %v2928_v7  ;;  %v2931_v5 = vpop.f32.mrb[10].mxu1 }
 0x1bd   : > { %v2932_v2 = vpop.f32.mrb[11].mxu1 }
 0x1be   : > { %v4529_v25 = vadd.f32 %v2932_v2, %v2931_v5 }
 0x1c0   : > { %v2868_v16 = vpop.f32.mrb[16].mxu0 }
 0x1c1   : > { %2437 = vmatmul.mubr.bf16.gmra.mrb[116].mxu1 %v4311_v18  ;;  %3325 = vmatmul.mubr.bf16.gmra.mrb[120].mxu0 %v4350_v41  ;;  %v2869_v43 = vpop.f32.mrb[17].mxu0 }
 0x1c2   : > { %2444 = vmatprep.mubr.bf16.mxu1 %v3932_v13  ;;  %3328 = vmatprep.mubr.bf16.mxu0 %v4366_v42  ;;  %v4535_v50 = vadd.f32 %v2869_v43, %v2868_v16  ;;  %v2871_v57 = vpop.f32.mrb[18].mxu0  ;;  %v4550_v42 = vld [vmem:[%s4973_s5] ss:$0 sm:$0xff] }
 0x1c3   : > { %v2872_v56 = vpop.f32.mrb[19].mxu0  ;;  %v1884_v20 = vadd.f32 %v4345_v32, %v4550_v42  ;;  %v1895_v43 = vadd.f32 %v4499_v54, %v4550_v42  ;;  %v1900_v54 = vadd.f32 %v4507_v28, %v4550_v42 }
 0x1c4   : > { %v2934_v58 = vpop.f32.mrb[12].mxu1  ;;  %v4537_v26 = vadd.f32 %v2872_v56, %v2871_v57 }
 0x1c5   : > { %v2935_v4 = vpop.f32.mrb[13].mxu1 }
 0x1c6   : > { %v4539_v35 = vadd.f32 %v2935_v4, %v2934_v58  ;;  %v2937_v6 = vpop.f32.mrb[14].mxu1 }
 0x1c7   : > { %v2938_v3 = vpop.f32.mrb[15].mxu1 }
 0x1c8   : > { %v4541_v18 = vadd.f32 %v2938_v3, %v2937_v6 }
 0x1c9   : > { %2445 = vmatmul.mubr.bf16.gmra.mrb[120].mxu1 %v3905_v48  ;;  %3329 = vmatmul.mubr.bf16.gmra.mrb[124].mxu0 %v4381_v24 }
 0x1ca   : > { %2452 = vmatprep.mubr.bf16.mxu1 %v3982_v60  ;;  %3332 = vmatprep.mubr.bf16.mxu0 %v4398_v40  ;;  %v1887_v40 = vadd.f32 %v4347_v11, %v4550_v42  ;;  %v1892_v11 = vadd.f32 %v4492_v47, %v4550_v42 }
 0x1cc   : > { %v2956_v13 = vpop.f32.mrb[16].mxu1  ;;  %v2874_v41 = vpop.f32.mrb[20].mxu0 }
 0x1cd   : > { %v2957_v51 = vpop.f32.mrb[17].mxu1  ;;  %v2875_v46 = vpop.f32.mrb[21].mxu0 }
 0x1ce   : > { %v2958_v33 = vadd.f32 %v2957_v51, %v2956_v13  ;;  %v2959_v48 = vpop.f32.mrb[18].mxu1  ;;  %v4554_v61 = vadd.f32 %v2875_v46, %v2874_v41  ;;  %v2877_v24 = vpop.f32.mrb[22].mxu0  ;;  %v1903_v46 = vadd.f32 %v4511_v49, %v4550_v42  ;;  %v1908_v49 = vadd.f32 %v4519_v23, %v4550_v42 }
 0x1cf   : > { %v2960_v60 = vpop.f32.mrb[19].mxu1  ;;  %v2878_v62 = vpop.f32.mrb[23].mxu0 }
 0x1d0   : > { %v4558_v34 = vadd.f32 %v2958_v33, %v1884_v20  ;;  %v2961_v1 = vadd.f32 %v2960_v60, %v2959_v48  ;;  %v4560_v19 = vadd.f32 %v2878_v62, %v2877_v24 }
 0x1d1   : > { %2453 = vmatmul.mubr.bf16.gmra.mrb[124].mxu1 %v3944_v22  ;;  %3333 = vmatmul.mubr.bf16.gmra.mrb[128].mxu0 %v4414_v55 }
 0x1d2   : > { %v4564_v32 = vadd.f32 %v2961_v1, %v1887_v40  ;;  %2460 = vmatprep.mubr.bf16.mxu1 %v4056_v21  ;;  %3336 = vmatprep.mubr.bf16.mxu0 %v4423_v53 }
 0x1d4   : > { %v2962_v52 = vpop.f32.mrb[20].mxu1  ;;  %v2880_v30 = vpop.f32.mrb[24].mxu0 }
 0x1d5   : > { %v2963_v0 = vpop.f32.mrb[21].mxu1  ;;  %v2881_v7 = vpop.f32.mrb[25].mxu0 }
 0x1d6   : > { %v2964_v10 = vadd.f32 %v2963_v0, %v2962_v52  ;;  %v2965_v5 = vpop.f32.mrb[22].mxu1  ;;  %v4570_v2 = vadd.f32 %v2881_v7, %v2880_v30  ;;  %v2883_v22 = vpop.f32.mrb[26].mxu0  ;;  %v1911_v30 = vadd.f32 %v4521_v37, %v4550_v42  ;;  %v1916_v37 = vadd.f32 %v4535_v50, %v4550_v42 }
 0x1d7   : > { %v2966_v16 = vpop.f32.mrb[23].mxu1  ;;  %v2884_v55 = vpop.f32.mrb[27].mxu0 }
 0x1d8   : > { %v4574_v21 = vadd.f32 %v2964_v10, %v1892_v11  ;;  %v2967_v53 = vadd.f32 %v2966_v16, %v2965_v5  ;;  %v4576_v57 = vadd.f32 %v2884_v55, %v2883_v22 }
 0x1d9   : > { %2461 = vmatmul.mubr.bf16.gmra.mrb[128].mxu1 %v4017_v38  ;;  %3337 = vmatmul.mubr.bf16.gmra.mrb[132].mxu0 %v4432_v39 }
 0x1da   : > { %v4580_v47 = vadd.f32 %v2967_v53, %v1895_v43  ;;  %2468 = vmatprep.mubr.bf16.mxu1 %v4109_v27  ;;  %3340 = vmatprep.mubr.bf16.mxu0 %v4441_v12 }
 0x1dc   : > { %v2968_v56 = vpop.f32.mrb[24].mxu1  ;;  %v2886_v58 = vpop.f32.mrb[28].mxu0 }
 0x1dd   : > { %v2969_v4 = vpop.f32.mrb[25].mxu1  ;;  %v2887_v6 = vpop.f32.mrb[29].mxu0 }
 0x1de   : > { %v2970_v3 = vadd.f32 %v2969_v4, %v2968_v56  ;;  %v2971_v13 = vpop.f32.mrb[26].mxu1  ;;  %v4586_v41 = vadd.f32 %v2887_v6, %v2886_v58  ;;  %v2889_v38 = vpop.f32.mrb[30].mxu0  ;;  %v4979_v4 = vld [vmem:[#allocation2_spill] sm:$0xff] }
 0x1df   : > { %v2972_v51 = vpop.f32.mrb[27].mxu1  ;;  %v2890_v39 = vpop.f32.mrb[31].mxu0 }
 0x1e0   : > { %v4590_v27 = vadd.f32 %v2970_v3, %v1900_v54  ;;  %v2973_v12 = vadd.f32 %v2972_v51, %v2971_v13  ;;  %v4592_v20 = vadd.f32 %v2890_v39, %v2889_v38  ;;  %v1924_v38 = vadd.f32 %v4554_v61, %v4550_v42 }
 0x1e1   : > { %2469 = vmatmul.mubr.bf16.gmra.mrb[132].mxu1 %v4079_v45  ;;  %3341 = vmatmul.mubr.bf16.gmra.mrb[136].mxu0 %v4454_v44 }
 0x1e2   : > { %v4596_v28 = vadd.f32 %v2973_v12, %v1903_v46  ;;  %2476 = vmatprep.mubr.bf16.mxu1 %v4495_v31  ;;  %3344 = vmatprep.mubr.bf16.mxu0 %v4486_v15 }
 0x1e4   : > { %v2974_v33 = vpop.f32.mrb[28].mxu1  ;;  %v2892_v48 = vpop.f32.mrb[32].mxu0 }
 0x1e5   : > { %v2975_v24 = vpop.f32.mrb[29].mxu1  ;;  %v2893_v60 = vpop.f32.mrb[33].mxu0 }
 0x1e6   : > { %v2976_v62 = vadd.f32 %v2975_v24, %v2974_v33  ;;  %v2977_v40 = vpop.f32.mrb[30].mxu1  ;;  %v4602_v1 = vadd.f32 %v2893_v60, %v2892_v48  ;;  %v2895_v45 = vpop.f32.mrb[34].mxu0  ;;  %v1927_v48 = vadd.f32 %v4560_v19, %v4550_v42 }
 0x1e7   : > { %v2978_v52 = vpop.f32.mrb[31].mxu1  ;;  %v2896_v44 = vpop.f32.mrb[35].mxu0 }
 0x1e8   : > { %v4606_v31 = vadd.f32 %v2976_v62, %v1908_v49  ;;  %v2979_v15 = vadd.f32 %v2978_v52, %v2977_v40  ;;  %v4608_v0 = vadd.f32 %v2896_v44, %v2895_v45  ;;  %v1932_v44 = vadd.f32 %v4570_v2, %v4550_v42 }
 0x1e9   : > { %2477 = vmatmul.mubr.bf16.gmra.mrb[136].mxu1 %v4445_v8  ;;  %3345 = vmatmul.mubr.bf16.gmra.mrb[140].mxu0 %v4127_v63  ;;  %v1919_v63 = vadd.f32 %v4537_v26, %v4550_v42 }
 0x1ea   : > { %v4612_v23 = vadd.f32 %v2979_v15, %v1911_v30  ;;  %2484 = vmatprep.mubr.bf16.mxu1 %v3578_v36 }
 0x1ec   : > { %v2980_v7 = vpop.f32.mrb[32].mxu1  ;;  %v2898_v11 = vpop.f32.mrb[36].mxu0 }
 0x1ed   : > { %v2981_v10 = vpop.f32.mrb[33].mxu1  ;;  %v2899_v5 = vpop.f32.mrb[37].mxu0 }
 0x1ee   : > { %v2982_v22 = vadd.f32 %v2981_v10, %v2980_v7  ;;  %v2983_v16 = vpop.f32.mrb[34].mxu1  ;;  %v4617_v55 = vadd.f32 %v2899_v5, %v2898_v11  ;;  %v2901_v43 = vpop.f32.mrb[38].mxu0  ;;  %v1935_v5 = vadd.f32 %v4576_v57, %v4550_v42  ;;  %v1943_v57 = vadd.f32 %v4592_v20, %v4550_v42 }
 0x1ef   : > { %v2984_v53 = vpop.f32.mrb[35].mxu1  ;;  %v2902_v8 = vpop.f32.mrb[39].mxu0  ;;  %v1948_v20 = vadd.f32 %v4602_v1, %v4550_v42 }
 0x1f0   : > { %v4621_v56 = vadd.f32 %v2982_v22, %v1916_v37  ;;  %v2985_v36 = vadd.f32 %v2984_v53, %v2983_v16  ;;  %v4623_v58 = vadd.f32 %v2902_v8, %v2901_v43 }
 0x1f1   : > { %2485 = vmatmul.mubr.bf16.gmra.mrb[140].mxu1 %v4979_v4 }
 0x1f2   : > { %v4626_v6 = vadd.f32 %v2985_v36, %v1919_v63  ;;  %v1940_v36 = vadd.f32 %v4586_v41, %v4550_v42 }
 0x1f4   : > { %v2986_v50 = vpop.f32.mrb[36].mxu1  ;;  %v2904_v54 = vpop.f32.mrb[40].mxu0 }
 0x1f5   : > { %v2987_v3 = vpop.f32.mrb[37].mxu1  ;;  %v2905_v13 = vpop.f32.mrb[41].mxu0 }
 0x1f6   : > { %v2988_v51 = vadd.f32 %v2987_v3, %v2986_v50  ;;  %v2989_v39 = vpop.f32.mrb[38].mxu1  ;;  %v4630_v46 = vadd.f32 %v2905_v13, %v2904_v54  ;;  %v2907_v26 = vpop.f32.mrb[42].mxu0 }
 0x1f7   : > { %v2990_v12 = vpop.f32.mrb[39].mxu1  ;;  %v2908_v33 = vpop.f32.mrb[43].mxu0 }
 0x1f8   : > { %v4634_v24 = vadd.f32 %v2988_v51, %v1924_v38  ;;  %v2991_v60 = vadd.f32 %v2990_v12, %v2989_v39  ;;  %v4636_v49 = vadd.f32 %v2908_v33, %v2907_v26 }
 0x1fa   : > { %v4638_v62 = vadd.f32 %v2991_v60, %v1927_v48 }
 0x1fc   : > { %v2992_v40 = vpop.f32.mrb[40].mxu1  ;;  %v2910_v45 = vpop.f32.mrb[44].mxu0 }
 0x1fd   : > { %v2993_v61 = vpop.f32.mrb[41].mxu1  ;;  %v2911_v52 = vpop.f32.mrb[45].mxu0 }
 0x1fe   : > { %v2994_v30 = vadd.f32 %v2993_v61, %v2992_v40  ;;  %v2995_v15 = vpop.f32.mrb[42].mxu1  ;;  %v4642_v7 = vadd.f32 %v2911_v52, %v2910_v45  ;;  %v2913_v11 = vpop.f32.mrb[46].mxu0 }
 0x1ff   : > { %v2996_v19 = vpop.f32.mrb[43].mxu1  ;;  %v2914_v10 = vpop.f32.mrb[47].mxu0 }
 0x200   : > { %v4646_v37 = vadd.f32 %v2994_v30, %v1932_v44  ;;  %v2997_v22 = vadd.f32 %v2996_v19, %v2995_v15  ;;  %v4648_v16 = vadd.f32 %v2914_v10, %v2913_v11 }
 0x202   : > { %v4650_v43 = vadd.f32 %v2997_v22, %v1935_v5 }
 0x204   : > { %v2998_v53 = vpop.f32.mrb[44].mxu1  ;;  %v3068_v8 = vpop.f32.mrb[48].mxu0 }
 0x205   : > { %v2999_v2 = vpop.f32.mrb[45].mxu1  ;;  %v3069_v63 = vpop.f32.mrb[49].mxu0 }
 0x206   : > { %v3000_v4 = vadd.f32 %v2999_v2, %v2998_v53  ;;  %v3070_v50 = vadd.f32 %v3069_v63, %v3068_v8  ;;  %v3001_v54 = vpop.f32.mrb[46].mxu1  ;;  %v3071_v3 = vpop.f32.mrb[50].mxu0 }
 0x207   : > { %v3002_v13 = vpop.f32.mrb[47].mxu1  ;;  %v3072_v38 = vpop.f32.mrb[51].mxu0 }
 0x208   : > { %v4656_v51 = vadd.f32 %v3000_v4, %v1940_v36  ;;  %v4659_v39 = vadd.f32 %v3070_v50, %v4558_v34  ;;  %v3003_v26 = vadd.f32 %v3002_v13, %v3001_v54  ;;  %v3073_v12 = vadd.f32 %v3072_v38, %v3071_v3 }
 0x209   : > { %v1951_v34 = vadd.f32 %v4608_v0, %v4550_v42  ;;  %v1956_v0 = vadd.f32 %v4617_v55, %v4550_v42 }
 0x20a   : > { %v4661_v33 = vadd.f32 %v3003_v26, %v1943_v57  ;;  %v4664_v41 = vadd.f32 %v3073_v12, %v4564_v32 }
 0x20c   : > { %v3004_v48 = vpop.f32.mrb[48].mxu1  ;;  %v3074_v60 = vpop.f32.mrb[52].mxu0 }
 0x20d   : > { %v3005_v40 = vpop.f32.mrb[49].mxu1  ;;  %v3075_v45 = vpop.f32.mrb[53].mxu0 }
 0x20e   : > { %v3006_v61 = vadd.f32 %v3005_v40, %v3004_v48  ;;  %v3076_v52 = vadd.f32 %v3075_v45, %v3074_v60  ;;  %v3007_v44 = vpop.f32.mrb[50].mxu1  ;;  %v3077_v30 = vpop.f32.mrb[54].mxu0 }
 0x20f   : > { %v3008_v15 = vpop.f32.mrb[51].mxu1  ;;  %v3078_v11 = vpop.f32.mrb[55].mxu0 }
 0x210   : > { %v4670_v19 = vadd.f32 %v3006_v61, %v1948_v20  ;;  %v4673_v32 = vadd.f32 %v3076_v52, %v4574_v21  ;;  %v3009_v10 = vadd.f32 %v3008_v15, %v3007_v44  ;;  %v3079_v5 = vadd.f32 %v3078_v11, %v3077_v30 }
 0x211   : > { %v1959_v21 = vadd.f32 %v4623_v58, %v4550_v42  ;;  %v1964_v58 = vadd.f32 %v4630_v46, %v4550_v42 }
 0x212   : > { %v4675_v22 = vadd.f32 %v3009_v10, %v1951_v34  ;;  %v4678_v1 = vadd.f32 %v3079_v5, %v4580_v47 }
 0x214   : > { %v3010_v53 = vpop.f32.mrb[52].mxu1  ;;  %v3080_v8 = vpop.f32.mrb[56].mxu0 }
 0x215   : > { %v3011_v2 = vpop.f32.mrb[53].mxu1  ;;  %v3081_v63 = vpop.f32.mrb[57].mxu0 }
 0x216   : > { %v3012_v36 = vadd.f32 %v3011_v2, %v3010_v53  ;;  %v3082_v4 = vadd.f32 %v3081_v63, %v3080_v8  ;;  %v3013_v50 = vpop.f32.mrb[54].mxu1  ;;  %v3083_v54 = vpop.f32.mrb[58].mxu0 }
 0x217   : > { %v3014_v3 = vpop.f32.mrb[55].mxu1  ;;  %v3084_v57 = vpop.f32.mrb[59].mxu0 }
 0x218   : > { %v4684_v13 = vadd.f32 %v3012_v36, %v1956_v0  ;;  %v4687_v47 = vadd.f32 %v3082_v4, %v4590_v27  ;;  %v3015_v38 = vadd.f32 %v3014_v3, %v3013_v50  ;;  %v3085_v26 = vadd.f32 %v3084_v57, %v3083_v54 }
 0x219   : > { %v1967_v27 = vadd.f32 %v4636_v49, %v4550_v42  ;;  %v1972_v49 = vadd.f32 %v4642_v7, %v4550_v42 }
 0x21a   : > { %v4689_v12 = vadd.f32 %v3015_v38, %v1959_v21  ;;  %v4692_v55 = vadd.f32 %v3085_v26, %v4596_v28 }
 0x21c   : > { %v3016_v48 = vpop.f32.mrb[56].mxu1  ;;  %v3086_v60 = vpop.f32.mrb[60].mxu0 }
 0x21d   : > { %v3017_v40 = vpop.f32.mrb[57].mxu1  ;;  %v3087_v45 = vpop.f32.mrb[61].mxu0 }
 0x21e   : > { %v3018_v20 = vadd.f32 %v3017_v40, %v3016_v48  ;;  %v3088_v61 = vadd.f32 %v3087_v45, %v3086_v60  ;;  %v3019_v52 = vpop.f32.mrb[58].mxu1  ;;  %v3089_v44 = vpop.f32.mrb[62].mxu0 }
 0x21f   : > { %v3020_v30 = vpop.f32.mrb[59].mxu1  ;;  %v3090_v34 = vpop.f32.mrb[63].mxu0 }
 0x220   : > { %v4698_v15 = vadd.f32 %v3018_v20, %v1964_v58  ;;  %v4701_v28 = vadd.f32 %v3088_v61, %v4606_v31  ;;  %v3021_v11 = vadd.f32 %v3020_v30, %v3019_v52  ;;  %v3091_v10 = vadd.f32 %v3090_v34, %v3089_v44 }
 0x221   : > { %v1975_v31 = vadd.f32 %v4648_v16, %v4550_v42  ;;  %v1980_v16 = vadd.f32 %v4497_v9, %v4550_v42 }
 0x222   : > { %v4703_v5 = vadd.f32 %v3021_v11, %v1967_v27  ;;  %v4706_v46 = vadd.f32 %v3091_v10, %v4612_v23 }
 0x224   : > { %v3022_v53 = vpop.f32.mrb[60].mxu1  ;;  %v3092_v8 = vpop.f32.mrb[64].mxu0 }
 0x225   : > { %v3023_v2 = vpop.f32.mrb[61].mxu1  ;;  %v3093_v63 = vpop.f32.mrb[65].mxu0 }
 0x226   : > { %v3024_v0 = vadd.f32 %v3023_v2, %v3022_v53  ;;  %v3094_v36 = vadd.f32 %v3093_v63, %v3092_v8  ;;  %v3025_v4 = vpop.f32.mrb[62].mxu1  ;;  %v3095_v50 = vpop.f32.mrb[66].mxu0 }
 0x227   : > { %v3026_v54 = vpop.f32.mrb[63].mxu1  ;;  %v3096_v21 = vpop.f32.mrb[67].mxu0 }
 0x228   : > { %v4712_v3 = vadd.f32 %v3024_v0, %v1972_v49  ;;  %v4715_v23 = vadd.f32 %v3094_v36, %v4621_v56  ;;  %v3027_v57 = vadd.f32 %v3026_v54, %v3025_v4  ;;  %v3097_v38 = vadd.f32 %v3096_v21, %v3095_v50 }
 0x229   : > { %v1983_v56 = vadd.f32 %v4501_v17, %v4550_v42  ;;  %v1988_v17 = vadd.f32 %v4509_v29, %v4550_v42 }
 0x22a   : > { %v4717_v26 = vadd.f32 %v3027_v57, %v1975_v31  ;;  %v4720_v7 = vadd.f32 %v3097_v38, %v4626_v6 }
 0x22c   : > { %v3028_v48 = vpop.f32.mrb[64].mxu1  ;;  %v3098_v60 = vpop.f32.mrb[68].mxu0 }
 0x22d   : > { %v3029_v40 = vpop.f32.mrb[65].mxu1  ;;  %v3099_v45 = vpop.f32.mrb[69].mxu0 }
 0x22e   : > { %v3030_v58 = vadd.f32 %v3029_v40, %v3028_v48  ;;  %v3100_v20 = vadd.f32 %v3099_v45, %v3098_v60  ;;  %v3031_v61 = vpop.f32.mrb[66].mxu1  ;;  %v3101_v52 = vpop.f32.mrb[70].mxu0 }
 0x22f   : > { %v3032_v44 = vpop.f32.mrb[67].mxu1  ;;  %v3102_v27 = vpop.f32.mrb[71].mxu0 }
 0x230   : > { %v4726_v30 = vadd.f32 %v3030_v58, %v1980_v16  ;;  %v4729_v6 = vadd.f32 %v3100_v20, %v4634_v24  ;;  %v3033_v34 = vadd.f32 %v3032_v44, %v3031_v61  ;;  %v3103_v11 = vadd.f32 %v3102_v27, %v3101_v52 }
 0x231   : > { %v1991_v24 = vadd.f32 %v4513_v14, %v4550_v42  ;;  %v1996_v14 = vadd.f32 %v4527_v59, %v4550_v42 }
 0x232   : > { %v4731_v10 = vadd.f32 %v3033_v34, %v1983_v56  ;;  %v4734_v9 = vadd.f32 %v3103_v11, %v4638_v62 }
 0x234   : > { %v3034_v53 = vpop.f32.mrb[68].mxu1  ;;  %v3104_v8 = vpop.f32.mrb[72].mxu0 }
 0x235   : > { %v3035_v2 = vpop.f32.mrb[69].mxu1  ;;  %v3105_v63 = vpop.f32.mrb[73].mxu0 }
 0x236   : > { %v3036_v49 = vadd.f32 %v3035_v2, %v3034_v53  ;;  %v3106_v0 = vadd.f32 %v3105_v63, %v3104_v8  ;;  %v3037_v36 = vpop.f32.mrb[70].mxu1  ;;  %v3107_v4 = vpop.f32.mrb[74].mxu0 }
 0x237   : > { %v3038_v50 = vpop.f32.mrb[71].mxu1  ;;  %v3108_v31 = vpop.f32.mrb[75].mxu0 }
 0x238   : > { %v4740_v54 = vadd.f32 %v3036_v49, %v1988_v17  ;;  %v4743_v62 = vadd.f32 %v3106_v0, %v4646_v37  ;;  %v3039_v21 = vadd.f32 %v3038_v50, %v3037_v36  ;;  %v3109_v57 = vadd.f32 %v3108_v31, %v3107_v4 }
 0x239   : > { %v1999_v37 = vadd.f32 %v4529_v25, %v4550_v42  ;;  %v2004_v25 = vadd.f32 %v4539_v35, %v4550_v42 }
 0x23a   : > { %v4745_v38 = vadd.f32 %v3039_v21, %v1991_v24  ;;  %v4748_v29 = vadd.f32 %v3109_v57, %v4650_v43 }
 0x23c   : > { %v3040_v48 = vpop.f32.mrb[72].mxu1  ;;  %v3110_v60 = vpop.f32.mrb[76].mxu0 }
 0x23d   : > { %v3041_v40 = vpop.f32.mrb[73].mxu1  ;;  %v3111_v45 = vpop.f32.mrb[77].mxu0 }
 0x23e   : > { %v3042_v16 = vadd.f32 %v3041_v40, %v3040_v48  ;;  %v3112_v58 = vadd.f32 %v3111_v45, %v3110_v60  ;;  %v3043_v20 = vpop.f32.mrb[74].mxu1  ;;  %v3113_v61 = vpop.f32.mrb[78].mxu0 }
 0x23f   : > { %v3044_v52 = vpop.f32.mrb[75].mxu1  ;;  %v3114_v56 = vpop.f32.mrb[79].mxu0 }
 0x240   : > { %v4754_v44 = vadd.f32 %v3042_v16, %v1996_v14  ;;  %v4757_v43 = vadd.f32 %v3112_v58, %v4656_v51  ;;  %v3045_v27 = vadd.f32 %v3044_v52, %v3043_v20  ;;  %v3115_v34 = vadd.f32 %v3114_v56, %v3113_v61 }
 0x241   : > { %v2007_v51 = vadd.f32 %v4541_v18, %v4550_v42 }
 0x242   : > { %v4759_v11 = vadd.f32 %v3045_v27, %v1999_v37  ;;  %v4762_v59 = vadd.f32 %v3115_v34, %v4661_v33 }
 0x244   : > { %v3046_v53 = vpop.f32.mrb[76].mxu1  ;;  %v3116_v8 = vpop.f32.mrb[80].mxu0 }
 0x245   : > { %v3047_v2 = vpop.f32.mrb[77].mxu1  ;;  %v3117_v63 = vpop.f32.mrb[81].mxu0 }
 0x246   : > { %v3048_v17 = vadd.f32 %v3047_v2, %v3046_v53  ;;  %v3118_v49 = vadd.f32 %v3117_v63, %v3116_v8  ;;  %v3049_v0 = vpop.f32.mrb[78].mxu1  ;;  %v3119_v36 = vpop.f32.mrb[82].mxu0 }
 0x247   : > { %v3050_v4 = vpop.f32.mrb[79].mxu1  ;;  %v3120_v24 = vpop.f32.mrb[83].mxu0 }
 0x248   : > { %v4768_v50 = vadd.f32 %v3048_v17, %v2004_v25  ;;  %v4771_v33 = vadd.f32 %v3118_v49, %v4670_v19  ;;  %v3051_v31 = vadd.f32 %v3050_v4, %v3049_v0  ;;  %v3121_v21 = vadd.f32 %v3120_v24, %v3119_v36 }
 0x24a   : > { %v4773_v57 = vadd.f32 %v3051_v31, %v2007_v51  ;;  %v4776_v35 = vadd.f32 %v3121_v21, %v4675_v22 }
 0x24c   : > { %v3122_v48 = vpop.f32.mrb[84].mxu0  ;;  %v3180_v60 = vpop.f32.mrb[80].mxu1 }
 0x24d   : > { %v3123_v40 = vpop.f32.mrb[85].mxu0  ;;  %v3181_v45 = vpop.f32.mrb[81].mxu1 }
 0x24e   : > { %v3124_v14 = vadd.f32 %v3123_v40, %v3122_v48  ;;  %v3182_v18 = vadd.f32 %v3181_v45, %v3180_v60  ;;  %v3125_v42 = vpop.f32.mrb[86].mxu0  ;;  %v3183_v16 = vpop.f32.mrb[82].mxu1 }
 0x24f   : > { %v3126_v58 = vpop.f32.mrb[87].mxu0  ;;  %v3184_v20 = vpop.f32.mrb[83].mxu1 }
 0x250   : > { %v4779_v19 = vadd.f32 %v3124_v14, %v4684_v13  ;;  %v3127_v61 = vadd.f32 %v3126_v58, %v3125_v42  ;;  %v3185_v37 = vadd.f32 %v3184_v20, %v3183_v16  ;;  %v4782_v52 = vadd.f32 %v3182_v18, %v4659_v39 }
 0x252   : > { %v4785_v22 = vadd.f32 %v3127_v61, %v4689_v12  ;;  %v4788_v56 = vadd.f32 %v3185_v37, %v4664_v41 }
 0x254   : > { %v3128_v27 = vpop.f32.mrb[88].mxu0  ;;  %v3186_v34 = vpop.f32.mrb[84].mxu1 }
 0x255   : > { %v3129_v53 = vpop.f32.mrb[89].mxu0  ;;  %v3187_v8 = vpop.f32.mrb[85].mxu1 }
 0x256   : > { %v3130_v2 = vadd.f32 %v3129_v53, %v3128_v27  ;;  %v3188_v63 = vadd.f32 %v3187_v8, %v3186_v34  ;;  %v3131_v25 = vpop.f32.mrb[90].mxu0  ;;  %v3189_v13 = vpop.f32.mrb[86].mxu1 }
 0x257   : > { %v3132_v17 = vpop.f32.mrb[91].mxu0  ;;  %v3190_v49 = vpop.f32.mrb[87].mxu1 }
 0x258   : > { %v4791_v0 = vadd.f32 %v3130_v2, %v4698_v15  ;;  %v3133_v39 = vadd.f32 %v3132_v17, %v3131_v25  ;;  %v3191_v36 = vadd.f32 %v3190_v49, %v3189_v13  ;;  %v4794_v12 = vadd.f32 %v3188_v63, %v4673_v32 }
 0x25a   : > { %v4797_v41 = vadd.f32 %v3133_v39, %v4703_v5  ;;  %v4800_v51 = vadd.f32 %v3191_v36, %v4678_v1 }
 0x25c   : > { %v3134_v4 = vpop.f32.mrb[92].mxu0  ;;  %v3192_v24 = vpop.f32.mrb[88].mxu1 }
 0x25d   : > { %v3135_v31 = vpop.f32.mrb[93].mxu0  ;;  %v3193_v21 = vpop.f32.mrb[89].mxu1 }
 0x25e   : > { %v3136_v48 = vadd.f32 %v3135_v31, %v3134_v4  ;;  %v3194_v60 = vadd.f32 %v3193_v21, %v3192_v24  ;;  %v3137_v40 = vpop.f32.mrb[94].mxu0  ;;  %v3195_v15 = vpop.f32.mrb[90].mxu1 }
 0x25f   : > { %v3138_v45 = vpop.f32.mrb[95].mxu0  ;;  %v3196_v14 = vpop.f32.mrb[91].mxu1 }
 0x260   : > { %v4803_v18 = vadd.f32 %v3136_v48, %v4712_v3  ;;  %v3139_v32 = vadd.f32 %v3138_v45, %v3137_v40  ;;  %v3197_v42 = vadd.f32 %v3196_v14, %v3195_v15  ;;  %v4806_v5 = vadd.f32 %v3194_v60, %v4687_v47 }
 0x262   : > { %v4809_v1 = vadd.f32 %v3139_v32, %v4717_v26  ;;  %v4812_v16 = vadd.f32 %v3197_v42, %v4692_v55 }
 0x264   : > { %v3140_v58 = vpop.f32.mrb[96].mxu0  ;;  %v3198_v20 = vpop.f32.mrb[92].mxu1 }
 0x265   : > { %v3141_v61 = vpop.f32.mrb[97].mxu0  ;;  %v3199_v37 = vpop.f32.mrb[93].mxu1 }
 0x266   : > { %v3142_v27 = vadd.f32 %v3141_v61, %v3140_v58  ;;  %v3200_v34 = vadd.f32 %v3199_v37, %v3198_v20  ;;  %v3143_v53 = vpop.f32.mrb[98].mxu0  ;;  %v3201_v3 = vpop.f32.mrb[94].mxu1 }
 0x267   : > { %v3144_v8 = vpop.f32.mrb[99].mxu0  ;;  %v3202_v2 = vpop.f32.mrb[95].mxu1 }
 0x268   : > { %v4815_v63 = vadd.f32 %v3142_v27, %v4726_v30  ;;  %v3145_v47 = vadd.f32 %v3144_v8, %v3143_v53  ;;  %v3203_v25 = vadd.f32 %v3202_v2, %v3201_v3  ;;  %v4818_v26 = vadd.f32 %v3200_v34, %v4701_v28 }
 0x26a   : > { %v4821_v55 = vadd.f32 %v3145_v47, %v4731_v10  ;;  %v4824_v13 = vadd.f32 %v3203_v25, %v4706_v46 }
 0x26c   : > { %v3146_v17 = vpop.f32.mrb[100].mxu0  ;;  %v3204_v49 = vpop.f32.mrb[96].mxu1 }
 0x26d   : > { %v3147_v39 = vpop.f32.mrb[101].mxu0  ;;  %v3205_v36 = vpop.f32.mrb[97].mxu1 }
 0x26e   : > { %v3148_v4 = vadd.f32 %v3147_v39, %v3146_v17  ;;  %v3206_v24 = vadd.f32 %v3205_v36, %v3204_v49  ;;  %v3149_v31 = vpop.f32.mrb[102].mxu0  ;;  %v3207_v30 = vpop.f32.mrb[98].mxu1 }
 0x26f   : > { %v3150_v21 = vpop.f32.mrb[103].mxu0  ;;  %v3208_v48 = vpop.f32.mrb[99].mxu1 }
 0x270   : > { %v4827_v60 = vadd.f32 %v3148_v4, %v4740_v54  ;;  %v3151_v28 = vadd.f32 %v3150_v21, %v3149_v31  ;;  %v3209_v40 = vadd.f32 %v3208_v48, %v3207_v30  ;;  %v4830_v10 = vadd.f32 %v3206_v24, %v4715_v23 }
 0x272   : > { %v4833_v46 = vadd.f32 %v3151_v28, %v4745_v38  ;;  %v4836_v15 = vadd.f32 %v3209_v40, %v4720_v7 }
 0x274   : > { %v3152_v45 = vpop.f32.mrb[104].mxu0  ;;  %v3210_v14 = vpop.f32.mrb[100].mxu1 }
 0x275   : > { %v3153_v32 = vpop.f32.mrb[105].mxu0  ;;  %v3211_v42 = vpop.f32.mrb[101].mxu1 }
 0x276   : > { %v3154_v58 = vadd.f32 %v3153_v32, %v3152_v45  ;;  %v3212_v20 = vadd.f32 %v3211_v42, %v3210_v14  ;;  %v3155_v61 = vpop.f32.mrb[106].mxu0  ;;  %v3213_v54 = vpop.f32.mrb[102].mxu1 }
 0x277   : > { %v3156_v37 = vpop.f32.mrb[107].mxu0  ;;  %v3214_v27 = vpop.f32.mrb[103].mxu1 }
 0x278   : > { %v4839_v34 = vadd.f32 %v3154_v58, %v4754_v44  ;;  %v3157_v23 = vadd.f32 %v3156_v37, %v3155_v61  ;;  %v3215_v53 = vadd.f32 %v3214_v27, %v3213_v54  ;;  %v4842_v38 = vadd.f32 %v3212_v20, %v4729_v6 }
 0x27a   : > { %v4845_v7 = vadd.f32 %v3157_v23, %v4759_v11  ;;  %v4848_v3 = vadd.f32 %v3215_v53, %v4734_v9 }
 0x27c   : > { %v3158_v8 = vpop.f32.mrb[108].mxu0  ;;  %v3216_v2 = vpop.f32.mrb[104].mxu1 }
 0x27d   : > { %v3159_v47 = vpop.f32.mrb[109].mxu0  ;;  %v3217_v25 = vpop.f32.mrb[105].mxu1 }
 0x27e   : > { %v3160_v17 = vadd.f32 %v3159_v47, %v3158_v8  ;;  %v3218_v49 = vadd.f32 %v3217_v25, %v3216_v2  ;;  %v3161_v44 = vpop.f32.mrb[110].mxu0  ;;  %v3219_v39 = vpop.f32.mrb[106].mxu1 }
 0x27f   : > { %v3162_v36 = vpop.f32.mrb[111].mxu0  ;;  %v3220_v4 = vpop.f32.mrb[107].mxu1 }
 0x280   : > { %v4851_v6 = vadd.f32 %v3160_v17, %v4768_v50  ;;  %v3163_v24 = vadd.f32 %v3162_v36, %v3161_v44  ;;  %v3221_v11 = vadd.f32 %v3220_v4, %v3219_v39  ;;  %v4854_v31 = vadd.f32 %v3218_v49, %v4743_v62 }
 0x282   : > { %v4857_v9 = vadd.f32 %v3163_v24, %v4773_v57  ;;  %v4860_v30 = vadd.f32 %v3221_v11, %v4748_v29 }
 0x284   : > { %v3222_v21 = vpop.f32.mrb[108].mxu1  ;;  %v3318_v50 = vpop.f32.mrb[112].mxu0 }
 0x285   : > { %v2536_v62 = vadd.f32 %v3318_v50, %v4794_v12  ;;  %v3223_v57 = vpop.f32.mrb[109].mxu1  ;;  %v2527_v48 = vpop.f32.mrb[113].mxu0 }
 0x286   : > { %v3224_v28 = vadd.f32 %v3223_v57, %v3222_v21  ;;  %v2528_v29 = vadd.f32 %v2527_v48, %v4782_v52  ;;  %v3225_v40 = vpop.f32.mrb[110].mxu1  ;;  %v3319_v45 = vpop.f32.mrb[114].mxu0 }
 0x287   : > { %2657 = vst.msk [vmem:[%s4867_s28 + $0x10] sm:$0xff] %vm2654_vm2, %v2536_v62  ;;  %v2539_v14 = vadd.f32 %v3319_v45, %v4800_v51  ;;  %v3226_v32 = vpop.f32.mrb[111].mxu1  ;;  %v2530_v42 = vpop.f32.mrb[115].mxu0 }
 0x288   : > { %2655 = vst.msk [vmem:[%s4867_s28] sm:$0xff] %vm2654_vm2, %v2528_v29  ;;  %v3227_v58 = vadd.f32 %v3226_v32, %v3225_v40  ;;  %v2531_v12 = vadd.f32 %v2530_v42, %v4788_v56  ;;  %v2423_v20 = vadd.f32 %v3224_v28, %v4757_v43 }
 0x289   : > { %2658 = vst.msk [vmem:[%s4867_s28 + $0x18] sm:$0xff] %vm2654_vm2, %v2539_v14 }
 0x28a   : > { %2656 = vst.msk [vmem:[%s4867_s28 + $0x8] sm:$0xff] %vm2654_vm2, %v2531_v12  ;;  %v2426_v52 = vadd.f32 %v3227_v58, %v4762_v59 }
 0x28c   : > { %v3228_v61 = vpop.f32.mrb[112].mxu1  ;;  %v3322_v54 = vpop.f32.mrb[116].mxu0 }
 0x28d   : > { %v2552_v51 = vadd.f32 %v3322_v54, %v4818_v26  ;;  %v3229_v37 = vpop.f32.mrb[113].mxu1  ;;  %v2543_v27 = vpop.f32.mrb[117].mxu0 }
 0x28e   : > { %v3230_v23 = vadd.f32 %v3229_v37, %v3228_v61  ;;  %v2544_v56 = vadd.f32 %v2543_v27, %v4806_v5  ;;  %v3231_v53 = vpop.f32.mrb[114].mxu1  ;;  %v3323_v43 = vpop.f32.mrb[118].mxu0 }
 0x28f   : > { %2661 = vst.msk [vmem:[%s4867_s28 + $0x30] sm:$0xff] %vm2654_vm2, %v2552_v51  ;;  %v2555_v8 = vadd.f32 %v3323_v43, %v4824_v13  ;;  %v3232_v2 = vpop.f32.mrb[115].mxu1  ;;  %v2546_v47 = vpop.f32.mrb[119].mxu0 }
 0x290   : > { %2659 = vst.msk [vmem:[%s4867_s28 + $0x20] sm:$0xff] %vm2654_vm2, %v2544_v56  ;;  %v3233_v59 = vadd.f32 %v3232_v2, %v3231_v53  ;;  %v2547_v26 = vadd.f32 %v2546_v47, %v4812_v16  ;;  %v2431_v25 = vadd.f32 %v3230_v23, %v4771_v33 }
 0x291   : > { %2662 = vst.msk [vmem:[%s4867_s28 + $0x38] sm:$0xff] %vm2654_vm2, %v2555_v8 }
 0x292   : > { %2660 = vst.msk [vmem:[%s4867_s28 + $0x28] sm:$0xff] %vm2654_vm2, %v2547_v26  ;;  %v2434_v5 = vadd.f32 %v3233_v59, %v4776_v35 }
 0x294   : > { %v3234_v17 = vpop.f32.mrb[116].mxu1  ;;  %v3326_v49 = vpop.f32.mrb[120].mxu0 }
 0x295   : > { %v2568_v13 = vadd.f32 %v3326_v49, %v4842_v38  ;;  %v3235_v44 = vpop.f32.mrb[117].mxu1  ;;  %v2559_v39 = vpop.f32.mrb[121].mxu0 }
 0x296   : > { %v3236_v36 = vadd.f32 %v3235_v44, %v3234_v17  ;;  %v2560_v16 = vadd.f32 %v2559_v39, %v4830_v10  ;;  %v3237_v4 = vpop.f32.mrb[118].mxu1  ;;  %v3327_v33 = vpop.f32.mrb[122].mxu0 }
 0x297   : > { %2665 = vst.msk [vmem:[%s4867_s28 + $0x50] sm:$0xff] %vm2654_vm2, %v2568_v13  ;;  %v2571_v24 = vadd.f32 %v3327_v33, %v4848_v3  ;;  %v3238_v11 = vpop.f32.mrb[119].mxu1  ;;  %v2562_v21 = vpop.f32.mrb[123].mxu0 }
 0x298   : > { %2663 = vst.msk [vmem:[%s4867_s28 + $0x40] sm:$0xff] %vm2654_vm2, %v2560_v16  ;;  %v3239_v35 = vadd.f32 %v3238_v11, %v3237_v4  ;;  %v2563_v38 = vadd.f32 %v2562_v21, %v4836_v15  ;;  %v2439_v50 = vadd.f32 %v3236_v36, %v4779_v19 }
 0x299   : > { %2666 = vst.msk [vmem:[%s4867_s28 + $0x58] sm:$0xff] %vm2654_vm2, %v2571_v24 }
 0x29a   : > { %2664 = vst.msk [vmem:[%s4867_s28 + $0x48] sm:$0xff] %vm2654_vm2, %v2563_v38  ;;  %v2442_v10 = vadd.f32 %v3239_v35, %v4785_v22 }
 0x29c   : > { %v3240_v62 = vpop.f32.mrb[120].mxu1  ;;  %v3330_v57 = vpop.f32.mrb[124].mxu0 }
 0x29d   : > { %v2584_v3 = vadd.f32 %v3330_v57, %v2423_v20  ;;  %v3241_v48 = vpop.f32.mrb[121].mxu1  ;;  %v2575_v28 = vpop.f32.mrb[125].mxu0 }
 0x29e   : > { %v3242_v29 = vadd.f32 %v3241_v48, %v3240_v62  ;;  %v2576_v40 = vadd.f32 %v2575_v28, %v4854_v31  ;;  %v3243_v15 = vpop.f32.mrb[122].mxu1  ;;  %v3331_v45 = vpop.f32.mrb[126].mxu0 }
 0x29f   : > { %2669 = vst.msk [vmem:[%s4867_s28 + $0x70] sm:$0xff] %vm2654_vm2, %v2584_v3  ;;  %v2587_v19 = vadd.f32 %v3331_v45, %v2426_v52  ;;  %v3244_v14 = vpop.f32.mrb[123].mxu1  ;;  %v2578_v32 = vpop.f32.mrb[127].mxu0 }
 0x2a0   : > { %2667 = vst.msk [vmem:[%s4867_s28 + $0x60] sm:$0xff] %vm2654_vm2, %v2576_v40  ;;  %v3245_v22 = vadd.f32 %v3244_v14, %v3243_v15  ;;  %v2579_v42 = vadd.f32 %v2578_v32, %v4860_v30  ;;  %v2447_v58 = vadd.f32 %v3242_v29, %v4791_v0 }
 0x2a1   : > { %2670 = vst.msk [vmem:[%s4867_s28 + $0x78] sm:$0xff] %vm2654_vm2, %v2587_v19 }
 0x2a2   : > { %2668 = vst.msk [vmem:[%s4867_s28 + $0x68] sm:$0xff] %vm2654_vm2, %v2579_v42  ;;  %v2450_v31 = vadd.f32 %v3245_v22, %v4797_v41 }
 0x2a4   : > { %v3246_v12 = vpop.f32.mrb[124].mxu1  ;;  %v3334_v20 = vpop.f32.mrb[128].mxu0 }
 0x2a5   : > { %v2600_v52 = vadd.f32 %v3334_v20, %v2439_v50  ;;  %v3247_v61 = vpop.f32.mrb[125].mxu1  ;;  %v2591_v54 = vpop.f32.mrb[129].mxu0 }
 0x2a6   : > { %v3248_v51 = vadd.f32 %v3247_v61, %v3246_v12  ;;  %v2592_v37 = vadd.f32 %v2591_v54, %v2431_v25  ;;  %v3249_v27 = vpop.f32.mrb[126].mxu1  ;;  %v3335_v30 = vpop.f32.mrb[130].mxu0 }
 0x2a7   : > { %2673 = vst.msk [vmem:[%s4867_s28 + $0x90] sm:$0xff] %vm2654_vm2, %v2600_v52  ;;  %v2603_v0 = vadd.f32 %v3335_v30, %v2442_v10  ;;  %v3250_v23 = vpop.f32.mrb[127].mxu1  ;;  %v2594_v56 = vpop.f32.mrb[131].mxu0 }
 0x2a8   : > { %2671 = vst.msk [vmem:[%s4867_s28 + $0x80] sm:$0xff] %vm2654_vm2, %v2592_v37  ;;  %v3251_v41 = vadd.f32 %v3250_v23, %v3249_v27  ;;  %v2595_v53 = vadd.f32 %v2594_v56, %v2434_v5  ;;  %v2455_v43 = vadd.f32 %v3248_v51, %v4803_v18 }
 0x2a9   : > { %2674 = vst.msk [vmem:[%s4867_s28 + $0x98] sm:$0xff] %vm2654_vm2, %v2603_v0 }
 0x2aa   : > { %2672 = vst.msk [vmem:[%s4867_s28 + $0x88] sm:$0xff] %vm2654_vm2, %v2595_v53  ;;  %v2458_v8 = vadd.f32 %v3251_v41, %v4809_v1 }
 0x2ac   : > { %v3252_v2 = vpop.f32.mrb[128].mxu1  ;;  %v3338_v47 = vpop.f32.mrb[132].mxu0 }
 0x2ad   : > { %v2616_v59 = vadd.f32 %v3338_v47, %v2455_v43  ;;  %v3253_v26 = vpop.f32.mrb[129].mxu1  ;;  %v2607_v25 = vpop.f32.mrb[133].mxu0 }
 0x2ae   : > { %v3254_v17 = vadd.f32 %v3253_v26, %v3252_v2  ;;  %v2608_v49 = vadd.f32 %v2607_v25, %v2447_v58  ;;  %v3255_v13 = vpop.f32.mrb[130].mxu1  ;;  %v3339_v5 = vpop.f32.mrb[134].mxu0 }
 0x2af   : > { %2677 = vst.msk [vmem:[%s4867_s28 + $0xb0] sm:$0xff] %vm2654_vm2, %v2616_v59  ;;  %v2619_v18 = vadd.f32 %v3339_v5, %v2458_v8  ;;  %v3256_v44 = vpop.f32.mrb[131].mxu1  ;;  %v2610_v39 = vpop.f32.mrb[135].mxu0 }
 0x2b0   : > { %2675 = vst.msk [vmem:[%s4867_s28 + $0xa0] sm:$0xff] %vm2654_vm2, %v2608_v49  ;;  %v3257_v36 = vadd.f32 %v3256_v44, %v3255_v13  ;;  %v2611_v1 = vadd.f32 %v2610_v39, %v2450_v31  ;;  %v2463_v16 = vadd.f32 %v3254_v17, %v4815_v63 }
 0x2b1   : > { %2678 = vst.msk [vmem:[%s4867_s28 + $0xb8] sm:$0xff] %vm2654_vm2, %v2619_v18 }
 0x2b2   : > { %2676 = vst.msk [vmem:[%s4867_s28 + $0xa8] sm:$0xff] %vm2654_vm2, %v2611_v1  ;;  %v2466_v4 = vadd.f32 %v3257_v36, %v4821_v55 }
 0x2b4   : > { %v3258_v33 = vpop.f32.mrb[132].mxu1  ;;  %v3342_v24 = vpop.f32.mrb[136].mxu0 }
 0x2b5   : > { %v3259_v11 = vpop.f32.mrb[133].mxu1  ;;  %v2623_v21 = vpop.f32.mrb[137].mxu0 }
 0x2b6   : > { %v3260_v35 = vadd.f32 %v3259_v11, %v3258_v33  ;;  %v2624_v38 = vadd.f32 %v2623_v21, %v2463_v16  ;;  %v3261_v50 = vpop.f32.mrb[134].mxu1  ;;  %v3343_v10 = vpop.f32.mrb[138].mxu0 }
 0x2b7   : > { %v3262_v62 = vpop.f32.mrb[135].mxu1  ;;  %v2626_v57 = vpop.f32.mrb[139].mxu0 }
 0x2b8   : > { %v2471_v63 = vadd.f32 %v3260_v35, %v4827_v60  ;;  %2679 = vst.msk [vmem:[%s4867_s28 + $0xc0] sm:$0xff] %vm2654_vm2, %v2624_v38  ;;  %v3263_v3 = vadd.f32 %v3262_v62, %v3261_v50  ;;  %v2627_v48 = vadd.f32 %v2626_v57, %v2466_v4 }
 0x2ba   : > { %v2632_v55 = vadd.f32 %v3342_v24, %v2471_v63  ;;  %v2474_v28 = vadd.f32 %v3263_v3, %v4833_v46  ;;  %2680 = vst.msk [vmem:[%s4867_s28 + $0xc8] sm:$0xff] %vm2654_vm2, %v2627_v48 }
 0x2bc   : > { %2681 = vst.msk [vmem:[%s4867_s28 + $0xd0] sm:$0xff] %vm2654_vm2, %v2632_v55  ;;  %v2635_v29 = vadd.f32 %v3343_v10, %v2474_v28  ;;  %v3264_v40 = vpop.f32.mrb[136].mxu1  ;;  %v3346_v15 = vpop.f32.mrb[140].mxu0 }
 0x2bd   : > { %v3265_v45 = vpop.f32.mrb[137].mxu1  ;;  %v2639_v19 = vpop.f32.mrb[141].mxu0 }
 0x2be   : > { %2682 = vst.msk [vmem:[%s4867_s28 + $0xd8] sm:$0xff] %vm2654_vm2, %v2635_v29  ;;  %v3266_v60 = vadd.f32 %v3265_v45, %v3264_v40  ;;  %v3267_v14 = vpop.f32.mrb[138].mxu1  ;;  %v3347_v32 = vpop.f32.mrb[142].mxu0 }
 0x2bf   : > { %v3268_v22 = vpop.f32.mrb[139].mxu1  ;;  %v2642_v42 = vpop.f32.mrb[143].mxu0 }
 0x2c0   : > { %v3269_v58 = vadd.f32 %v3268_v22, %v3267_v14  ;;  %v2479_v46 = vadd.f32 %v3266_v60, %v4839_v34 }
 0x2c2   : > { %v2640_v31 = vadd.f32 %v2639_v19, %v2479_v46  ;;  %v2482_v12 = vadd.f32 %v3269_v58, %v4845_v7 }
 0x2c4   : > { %2683 = vst.msk [vmem:[%s4867_s28 + $0xe0] sm:$0xff] %vm2654_vm2, %v2640_v31  ;;  %v2643_v20 = vadd.f32 %v2642_v42, %v2482_v12  ;;  %v3270_v52 = vpop.f32.mrb[140].mxu1 }
 0x2c5   : > { %v3271_v61 = vpop.f32.mrb[141].mxu1 }
 0x2c6   : > { %2684 = vst.msk [vmem:[%s4867_s28 + $0xe8] sm:$0xff] %vm2654_vm2, %v2643_v20  ;;  %v3272_v54 = vadd.f32 %v3271_v61, %v3270_v52  ;;  %v3273_v51 = vpop.f32.mrb[142].mxu1 }
 0x2c7   : > { %v3274_v37 = vpop.f32.mrb[143].mxu1 }
 0x2c8   : > { %v2487_v27 = vadd.f32 %v3272_v54, %v4851_v6  ;;  %v3275_v30 = vadd.f32 %v3274_v37, %v3273_v51 }
 0x2ca   : > { %v2648_v0 = vadd.f32 %v3346_v15, %v2487_v27  ;;  %v2490_v34 = vadd.f32 %v3275_v30, %v4857_v9 }
 0x2cc   : > { %2685 = vst.msk [vmem:[%s4867_s28 + $0xf0] sm:$0xff] %vm2654_vm2, %v2648_v0  ;;  %v2651_v23 = vadd.f32 %v3347_v32, %v2490_v34 }
 0x2ce   : > { %2686 = vst.msk [vmem:[%s4867_s28 + $0xf8] sm:$0xff] %vm2654_vm2, %v2651_v23 }
 0x2cf PF: > { %s16_s21 = sadd.s32 1, %s3453_s21  }
 0x2d0   : > { %p13_p4 = scmp.ge.s32.totalorder %s16_s21, 4  }
 0x2d2   :  { %15 = sbr.rel (!%p13_p4) target bundleno = 1 (0x1), region = 74 }

// kernel: generator_forward.7
= control target key start
LH: loop header
LB: loop body
LE: loop exit
PB: predicated region body
PF: predicated region fallthrough
CT: control target
= control target key end

     0   :  { %s3091_s21 = smov 0   ;;  %s4694_s0 = inlined_call_operand.vmem [shape: f32[2,16,16,64], index: 0, kind: input, shape index: {}, may-alias: {0,1}]   ;;  %s4695_s1 = inlined_call_operand.vmem [shape: f32[2,16,16,64], index: 1, kind: input, shape index: {}, may-alias: {0,1}]   ;;  %s4696_s2 = inlined_call_operand.vmem [shape: f32[1,64], index: 2, kind: input, shape index: {}]   ;;  %s4697_s3 = inlined_call_operand.vmem [shape: f32[1,64], index: 3, kind: input, shape index: {}]   ;;  %s4698_s4 = inlined_call_operand.vmem [shape: bf16[576,128], index: 4, kind: input, shape index: {}]   ;;  %s4699_s5 = inlined_call_operand.vmem [shape: f32[1,128], index: 5, kind: input, shape index: {}]   ;;  %s4700_s6 = inlined_call_operand.vmem [shape: f32[2,256,128], index: 6, kind: output, shape index: {}]  }
   0x1 LB: > { %s2568_s22 = sadd.s32 4294967295, %s3052_s21   ;;  %p2572_p0 = scmp.ge.s32.totalorder %s3052_s21, 1  ;;  %s3052_s21 = sphi %s3091_s21, %s16_s21  }
   0x2   : > { %p212_p1 = scmp.lt.s32.totalorder %s3052_s21, 3 }
   0x4   : > { %p213_p2 = pnand %p2572_p0, %p212_p1 }
   0x6   : > { %216 = sbr.rel (%p213_p2) target bundleno = 730 (0x2da), region = 44 }
   0xd   : > { %v253_v0 = vld [vmem:[%s4694_s0] sm:$0xff]  ;;  %v254_v1 = vld [vmem:[%s4694_s0 + $0x8] sm:$0xff]  ;;  %v255_v2 = vld [vmem:[%s4694_s0 + $0x10] sm:$0xff]  ;;  %vm317_vm0 = vcmask 523264   ;;  %vm1033_vm1 = vcmask 1040384   ;;  %p242_p3 = scmp.lt.s32.totalorder %s2568_s22, 1 }
   0xe   : > { %v256_v3 = vld [vmem:[%s4694_s0 + $0x18] sm:$0xff]  ;;  %v318_v4 = vsel %vm317_vm0, %v253_v0, 0.0  ;;  %v319_v5 = vsel %vm317_vm0, %v254_v1, 0.0  ;;  %v321_v6 = vsel %vm317_vm0, %v255_v2, 0.0  ;;  %v257_v7 = vld [vmem:[%s4694_s0 + $0x20] sm:$0xff]  ;;  %v3121_v10 = vld [vmem:[%s4694_s0 + $0x28] sm:$0xff]  ;;  %v453_v58 = vmul.f32 %v253_v0, %v253_v0 }
   0xf   : > { %v320_v8 = vadd.f32 %v319_v5, %v318_v4  ;;  %v323_v9 = vsel %vm317_vm0, %v256_v3, 0.0  ;;  %v325_v12 = vsel %vm317_vm0, %v257_v7, 0.0  ;;  %v3127_v13 = vld [vmem:[%s4694_s0 + $0x30] sm:$0xff]  ;;  %v327_v15 = vsel %vm317_vm0, %v3121_v10, 0.0  ;;  %v3134_v16 = vld [vmem:[%s4694_s0 + $0x38] sm:$0xff]  ;;  %v3141_v19 = vld [vmem:[%s4694_s0 + $0x40] sm:$0xff] }
  0x10   : > { %v329_v18 = vsel %vm317_vm0, %v3127_v13, 0.0  ;;  %v331_v21 = vsel %vm317_vm0, %v3134_v16, 0.0  ;;  %v3148_v22 = vld [vmem:[%s4694_s0 + $0x48] sm:$0xff]  ;;  %v333_v24 = vsel %vm317_vm0, %v3141_v19, 0.0  ;;  %v3155_v25 = vld [vmem:[%s4694_s0 + $0x50] sm:$0xff]  ;;  %v3162_v28 = vld [vmem:[%s4694_s0 + $0x58] sm:$0xff]  ;;  %v454_v59 = vmul.f32 %v254_v1, %v254_v1 }
  0x11   : > { %v322_v11 = vadd.f32 %v321_v6, %v320_v8  ;;  %v335_v27 = vsel %vm317_vm0, %v3148_v22, 0.0  ;;  %v3167_v29 = vld [vmem:[%s4694_s0 + $0x60] sm:$0xff]  ;;  %v3172_v31 = vld [vmem:[%s4694_s0 + $0x68] sm:$0xff]  ;;  %v3177_v32 = vld [vmem:[%s4694_s0 + $0x70] sm:$0xff]  ;;  %v337_v34 = vsel %vm317_vm0, %v3155_v25, 0.0  ;;  %v339_v41 = vsel %vm317_vm0, %v3162_v28, 0.0 }
  0x12   : > { %v3182_v33 = vld [vmem:[%s4694_s0 + $0x78] sm:$0xff]  ;;  %v3189_v35 = vld [vmem:[%s4694_s0 + $0x80] sm:$0xff]  ;;  %v3194_v36 = vld [vmem:[%s4694_s0 + $0x88] sm:$0xff]  ;;  %v341_v43 = vsel %vm317_vm0, %v3167_v29, 0.0  ;;  %v343_v44 = vsel %vm317_vm0, %v3172_v31, 0.0  ;;  %v345_v45 = vsel %vm317_vm0, %v3177_v32, 0.0  ;;  %v455_v62 = vmul.f32 %v255_v2, %v255_v2 }
  0x13   : > { %v324_v14 = vadd.f32 %v323_v9, %v322_v11  ;;  %v3199_v37 = vld [vmem:[%s4694_s0 + $0x90] sm:$0xff]  ;;  %v3204_v39 = vld [vmem:[%s4694_s0 + $0x98] sm:$0xff]  ;;  %v3209_v40 = vld [vmem:[%s4694_s0 + $0xa0] sm:$0xff]  ;;  %v347_v46 = vsel %vm317_vm0, %v3182_v33, 0.0  ;;  %v349_v47 = vsel %vm317_vm0, %v3189_v35, 0.0  ;;  %v351_v48 = vsel %vm317_vm0, %v3194_v36, 0.0 }
  0x14   : > { %v353_v49 = vsel %vm317_vm0, %v3199_v37, 0.0  ;;  %v355_v51 = vsel %vm317_vm0, %v3204_v39, 0.0  ;;  %v357_v52 = vsel %vm317_vm0, %v3209_v40, 0.0  ;;  %v3234_v60 = vld [vmem:[%s4694_s0 + $0xa8] sm:$0xff]  ;;  %v456_v63 = vmul.f32 %v256_v3, %v256_v3  ;;  %v3241_v9 = vld [vmem:[%s4694_s0 + $0xb0] sm:$0xff]  ;;  %s4710_s22 = smov (!%p242_p3, %s2568_s22), 1 }
  0x15   : > { %v326_v17 = vadd.f32 %v325_v12, %v324_v14  ;;  %v457_v5 = vmul.f32 %v257_v7, %v257_v7  ;;  %v517_v6 = vsel %vm317_vm0, %v453_v58, 0.0  ;;  %v518_v8 = vsel %vm317_vm0, %v454_v59, 0.0  ;;  %v3252_v7 = vld [vmem:[%s4694_s0 + $0xb8] sm:$0xff]  ;;  %s2632_s11 = sshll.u32 %s4710_s22, 8  ;;  %s3055_s17 = smov 64  }
  0x16   : > { %v519_v1 = vadd.f32 %v518_v8, %v517_v6  ;;  %v520_v11 = vsel %vm317_vm0, %v455_v62, 0.0  ;;  %v359_v12 = vsel %vm317_vm0, %v3234_v60, 0.0  ;;  %v458_v2 = vmul.f32 %v3121_v10, %v3121_v10  ;;  %v3262_v10 = vld [vmem:[%s4694_s0 + $0xc0] sm:$0xff]  ;;  %s3742_s16 = scalar_lea.vmem %s4695_s1, %s2632_s11  ;;  %s4601_s18 = scalar_lea.vmem %s4700_s6, %s2632_s11 }
  0x17   : > { %v328_v20 = vadd.f32 %v327_v15, %v326_v17  ;;  %v522_v3 = vsel %vm317_vm0, %v456_v63, 0.0  ;;  %v361_v17 = vsel %vm317_vm0, %v3241_v9, 0.0  ;;  %v465_v62 = vmul.f32 %v3167_v29, %v3167_v29  ;;  %v3332_v29 = vld [vmem:[%s4694_s0 + $0xf8] sm:$0xff] }
  0x18   : > { %v521_v15 = vadd.f32 %v520_v11, %v519_v1  ;;  %v466_v8 = vmul.f32 %v3172_v31, %v3172_v31  ;;  %v3342_v31 = vld [vmem:[%s4694_s0 + $0x100] sm:$0xff]  ;;  %vm1034_vm2 = vsmask.f32 256  ;;  %vm1070_vm4 = vsmask.f32 7424 }
  0x19   : > { %v330_v23 = vadd.f32 %v329_v18, %v328_v20  ;;  %v459_v18 = vmul.f32 %v3127_v13, %v3127_v13  ;;  %v524_v20 = vsel %vm317_vm0, %v457_v5, 0.0  ;;  %v3272_v13 = vld [vmem:[%s4694_s0 + $0xc8] sm:$0xff]  ;;  %vm3697_vm3 = vmand %vm1033_vm1, %vm1034_vm2 }
  0x1b   : > { %v332_v26 = vadd.f32 %v331_v21, %v330_v23  ;;  %v523_v23 = vadd.f32 %v522_v3, %v521_v15  ;;  %v540_v3 = vsel %vm317_vm0, %v465_v62, 0.0  ;;  %v474_v62 = vmul.f32 %v3234_v60, %v3234_v60  ;;  %v3422_v60 = vld [vmem:[%s4694_s0 + $0x140] sm:$0xff] }
  0x1d   : > { %v334_v30 = vadd.f32 %v333_v24, %v332_v26  ;;  %v363_v24 = vsel %vm317_vm0, %v3252_v7, 0.0  ;;  %v460_v26 = vmul.f32 %v3134_v16, %v3134_v16  ;;  %v3282_v16 = vld [vmem:[%s4694_s0 + $0xd0] sm:$0xff] }
  0x1f   : > { %v336_v38 = vadd.f32 %v335_v27, %v334_v30  ;;  %v526_v27 = vsel %vm317_vm0, %v458_v2, 0.0  ;;  %v467_v2 = vmul.f32 %v3177_v32, %v3177_v32  ;;  %v3352_v32 = vld [vmem:[%s4694_s0 + $0x108] sm:$0xff] }
  0x21   : > { %v338_v42 = vadd.f32 %v337_v34, %v336_v38  ;;  %v525_v34 = vadd.f32 %v524_v20, %v523_v23  ;;  %v365_v38 = vsel %vm317_vm0, %v3262_v10, 0.0  ;;  %v542_v20 = vsel %vm317_vm0, %v466_v8, 0.0 }
  0x22   : > { %v475_v8 = vmul.f32 %v3241_v9, %v3241_v9  ;;  %v3432_v9 = vld [vmem:[%s4694_s0 + $0x148] sm:$0xff] }
  0x23   : > { %v340_v50 = vadd.f32 %v339_v41, %v338_v42  ;;  %v461_v41 = vmul.f32 %v3141_v19, %v3141_v19  ;;  %v528_v42 = vsel %vm317_vm0, %v459_v18, 0.0  ;;  %v3292_v19 = vld [vmem:[%s4694_s0 + $0xd8] sm:$0xff]  ;;  %v468_v18 = vmul.f32 %v3182_v33, %v3182_v33  ;;  %v3362_v33 = vld [vmem:[%s4694_s0 + $0x110] sm:$0xff] }
  0x25   : > { %v342_v53 = vadd.f32 %v341_v43, %v340_v50  ;;  %v369_v50 = vsel %vm317_vm0, %v3282_v16, 0.0 }
  0x27   : > { %v344_v54 = vadd.f32 %v343_v44, %v342_v53  ;;  %v527_v44 = vadd.f32 %v526_v27, %v525_v34  ;;  %v544_v27 = vsel %vm317_vm0, %v467_v2, 0.0  ;;  %v476_v2 = vmul.f32 %v3252_v7, %v3252_v7  ;;  %v3442_v7 = vld [vmem:[%s4694_s0 + $0x150] sm:$0xff] }
  0x29   : > { %v346_v55 = vadd.f32 %v345_v45, %v344_v54  ;;  %v367_v45 = vsel %vm317_vm0, %v3272_v13, 0.0 }
  0x2b   : > { %v348_v56 = vadd.f32 %v347_v46, %v346_v55  ;;  %v462_v46 = vmul.f32 %v3148_v22, %v3148_v22  ;;  %v3302_v22 = vld [vmem:[%s4694_s0 + $0xe0] sm:$0xff]  ;;  %v371_v55 = vsel %vm317_vm0, %v3292_v19, 0.0 }
  0x2d   : > { %v350_v57 = vadd.f32 %v349_v47, %v348_v56  ;;  %v530_v47 = vsel %vm317_vm0, %v460_v26, 0.0  ;;  %v464_v56 = vmul.f32 %v3162_v28, %v3162_v28  ;;  %v3322_v28 = vld [vmem:[%s4694_s0 + $0xf0] sm:$0xff]  ;;  %v469_v26 = vmul.f32 %v3189_v35, %v3189_v35  ;;  %v3372_v35 = vld [vmem:[%s4694_s0 + $0x118] sm:$0xff] }
  0x2f   : > { %v352_v61 = vadd.f32 %v351_v48, %v350_v57  ;;  %v534_v57 = vsel %vm317_vm0, %v462_v46, 0.0  ;;  %v471_v46 = vmul.f32 %v3199_v37, %v3199_v37  ;;  %v3392_v37 = vld [vmem:[%s4694_s0 + $0x128] sm:$0xff] }
  0x31   : > { %v354_v4 = vadd.f32 %v353_v49, %v352_v61  ;;  %v529_v49 = vadd.f32 %v528_v42, %v527_v44  ;;  %v373_v61 = vsel %vm317_vm0, %v3302_v22, 0.0  ;;  %v546_v42 = vsel %vm317_vm0, %v468_v18, 0.0 }
  0x32   : > { %v477_v18 = vmul.f32 %v3262_v10, %v3262_v10  ;;  %v3452_v10 = vld [vmem:[%s4694_s0 + $0x158] sm:$0xff] }
  0x33   : > { %v356_v0 = vadd.f32 %v355_v51, %v354_v4  ;;  %v463_v51 = vmul.f32 %v3155_v25, %v3155_v25  ;;  %v531_v54 = vadd.f32 %v530_v47, %v529_v49  ;;  %v3312_v25 = vld [vmem:[%s4694_s0 + $0xe8] sm:$0xff]  ;;  %v548_v47 = vsel %vm317_vm0, %v469_v26, 0.0 }
  0x34   : > { %v375_v6 = vsel %vm317_vm0, %v3312_v25, 0.0  ;;  %v478_v26 = vmul.f32 %v3272_v13, %v3272_v13  ;;  %v3462_v13 = vld [vmem:[%s4694_s0 + $0x160] sm:$0xff] }
  0x35   : > { %v358_v14 = vadd.f32 %v357_v52, %v356_v0  ;;  %v532_v52 = vsel %vm317_vm0, %v461_v41, 0.0  ;;  %v536_v63 = vsel %vm317_vm0, %v463_v51, 0.0  ;;  %v538_v0 = vsel %vm317_vm0, %v464_v56, 0.0 }
  0x36   : > { %v533_v59 = vadd.f32 %v532_v52, %v531_v54  ;;  %v470_v41 = vmul.f32 %v3194_v36, %v3194_v36  ;;  %v3382_v36 = vld [vmem:[%s4694_s0 + $0x120] sm:$0xff]  ;;  %v472_v51 = vmul.f32 %v3204_v39, %v3204_v39  ;;  %v473_v56 = vmul.f32 %v3209_v40, %v3209_v40  ;;  %v3402_v39 = vld [vmem:[%s4694_s0 + $0x130] sm:$0xff]  ;;  %v3412_v40 = vld [vmem:[%s4694_s0 + $0x138] sm:$0xff] }
  0x37   : > { %v360_v21 = vadd.f32 %v359_v12, %v358_v14  ;;  %v377_v12 = vsel %vm317_vm0, %v3322_v28, 0.0 }
  0x38   : > { %v535_v5 = vadd.f32 %v534_v57, %v533_v59  ;;  %v550_v52 = vsel %vm317_vm0, %v470_v41, 0.0  ;;  %v552_v57 = vsel %vm317_vm0, %v471_v46, 0.0  ;;  %v479_v41 = vmul.f32 %v3282_v16, %v3282_v16  ;;  %v3472_v16 = vld [vmem:[%s4694_s0 + $0x168] sm:$0xff] }
  0x39   : > { %v362_v30 = vadd.f32 %v361_v17, %v360_v21  ;;  %v379_v17 = vsel %vm317_vm0, %v3332_v29, 0.0  ;;  %v480_v46 = vmul.f32 %v3292_v19, %v3292_v19  ;;  %v3482_v19 = vld [vmem:[%s4694_s0 + $0x170] sm:$0xff] }
  0x3a   : > { %v537_v11 = vadd.f32 %v536_v63, %v535_v5  ;;  %v554_v63 = vsel %vm317_vm0, %v472_v51, 0.0  ;;  %v481_v51 = vmul.f32 %v3302_v22, %v3302_v22  ;;  %v3492_v22 = vld [vmem:[%s4694_s0 + $0x178] sm:$0xff] }
  0x3b   : > { %v364_v43 = vadd.f32 %v363_v24, %v362_v30  ;;  %v381_v24 = vsel %vm317_vm0, %v3342_v31, 0.0 }
  0x3c   : > { %v539_v15 = vadd.f32 %v538_v0, %v537_v11  ;;  %v556_v0 = vsel %vm317_vm0, %v473_v56, 0.0  ;;  %v482_v56 = vmul.f32 %v3312_v25, %v3312_v25  ;;  %v3502_v25 = vld [vmem:[%s4694_s0 + $0x180] sm:$0xff] }
  0x3d   : > { %v366_v48 = vadd.f32 %v365_v38, %v364_v43  ;;  %v383_v38 = vsel %vm317_vm0, %v3352_v32, 0.0 }
  0x3e   : > { %v541_v23 = vadd.f32 %v540_v3, %v539_v15  ;;  %v558_v3 = vsel %vm317_vm0, %v474_v62, 0.0  ;;  %v483_v62 = vmul.f32 %v3322_v28, %v3322_v28  ;;  %v3512_v28 = vld [vmem:[%s4694_s0 + $0x188] sm:$0xff] }
  0x3f   : > { %v368_v53 = vadd.f32 %v367_v45, %v366_v48  ;;  %v385_v45 = vsel %vm317_vm0, %v3362_v33, 0.0 }
  0x40   : > { %v543_v34 = vadd.f32 %v542_v20, %v541_v23  ;;  %v560_v20 = vsel %vm317_vm0, %v475_v8, 0.0  ;;  %v484_v8 = vmul.f32 %v3332_v29, %v3332_v29  ;;  %v3522_v29 = vld [vmem:[%s4694_s0 + $0x190] sm:$0xff] }
  0x41   : > { %v370_v58 = vadd.f32 %v369_v50, %v368_v53  ;;  %v387_v50 = vsel %vm317_vm0, %v3372_v35, 0.0 }
  0x42   : > { %v545_v44 = vadd.f32 %v544_v27, %v543_v34  ;;  %v562_v27 = vsel %vm317_vm0, %v476_v2, 0.0  ;;  %v485_v2 = vmul.f32 %v3342_v31, %v3342_v31  ;;  %v3532_v31 = vld [vmem:[%s4694_s0 + $0x198] sm:$0xff] }
  0x43   : > { %v372_v4 = vadd.f32 %v371_v55, %v370_v58  ;;  %v389_v55 = vsel %vm317_vm0, %v3382_v36, 0.0 }
  0x44   : > { %v547_v49 = vadd.f32 %v546_v42, %v545_v44  ;;  %v564_v42 = vsel %vm317_vm0, %v477_v18, 0.0  ;;  %v486_v18 = vmul.f32 %v3352_v32, %v3352_v32  ;;  %v3542_v32 = vld [vmem:[%s4694_s0 + $0x1a0] sm:$0xff] }
  0x45   : > { %v374_v1 = vadd.f32 %v373_v61, %v372_v4  ;;  %v391_v61 = vsel %vm317_vm0, %v3392_v37, 0.0 }
  0x46   : > { %v549_v54 = vadd.f32 %v548_v47, %v547_v49  ;;  %v566_v47 = vsel %vm317_vm0, %v478_v26, 0.0  ;;  %v487_v26 = vmul.f32 %v3362_v33, %v3362_v33  ;;  %v3552_v33 = vld [vmem:[%s4694_s0 + $0x1a8] sm:$0xff] }
  0x47   : > { %v376_v14 = vadd.f32 %v375_v6, %v374_v1  ;;  %v393_v6 = vsel %vm317_vm0, %v3402_v39, 0.0 }
  0x48   : > { %v551_v59 = vadd.f32 %v550_v52, %v549_v54  ;;  %v568_v52 = vsel %vm317_vm0, %v479_v41, 0.0  ;;  %v488_v41 = vmul.f32 %v3372_v35, %v3372_v35  ;;  %v3562_v35 = vld [vmem:[%s4694_s0 + $0x1b0] sm:$0xff] }
  0x49   : > { %v378_v21 = vadd.f32 %v377_v12, %v376_v14  ;;  %v395_v12 = vsel %vm317_vm0, %v3412_v40, 0.0 }
  0x4a   : > { %v553_v5 = vadd.f32 %v552_v57, %v551_v59  ;;  %v570_v57 = vsel %vm317_vm0, %v480_v46, 0.0  ;;  %v489_v46 = vmul.f32 %v3382_v36, %v3382_v36  ;;  %v3572_v36 = vld [vmem:[%s4694_s0 + $0x1b8] sm:$0xff] }
  0x4b   : > { %v380_v30 = vadd.f32 %v379_v17, %v378_v21  ;;  %v397_v17 = vsel %vm317_vm0, %v3422_v60, 0.0 }
  0x4c   : > { %v555_v11 = vadd.f32 %v554_v63, %v553_v5  ;;  %v572_v63 = vsel %vm317_vm0, %v481_v51, 0.0  ;;  %v490_v51 = vmul.f32 %v3392_v37, %v3392_v37  ;;  %v427_v37 = vsel %vm317_vm0, %v3572_v36, 0.0 }
  0x4d   : > { %v382_v43 = vadd.f32 %v381_v24, %v380_v30  ;;  %v399_v24 = vsel %vm317_vm0, %v3432_v9, 0.0 }
  0x4e   : > { %v557_v15 = vadd.f32 %v556_v0, %v555_v11  ;;  %v574_v0 = vsel %vm317_vm0, %v482_v56, 0.0  ;;  %v491_v56 = vmul.f32 %v3402_v39, %v3402_v39  ;;  %v493_v39 = vmul.f32 %v3422_v60, %v3422_v60 }
  0x4f   : > { %v384_v48 = vadd.f32 %v383_v38, %v382_v43  ;;  %v401_v38 = vsel %vm317_vm0, %v3442_v7, 0.0  ;;  %v495_v60 = vmul.f32 %v3442_v7, %v3442_v7  ;;  %v497_v7 = vmul.f32 %v3462_v13, %v3462_v13 }
  0x50   : > { %v559_v23 = vadd.f32 %v558_v3, %v557_v15  ;;  %v576_v3 = vsel %vm317_vm0, %v483_v62, 0.0  ;;  %v590_v62 = vsel %vm317_vm0, %v490_v51, 0.0 }
  0x51   : > { %v386_v53 = vadd.f32 %v385_v45, %v384_v48  ;;  %v403_v45 = vsel %vm317_vm0, %v3452_v10, 0.0 }
  0x52   : > { %v561_v34 = vadd.f32 %v560_v20, %v559_v23  ;;  %v578_v20 = vsel %vm317_vm0, %v484_v8, 0.0 }
  0x53   : > { %v388_v58 = vadd.f32 %v387_v50, %v386_v53  ;;  %v405_v50 = vsel %vm317_vm0, %v3462_v13, 0.0  ;;  %v604_v13 = vsel %vm317_vm0, %v497_v7, 0.0 }
  0x54   : > { %v563_v44 = vadd.f32 %v562_v27, %v561_v34  ;;  %v580_v27 = vsel %vm317_vm0, %v485_v2, 0.0 }
  0x55   : > { %v390_v4 = vadd.f32 %v389_v55, %v388_v58  ;;  %v407_v55 = vsel %vm317_vm0, %v3472_v16, 0.0 }
  0x56   : > { %v565_v49 = vadd.f32 %v564_v42, %v563_v44  ;;  %v582_v42 = vsel %vm317_vm0, %v486_v18, 0.0 }
  0x57   : > { %v392_v1 = vadd.f32 %v391_v61, %v390_v4  ;;  %v409_v61 = vsel %vm317_vm0, %v3482_v19, 0.0 }
  0x58   : > { %v567_v54 = vadd.f32 %v566_v47, %v565_v49  ;;  %v584_v47 = vsel %vm317_vm0, %v487_v26, 0.0 }
  0x59   : > { %v394_v14 = vadd.f32 %v393_v6, %v392_v1  ;;  %v411_v6 = vsel %vm317_vm0, %v3492_v22, 0.0 }
  0x5a   : > { %v569_v59 = vadd.f32 %v568_v52, %v567_v54  ;;  %v586_v52 = vsel %vm317_vm0, %v488_v41, 0.0  ;;  %v499_v41 = vmul.f32 %v3482_v19, %v3482_v19 }
  0x5b   : > { %v396_v21 = vadd.f32 %v395_v12, %v394_v14  ;;  %v413_v12 = vsel %vm317_vm0, %v3502_v25, 0.0 }
  0x5c   : > { %v571_v5 = vadd.f32 %v570_v57, %v569_v59  ;;  %v588_v57 = vsel %vm317_vm0, %v489_v46, 0.0  ;;  %v313_v46 = vld [vmem:[%s4694_s0 + $0x1e0] sm:$0xff]  ;;  %v608_v19 = vsel %vm317_vm0, %v499_v41, 0.0 }
  0x5d   : > { %v398_v30 = vadd.f32 %v397_v17, %v396_v21  ;;  %v415_v17 = vsel %vm317_vm0, %v3512_v28, 0.0  ;;  %v437_v51 = vsel %vm317_vm0, %v313_v46, 0.0 }
  0x5e   : > { %v573_v11 = vadd.f32 %v572_v63, %v571_v5  ;;  %v3587_v63 = vld [vmem:[%s4694_s0 + $0x1c0] sm:$0xff] }
  0x5f   : > { %v400_v43 = vadd.f32 %v399_v24, %v398_v30  ;;  %v417_v24 = vsel %vm317_vm0, %v3522_v29, 0.0 }
  0x60   : > { %v575_v15 = vadd.f32 %v574_v0, %v573_v11 }
  0x61   : > { %v402_v48 = vadd.f32 %v401_v38, %v400_v43  ;;  %v419_v38 = vsel %vm317_vm0, %v3532_v31, 0.0 }
  0x62   : > { %v577_v23 = vadd.f32 %v576_v3, %v575_v15  ;;  %v596_v3 = vsel %vm317_vm0, %v493_v39, 0.0 }
  0x63   : > { %v404_v53 = vadd.f32 %v403_v45, %v402_v48  ;;  %v421_v45 = vsel %vm317_vm0, %v3542_v32, 0.0 }
  0x64   : > { %v579_v34 = vadd.f32 %v578_v20, %v577_v23  ;;  %v311_v20 = vld [vmem:[%s4694_s0 + $0x1d0] sm:$0xff]  ;;  %v600_v23 = vsel %vm317_vm0, %v495_v60, 0.0  ;;  %v508_v60 = vmul.f32 %v3572_v36, %v3572_v36 }
  0x65   : > { %v406_v58 = vadd.f32 %v405_v50, %v404_v53  ;;  %v423_v50 = vsel %vm317_vm0, %v3552_v33, 0.0  ;;  %v511_v7 = vmul.f32 %v311_v20, %v311_v20 }
  0x66   : > { %v581_v44 = vadd.f32 %v580_v27, %v579_v34  ;;  %v433_v27 = vsel %vm317_vm0, %v311_v20, 0.0  ;;  %v312_v34 = vld [vmem:[%s4694_s0 + $0x1d8] sm:$0xff] }
  0x67   : > { %v408_v4 = vadd.f32 %v407_v55, %v406_v58  ;;  %v425_v55 = vsel %vm317_vm0, %v3562_v35, 0.0 }
  0x68   : > { %v583_v49 = vadd.f32 %v582_v42, %v581_v44  ;;  %v435_v44 = vsel %vm317_vm0, %v312_v34, 0.0 }
  0x69   : > { %v410_v1 = vadd.f32 %v409_v61, %v408_v4  ;;  %v492_v61 = vmul.f32 %v3412_v40, %v3412_v40  ;;  %v494_v40 = vmul.f32 %v3432_v9, %v3432_v9  ;;  %v496_v9 = vmul.f32 %v3452_v10, %v3452_v10 }
  0x6a   : > { %v585_v54 = vadd.f32 %v584_v47, %v583_v49 }
  0x6b   : > { %v412_v14 = vadd.f32 %v411_v6, %v410_v1  ;;  %v592_v6 = vsel %vm317_vm0, %v491_v56, 0.0  ;;  %v429_v1 = vsel %vm317_vm0, %v3587_v63, 0.0  ;;  %v594_v11 = vsel %vm317_vm0, %v492_v61, 0.0 }
  0x6c   : > { %v587_v59 = vadd.f32 %v586_v52, %v585_v54  ;;  %v598_v18 = vsel %vm317_vm0, %v494_v40, 0.0  ;;  %v602_v10 = vsel %vm317_vm0, %v496_v9, 0.0  ;;  %v502_v52 = vmul.f32 %v3512_v28, %v3512_v28 }
  0x6d   : > { %v414_v21 = vadd.f32 %v413_v12, %v412_v14  ;;  %v3600_v12 = vld [vmem:[%s4694_s0 + $0x1c8] sm:$0xff] }
  0x6e   : > { %v589_v5 = vadd.f32 %v588_v57, %v587_v59  ;;  %v504_v59 = vmul.f32 %v3532_v31, %v3532_v31  ;;  %v614_v28 = vsel %vm317_vm0, %v502_v52, 0.0 }
  0x6f   : > { %v416_v30 = vadd.f32 %v415_v17, %v414_v21  ;;  %v431_v17 = vsel %vm317_vm0, %v3600_v12, 0.0 }
  0x70   : > { %v591_v0 = vadd.f32 %v590_v62, %v589_v5  ;;  %v505_v62 = vmul.f32 %v3542_v32, %v3542_v32  ;;  %v618_v31 = vsel %vm317_vm0, %v504_v59, 0.0 }
  0x71   : > { %v418_v43 = vadd.f32 %v417_v24, %v416_v30  ;;  %v498_v30 = vmul.f32 %v3472_v16, %v3472_v16 }
  0x72   : > { %v593_v2 = vadd.f32 %v592_v6, %v591_v0  ;;  %v506_v6 = vmul.f32 %v3552_v33, %v3552_v33  ;;  %v620_v32 = vsel %vm317_vm0, %v505_v62, 0.0  ;;  %v3054_v62 = vmov 0  }
  0x73   : > { %v420_v48 = vadd.f32 %v419_v38, %v418_v43  ;;  %v606_v16 = vsel %vm317_vm0, %v498_v30, 0.0 }
  0x74   : > { %v595_v15 = vadd.f32 %v594_v11, %v593_v2  ;;  %v622_v33 = vsel %vm317_vm0, %v506_v6, 0.0  ;;  %v2947_v6 = vld [vmem:[%s4698_s4 + $0x8] sm:$0xff]  }
  0x75   : > { %v422_v53 = vadd.f32 %v421_v45, %v420_v48  ;;  %v500_v45 = vmul.f32 %v3492_v22, %v3492_v22  ;;  %v501_v48 = vmul.f32 %v3502_v25, %v3502_v25 }
  0x76   : > { %v597_v21 = vadd.f32 %v596_v3, %v595_v15 }
  0x77   : > { %v424_v58 = vadd.f32 %v423_v50, %v422_v53  ;;  %v610_v22 = vsel %vm317_vm0, %v500_v45, 0.0  ;;  %v314_v53 = vld [vmem:[%s4694_s0 + $0x1e8] sm:$0xff]  ;;  %v612_v25 = vsel %vm317_vm0, %v501_v48, 0.0 }
  0x78   : > { %v599_v26 = vadd.f32 %v598_v18, %v597_v21  ;;  %v626_v18 = vsel %vm317_vm0, %v508_v60, 0.0  ;;  %v2951_v60 = vld [vmem:[%s4698_s4 + $0x18] sm:$0xff]  }
  0x79   : > { %v426_v4 = vadd.f32 %v425_v55, %v424_v58  ;;  %v503_v55 = vmul.f32 %v3522_v29, %v3522_v29  ;;  %v439_v58 = vsel %vm317_vm0, %v314_v53, 0.0 }
  0x7a   : > { %v601_v38 = vadd.f32 %v600_v23, %v599_v26  ;;  %v512_v26 = vmul.f32 %v312_v34, %v312_v34 }
  0x7b   : > { %v428_v8 = vadd.f32 %v427_v37, %v426_v4  ;;  %v315_v37 = vld [vmem:[%s4694_s0 + $0x1f0] sm:$0xff]  ;;  %v616_v29 = vsel %vm317_vm0, %v503_v55, 0.0 }
  0x7c   : > { %v603_v43 = vadd.f32 %v602_v10, %v601_v38  ;;  %v441_v39 = vsel %vm317_vm0, %v315_v37, 0.0  ;;  %v632_v10 = vsel %vm317_vm0, %v511_v7, 0.0 }
  0x7d   : > { %v430_v14 = vadd.f32 %v429_v1, %v428_v8  ;;  %v316_v8 = vld [vmem:[%s4694_s0 + $0x1f8] sm:$0xff]  ;;  %v507_v1 = vmul.f32 %v3562_v35, %v3562_v35  ;;  %v510_v35 = vmul.f32 %v3600_v12, %v3600_v12  ;;  %v634_v12 = vsel %vm317_vm0, %v512_v26, 0.0 }
  0x7e   : > { %v605_v47 = vadd.f32 %v604_v13, %v603_v43  ;;  %v443_v2 = vsel %vm317_vm0, %v316_v8, 0.0  ;;  %v514_v13 = vmul.f32 %v314_v53, %v314_v53  ;;  %v515_v43 = vmul.f32 %v315_v37, %v315_v37  ;;  %v2945_v37 = vld [vmem:[%s4698_s4] sm:$0xff]  }
  0x7f   : > { %v432_v24 = vadd.f32 %v431_v17, %v430_v14  ;;  %v509_v14 = vmul.f32 %v3587_v63, %v3587_v63  ;;  %v624_v15 = vsel %vm317_vm0, %v507_v1, 0.0  ;;  %v513_v63 = vmul.f32 %v313_v46, %v313_v46  ;;  %v2949_v1 = vld [vmem:[%s4698_s4 + $0x10] sm:$0xff]  }
  0x80   : > { %v607_v50 = vadd.f32 %v606_v16, %v605_v47  ;;  %v516_v16 = vmul.f32 %v316_v8, %v316_v8  ;;  %v638_v34 = vsel %vm317_vm0, %v514_v13, 0.0  ;;  %v640_v48 = vsel %vm317_vm0, %v515_v43, 0.0  ;;  %v2955_v13 = vld [vmem:[%s4698_s4 + $0x28] sm:$0xff]   ;;  %v686_v43 = vld [vmem:[%s3742_s16 + $0xd0] sm:$0xff] }
  0x81   : > { %v434_v42 = vadd.f32 %v433_v27, %v432_v24  ;;  %v628_v23 = vsel %vm317_vm0, %v509_v14, 0.0  ;;  %v630_v27 = vsel %vm317_vm0, %v510_v35, 0.0  ;;  %v636_v20 = vsel %vm317_vm0, %v513_v63, 0.0  ;;  %v2953_v35 = vld [vmem:[%s4698_s4 + $0x20] sm:$0xff]   ;;  %v682_v63 = vld [vmem:[%s3742_s16 + $0xb0] sm:$0xff] }
  0x82   : > { %v609_v54 = vadd.f32 %v608_v19, %v607_v50 }
  0x83   : > { %v436_v49 = vadd.f32 %v435_v44, %v434_v42 }
  0x84   : > { %v611_v57 = vadd.f32 %v610_v22, %v609_v54 }
  0x85   : > { %v438_v56 = vadd.f32 %v437_v51, %v436_v49  ;;  %v642_v49 = vsel %vm317_vm0, %v516_v16, 0.0  ;;  %v663_v16 = vld [vmem:[%s3742_s16 + $0x18] sm:$0xff] }
  0x86   : > { %v613_v61 = vadd.f32 %v612_v25, %v611_v57 }
  0x87   : > { %v440_v4 = vadd.f32 %v439_v58, %v438_v56 }
  0x88   : > { %v615_v5 = vadd.f32 %v614_v28, %v613_v61  ;;  %v2944_v28 = vld [vmem:[%s4698_s4 + $0x40] sm:$0xff]  }
  0x89   : > { %v442_v40 = vadd.f32 %v441_v39, %v440_v4  ;;  %2918 = vmatprep.subr.bf16.mxu1 %v2944_v28  ;;  %2634 = vmatprep.subr.bf16.mxu0 %v2944_v28  ;;  %v2946_v4 = vld [vmem:[%s4698_s4 + $0x48] sm:$0xff]  }
  0x8a   : > { %v617_v0 = vadd.f32 %v616_v29, %v615_v5  ;;  %v883_v29 = vrot.slane %v3054_v62, 7  ;;  %2926 = vmatpush3.bf16.msra.mxu1 %v2945_v37  ;;  %2635 = vmatpush3.bf16.msra.mxu0 %v2945_v37 }
  0x8b   : > { %v444_v17 = vadd.f32 %v443_v2, %v442_v40  ;;  %2919 = vmatprep.subr.bf16.mxu1 %v2946_v4  ;;  %2636 = vmatprep.subr.bf16.mxu0 %v2946_v4  ;;  %v2950_v40 = vld [vmem:[%s4698_s4 + $0x58] sm:$0xff]  }
  0x8c   : > { %v619_v11 = vadd.f32 %v618_v31, %v617_v0  ;;  %v3708_v8 = vsel %vm3697_vm3, 0, %v883_v29  ;;  %v2948_v0 = vld [vmem:[%s4698_s4 + $0x50] sm:$0xff]   ;;  %v3726_v2 = vsel %vm3697_vm3, %v883_v29, 0 }
  0x8d   : > { %v445_v36 = vrot.slane %v444_v17, 4  ;;  %v1072_v14 = vshrl.u32 %v3708_v8, 16 }
  0x8e   : > { %v621_v3 = vadd.f32 %v620_v32, %v619_v11  ;;  %2927 = vmatpush3.bf16.msra.mxu1 %v2947_v6  ;;  %2637 = vmatpush3.bf16.msra.mxu0 %v2947_v6  ;;  %v693_v32 = vlaneseq  ;;  %v1074_v11 = vshll.u32 %v3708_v8, 16 }
  0x8f   : > { %v446_v38 = vadd.f32 %v445_v36, %v444_v17  ;;  %2920 = vmatprep.subr.bf16.mxu1 %v2948_v0  ;;  %2638 = vmatprep.subr.bf16.mxu0 %v2948_v0  ;;  %v1079_v17 = vshll.u32 %v3726_v2, 16  ;;  %v684_v36 = vld [vmem:[%s3742_s16 + $0xc0] sm:$0xff] }
  0x90   : > { %v623_v9 = vadd.f32 %v622_v33, %v621_v3  ;;  %v694_v33 = vshrl.u32 %v693_v32, 7  ;;  %v2952_v3 = vld [vmem:[%s4698_s4 + $0x60] sm:$0xff]  }
  0x91   : > { %v447_v44 = vrot.slane %v446_v38, 2  ;;  %v1081_v26 = vrot.slane %v1079_v17, 1 }
  0x92   : > { %v625_v21 = vadd.f32 %v624_v15, %v623_v9  ;;  %2928 = vmatpush3.bf16.msra.mxu1 %v2949_v1  ;;  %2639 = vmatpush3.bf16.msra.mxu0 %v2949_v1  ;;  %v1076_v15 = vrot.slane %v1074_v11, 1  ;;  %v653_v9 = vld [vmem:[%s4696_s2] sm:$0x1]  ;;  %v2959_v11 = vld [vmem:[%s4698_s4 + $0x38] sm:$0xff]  }
  0x93   : > { %v448_v46 = vadd.f32 %v447_v44, %v446_v38  ;;  %2921 = vmatprep.subr.bf16.mxu1 %v2950_v40  ;;  %2640 = vmatprep.subr.bf16.mxu0 %v2950_v40  ;;  %v660_v38 = vld [vmem:[%s3742_s16] sm:$0xff]  ;;  %v662_v44 = vld [vmem:[%s3742_s16 + $0x10] sm:$0xff] }
  0x94   : > { %v627_v24 = vadd.f32 %v626_v18, %v625_v21  ;;  %v695_v18 = vsub.s32 0, %v694_v33  ;;  %v2954_v21 = vld [vmem:[%s4698_s4 + $0x68] sm:$0xff]  }
  0x95   : > { %v449_v51 = vrot.slane %v448_v46, 1 }
  0x96   : > { %v629_v30 = vadd.f32 %v628_v23, %v627_v24  ;;  %2929 = vmatpush3.bf16.msra.mxu1 %v2951_v60  ;;  %2641 = vmatpush3.bf16.msra.mxu0 %v2951_v60  ;;  %v657_v23 = vld [vmem:[%s4697_s3] sm:$0x1]  ;;  %v1077_v24 = vor.u32 %v1076_v15, %v1072_v14 }
  0x97   : > { %v450_v53 = vadd.f32 %v449_v51, %v448_v46  ;;  %2922 = vmatprep.subr.bf16.mxu1 %v2952_v3  ;;  %2642 = vmatprep.subr.bf16.mxu0 %v2952_v3  ;;  %v664_v51 = vld [vmem:[%s3742_s16 + $0x20] sm:$0xff] }
  0x98   : > { %v631_v41 = vadd.f32 %v630_v27, %v629_v30  ;;  %v685_v30 = vld [vmem:[%s3742_s16 + $0xc8] sm:$0xff] }
  0x99   : > { %v3684_v25 = vmul.f32 0.001953125, %v450_v53 }
  0x9a   : > { %v633_v42 = vadd.f32 %v632_v10, %v631_v41  ;;  %v683_v10 = vld [vmem:[%s3742_s16 + $0xb8] sm:$0xff]  ;;  %v661_v41 = vld [vmem:[%s3742_s16 + $0x8] sm:$0xff]  ;;  %2930 = vmatpush3.bf16.msra.mxu1 %v2953_v35  ;;  %2643 = vmatpush3.bf16.msra.mxu0 %v2953_v35 }
  0x9b   : > { %v651_v59 = vmul.f32 %v3684_v25, %v3684_v25  ;;  %2923 = vmatprep.subr.bf16.mxu1 %v2954_v21  ;;  %2644 = vmatprep.subr.bf16.mxu0 %v2954_v21 }
  0x9c   : > { %v635_v45 = vadd.f32 %v634_v12, %v633_v42 }
  0x9e   : > { %v637_v47 = vadd.f32 %v636_v20, %v635_v45  ;;  %v687_v20 = vld [vmem:[%s3742_s16 + $0xd8] sm:$0xff]  ;;  %v3772_v45 = vsel %vm1070_vm4, %v1077_v24, %v1081_v26  ;;  %2931 = vmatpush3.bf16.msra.mxu1 %v2955_v13  ;;  %2645 = vmatpush3.bf16.msra.mxu0 %v2955_v13 }
  0xa0   : > { %v639_v19 = vadd.f32 %v638_v34, %v637_v47  ;;  %v688_v34 = vld [vmem:[%s3742_s16 + $0xe0] sm:$0xff]  ;;  %v2956_v47 = vld [vmem:[%s4698_s4 + $0x70] sm:$0xff]  }
  0xa1   : > { %2924 = vmatprep.subr.bf16.mxu1 %v2956_v47  ;;  %2646 = vmatprep.subr.bf16.mxu0 %v2956_v47 }
  0xa2   : > { %v641_v50 = vadd.f32 %v640_v48, %v639_v19 }
  0xa4   : > { %v643_v52 = vadd.f32 %v642_v49, %v641_v50  ;;  %v689_v50 = vld [vmem:[%s3742_s16 + $0xe8] sm:$0xff] }
  0xa6   : > { %v644_v22 = vrot.slane %v643_v52, 4 }
  0xa8   : > { %v645_v54 = vadd.f32 %v644_v22, %v643_v52  ;;  %v665_v52 = vld [vmem:[%s3742_s16 + $0x28] sm:$0xff] }
  0xaa   : > { %v646_v55 = vrot.slane %v645_v54, 2 }
  0xac   : > { %v647_v56 = vadd.f32 %v646_v55, %v645_v54 }
  0xae   : > { %v648_v57 = vrot.slane %v647_v56, 1 }
  0xb0   : > { %v649_v58 = vadd.f32 %v648_v57, %v647_v56 }
  0xb2   : > { %v650_v61 = vmul.f32 0.001953125, %v649_v58 }
  0xb4   : > { %v652_v5 = vsub.f32 %v650_v61, %v651_v59 }
  0xb6   : > { %v654_v31 = vadd.f32 1e-05, %v652_v5 }
  0xb8   : > { %2980 = vrsqrt.f32 %v654_v31  ;;  %v2958_v31 = vld [vmem:[%s4698_s4 + $0x78] sm:$0xff]  }
  0xc2   : > { %v2981_v7 = vpop.eup %2980 }
  0xc3   : > { %v656_v27 = vmul.f32 %v2981_v7, %v653_v9 }
  0xc5   : > { %v658_v12 = vmul.f32 %v656_v27, %v3684_v25  ;;  %v3766_v42 = vrot.slane %v656_v27, %v695_v18  ;;  %v2957_v25 = vld [vmem:[%s4698_s4 + $0x30] sm:$0xff]  }
  0xc6   : > { %2932 = vmatpush3.bf16.msra.mxu1 %v2957_v25  ;;  %2647 = vmatpush3.bf16.msra.mxu0 %v2957_v25 }
  0xc7   : > { %v659_v48 = vsub.f32 %v657_v23, %v658_v12  ;;  %v722_v46 = vmul.f32 %v3766_v42, %v684_v36  ;;  %v723_v19 = vmul.f32 %v3766_v42, %v685_v30  ;;  %v698_v49 = vmul.f32 %v3766_v42, %v660_v38  ;;  %2925 = vmatprep.subr.bf16.mxu1 %v2958_v31 }
  0xc8   : > { %v699_v22 = vmul.f32 %v3766_v42, %v661_v41  ;;  %v720_v53 = vmul.f32 %v3766_v42, %v682_v63  ;;  %v721_v54 = vmul.f32 %v3766_v42, %v683_v10  ;;  %v724_v55 = vmul.f32 %v3766_v42, %v686_v43  ;;  %2648 = vmatprep.subr.bf16.mxu0 %v2958_v31 }
  0xc9   : > { %v3792_v56 = vrot.slane %v659_v48, %v695_v18  ;;  %v725_v57 = vmul.f32 %v3766_v42, %v687_v20  ;;  %v700_v58 = vmul.f32 %v3766_v42, %v662_v44  ;;  %v701_v59 = vmul.f32 %v3766_v42, %v663_v16 }
  0xca   : > { %v726_v28 = vmul.f32 %v3766_v42, %v688_v34  ;;  %v3799_v37 = vmul.f32 %v3766_v42, %v689_v50  ;;  %v3802_v61 = vmul.f32 %v3766_v42, %v664_v51  ;;  %v3805_v62 = vmul.f32 %v3766_v42, %v665_v52  ;;  %2933 = vmatpush3.bf16.msra.mxu1 %v2959_v11 }
  0xcb   : > { %v760_v29 = vadd.f32 %v3792_v56, %v722_v46  ;;  %v761_v4 = vadd.f32 %v3792_v56, %v723_v19  ;;  %v736_v5 = vadd.f32 %v3792_v56, %v698_v49  ;;  %v737_v6 = vadd.f32 %v3792_v56, %v699_v22  ;;  %2649 = vmatpush3.bf16.msra.mxu0 %v2959_v11  ;;  %v2960_v49 = vld [vmem:[%s4698_s4 + $0xc0] sm:$0xff]  }
  0xcc   : > { %v758_v0 = vadd.f32 %v3792_v56, %v720_v53  ;;  %v759_v1 = vadd.f32 %v3792_v56, %v721_v54  ;;  %v762_v32 = vadd.f32 %v3792_v56, %v724_v55  ;;  %v763_v40 = vadd.f32 %v3792_v56, %v725_v57  ;;  %2746 = vmatprep.subr.bf16.mxu1 %v2960_v49 }
  0xcd   : > { %vm792_vm5 = vcmp.gt.f32.partialorder %v760_v29, 0.0  ;;  %vm793_vm6 = vcmp.gt.f32.partialorder %v761_v4, 0.0  ;;  %v824_v60 = vmul.f32 0.2, %v760_v29  ;;  %v825_v33 = vmul.f32 0.2, %v761_v4 }
  0xce   : > { %vm768_vm7 = vcmp.gt.f32.partialorder %v736_v5, 0.0  ;;  %vm769_vm8 = vcmp.gt.f32.partialorder %v737_v6, 0.0  ;;  %v800_v3 = vmul.f32 0.2, %v736_v5  ;;  %v801_v14 = vmul.f32 0.2, %v737_v6 }
  0xcf   : > { %v856_v15 = vsel %vm792_vm5, %v760_v29, %v824_v60  ;;  %v857_v17 = vsel %vm793_vm6, %v761_v4, %v825_v33  ;;  %vm790_vm9 = vcmp.gt.f32.partialorder %v758_v0, 0.0  ;;  %vm791_vm10 = vcmp.gt.f32.partialorder %v759_v1, 0.0 }
  0xd0   : > { %v876_v9 = vpack.c.bf16 %v857_v17, %v856_v15  ;;  %v832_v35 = vsel %vm768_vm7, %v736_v5, %v800_v3  ;;  %v833_v18 = vsel %vm769_vm8, %v737_v6, %v801_v14  ;;  %v822_v21 = vmul.f32 0.2, %v758_v0  ;;  %v3854_v5 = vld [vmem:[%s4698_s4 + $0x100] sm:$0xff]  }
  0xd1   : > { %v864_v7 = vpack.c.bf16 %v833_v18, %v832_v35  ;;  %v823_v23 = vmul.f32 0.2, %v759_v1  ;;  %vm794_vm11 = vcmp.gt.f32.partialorder %v762_v32, 0.0  ;;  %vm795_vm12 = vcmp.gt.f32.partialorder %v763_v40, 0.0  ;;  %2878 = vmatprep.subr.bf16.mxu0 %v3854_v5 }
  0xd2   : > { %v972_v36 = vshrl.u32 %v876_v9, 16  ;;  %v975_v24 = vshll.u32 %v876_v9, 16  ;;  %v854_v26 = vsel %vm790_vm9, %v758_v0, %v822_v21  ;;  %v826_v27 = vmul.f32 0.2, %v762_v32 }
  0xd3   : > { %v888_v30 = vshrl.u32 %v864_v7, 16  ;;  %v891_v63 = vshll.u32 %v864_v7, 16  ;;  %v855_v10 = vsel %vm791_vm10, %v759_v1, %v823_v23  ;;  %v827_v38 = vmul.f32 0.2, %v763_v40 }
  0xd4   : > { %v974_v41 = vrot.slane %v972_v36, 7  ;;  %v875_v13 = vpack.c.bf16 %v855_v10, %v854_v26  ;;  %v858_v12 = vsel %vm794_vm11, %v762_v32, %v826_v27  ;;  %v738_v43 = vadd.f32 %v3792_v56, %v700_v58 }
  0xd5   : > { %v890_v20 = vrot.slane %v888_v30, 7  ;;  %v859_v44 = vsel %vm795_vm12, %v763_v40, %v827_v38  ;;  %v739_v16 = vadd.f32 %v3792_v56, %v701_v59  ;;  %v764_v34 = vadd.f32 %v3792_v56, %v726_v28 }
  0xd6   : > { %v977_v47 = vor.u32 %v975_v24, %v974_v41  ;;  %v965_v48 = vshrl.u32 %v875_v13, 16  ;;  %v968_v46 = vshll.u32 %v875_v13, 16  ;;  %v877_v19 = vpack.c.bf16 %v859_v44, %v858_v12  ;;  %v690_v44 = vld [vmem:[%s3742_s16 + $0xf0] sm:$0xff] }
  0xd7   : > { %v893_v50 = vor.u32 %v891_v63, %v890_v20  ;;  %v3830_v51 = vsel %vm3697_vm3, %v974_v41, 0  ;;  %vm770_vm13 = vcmp.gt.f32.partialorder %v738_v43, 0.0  ;;  %vm771_vm14 = vcmp.gt.f32.partialorder %v739_v16, 0.0 }
  0xd8   : > { %v3834_v52 = vsel %vm3697_vm3, 0, %v977_v47  ;;  %v967_v22 = vrot.slane %v965_v48, 7  ;;  %v979_v53 = vshrl.u32 %v877_v19, 16  ;;  %v982_v54 = vshll.u32 %v877_v19, 16 }
  0xd9   : > { %1417 = vrot.lane.b32.xlu0 %v3834_v52, %s3055_s17  ;;  %v3840_v55 = vsel %vm3697_vm3, 0, %v893_v50  ;;  %v1228_v25 = vshrl.u32 %v3834_v52, 16  ;;  %v1230_v57 = vshll.u32 %v3834_v52, 16  ;;  %v1235_v58 = vshll.u32 %v3830_v51, 16 }
  0xda   : > { %1393 = vrot.lane.b32.xlu1 %v3840_v55, %s3055_s17  ;;  %v970_v59 = vor.u32 %v968_v46, %v967_v22  ;;  %v3849_v28 = vsel %vm3697_vm3, %v967_v22, 0  ;;  %v981_v29 = vrot.slane %v979_v53, 7  ;;  %v802_v4 = vmul.f32 0.2, %v738_v43 }
  0xdb   : > { %v1223_v6 = vshll.u32 %v3849_v28, 16  ;;  %v1232_v31 = vrot.slane %v1230_v57, 1  ;;  %v1237_v0 = vrot.slane %v1235_v58, 1  ;;  %v803_v1 = vmul.f32 0.2, %v739_v16 }
  0xdc   : > { %v3859_v32 = vsel %vm3697_vm3, 0, %v970_v59  ;;  %v984_v40 = vor.u32 %v982_v54, %v981_v29  ;;  %v834_v11 = vsel %vm770_vm13, %v738_v43, %v802_v4  ;;  %v3864_v60 = vsel %vm3697_vm3, %v890_v20, 0 }
  0xdd   : > { %v1216_v33 = vshrl.u32 %v3859_v32, 16  ;;  %v1218_v3 = vshll.u32 %v3859_v32, 16  ;;  %v1225_v14 = vrot.slane %v1223_v6, 1  ;;  %v1233_v15 = vor.u32 %v1232_v31, %v1228_v25 }
  0xde   : > { %1361 = vrot.lane.b32.xlu1 %v3772_v45, %s3055_s17  ;;  %v3873_v17 = vsel %vm3697_vm3, 0, %v984_v40  ;;  %v835_v9 = vsel %vm771_vm14, %v739_v16, %v803_v1  ;;  %v1084_v35 = vshrl.u32 %v3840_v55, 16  ;;  %v1086_v18 = vshll.u32 %v3840_v55, 16  ;;  %v666_v40 = vld [vmem:[%s3742_s16 + $0x30] sm:$0xff] }
  0xdf   : > { %v1220_v21 = vrot.slane %v1218_v3, 1  ;;  %v3879_v7 = vsel %vm1070_vm4, %v1233_v15, %v1237_v0  ;;  %v865_v23 = vpack.c.bf16 %v835_v9, %v834_v11  ;;  %v1091_v36 = vshll.u32 %v3864_v60, 16 }
  0xe0   : > { %v1088_v24 = vrot.slane %v1086_v18, 1  ;;  %v765_v45 = vadd.f32 %v3792_v56, %v3799_v37  ;;  %vm796_vm15 = vcmp.gt.f32.partialorder %v764_v34, 0.0  ;;  %v828_v26 = vmul.f32 0.2, %v764_v34 }
  0xe1   : > { %v1221_v27 = vor.u32 %v1220_v21, %v1216_v33  ;;  %v895_v30 = vshrl.u32 %v865_v23, 16  ;;  %v898_v63 = vshll.u32 %v865_v23, 16  ;;  %v1093_v10 = vrot.slane %v1091_v36, 1 }
  0xe2   : > { %1387 = vrot.lane.b32.xlu1 %v3879_v7, %s3055_s17  ;;  %v1089_v38 = vor.u32 %v1088_v24, %v1084_v35  ;;  %vm797_vm1 = vcmp.gt.f32.partialorder %v765_v45, 0.0  ;;  %v829_v41 = vmul.f32 0.2, %v765_v45  ;;  %v860_v13 = vsel %vm796_vm15, %v764_v34, %v828_v26 }
  0xe3   : > { %v3887_v12 = vsel %vm1070_vm4, %v1221_v27, %v1225_v14  ;;  %v897_v43 = vrot.slane %v895_v30, 7  ;;  %v3891_v37 = vsel %vm3697_vm3, %v981_v29, 0  ;;  %v1240_v20 = vshrl.u32 %v3873_v17, 16 }
  0xe4   : > { %1385 = vrot.lane.b32.xlu0 %v3887_v12, %s3055_s17  ;;  %v3898_v16 = vsel %vm1070_vm4, %v1089_v38, %v1093_v10  ;;  %v861_v47 = vsel %vm797_vm1, %v765_v45, %v829_v41  ;;  %v1242_v34 = vshll.u32 %v3873_v17, 16  ;;  %v1247_v48 = vshll.u32 %v3891_v37, 16 }
  0xe5   : > { %v900_v46 = vor.u32 %v898_v63, %v897_v43  ;;  %v878_v19 = vpack.c.bf16 %v861_v47, %v860_v13  ;;  %v740_v49 = vadd.f32 %v3792_v56, %v3802_v61  ;;  %v741_v50 = vadd.f32 %v3792_v56, %v3805_v62  ;;  %v691_v62 = vld [vmem:[%s3742_s16 + $0xf8] sm:$0xff] }
  0xe6   : > { %1363 = vrot.lane.b32.xlu1 %v3898_v16, %s3055_s17  ;;  %v1244_v22 = vrot.slane %v1242_v34, 1  ;;  %v1249_v53 = vrot.slane %v1247_v48, 1  ;;  %v3910_v54 = vsel %vm3697_vm3, %v897_v43, 0  ;;  %v728_v25 = vmul.f32 %v3766_v42, %v690_v44  ;;  %v667_v63 = vld [vmem:[%s3742_s16 + $0x38] sm:$0xff] }
  0xe7   : > { %v3915_v57 = vsel %vm3697_vm3, 0, %v900_v46  ;;  %v986_v61 = vshrl.u32 %v878_v19, 16  ;;  %v989_v58 = vshll.u32 %v878_v19, 16  ;;  %vm772_vm2 = vcmp.gt.f32.partialorder %v740_v49, 0.0 }
  0xe8   : > { %1419 = vrot.lane.b32.xlu0 %v3873_v17, %s3055_s17  ;;  %v1245_v59 = vor.u32 %v1244_v22, %v1240_v20  ;;  %vm773_vm5 = vcmp.gt.f32.partialorder %v741_v50, 0.0  ;;  %v804_v29 = vmul.f32 0.2, %v740_v49  ;;  %v805_v4 = vmul.f32 0.2, %v741_v50 }
  0xe9   : > { %v988_v6 = vrot.slane %v986_v61, 7  ;;  %v1096_v31 = vshrl.u32 %v3915_v57, 16  ;;  %v1098_v0 = vshll.u32 %v3915_v57, 16  ;;  %v1103_v1 = vshll.u32 %v3910_v54, 16 }
  0xea   : > { %v3925_v11 = vsel %vm1070_vm4, %v1245_v59, %v1249_v53  ;;  %v836_v33 = vsel %vm772_vm2, %v740_v49, %v804_v29  ;;  %v837_v3 = vsel %vm773_vm5, %v741_v50, %v805_v4  ;;  %v729_v14 = vmul.f32 %v3766_v42, %v691_v62  ;;  %v668_v4 = vld [vmem:[%s3742_s16 + $0x40] sm:$0xff] }
  0xeb   : > { %4705 = vst [vmem:[#allocation2_spill] sm:$0xff] %v3925_v11  ;;  %v991_v15 = vor.u32 %v989_v58, %v988_v6  ;;  %1389 = vrot.lane.b32.xlu1 %v3925_v11, %s3055_s17  ;;  %v866_v9 = vpack.c.bf16 %v837_v3, %v836_v33  ;;  %v1100_v35 = vrot.slane %v1098_v0, 1  ;;  %v1105_v18 = vrot.slane %v1103_v1, 1  ;;  %v669_v3 = vld [vmem:[%s3742_s16 + $0x48] sm:$0xff] }
  0xec   : > { %1395 = vrot.lane.b32.xlu0 %v3915_v57, %s3055_s17  ;;  %v766_v21 = vadd.f32 %v3792_v56, %v728_v25  ;;  %v767_v23 = vadd.f32 %v3792_v56, %v729_v14  ;;  %v3936_v36 = vsel %vm3697_vm3, %v988_v6, 0  ;;  %v704_v24 = vmul.f32 %v3766_v42, %v666_v40 }
  0xed   : > { %v3941_v45 = vsel %vm3697_vm3, 0, %v991_v15  ;;  %v902_v26 = vshrl.u32 %v866_v9, 16  ;;  %v905_v27 = vshll.u32 %v866_v9, 16  ;;  %v1101_v30 = vor.u32 %v1100_v35, %v1096_v31 }
  0xee   : > { %vm798_vm6 = vcmp.gt.f32.partialorder %v766_v21, 0.0  ;;  %vm799_vm7 = vcmp.gt.f32.partialorder %v767_v23, 0.0  ;;  %v830_v10 = vmul.f32 0.2, %v766_v21  ;;  %v831_v38 = vmul.f32 0.2, %v767_v23 }
  0xef   : > { %v904_v41 = vrot.slane %v902_v26, 7  ;;  %v3945_v13 = vsel %vm1070_vm4, %v1101_v30, %v1105_v18  ;;  %v1252_v43 = vshrl.u32 %v3941_v45, 16  ;;  %v1254_v20 = vshll.u32 %v3941_v45, 16  ;;  %v670_v26 = vld [vmem:[%s3742_s16 + $0x50] sm:$0xff] }
  0xf0   : > { %1421 = vrot.lane.b32.xlu0 %v3941_v45, %s3055_s17  ;;  %1365 = vrot.lane.b32.xlu1 %v3945_v13, %s3055_s17  ;;  %v862_v44 = vsel %vm798_vm6, %v766_v21, %v830_v10  ;;  %v863_v47 = vsel %vm799_vm7, %v767_v23, %v831_v38  ;;  %v1259_v34 = vshll.u32 %v3936_v36, 16  ;;  %v705_v48 = vmul.f32 %v3766_v42, %v667_v63  ;;  %v671_v63 = vld [vmem:[%s3742_s16 + $0x58] sm:$0xff] }
  0xf1   : > { %v907_v46 = vor.u32 %v905_v27, %v904_v41  ;;  %v879_v19 = vpack.c.bf16 %v863_v47, %v862_v44  ;;  %v1256_v49 = vrot.slane %v1254_v20, 1  ;;  %v742_v50 = vadd.f32 %v3792_v56, %v704_v24 }
  0xf2   : > { %v1261_v22 = vrot.slane %v1259_v34, 1  ;;  %v743_v53 = vadd.f32 %v3792_v56, %v705_v48  ;;  %v3959_v25 = vsel %vm3697_vm3, %v904_v41, 0  ;;  %v1299_v61 = vrot.slane %v3840_v55, 1 }
  0xf3   : > { %v3964_v58 = vsel %vm3697_vm3, 0, %v907_v46  ;;  %v993_v62 = vshrl.u32 %v879_v19, 16  ;;  %v996_v59 = vshll.u32 %v879_v19, 16  ;;  %v1257_v29 = vor.u32 %v1256_v49, %v1252_v43 }
  0xf4   : > { %1397 = vrot.lane.b32.xlu0 %v3964_v58, %s3055_s17  ;;  %vm774_vm8 = vcmp.gt.f32.partialorder %v742_v50, 0.0  ;;  %vm775_vm9 = vcmp.gt.f32.partialorder %v743_v53, 0.0  ;;  %v806_v6 = vmul.f32 0.2, %v742_v50  ;;  %v807_v31 = vmul.f32 0.2, %v743_v53 }
  0xf5   : > { %v3969_v0 = vrot.slane %v993_v62, 7  ;;  %v3972_v1 = vsel %vm1070_vm4, %v1257_v29, %v1261_v22  ;;  %v1108_v40 = vshrl.u32 %v3964_v58, 16  ;;  %v1110_v33 = vshll.u32 %v3964_v58, 16 }
  0xf6   : > { %4706 = vst [vmem:[#allocation3_spill] sm:$0xff] %v3972_v1  ;;  %1391 = vrot.lane.b32.xlu1 %v3972_v1, %s3055_s17  ;;  %v838_v14 = vsel %vm774_vm8, %v742_v50, %v806_v6  ;;  %v839_v15 = vsel %vm775_vm9, %v743_v53, %v807_v31  ;;  %v1115_v9 = vshll.u32 %v3959_v25, 16  ;;  %v1300_v35 = vrot.slane %v3864_v60, 1 }
  0xf7   : > { %v998_v18 = vor.u32 %v996_v59, %v3969_v0  ;;  %v867_v21 = vpack.c.bf16 %v839_v15, %v838_v14  ;;  %v1112_v23 = vrot.slane %v1110_v33, 1  ;;  %v706_v24 = vmul.f32 %v3766_v42, %v668_v4  ;;  %v672_v33 = vld [vmem:[%s3742_s16 + $0x60] sm:$0xff] }
  0xf8   : > { %v1117_v27 = vrot.slane %v1115_v9, 1  ;;  %vm1295_vm10 = vcmask 1046528   ;;  %v707_v30 = vmul.f32 %v3766_v42, %v669_v3  ;;  %v708_v44 = vmul.f32 %v3766_v42, %v670_v26  ;;  %v673_v3 = vld [vmem:[%s3742_s16 + $0x68] sm:$0xff] }
  0xf9   : > { %v3988_v10 = vsel %vm3697_vm3, 0, %v998_v18  ;;  %v909_v38 = vshrl.u32 %v867_v21, 16  ;;  %v912_v41 = vshll.u32 %v867_v21, 16  ;;  %v1113_v43 = vor.u32 %v1112_v23, %v1108_v40 }
  0xfa   : > { %1423 = vrot.lane.b32.xlu0 %v3988_v10, %s3055_s17  ;;  %v744_v60 = vadd.f32 %v3792_v56, %v706_v24  ;;  %v745_v20 = vadd.f32 %v3792_v56, %v707_v30  ;;  %v3999_v48 = vsel %vm1295_vm10, %v1299_v61, %v1300_v35  ;;  %v709_v46 = vmul.f32 %v3766_v42, %v671_v63 }
  0xfb   : > { %v911_v47 = vrot.slane %v909_v38, 7  ;;  %v3996_v34 = vsel %vm1070_vm4, %v1113_v43, %v1117_v27  ;;  %v1302_v53 = vrot.slane %v3915_v57, 1  ;;  %v746_v61 = vadd.f32 %v3792_v56, %v708_v44 }
  0xfc   : > { %1367 = vrot.lane.b32.xlu1 %v3996_v34, %s3055_s17  ;;  %vm776_vm11 = vcmp.gt.f32.partialorder %v744_v60, 0.0  ;;  %vm777_vm12 = vcmp.gt.f32.partialorder %v745_v20, 0.0  ;;  %v808_v19 = vmul.f32 0.2, %v744_v60  ;;  %v809_v49 = vmul.f32 0.2, %v745_v20 }
  0xfd   : > { %v914_v50 = vor.u32 %v912_v41, %v911_v47  ;;  %v4006_v22 = vsel %vm3697_vm3, %v911_v47, 0  ;;  %v747_v4 = vadd.f32 %v3792_v56, %v709_v46  ;;  %vm778_vm13 = vcmp.gt.f32.partialorder %v746_v61, 0.0 }
  0xfe   : > { %v840_v62 = vsel %vm776_vm11, %v744_v60, %v808_v19  ;;  %v841_v59 = vsel %vm777_vm12, %v745_v20, %v809_v49  ;;  %v1127_v29 = vshll.u32 %v4006_v22, 16  ;;  %v810_v40 = vmul.f32 0.2, %v746_v61 }
  0xff   : > { %v4014_v6 = vsel %vm3697_vm3, 0, %v914_v50  ;;  %v868_v31 = vpack.c.bf16 %v841_v59, %v840_v62  ;;  %v1303_v9 = vrot.slane %v3910_v54, 1  ;;  %vm779_vm14 = vcmp.gt.f32.partialorder %v747_v4, 0.0  ;;  %v674_v62 = vld [vmem:[%s3742_s16 + $0x70] sm:$0xff]  ;;  %v675_v59 = vld [vmem:[%s3742_s16 + $0x78] sm:$0xff] }
 0x100   : > { %1399 = vrot.lane.b32.xlu0 %v4014_v6, %s3055_s17  ;;  %v1120_v14 = vshrl.u32 %v4014_v6, 16  ;;  %v1122_v15 = vshll.u32 %v4014_v6, 16  ;;  %v811_v21 = vmul.f32 0.2, %v747_v4  ;;  %v842_v23 = vsel %vm778_vm13, %v746_v61, %v810_v40 }
 0x101   : > { %v916_v35 = vshrl.u32 %v868_v31, 16  ;;  %v919_v18 = vshll.u32 %v868_v31, 16  ;;  %v1129_v26 = vrot.slane %v1127_v29, 1  ;;  %v710_v27 = vmul.f32 %v3766_v42, %v672_v33 }
 0x102   : > { %v1124_v24 = vrot.slane %v1122_v15, 1  ;;  %v711_v30 = vmul.f32 %v3766_v42, %v673_v3  ;;  %v843_v38 = vsel %vm779_vm14, %v747_v4, %v811_v21  ;;  %v1305_v41 = vrot.slane %v3964_v58, 1 }
 0x103   : > { %v918_v63 = vrot.slane %v916_v35, 7  ;;  %v4029_v43 = vsel %vm1295_vm10, %v1302_v53, %v1303_v9  ;;  %v869_v60 = vpack.c.bf16 %v843_v38, %v842_v23  ;;  %v748_v20 = vadd.f32 %v3792_v56, %v710_v27 }
 0x104   : > { %1425 = vrot.lane.b32.xlu0 %v3999_v48, %s3055_s17  ;;  %v1125_v54 = vor.u32 %v1124_v24, %v1120_v14  ;;  %v1306_v46 = vrot.slane %v3959_v25, 1  ;;  %v749_v19 = vadd.f32 %v3792_v56, %v711_v30  ;;  %v1308_v31 = vrot.slane %v4014_v6, 1 }
 0x105   : > { %v921_v44 = vor.u32 %v919_v18, %v918_v63  ;;  %v4034_v47 = vsel %vm3697_vm3, %v918_v63, 0  ;;  %v923_v50 = vshrl.u32 %v869_v60, 16  ;;  %v926_v61 = vshll.u32 %v869_v60, 16 }
 0x106   : > { %v4039_v49 = vsel %vm1070_vm4, %v1125_v54, %v1129_v26  ;;  %v1139_v53 = vshll.u32 %v4034_v47, 16  ;;  %vm780_vm15 = vcmp.gt.f32.partialorder %v748_v20, 0.0  ;;  %v812_v4 = vmul.f32 0.2, %v748_v20 }
 0x107   : > { %v4046_v29 = vsel %vm3697_vm3, 0, %v921_v44  ;;  %v925_v25 = vrot.slane %v923_v50, 7  ;;  %vm781_vm1 = vcmp.gt.f32.partialorder %v749_v19, 0.0  ;;  %v813_v3 = vmul.f32 0.2, %v749_v19  ;;  %v676_v50 = vld [vmem:[%s3742_s16 + $0x80] sm:$0xff] }
 0x108   : > { %1401 = vrot.lane.b32.xlu1 %v4046_v29, %s3055_s17  ;;  %1369 = vrot.lane.b32.xlu0 %v4039_v49, %s3055_s17  ;;  %v1132_v40 = vshrl.u32 %v4046_v29, 16  ;;  %v1134_v33 = vshll.u32 %v4046_v29, 16  ;;  %v844_v14 = vsel %vm780_vm15, %v748_v20, %v812_v4  ;;  %v712_v15 = vmul.f32 %v3766_v42, %v674_v62 }
 0x109   : > { %v713_v9 = vmul.f32 %v3766_v42, %v675_v59  ;;  %v928_v35 = vor.u32 %v926_v61, %v925_v25  ;;  %v1141_v21 = vrot.slane %v1139_v53, 1  ;;  %v4059_v23 = vsel %vm3697_vm3, %v925_v25, 0  ;;  %v677_v61 = vld [vmem:[%s3742_s16 + $0x88] sm:$0xff] }
 0x10a   : > { %v1136_v18 = vrot.slane %v1134_v33, 1  ;;  %v845_v24 = vsel %vm781_vm1, %v749_v19, %v813_v3  ;;  %v1151_v26 = vshll.u32 %v4059_v23, 16  ;;  %v750_v27 = vadd.f32 %v3792_v56, %v712_v15 }
 0x10b   : > { %v751_v30 = vadd.f32 %v3792_v56, %v713_v9  ;;  %v4068_v63 = vsel %vm3697_vm3, 0, %v928_v35  ;;  %v870_v54 = vpack.c.bf16 %v845_v24, %v844_v14  ;;  %v1309_v60 = vrot.slane %v4006_v22, 1 }
 0x10c   : > { %1427 = vrot.lane.b32.xlu1 %v4029_v43, %s3055_s17  ;;  %v1137_v38 = vor.u32 %v1136_v18, %v1132_v40  ;;  %1403 = vrot.lane.b32.xlu0 %v4068_v63, %s3055_s17  ;;  %v4074_v20 = vsel %vm1295_vm10, %v1305_v41, %v1306_v46  ;;  %v1144_v44 = vshrl.u32 %v4068_v63, 16  ;;  %v1146_v19 = vshll.u32 %v4068_v63, 16 }
 0x10d   : > { %vm782_vm2 = vcmp.gt.f32.partialorder %v750_v27, 0.0  ;;  %v930_v62 = vshrl.u32 %v870_v54, 16  ;;  %v933_v59 = vshll.u32 %v870_v54, 16  ;;  %vm783_vm5 = vcmp.gt.f32.partialorder %v751_v30, 0.0 }
 0x10e   : > { %v4081_v53 = vsel %vm1070_vm4, %v1137_v38, %v1141_v21  ;;  %v1148_v22 = vrot.slane %v1146_v19, 1  ;;  %v1153_v4 = vrot.slane %v1151_v26, 1  ;;  %v814_v25 = vmul.f32 0.2, %v750_v27 }
 0x10f   : > { %v815_v40 = vmul.f32 0.2, %v751_v30  ;;  %v932_v41 = vrot.slane %v930_v62, 7  ;;  %v714_v46 = vmul.f32 %v3766_v42, %v676_v50  ;;  %v715_v33 = vmul.f32 %v3766_v42, %v677_v61  ;;  %v679_v50 = vld [vmem:[%s3742_s16 + $0x98] sm:$0xff] }
 0x110   : > { %1371 = vrot.lane.b32.xlu1 %v4081_v53, %s3055_s17  ;;  %1429 = vrot.lane.b32.xlu0 %v4074_v20, %s3055_s17  ;;  %v1149_v3 = vor.u32 %v1148_v22, %v1144_v44  ;;  %v4090_v14 = vsel %vm1295_vm10, %v1308_v31, %v1309_v60  ;;  %v846_v15 = vsel %vm782_vm2, %v750_v27, %v814_v25  ;;  %v1311_v31 = vrot.slane %v4046_v29, 1  ;;  %v678_v60 = vld [vmem:[%s3742_s16 + $0x90] sm:$0xff] }
 0x111   : > { %v847_v9 = vsel %vm783_vm5, %v751_v30, %v815_v40  ;;  %v935_v35 = vor.u32 %v933_v59, %v932_v41  ;;  %v4095_v21 = vsel %vm3697_vm3, %v932_v41, 0  ;;  %v752_v24 = vadd.f32 %v3792_v56, %v714_v46  ;;  %v680_v46 = vld [vmem:[%s3742_s16 + $0xa0] sm:$0xff] }
 0x112   : > { %v871_v18 = vpack.c.bf16 %v847_v9, %v846_v15  ;;  %v4099_v26 = vsel %vm1070_vm4, %v1149_v3, %v1153_v4  ;;  %v1163_v38 = vshll.u32 %v4095_v21, 16  ;;  %v753_v54 = vadd.f32 %v3792_v56, %v715_v33 }
 0x113   : > { %v4107_v27 = vsel %vm3697_vm3, 0, %v935_v35  ;;  %v1312_v19 = vrot.slane %v4034_v47, 1  ;;  %vm784_vm6 = vcmp.gt.f32.partialorder %v752_v24, 0.0  ;;  %v816_v22 = vmul.f32 0.2, %v752_v24 }
 0x114   : > { %v937_v30 = vshrl.u32 %v871_v18, 16  ;;  %v940_v44 = vshll.u32 %v871_v18, 16  ;;  %1405 = vrot.lane.b32.xlu1 %v4107_v27, %s3055_s17  ;;  %1373 = vrot.lane.b32.xlu0 %v4099_v26, %s3055_s17  ;;  %v1156_v61 = vshrl.u32 %v4107_v27, 16  ;;  %v1158_v62 = vshll.u32 %v4107_v27, 16 }
 0x115   : > { %vm785_vm7 = vcmp.gt.f32.partialorder %v753_v54, 0.0  ;;  %v817_v4 = vmul.f32 0.2, %v753_v54  ;;  %v716_v25 = vmul.f32 %v3766_v42, %v678_v60  ;;  %v1165_v47 = vrot.slane %v1163_v38, 1 }
 0x116   : > { %v939_v59 = vrot.slane %v937_v30, 7  ;;  %v1160_v40 = vrot.slane %v1158_v62, 1  ;;  %v717_v41 = vmul.f32 %v3766_v42, %v679_v50  ;;  %v848_v3 = vsel %vm784_vm6, %v752_v24, %v816_v22 }
 0x117   : > { %v849_v15 = vsel %vm785_vm7, %v753_v54, %v817_v4  ;;  %v4127_v18 = vsel %vm1295_vm10, %v1311_v31, %v1312_v19  ;;  %v754_v38 = vadd.f32 %v3792_v56, %v716_v25  ;;  %v718_v50 = vmul.f32 %v3766_v42, %v680_v46 }
 0x118   : > { %v942_v33 = vor.u32 %v940_v44, %v939_v59  ;;  %v4122_v9 = vsel %vm3697_vm3, %v939_v59, 0  ;;  %1431 = vrot.lane.b32.xlu1 %v4090_v14, %s3055_s17  ;;  %v1161_v35 = vor.u32 %v1160_v40, %v1156_v61  ;;  %v872_v60 = vpack.c.bf16 %v849_v15, %v848_v3  ;;  %v681_v44 = vld [vmem:[%s3742_s16 + $0xa8] sm:$0xff] }
 0x119   : > { %v1175_v24 = vshll.u32 %v4122_v9, 16  ;;  %v755_v54 = vadd.f32 %v3792_v56, %v717_v41  ;;  %v1314_v62 = vrot.slane %v4068_v63, 1  ;;  %vm786_vm8 = vcmp.gt.f32.partialorder %v754_v38, 0.0 }
 0x11a   : > { %v4132_v30 = vsel %vm3697_vm3, 0, %v942_v33  ;;  %v4141_v31 = vsel %vm1070_vm4, %v1161_v35, %v1165_v47  ;;  %v944_v19 = vshrl.u32 %v872_v60, 16  ;;  %v947_v61 = vshll.u32 %v872_v60, 16 }
 0x11b   : > { %1407 = vrot.lane.b32.xlu0 %v4132_v30, %s3055_s17  ;;  %v1168_v59 = vshrl.u32 %v4132_v30, 16  ;;  %v1170_v22 = vshll.u32 %v4132_v30, 16  ;;  %vm787_vm9 = vcmp.gt.f32.partialorder %v755_v54, 0.0  ;;  %v818_v25 = vmul.f32 0.2, %v754_v38 }
 0x11c   : > { %1375 = vrot.lane.b32.xlu1 %v4141_v31, %s3055_s17  ;;  %v946_v4 = vrot.slane %v944_v19, 7  ;;  %v819_v40 = vmul.f32 0.2, %v755_v54  ;;  %v719_v41 = vmul.f32 %v3766_v42, %v681_v44  ;;  %v1177_v46 = vrot.slane %v1175_v24, 1 }
 0x11d   : > { %v1172_v47 = vrot.slane %v1170_v22, 1  ;;  %v1315_v33 = vrot.slane %v4059_v23, 1  ;;  %v756_v3 = vadd.f32 %v3792_v56, %v718_v50  ;;  %v850_v35 = vsel %vm786_vm8, %v754_v38, %v818_v25 }
 0x11e   : > { %v949_v15 = vor.u32 %v947_v61, %v946_v4  ;;  %v851_v60 = vsel %vm787_vm9, %v755_v54, %v819_v40  ;;  %v4155_v1 = vsel %vm3697_vm3, %v946_v4, 0  ;;  %v757_v42 = vadd.f32 %v3792_v56, %v719_v41 }
 0x11f   : > { %1433 = vrot.lane.b32.xlu0 %v4127_v18, %s3055_s17  ;;  %v1173_v19 = vor.u32 %v1172_v47, %v1168_v59  ;;  %v873_v11 = vpack.c.bf16 %v851_v60, %v850_v35  ;;  %v1187_v23 = vshll.u32 %v4155_v1, 16  ;;  %vm788_vm11 = vcmp.gt.f32.partialorder %v756_v3, 0.0 }
 0x120   : > { %v4160_v24 = vsel %vm3697_vm3, 0, %v949_v15  ;;  %v820_v44 = vmul.f32 0.2, %v756_v3  ;;  %v4169_v54 = vsel %vm1295_vm10, %v1314_v62, %v1315_v33  ;;  %vm789_vm12 = vcmp.gt.f32.partialorder %v757_v42, 0.0 }
 0x121   : > { %1409 = vrot.lane.b32.xlu1 %v4160_v24, %s3055_s17  ;;  %v4166_v38 = vsel %vm1070_vm4, %v1173_v19, %v1177_v46  ;;  %v951_v50 = vshrl.u32 %v873_v11, 16  ;;  %v954_v61 = vshll.u32 %v873_v11, 16  ;;  %v1180_v56 = vshrl.u32 %v4160_v24, 16 }
 0x122   : > { %v1182_v59 = vshll.u32 %v4160_v24, 16  ;;  %v821_v22 = vmul.f32 0.2, %v757_v42  ;;  %v852_v25 = vsel %vm788_vm11, %v756_v3, %v820_v44  ;;  %v1189_v41 = vrot.slane %v1187_v23, 1 }
 0x123   : > { %1377 = vrot.lane.b32.xlu0 %v4166_v38, %s3055_s17  ;;  %v953_v4 = vrot.slane %v951_v50, 7  ;;  %v1317_v47 = vrot.slane %v4107_v27, 1  ;;  %v1318_v62 = vrot.slane %v4095_v21, 1 }
 0x124   : > { %v1184_v40 = vrot.slane %v1182_v59, 1  ;;  %v853_v46 = vsel %vm789_vm12, %v757_v42, %v821_v22 }
 0x125   : > { %1435 = vrot.lane.b32.xlu1 %v4169_v54, %s3055_s17  ;;  %v956_v11 = vor.u32 %v954_v61, %v953_v4  ;;  %v874_v33 = vpack.c.bf16 %v853_v46, %v852_v25  ;;  %v1063_v15 = vsel %vm3697_vm3, %v953_v4, 0  ;;  %v4195_v50 = vsel %vm1295_vm10, %v1317_v47, %v1318_v62 }
 0x126   : > { %v1185_v35 = vor.u32 %v1184_v40, %v1180_v56  ;;  %v1199_v60 = vshll.u32 %v1063_v15, 16  ;;  %v1320_v4 = vrot.slane %v4132_v30, 1  ;;  %v1321_v25 = vrot.slane %v4122_v9, 1 }
 0x127   : > { %v4183_v3 = vsel %vm3697_vm3, 0, %v956_v11  ;;  %v958_v19 = vshrl.u32 %v874_v33, 16  ;;  %v961_v23 = vshll.u32 %v874_v33, 16  ;;  %v1341_v11 = vrot.slane %v3941_v45, 1 }
 0x128   : > { %1411 = vrot.lane.b32.xlu0 %v4183_v3, %s3055_s17  ;;  %v4188_v42 = vsel %vm1070_vm4, %v1185_v35, %v1189_v41  ;;  %v1192_v21 = vshrl.u32 %v4183_v3, 16  ;;  %v1194_v44 = vshll.u32 %v4183_v3, 16  ;;  %v1201_v59 = vrot.slane %v1199_v60, 1 }
 0x129   : > { %1379 = vrot.lane.b32.xlu1 %v4188_v42, %s3055_s17  ;;  %v960_v61 = vrot.slane %v958_v19, 7  ;;  %v1342_v62 = vrot.slane %v3936_v36, 1  ;;  %v4217_v60 = vsel %vm1295_vm10, %v1320_v4, %v1321_v25  ;;  %v1326_v4 = vrot.slane %v4183_v3, 1 }
 0x12a   : > { %v1196_v56 = vrot.slane %v1194_v44, 1  ;;  %v1358_v44 = vrot.slane %v3988_v10, 1  ;;  %v1327_v25 = vrot.slane %v1063_v15, 1 }
 0x12b   : > { %v963_v22 = vor.u32 %v961_v23, %v960_v61  ;;  %v1064_v40 = vsel %vm3697_vm3, %v960_v61, 0  ;;  %v4220_v19 = vsel %vm1295_vm10, %v1341_v11, %v1342_v62  ;;  %v1323_v61 = vrot.slane %v4160_v24, 1 }
 0x12c   : > { %1437 = vrot.lane.b32.xlu0 %v4195_v50, %s3055_s17  ;;  %v1197_v41 = vor.u32 %v1196_v56, %v1192_v21  ;;  %v1211_v46 = vshll.u32 %v1064_v40, 16  ;;  %v1069_v21 = vsel %vm3697_vm3, %v3969_v0, 0  ;;  %v1324_v56 = vrot.slane %v4155_v1, 1 }
 0x12d   : > { %v4205_v47 = vsel %vm3697_vm3, 0, %v963_v22  ;;  %v1347_v11 = vshll.u32 %v3988_v10, 16  ;;  %v4249_v15 = vsel %vm1295_vm10, %v1326_v4, %v1327_v25  ;;  %v1332_v62 = vrot.slane %v3859_v32, 1 }
 0x12e   : > { %1413 = vrot.lane.b32.xlu1 %v4205_v47, %s3055_s17  ;;  %v4212_v9 = vsel %vm1070_vm4, %v1197_v41, %v1201_v59  ;;  %v1204_v33 = vshrl.u32 %v4205_v47, 16  ;;  %v1206_v35 = vshll.u32 %v4205_v47, 16  ;;  %v1213_v23 = vrot.slane %v1211_v46, 1 }
 0x12f   : > { %v1359_v59 = vrot.slane %v1069_v21, 1  ;;  %v4242_v0 = vsel %vm1295_vm10, %v1323_v61, %v1324_v56  ;;  %v1329_v1 = vrot.slane %v4205_v47, 1  ;;  %v1330_v46 = vrot.slane %v1064_v40, 1 }
 0x130   : > { %1381 = vrot.lane.b32.xlu0 %v4212_v9, %s3055_s17  ;;  %v1208_v36 = vrot.slane %v1206_v35, 1  ;;  %v1345_v40 = vshrl.u32 %v3988_v10, 16  ;;  %v1336_v61 = vrot.slane %v3830_v51, 1 }
 0x131   : > { %v4234_v41 = vsel %vm1295_vm10, %v1358_v44, %v1359_v59  ;;  %v4256_v35 = vsel %vm1295_vm10, %v1329_v1, %v1330_v46  ;;  %v1335_v44 = vrot.slane %v3834_v52, 1  ;;  %v1339_v59 = vrot.slane %v3891_v37, 1 }
 0x132   : > { %1439 = vrot.lane.b32.xlu1 %v4217_v60, %s3055_s17  ;;  %v1209_v22 = vor.u32 %v1208_v36, %v1204_v33  ;;  %v1333_v33 = vrot.slane %v3849_v28, 1  ;;  %v1349_v36 = vrot.slane %v1347_v11, 1  ;;  %v1338_v28 = vrot.slane %v3873_v17, 1 }
 0x133   : > { %v1296_v37 = vrot.slane %v3708_v8, 1  ;;  %v1297_v1 = vrot.slane %v3726_v2, 1 }
 0x134   : > { %1415 = vrot.lane.b32.xlu0 %v3859_v32, %s3055_s17  ;;  %v4239_v39 = vsel %vm1070_vm4, %v1209_v22, %v1213_v23  ;;  %v1352_v23 = vshll.u32 %v1069_v21, 16  ;;  %v4264_v56 = vsel %vm1295_vm10, %v1332_v62, %v1333_v33  ;;  %v1350_v22 = vor.u32 %v1349_v36, %v1345_v40  ;;  %v2976_v36 = vld [vmem:[%s4698_s4 + $0x108] sm:$0xff]  }
 0x135   : > { %v4273_v21 = vsel %vm1295_vm10, %v1335_v44, %v1336_v61  ;;  %v4278_v51 = vsel %vm1295_vm10, %v1338_v28, %v1339_v59  ;;  %v4294_v46 = vsel %vm1295_vm10, %v1296_v37, %v1297_v1  ;;  %v2978_v61 = vld [vmem:[%s4698_s4 + $0x110] sm:$0xff]   ;;  %v2961_v28 = vld [vmem:[%s4698_s4 + $0x80] sm:$0xff]   ;;  %v2964_v37 = vld [vmem:[%s4698_s4 + $0x88] sm:$0xff]  }
 0x136   : > { %1383 = vrot.lane.b32.xlu1 %v4239_v39, %s3055_s17  ;;  %v1354_v4 = vrot.slane %v1352_v23, 1 }
 0x138   : > { %1441 = vrot.lane.b32.xlu0 %v4242_v0, %s3055_s17  ;;  %v4281_v25 = vsel %vm1070_vm4, %v1350_v22, %v1354_v4  ;;  %v2979_v4 = vld [vmem:[%s4698_s4 + $0x118] sm:$0xff]  }
 0x13a   : > { %1443 = vrot.lane.b32.xlu1 %v4249_v15, %s3055_s17 }
 0x13c   : > { %1445 = vrot.lane.b32.xlu0 %v4256_v35, %s3055_s17 }
 0x13e   : > { %1447 = vrot.lane.b32.xlu1 %v4264_v56, %s3055_s17 }
 0x140   : > { %1449 = vrot.lane.b32.xlu0 %v4273_v21, %s3055_s17 }
 0x142   : > { %1451 = vrot.lane.b32.xlu1 %v4278_v51, %s3055_s17 }
 0x144   : > { %1457 = vrot.lane.b32.xlu0 %v4281_v25, %s3055_s17 }
 0x146   : > { %1453 = vrot.lane.b32.xlu1 %v4220_v19, %s3055_s17 }
 0x148   : > { %1455 = vrot.lane.b32.xlu0 %v4234_v41, %s3055_s17 }
 0x14b   : > { %v1418_v11 = vpop.permute.xlu0 %1417 }
 0x14c   : > { %v1394_v62 = vpop.permute.xlu1 %1393  ;;  %v1557_v33 = vsel %vm317_vm0, %v4264_v56, %v1418_v11 }
 0x14d   : > { %2094 = vmatprep.mubr.bf16.mxu1 %v1557_v33  ;;  %v1509_v40 = vsel %vm317_vm0, %v4294_v46, %v1394_v62  ;;  %v2966_v33 = vld [vmem:[%s4698_s4 + $0x90] sm:$0xff]  }
 0x14e   : > { %1998 = vmatprep.mubr.bf16.mxu0 %v1509_v40 }
 0x150   : > { %v1362_v2 = vpop.permute.xlu1 %1361 }
 0x151   : > { %v4305_v23 = vsel %vm317_vm0, %v3708_v8, %v1362_v2  ;;  %v2962_v8 = vld [vmem:[%s4698_s4 + $0xc8] sm:$0xff]  }
 0x152   : > { %1999 = vmatmul.mubr.bf16.vlgmr.msra.gmra.mrb[0].mxu0 %v4305_v23 }
 0x153   : > { %2879 = vmatpush3.bf16.msra.mxu0 %v3854_v5 }
 0x154   : > { %v1388_v44 = vpop.permute.xlu1 %1387  ;;  %2880 = vmatprep.subr.bf16.mxu0 %v2976_v36 }
 0x155   : > { %v4336_v62 = vsel %vm317_vm0, %v3834_v52, %v1388_v44  ;;  %v2968_v52 = vld [vmem:[%s4698_s4 + $0x98] sm:$0xff]  }
 0x156   : > { %v1386_v59 = vpop.permute.xlu0 %1385 }
 0x157   : > { %v4320_v22 = vsel %vm317_vm0, %v3859_v32, %v1386_v59  ;;  %2881 = vmatpush3.bf16.msra.mxu0 %v2976_v36  ;;  %v2965_v32 = vld [vmem:[%s4698_s4 + $0xd0] sm:$0xff]  }
 0x158   : > { %2095 = vmatmul.mubr.bf16.vlgmr.msra.gmra.mrb[0].mxu1 %v4320_v22  ;;  %v1364_v5 = vpop.permute.xlu1 %1363  ;;  %2882 = vmatprep.subr.bf16.mxu0 %v2978_v61 }
 0x159   : > { %2747 = vmatpush3.bf16.msra.mxu1 %v2961_v28  ;;  %v1463_v36 = vsel %vm317_vm0, %v3840_v55, %v1364_v5  ;;  %v2969_v55 = vld [vmem:[%s4698_s4 + $0xe0] sm:$0xff]  }
 0x15a   : > { %v1420_v1 = vpop.permute.xlu0 %1419  ;;  %2748 = vmatprep.subr.bf16.mxu1 %v2962_v8  ;;  %v2970_v5 = vld [vmem:[%s4698_s4 + $0xa0] sm:$0xff]  }
 0x15b   : > { %v1561_v11 = vsel %vm317_vm0, %v4273_v21, %v1420_v1  ;;  %2883 = vmatpush3.bf16.msra.mxu0 %v2978_v61  ;;  %v2967_v61 = vld [vmem:[%s4698_s4 + $0xd8] sm:$0xff]   ;;  %v2971_v1 = vld [vmem:[%s4698_s4 + $0xe8] sm:$0xff]  }
 0x15c   : > { %2102 = vmatprep.mubr.bf16.mxu1 %v1561_v11  ;;  %2884 = vmatprep.subr.bf16.mxu0 %v2979_v4  ;;  %v2972_v11 = vld [vmem:[%s4698_s4 + $0xa8] sm:$0xff]  }
 0x15d   : > { %2749 = vmatpush3.bf16.msra.mxu1 %v2964_v37  ;;  %v1390_v40 = vpop.permute.xlu1 %1389 }
 0x15e   : > { %v1396_v2 = vpop.permute.xlu0 %1395  ;;  %2750 = vmatprep.subr.bf16.mxu1 %v2965_v32  ;;  %v4359_v8 = vsel %vm317_vm0, %v3873_v17, %v1390_v40 }
 0x15f   : > { %v1513_v28 = vsel %vm317_vm0, %v3999_v48, %v1396_v2  ;;  %2885 = vmatpush3.bf16.msra.mxu0 %v2979_v4 }
 0x160   : > { %2006 = vmatprep.mubr.bf16.mxu0 %v1513_v28  ;;  %2103 = vmatmul.mubr.bf16.gmra.mrb[4].mxu1 %v4336_v62 }
 0x161   : > { %2751 = vmatpush3.bf16.msra.mxu1 %v2966_v33  ;;  %2007 = vmatmul.mubr.bf16.gmra.mrb[4].mxu0 %v1463_v36  ;;  %v2974_v36 = vld [vmem:[%s4698_s4 + $0xb0] sm:$0xff]  }
 0x162   : > { %v1422_v44 = vpop.permute.xlu0 %1421  ;;  %2752 = vmatprep.subr.bf16.mxu1 %v2967_v61  ;;  %v1366_v48 = vpop.permute.xlu1 %1365  ;;  %v2975_v61 = vld [vmem:[%s4698_s4 + $0xf8] sm:$0xff]  }
 0x163   : > { %v1565_v59 = vsel %vm317_vm0, %v4278_v51, %v1422_v44  ;;  %v1466_v37 = vsel %vm317_vm0, %v3915_v57, %v1366_v48  ;;  %v2973_v57 = vld [vmem:[%s4698_s4 + $0xf0] sm:$0xff]  }
 0x164   : > { %2110 = vmatprep.mubr.bf16.mxu1 %v1565_v59 }
 0x165   : > { %2753 = vmatpush3.bf16.msra.mxu1 %v2968_v52 }
 0x166   : > { %v1398_v4 = vpop.permute.xlu0 %1397  ;;  %2754 = vmatprep.subr.bf16.mxu1 %v2969_v55 }
 0x167   : > { %v1517_v32 = vsel %vm317_vm0, %v4029_v43, %v1398_v4 }
 0x168   : > { %2014 = vmatprep.mubr.bf16.mxu0 %v1517_v32  ;;  %2111 = vmatmul.mubr.bf16.gmra.mrb[8].mxu1 %v4359_v8  ;;  %v1392_v17 = vpop.permute.xlu1 %1391 }
 0x169   : > { %2755 = vmatpush3.bf16.msra.mxu1 %v2970_v5  ;;  %2015 = vmatmul.mubr.bf16.gmra.mrb[8].mxu0 %v1466_v37  ;;  %v4382_v2 = vsel %vm317_vm0, %v3941_v45, %v1392_v17  ;;  %v2977_v45 = vld [vmem:[%s4698_s4 + $0xb8] sm:$0xff]  }
 0x16a   : > { %2756 = vmatprep.subr.bf16.mxu1 %v2971_v1 }
 0x16c   : > { %v1424_v33 = vpop.permute.xlu0 %1423 }
 0x16d   : > { %2757 = vmatpush3.bf16.msra.mxu1 %v2972_v11  ;;  %v1569_v40 = vsel %vm317_vm0, %v4220_v19, %v1424_v33 }
 0x16e   : > { %2118 = vmatprep.mubr.bf16.mxu1 %v1569_v40  ;;  %2758 = vmatprep.subr.bf16.mxu1 %v2973_v57  ;;  %v1368_v28 = vpop.permute.xlu1 %1367 }
 0x16f   : > { %v1469_v44 = vsel %vm317_vm0, %v3964_v58, %v1368_v28 }
 0x170   : > { %2119 = vmatmul.mubr.bf16.gmra.mrb[12].mxu1 %v4382_v2 }
 0x171   : > { %2759 = vmatpush3.bf16.msra.mxu1 %v2974_v36  ;;  %2159 = vmatprep.mubr.bf16.mxu1 %v1466_v37 }
 0x172   : > { %v1400_v52 = vpop.permute.xlu0 %1399  ;;  %2760 = vmatprep.subr.bf16.mxu1 %v2975_v61 }
 0x173   : > { %v1521_v55 = vsel %vm317_vm0, %v4074_v20, %v1400_v52 }
 0x174   : > { %2022 = vmatprep.mubr.bf16.mxu0 %v1521_v55 }
 0x175   : > { %2023 = vmatmul.mubr.bf16.gmra.mrb[12].mxu0 %v1469_v44  ;;  %2761 = vmatpush3.bf16.msra.mxu1 %v2977_v45 }
 0x176   : > { %v1426_v59 = vpop.permute.xlu0 %1425 }
 0x177   : > { %v1573_v48 = vsel %vm317_vm0, %v3898_v16, %v1426_v59 }
 0x178   : > { %2160 = vmatmul.mubr.bf16.vlgmr.msra.gmra.mrb[16].mxu1 %v1573_v48 }
 0x179   : > { %2167 = vmatprep.mubr.bf16.mxu1 %v1469_v44 }
 0x17a   : > { %v1402_v5 = vpop.permute.xlu1 %1401  ;;  %v1370_v4 = vpop.permute.xlu0 %1369 }
 0x17b   : > { %v1525_v37 = vsel %vm317_vm0, %v4090_v14, %v1402_v5  ;;  %v1472_v58 = vsel %vm317_vm0, %v4014_v6, %v1370_v4 }
 0x17c   : > { %2030 = vmatprep.mubr.bf16.mxu0 %v1525_v37 }
 0x17d   : > { %2031 = vmatmul.mubr.bf16.gmra.mrb[16].mxu0 %v1472_v58 }
 0x17e   : > { %v1428_v1 = vpop.permute.xlu1 %1427  ;;  %v1404_v32 = vpop.permute.xlu0 %1403 }
 0x17f   : > { %v1577_v17 = vsel %vm317_vm0, %v3945_v13, %v1428_v1  ;;  %v1529_v16 = vsel %vm317_vm0, %v4127_v18, %v1404_v32 }
 0x180   : > { %2168 = vmatmul.mubr.bf16.gmra.mrb[20].mxu1 %v1577_v17  ;;  %2038 = vmatprep.mubr.bf16.mxu0 %v1529_v16 }
 0x181   : > { %2175 = vmatprep.mubr.bf16.mxu1 %v1472_v58 }
 0x182   : > { %v1372_v11 = vpop.permute.xlu1 %1371  ;;  %v1430_v33 = vpop.permute.xlu0 %1429 }
 0x183   : > { %v1475_v57 = vsel %vm317_vm0, %v4046_v29, %v1372_v11  ;;  %v1581_v6 = vsel %vm317_vm0, %v3996_v34, %v1430_v33 }
 0x185   : > { %2039 = vmatmul.mubr.bf16.gmra.mrb[20].mxu0 %v1475_v57 }
 0x186   : > { %v1406_v40 = vpop.permute.xlu1 %1405  ;;  %v1374_v36 = vpop.permute.xlu0 %1373 }
 0x187   : > { %v1533_v13 = vsel %vm317_vm0, %v4169_v54, %v1406_v40  ;;  %v1478_v61 = vsel %vm317_vm0, %v4068_v63, %v1374_v36 }
 0x188   : > { %2176 = vmatmul.mubr.bf16.gmra.mrb[24].mxu1 %v1581_v6  ;;  %2046 = vmatprep.mubr.bf16.mxu0 %v1533_v13 }
 0x189   : > { %2183 = vmatprep.mubr.bf16.mxu1 %v1475_v57 }
 0x18a   : > { %v1432_v28 = vpop.permute.xlu1 %1431 }
 0x18b   : > { %v1585_v29 = vsel %vm317_vm0, %v4039_v49, %v1432_v28 }
 0x18d   : > { %2047 = vmatmul.mubr.bf16.gmra.mrb[24].mxu0 %v1478_v61  ;;  %v1408_v45 = vpop.permute.xlu0 %1407 }
 0x18e   : > { %v1537_v34 = vsel %vm317_vm0, %v4195_v50, %v1408_v45  ;;  %v1376_v52 = vpop.permute.xlu1 %1375 }
 0x18f   : > { %2054 = vmatprep.mubr.bf16.mxu0 %v1537_v34  ;;  %v1481_v55 = vsel %vm317_vm0, %v4107_v27, %v1376_v52 }
 0x190   : > { %2184 = vmatmul.mubr.bf16.gmra.mrb[28].mxu1 %v1585_v29 }
 0x191   : > { %2191 = vmatprep.mubr.bf16.mxu1 %v1478_v61  ;;  %v1434_v44 = vpop.permute.xlu0 %1433 }
 0x192   : > { %v1589_v48 = vsel %vm317_vm0, %v4081_v53, %v1434_v44 }
 0x193   : > { %v1410_v59 = vpop.permute.xlu1 %1409 }
 0x194   : > { %v1541_v63 = vsel %vm317_vm0, %v4217_v60, %v1410_v59 }
 0x195   : > { %2055 = vmatmul.mubr.bf16.gmra.mrb[28].mxu0 %v1481_v55  ;;  %v1378_v49 = vpop.permute.xlu0 %1377 }
 0x196   : > { %2062 = vmatprep.mubr.bf16.mxu0 %v1541_v63  ;;  %v1484_v4 = vsel %vm317_vm0, %v4132_v30, %v1378_v49 }
 0x197   : > { %v1436_v5 = vpop.permute.xlu1 %1435 }
 0x198   : > { %2192 = vmatmul.mubr.bf16.gmra.mrb[32].mxu1 %v1589_v48  ;;  %v1593_v1 = vsel %vm317_vm0, %v4099_v26, %v1436_v5 }
 0x199   : > { %2199 = vmatprep.mubr.bf16.mxu1 %v1481_v55 }
 0x19a   : > { %v1412_v37 = vpop.permute.xlu0 %1411 }
 0x19b   : > { %v1545_v27 = vsel %vm317_vm0, %v4242_v0, %v1412_v37  ;;  %v1380_v58 = vpop.permute.xlu1 %1379 }
 0x19c   : > { %v1487_v17 = vsel %vm317_vm0, %v4160_v24, %v1380_v58 }
 0x19d   : > { %2063 = vmatmul.mubr.bf16.gmra.mrb[32].mxu0 %v1484_v4 }
 0x19e   : > { %2070 = vmatprep.mubr.bf16.mxu0 %v1545_v27  ;;  %v1438_v32 = vpop.permute.xlu0 %1437 }
 0x19f   : > { %v1597_v11 = vsel %vm317_vm0, %v4141_v31, %v1438_v32 }
 0x1a0   : > { %2200 = vmatmul.mubr.bf16.gmra.mrb[36].mxu1 %v1593_v1  ;;  %v1414_v53 = vpop.permute.xlu1 %1413 }
 0x1a1   : > { %2207 = vmatprep.mubr.bf16.mxu1 %v1484_v4  ;;  %v1549_v30 = vsel %vm317_vm0, %v4249_v15, %v1414_v53 }
 0x1a2   : > { %v1382_v16 = vpop.permute.xlu0 %1381 }
 0x1a3   : > { %v1490_v33 = vsel %vm317_vm0, %v4183_v3, %v1382_v16 }
 0x1a4   : > { %v1440_v26 = vpop.permute.xlu1 %1439 }
 0x1a5   : > { %2071 = vmatmul.mubr.bf16.gmra.mrb[36].mxu0 %v1487_v17  ;;  %v1601_v24 = vsel %vm317_vm0, %v4166_v38, %v1440_v26 }
 0x1a6   : > { %2078 = vmatprep.mubr.bf16.mxu0 %v1549_v30  ;;  %v1416_v57 = vpop.permute.xlu0 %1415 }
 0x1a7   : > { %v1553_v6 = vsel %vm317_vm0, %v4256_v35, %v1416_v57 }
 0x1a8   : > { %2208 = vmatmul.mubr.bf16.gmra.mrb[40].mxu1 %v1597_v11  ;;  %v1384_v40 = vpop.permute.xlu1 %1383 }
 0x1a9   : > { %2215 = vmatprep.mubr.bf16.mxu1 %v1487_v17  ;;  %v1493_v31 = vsel %vm317_vm0, %v4205_v47, %v1384_v40 }
 0x1aa   : > { %v1442_v36 = vpop.permute.xlu0 %1441 }
 0x1ab   : > { %v1605_v13 = vsel %vm317_vm0, %v4188_v42, %v1442_v36 }
 0x1ac   : > { %v1444_v3 = vpop.permute.xlu1 %1443 }
 0x1ad   : > { %2079 = vmatmul.mubr.bf16.gmra.mrb[40].mxu0 %v1490_v33  ;;  %v1609_v38 = vsel %vm317_vm0, %v4212_v9, %v1444_v3 }
 0x1ae   : > { %2086 = vmatprep.mubr.bf16.mxu0 %v1553_v6  ;;  %v1446_v47 = vpop.permute.xlu0 %1445 }
 0x1b0   : > { %2216 = vmatmul.mubr.bf16.gmra.mrb[44].mxu1 %v1601_v24 }
 0x1b1   : > { %2223 = vmatprep.mubr.bf16.mxu1 %v1490_v33 }
 0x1b5   : > { %2087 = vmatmul.mubr.bf16.gmra.mrb[44].mxu0 %v1493_v31 }
 0x1b6   : > { %2886 = vmatprep.mubr.msk.bf16.mxu0 %vm317_vm0, %v4029_v43  ;;  %v1613_v43 = vsel %vm317_vm0, %v4239_v39, %v1446_v47  ;;  %v4708_v39 = vld [vmem:[#allocation3_spill] sm:$0xff]  ;;  %v4520_v47 = vld [vmem:[%s4699_s5] ss:$0 sm:$0xff] }
 0x1b8   : > { %2224 = vmatmul.mubr.bf16.gmra.mrb[48].mxu1 %v1605_v13 }
 0x1b9   : > { %2231 = vmatprep.mubr.bf16.mxu1 %v1493_v31 }
 0x1bd   : > { %2887 = vmatmul.mubr.msk.bf16.vlgmr.msra.gmra.mrb[48].mxu0 %vm317_vm0, %v4074_v20  ;;  %v1448_v20 = vpop.permute.xlu1 %1447 }
 0x1be   : > { %2890 = vmatprep.mubr.msk.bf16.mxu0 %vm317_vm0, %v4090_v14  ;;  %v1617_v14 = vsel %vm317_vm0, %v3887_v12, %v1448_v20 }
 0x1c0   : > { %2232 = vmatmul.mubr.bf16.gmra.mrb[52].mxu1 %v1609_v38 }
 0x1c1   : > { %2239 = vmatprep.mubr.bf16.mxu1 %v4320_v22  ;;  %v1452_v12 = vpop.permute.xlu1 %1451 }
 0x1c5   : > { %2891 = vmatmul.mubr.msk.bf16.gmra.mrb[52].mxu0 %vm317_vm0, %v4127_v18  ;;  %v1450_v18 = vpop.permute.xlu0 %1449 }
 0x1c6   : > { %2894 = vmatprep.mubr.msk.bf16.mxu0 %vm317_vm0, %v4169_v54  ;;  %v1621_v54 = vsel %vm317_vm0, %v3879_v7, %v1450_v18 }
 0x1c8   : > { %2240 = vmatmul.mubr.bf16.gmra.mrb[56].mxu1 %v1613_v43 }
 0x1c9   : > { %2247 = vmatprep.mubr.bf16.mxu1 %v4336_v62  ;;  %v1458_v42 = vpop.permute.xlu0 %1457 }
 0x1ca   : > { %v1636_v7 = vsel %vm317_vm0, %v3988_v10, %v1458_v42 }
 0x1cd   : > { %2895 = vmatmul.mubr.msk.bf16.gmra.mrb[56].mxu0 %vm317_vm0, %v4195_v50  ;;  %v4707_v50 = vld [vmem:[#allocation2_spill] sm:$0xff] }
 0x1ce   : > { %2898 = vmatprep.mubr.msk.bf16.mxu0 %vm317_vm0, %v4217_v60  ;;  %v1625_v9 = vsel %vm317_vm0, %v4707_v50, %v1452_v12  ;;  %v1454_v60 = vpop.permute.xlu1 %1453 }
 0x1d0   : > { %2248 = vmatmul.mubr.bf16.gmra.mrb[60].mxu1 %v1617_v14 }
 0x1d1   : > { %2255 = vmatprep.mubr.bf16.mxu1 %v4359_v8 }
 0x1d5   : > { %2899 = vmatmul.mubr.msk.bf16.gmra.mrb[60].mxu0 %vm317_vm0, %v4242_v0  ;;  %v1629_v0 = vsel %vm317_vm0, %v4708_v39, %v1454_v60 }
 0x1d6   : > { %2902 = vmatprep.mubr.msk.bf16.mxu0 %vm317_vm0, %v4249_v15  ;;  %v1456_v15 = vpop.permute.xlu0 %1455 }
 0x1d7   : > { %v1633_v10 = vsel %vm317_vm0, %v4281_v25, %v1456_v15 }
 0x1d8   : > { %2256 = vmatmul.mubr.bf16.gmra.mrb[64].mxu1 %v1621_v54 }
 0x1d9   : > { %2263 = vmatprep.mubr.bf16.mxu1 %v4382_v2 }
 0x1dd   : > { %2903 = vmatmul.mubr.msk.bf16.gmra.mrb[64].mxu0 %vm317_vm0, %v4256_v35 }
 0x1de   : > { %2906 = vmatprep.mubr.msk.bf16.mxu0 %vm317_vm0, %v4264_v56 }
 0x1e0   : > { %2264 = vmatmul.mubr.bf16.gmra.mrb[68].mxu1 %v1625_v9 }
 0x1e1   : > { %2271 = vmatprep.mubr.bf16.mxu1 %v1636_v7 }
 0x1e5   : > { %2907 = vmatmul.mubr.msk.bf16.gmra.mrb[68].mxu0 %vm317_vm0, %v4273_v21 }
 0x1e6   : > { %2910 = vmatprep.mubr.msk.bf16.mxu0 %vm317_vm0, %v4278_v51 }
 0x1e8   : > { %2272 = vmatmul.mubr.bf16.gmra.mrb[72].mxu1 %v1629_v0 }
 0x1e9   : > { %2279 = vmatprep.mubr.bf16.mxu1 %v4305_v23 }
 0x1ed   : > { %2911 = vmatmul.mubr.msk.bf16.gmra.mrb[72].mxu0 %vm317_vm0, %v4220_v19 }
 0x1ee   : > { %2914 = vmatprep.mubr.msk.bf16.mxu0 %vm317_vm0, %v4234_v41 }
 0x1f0   : > { %2280 = vmatmul.mubr.bf16.gmra.mrb[76].mxu1 %v1633_v10 }
 0x1f5   : > { %2915 = vmatmul.mubr.msk.bf16.gmra.mrb[76].mxu0 %vm317_vm0, %v4294_v46 }
 0x225   : > { %v2650_v35 = vpop.f32.mrb[0].mxu0 }
 0x226   : > { %v2651_v56 = vpop.f32.mrb[1].mxu0 }
 0x227   : > { %v2652_v21 = vadd.f32 %v2651_v56, %v2650_v35  ;;  %v2653_v51 = vpop.f32.mrb[2].mxu0 }
 0x228   : > { %v2654_v22 = vpop.f32.mrb[3].mxu0 }
 0x229   : > { %v2655_v23 = vadd.f32 %v2654_v22, %v2653_v51  ;;  %v2001_v14 = vadd.f32 %v2652_v21, %v4520_v47 }
 0x22b   : > { %v2722_v62 = vpop.f32.mrb[0].mxu1  ;;  %v2004_v42 = vadd.f32 %v2655_v23, %v4520_v47 }
 0x22c   : > { %v2723_v8 = vpop.f32.mrb[1].mxu1 }
 0x22d   : > { %v4501_v2 = vadd.f32 %v2723_v8, %v2722_v62  ;;  %v2725_v19 = vpop.f32.mrb[2].mxu1 }
 0x22e   : > { %v2726_v61 = vpop.f32.mrb[3].mxu1 }
 0x22f   : > { %v4503_v25 = vadd.f32 %v2726_v61, %v2725_v19 }
 0x233   : > { %v2728_v28 = vpop.f32.mrb[4].mxu1 }
 0x234   : > { %v2656_v41 = vpop.f32.mrb[4].mxu0  ;;  %v2729_v45 = vpop.f32.mrb[5].mxu1 }
 0x235   : > { %v4505_v29 = vadd.f32 %v2729_v45, %v2728_v28  ;;  %v2657_v46 = vpop.f32.mrb[5].mxu0  ;;  %v2731_v34 = vpop.f32.mrb[6].mxu1 }
 0x236   : > { %v2658_v52 = vadd.f32 %v2657_v46, %v2656_v41  ;;  %v2659_v44 = vpop.f32.mrb[6].mxu0  ;;  %v2732_v55 = vpop.f32.mrb[7].mxu1 }
 0x237   : > { %v4507_v59 = vadd.f32 %v2732_v55, %v2731_v34  ;;  %v2660_v63 = vpop.f32.mrb[7].mxu0 }
 0x238   : > { %v2661_v48 = vadd.f32 %v2660_v63, %v2659_v44  ;;  %v2009_v21 = vadd.f32 %v2658_v52, %v4520_v47 }
 0x23a   : > { %v2012_v23 = vadd.f32 %v2661_v48, %v4520_v47 }
 0x23b   : > { %v2734_v49 = vpop.f32.mrb[8].mxu1 }
 0x23c   : > { %v2662_v5 = vpop.f32.mrb[8].mxu0  ;;  %v2735_v4 = vpop.f32.mrb[9].mxu1 }
 0x23d   : > { %v4509_v37 = vadd.f32 %v2735_v4, %v2734_v49  ;;  %v2663_v27 = vpop.f32.mrb[9].mxu0  ;;  %v2737_v58 = vpop.f32.mrb[10].mxu1 }
 0x23e   : > { %v2664_v1 = vadd.f32 %v2663_v27, %v2662_v5  ;;  %v2665_v32 = vpop.f32.mrb[10].mxu0  ;;  %v2738_v53 = vpop.f32.mrb[11].mxu1 }
 0x23f   : > { %v4511_v17 = vadd.f32 %v2738_v53, %v2737_v58  ;;  %v2666_v30 = vpop.f32.mrb[11].mxu0 }
 0x240   : > { %v2667_v16 = vadd.f32 %v2666_v30, %v2665_v32  ;;  %v2017_v52 = vadd.f32 %v2664_v1, %v4520_v47 }
 0x242   : > { %v2020_v48 = vadd.f32 %v2667_v16, %v4520_v47 }
 0x243   : > { %v2740_v11 = vpop.f32.mrb[12].mxu1 }
 0x244   : > { %v2741_v57 = vpop.f32.mrb[13].mxu1 }
 0x245   : > { %v4513_v26 = vadd.f32 %v2741_v57, %v2740_v11  ;;  %v2743_v33 = vpop.f32.mrb[14].mxu1 }
 0x246   : > { %v2744_v6 = vpop.f32.mrb[15].mxu1 }
 0x247   : > { %v4515_v24 = vadd.f32 %v2744_v6, %v2743_v33 }
 0x248   : > { %v2668_v40 = vpop.f32.mrb[12].mxu0 }
 0x249   : > { %v2669_v31 = vpop.f32.mrb[13].mxu0 }
 0x24a   : > { %v2670_v36 = vadd.f32 %v2669_v31, %v2668_v40  ;;  %v2671_v13 = vpop.f32.mrb[14].mxu0 }
 0x24b   : > { %v2672_v3 = vpop.f32.mrb[15].mxu0  ;;  %v2762_v38 = vpop.f32.mrb[16].mxu1 }
 0x24c   : > { %v2673_v43 = vadd.f32 %v2672_v3, %v2671_v13  ;;  %v2763_v20 = vpop.f32.mrb[17].mxu1  ;;  %v2025_v1 = vadd.f32 %v2670_v36, %v4520_v47 }
 0x24d   : > { %v2764_v18 = vadd.f32 %v2763_v20, %v2762_v38  ;;  %v2765_v54 = vpop.f32.mrb[18].mxu1 }
 0x24e   : > { %v2766_v12 = vpop.f32.mrb[19].mxu1  ;;  %v2028_v16 = vadd.f32 %v2673_v43, %v4520_v47 }
 0x24f   : > { %v2767_v50 = vadd.f32 %v2766_v12, %v2765_v54  ;;  %v4524_v9 = vadd.f32 %v2764_v18, %v2001_v14 }
 0x250   : > { %v2674_v7 = vpop.f32.mrb[16].mxu0 }
 0x251   : > { %v2675_v60 = vpop.f32.mrb[17].mxu0  ;;  %v4526_v39 = vadd.f32 %v2767_v50, %v2004_v42 }
 0x252   : > { %v2676_v0 = vadd.f32 %v2675_v60, %v2674_v7  ;;  %v2677_v15 = vpop.f32.mrb[18].mxu0 }
 0x253   : > { %v2678_v10 = vpop.f32.mrb[19].mxu0  ;;  %v2768_v35 = vpop.f32.mrb[20].mxu1 }
 0x254   : > { %v2679_v56 = vadd.f32 %v2678_v10, %v2677_v15  ;;  %v2769_v51 = vpop.f32.mrb[21].mxu1  ;;  %v2033_v36 = vadd.f32 %v2676_v0, %v4520_v47 }
 0x255   : > { %v2770_v22 = vadd.f32 %v2769_v51, %v2768_v35  ;;  %v2771_v62 = vpop.f32.mrb[22].mxu1 }
 0x256   : > { %v2772_v8 = vpop.f32.mrb[23].mxu1  ;;  %v2036_v43 = vadd.f32 %v2679_v56, %v4520_v47 }
 0x257   : > { %v2773_v19 = vadd.f32 %v2772_v8, %v2771_v62  ;;  %v4530_v61 = vadd.f32 %v2770_v22, %v2009_v21 }
 0x258   : > { %v2680_v28 = vpop.f32.mrb[20].mxu0 }
 0x259   : > { %v2681_v41 = vpop.f32.mrb[21].mxu0  ;;  %v4532_v45 = vadd.f32 %v2773_v19, %v2012_v23 }
 0x25a   : > { %v2682_v46 = vadd.f32 %v2681_v41, %v2680_v28  ;;  %v2683_v34 = vpop.f32.mrb[22].mxu0 }
 0x25b   : > { %v2684_v44 = vpop.f32.mrb[23].mxu0  ;;  %v2774_v55 = vpop.f32.mrb[24].mxu1 }
 0x25c   : > { %v2685_v63 = vadd.f32 %v2684_v44, %v2683_v34  ;;  %v2775_v49 = vpop.f32.mrb[25].mxu1  ;;  %v2041_v0 = vadd.f32 %v2682_v46, %v4520_v47 }
 0x25d   : > { %v2776_v5 = vadd.f32 %v2775_v49, %v2774_v55  ;;  %v2777_v4 = vpop.f32.mrb[26].mxu1 }
 0x25e   : > { %v2778_v27 = vpop.f32.mrb[27].mxu1  ;;  %v2044_v56 = vadd.f32 %v2685_v63, %v4520_v47 }
 0x25f   : > { %v2779_v58 = vadd.f32 %v2778_v27, %v2777_v4  ;;  %v4536_v32 = vadd.f32 %v2776_v5, %v2017_v52 }
 0x260   : > { %v2686_v53 = vpop.f32.mrb[24].mxu0 }
 0x261   : > { %v2687_v30 = vpop.f32.mrb[25].mxu0  ;;  %v4538_v11 = vadd.f32 %v2779_v58, %v2020_v48 }
 0x262   : > { %v2688_v57 = vadd.f32 %v2687_v30, %v2686_v53  ;;  %v2689_v33 = vpop.f32.mrb[26].mxu0 }
 0x263   : > { %v2690_v6 = vpop.f32.mrb[27].mxu0  ;;  %v2780_v40 = vpop.f32.mrb[28].mxu1 }
 0x264   : > { %v2691_v31 = vadd.f32 %v2690_v6, %v2689_v33  ;;  %v2781_v13 = vpop.f32.mrb[29].mxu1  ;;  %v2049_v46 = vadd.f32 %v2688_v57, %v4520_v47 }
 0x265   : > { %v2782_v3 = vadd.f32 %v2781_v13, %v2780_v40  ;;  %v2783_v38 = vpop.f32.mrb[30].mxu1 }
 0x266   : > { %v2784_v20 = vpop.f32.mrb[31].mxu1  ;;  %v2052_v63 = vadd.f32 %v2691_v31, %v4520_v47 }
 0x267   : > { %v2785_v14 = vadd.f32 %v2784_v20, %v2783_v38  ;;  %v4542_v18 = vadd.f32 %v2782_v3, %v2025_v1 }
 0x268   : > { %v2692_v54 = vpop.f32.mrb[28].mxu0 }
 0x269   : > { %v2693_v12 = vpop.f32.mrb[29].mxu0  ;;  %v4544_v42 = vadd.f32 %v2785_v14, %v2028_v16 }
 0x26a   : > { %v2694_v50 = vadd.f32 %v2693_v12, %v2692_v54  ;;  %v2695_v7 = vpop.f32.mrb[30].mxu0 }
 0x26b   : > { %v2696_v60 = vpop.f32.mrb[31].mxu0  ;;  %v2786_v15 = vpop.f32.mrb[32].mxu1 }
 0x26c   : > { %v2697_v10 = vadd.f32 %v2696_v60, %v2695_v7  ;;  %v2787_v35 = vpop.f32.mrb[33].mxu1 }
 0x26d   : > { %v2788_v51 = vadd.f32 %v2787_v35, %v2786_v15  ;;  %v2789_v21 = vpop.f32.mrb[34].mxu1 }
 0x26e   : > { %v2790_v22 = vpop.f32.mrb[35].mxu1 }
 0x26f   : > { %v2791_v62 = vadd.f32 %v2790_v22, %v2789_v21  ;;  %v4548_v8 = vadd.f32 %v2788_v51, %v2033_v36 }
 0x270   : > { %v2698_v23 = vpop.f32.mrb[32].mxu0 }
 0x271   : > { %v2699_v19 = vpop.f32.mrb[33].mxu0  ;;  %v4550_v28 = vadd.f32 %v2791_v62, %v2036_v43  ;;  %v2057_v43 = vadd.f32 %v2694_v50, %v4520_v47 }
 0x272   : > { %v2700_v41 = vadd.f32 %v2699_v19, %v2698_v23  ;;  %v2701_v34 = vpop.f32.mrb[34].mxu0  ;;  %v2060_v19 = vadd.f32 %v2697_v10, %v4520_v47 }
 0x273   : > { %v2702_v44 = vpop.f32.mrb[35].mxu0  ;;  %v2792_v55 = vpop.f32.mrb[36].mxu1 }
 0x274   : > { %v2703_v49 = vadd.f32 %v2702_v44, %v2701_v34  ;;  %v2793_v52 = vpop.f32.mrb[37].mxu1 }
 0x275   : > { %v2794_v5 = vadd.f32 %v2793_v52, %v2792_v55  ;;  %v2795_v4 = vpop.f32.mrb[38].mxu1 }
 0x276   : > { %v2796_v27 = vpop.f32.mrb[39].mxu1 }
 0x277   : > { %v2797_v48 = vadd.f32 %v2796_v27, %v2795_v4  ;;  %v4554_v58 = vadd.f32 %v2794_v5, %v2041_v0 }
 0x278   : > { %v2704_v53 = vpop.f32.mrb[36].mxu0 }
 0x279   : > { %v2705_v30 = vpop.f32.mrb[37].mxu0  ;;  %v4556_v33 = vadd.f32 %v2797_v48, %v2044_v56 }
 0x27a   : > { %v2706_v6 = vadd.f32 %v2705_v30, %v2704_v53  ;;  %v2707_v40 = vpop.f32.mrb[38].mxu0  ;;  %v2065_v53 = vadd.f32 %v2700_v41, %v4520_v47 }
 0x27b   : > { %v2708_v13 = vpop.f32.mrb[39].mxu0  ;;  %v2798_v1 = vpop.f32.mrb[40].mxu1 }
 0x27c   : > { %v2709_v3 = vadd.f32 %v2708_v13, %v2707_v40  ;;  %v2799_v38 = vpop.f32.mrb[41].mxu1  ;;  %v2068_v13 = vadd.f32 %v2703_v49, %v4520_v47 }
 0x27d   : > { %v2800_v20 = vadd.f32 %v2799_v38, %v2798_v1  ;;  %v2801_v16 = vpop.f32.mrb[42].mxu1 }
 0x27e   : > { %v2802_v14 = vpop.f32.mrb[43].mxu1 }
 0x27f   : > { %v2803_v54 = vadd.f32 %v2802_v14, %v2801_v16  ;;  %v4560_v12 = vadd.f32 %v2800_v20, %v2049_v46 }
 0x280   : > { %v2710_v7 = vpop.f32.mrb[40].mxu0 }
 0x281   : > { %v2711_v60 = vpop.f32.mrb[41].mxu0  ;;  %v4562_v15 = vadd.f32 %v2803_v54, %v2052_v63 }
 0x282   : > { %v4564_v35 = vadd.f32 %v2711_v60, %v2710_v7  ;;  %v2713_v36 = vpop.f32.mrb[42].mxu0 }
 0x283   : > { %v2714_v51 = vpop.f32.mrb[43].mxu0  ;;  %v2804_v21 = vpop.f32.mrb[44].mxu1 }
 0x284   : > { %v4566_v22 = vadd.f32 %v2714_v51, %v2713_v36  ;;  %v2805_v57 = vpop.f32.mrb[45].mxu1  ;;  %v2073_v51 = vadd.f32 %v2706_v6, %v4520_v47 }
 0x285   : > { %v2806_v62 = vadd.f32 %v2805_v57, %v2804_v21  ;;  %v2807_v23 = vpop.f32.mrb[46].mxu1 }
 0x286   : > { %v2808_v31 = vpop.f32.mrb[47].mxu1 }
 0x287   : > { %v2809_v34 = vadd.f32 %v2808_v31, %v2807_v23  ;;  %v4570_v44 = vadd.f32 %v2806_v62, %v2057_v43 }
 0x288   : > { %v2716_v55 = vpop.f32.mrb[44].mxu0 }
 0x289   : > { %v2717_v52 = vpop.f32.mrb[45].mxu0  ;;  %v4572_v0 = vadd.f32 %v2809_v34, %v2060_v19 }
 0x28a   : > { %v4574_v5 = vadd.f32 %v2717_v52, %v2716_v55  ;;  %v2719_v4 = vpop.f32.mrb[46].mxu0 }
 0x28b   : > { %v2720_v27 = vpop.f32.mrb[47].mxu0  ;;  %v2810_v56 = vpop.f32.mrb[48].mxu1 }
 0x28c   : > { %v4576_v48 = vadd.f32 %v2720_v27, %v2719_v4  ;;  %v2811_v50 = vpop.f32.mrb[49].mxu1  ;;  %v2081_v4 = vadd.f32 %v4564_v35, %v4520_v47 }
 0x28d   : > { %v2812_v30 = vadd.f32 %v2811_v50, %v2810_v56  ;;  %v2813_v40 = vpop.f32.mrb[50].mxu1 }
 0x28e   : > { %v2814_v10 = vpop.f32.mrb[51].mxu1 }
 0x28f   : > { %v2815_v1 = vadd.f32 %v2814_v10, %v2813_v40  ;;  %v4580_v38 = vadd.f32 %v2812_v30, %v2065_v53  ;;  %v2084_v30 = vadd.f32 %v4566_v22, %v4520_v47 }
 0x290   : > { %v2888_v46 = vpop.f32.mrb[48].mxu0 }
 0x291   : > { %v2331_v20 = vadd.f32 %v2888_v46, %v4530_v61  ;;  %v2322_v16 = vpop.f32.mrb[49].mxu0  ;;  %v4583_v14 = vadd.f32 %v2815_v1, %v2068_v13 }
 0x292   : > { %v2323_v63 = vadd.f32 %v2322_v16, %v4524_v9  ;;  %v2889_v54 = vpop.f32.mrb[50].mxu0  ;;  %v2076_v9 = vadd.f32 %v2709_v3, %v4520_v47 }
 0x293   : > { %2982 = vtanh.f32 %v2331_v20  ;;  %v2334_v41 = vadd.f32 %v2889_v54, %v4532_v45  ;;  %v2325_v7 = vpop.f32.mrb[51].mxu0  ;;  %v2816_v60 = vpop.f32.mrb[52].mxu1 }
 0x294   : > { %2984 = vtanh.f32 %v2323_v63  ;;  %v2326_v49 = vadd.f32 %v2325_v7, %v4526_v39  ;;  %v2817_v36 = vpop.f32.mrb[53].mxu1 }
 0x295   : > { %2986 = vtanh.f32 %v2334_v41  ;;  %v2818_v61 = vadd.f32 %v2817_v36, %v2816_v60  ;;  %v2819_v21 = vpop.f32.mrb[54].mxu1 }
 0x296   : > { %2988 = vtanh.f32 %v2326_v49  ;;  %v2820_v57 = vpop.f32.mrb[55].mxu1 }
 0x297   : > { %v2821_v43 = vadd.f32 %v2820_v57, %v2819_v21  ;;  %v4590_v62 = vadd.f32 %v2818_v61, %v2073_v51  ;;  %v2092_v61 = vadd.f32 %v4576_v48, %v4520_v47 }
 0x298   : > { %v2892_v45 = vpop.f32.mrb[52].mxu0 }
 0x299   : > { %v2347_v23 = vadd.f32 %v2892_v45, %v4542_v18  ;;  %v2338_v31 = vpop.f32.mrb[53].mxu0  ;;  %v4593_v19 = vadd.f32 %v2821_v43, %v2076_v9 }
 0x29a   : > { %v2339_v39 = vadd.f32 %v2338_v31, %v4536_v32  ;;  %v2893_v34 = vpop.f32.mrb[54].mxu0 }
 0x29b   : > { %2990 = vtanh.f32 %v2347_v23  ;;  %v2350_v6 = vadd.f32 %v2893_v34, %v4544_v42  ;;  %v2341_v3 = vpop.f32.mrb[55].mxu0  ;;  %v2822_v55 = vpop.f32.mrb[56].mxu1 }
 0x29c   : > { %2992 = vtanh.f32 %v2339_v39  ;;  %v2342_v18 = vadd.f32 %v2341_v3, %v4538_v11  ;;  %v2823_v52 = vpop.f32.mrb[57].mxu1 }
 0x29d   : > { %v2983_v32 = vpop.eup %2982  ;;  %2994 = vtanh.f32 %v2350_v6  ;;  %v2824_v27 = vadd.f32 %v2823_v52, %v2822_v55  ;;  %v2825_v56 = vpop.f32.mrb[58].mxu1 }
 0x29e   : > { %v2985_v50 = vpop.eup %2984  ;;  %2483 = vst [vmem:[%s4601_s18 + $0x10] sm:$0xff] %v2983_v32  ;;  %2996 = vtanh.f32 %v2342_v18  ;;  %v2826_v42 = vpop.f32.mrb[59].mxu1 }
 0x29f   : > { %v2987_v53 = vpop.eup %2986  ;;  %2481 = vst [vmem:[%s4601_s18] sm:$0xff] %v2985_v50  ;;  %v2827_v11 = vadd.f32 %v2826_v42, %v2825_v56  ;;  %v4611_v40 = vadd.f32 %v2824_v27, %v2081_v4  ;;  %v2100_v4 = vadd.f32 %v4503_v25, %v4520_v47 }
 0x2a0   : > { %v2989_v10 = vpop.eup %2988  ;;  %2484 = vst [vmem:[%s4601_s18 + $0x18] sm:$0xff] %v2987_v53  ;;  %v2896_v13 = vpop.f32.mrb[56].mxu0 }
 0x2a1   : > { %2482 = vst [vmem:[%s4601_s18 + $0x8] sm:$0xff] %v2989_v10  ;;  %v2363_v35 = vadd.f32 %v2896_v13, %v4554_v58  ;;  %v2354_v1 = vpop.f32.mrb[57].mxu0  ;;  %v4616_v46 = vadd.f32 %v2827_v11, %v2084_v30  ;;  %v2089_v58 = vadd.f32 %v4574_v5, %v4520_v47 }
 0x2a2   : > { %v2355_v20 = vadd.f32 %v2354_v1, %v4548_v8  ;;  %v2897_v16 = vpop.f32.mrb[58].mxu0 }
 0x2a3   : > { %2998 = vtanh.f32 %v2363_v35  ;;  %v2366_v22 = vadd.f32 %v2897_v16, %v4556_v33  ;;  %v2357_v63 = vpop.f32.mrb[59].mxu0  ;;  %v2828_v54 = vpop.f32.mrb[60].mxu1 }
 0x2a4   : > { %3000 = vtanh.f32 %v2355_v20  ;;  %v2358_v41 = vadd.f32 %v2357_v63, %v4550_v28  ;;  %v2829_v7 = vpop.f32.mrb[61].mxu1 }
 0x2a5   : > { %v2991_v60 = vpop.eup %2990  ;;  %3002 = vtanh.f32 %v2366_v22  ;;  %v2830_v49 = vadd.f32 %v2829_v7, %v2828_v54  ;;  %v2831_v8 = vpop.f32.mrb[62].mxu1  ;;  %v2108_v54 = vadd.f32 %v4507_v59, %v4520_v47 }
 0x2a6   : > { %v2993_v36 = vpop.eup %2992  ;;  %2487 = vst [vmem:[%s4601_s18 + $0x30] sm:$0xff] %v2991_v60  ;;  %3004 = vtanh.f32 %v2358_v41  ;;  %v2832_v33 = vpop.f32.mrb[63].mxu1 }
 0x2a7   : > { %v2995_v51 = vpop.eup %2994  ;;  %2485 = vst [vmem:[%s4601_s18 + $0x20] sm:$0xff] %v2993_v36  ;;  %v2833_v28 = vadd.f32 %v2832_v33, %v2831_v8  ;;  %v4627_v21 = vadd.f32 %v2830_v49, %v2089_v58 }
 0x2a8   : > { %v2997_v57 = vpop.eup %2996  ;;  %2488 = vst [vmem:[%s4601_s18 + $0x38] sm:$0xff] %v2995_v51  ;;  %v2900_v9 = vpop.f32.mrb[60].mxu0 }
 0x2a9   : > { %2486 = vst [vmem:[%s4601_s18 + $0x28] sm:$0xff] %v2997_v57  ;;  %v2379_v5 = vadd.f32 %v2900_v9, %v4570_v44  ;;  %v2370_v43 = vpop.f32.mrb[61].mxu0  ;;  %v4632_v45 = vadd.f32 %v2833_v28, %v2092_v61  ;;  %v2097_v44 = vadd.f32 %v4501_v2, %v4520_v47 }
 0x2aa   : > { %v2371_v23 = vadd.f32 %v2370_v43, %v4560_v12  ;;  %v2901_v31 = vpop.f32.mrb[62].mxu0 }
 0x2ab   : > { %3006 = vtanh.f32 %v2379_v5  ;;  %v2382_v48 = vadd.f32 %v2901_v31, %v4572_v0  ;;  %v2373_v39 = vpop.f32.mrb[63].mxu0  ;;  %v2834_v34 = vpop.f32.mrb[64].mxu1 }
 0x2ac   : > { %3008 = vtanh.f32 %v2371_v23  ;;  %v2374_v6 = vadd.f32 %v2373_v39, %v4562_v15  ;;  %v2835_v3 = vpop.f32.mrb[65].mxu1  ;;  %v2116_v23 = vadd.f32 %v4511_v17, %v4520_v47 }
 0x2ad   : > { %v2999_v55 = vpop.eup %2998  ;;  %3010 = vtanh.f32 %v2382_v48  ;;  %v2836_v18 = vadd.f32 %v2835_v3, %v2834_v34  ;;  %v2837_v12 = vpop.f32.mrb[66].mxu1 }
 0x2ae   : > { %v3001_v52 = vpop.eup %3000  ;;  %2491 = vst [vmem:[%s4601_s18 + $0x50] sm:$0xff] %v2999_v55  ;;  %3012 = vtanh.f32 %v2374_v6  ;;  %v2838_v0 = vpop.f32.mrb[67].mxu1 }
 0x2af   : > { %v3003_v32 = vpop.eup %3002  ;;  %2489 = vst [vmem:[%s4601_s18 + $0x40] sm:$0xff] %v3001_v52  ;;  %v2839_v15 = vadd.f32 %v2838_v0, %v2837_v12  ;;  %v4643_v27 = vadd.f32 %v2836_v18, %v2097_v44 }
 0x2b0   : > { %v3005_v56 = vpop.eup %3004  ;;  %2492 = vst [vmem:[%s4601_s18 + $0x58] sm:$0xff] %v3003_v32  ;;  %v2904_v50 = vpop.f32.mrb[64].mxu0  ;;  %v2121_v32 = vadd.f32 %v4513_v26, %v4520_v47 }
 0x2b1   : > { %2490 = vst [vmem:[%s4601_s18 + $0x48] sm:$0xff] %v3005_v56  ;;  %v2395_v2 = vadd.f32 %v2904_v50, %v4590_v62  ;;  %v2386_v42 = vpop.f32.mrb[65].mxu0  ;;  %v4648_v53 = vadd.f32 %v2839_v15, %v2100_v4  ;;  %v2105_v62 = vadd.f32 %v4505_v29, %v4520_v47 }
 0x2b2   : > { %v2387_v30 = vadd.f32 %v2386_v42, %v4580_v38  ;;  %v2905_v11 = vpop.f32.mrb[66].mxu0 }
 0x2b3   : > { %3014 = vtanh.f32 %v2395_v2  ;;  %v2398_v25 = vadd.f32 %v2905_v11, %v4593_v19  ;;  %v2389_v10 = vpop.f32.mrb[67].mxu0  ;;  %v2840_v13 = vpop.f32.mrb[68].mxu1  ;;  %v2124_v2 = vadd.f32 %v4515_v24, %v4520_v47 }
 0x2b4   : > { %3016 = vtanh.f32 %v2387_v30  ;;  %v2390_v35 = vadd.f32 %v2389_v10, %v4583_v14  ;;  %v2841_v1 = vpop.f32.mrb[69].mxu1 }
 0x2b5   : > { %v3007_v20 = vpop.eup %3006  ;;  %3018 = vtanh.f32 %v2398_v25  ;;  %v2842_v16 = vadd.f32 %v2841_v1, %v2840_v13  ;;  %v2843_v38 = vpop.f32.mrb[70].mxu1 }
 0x2b6   : > { %v3009_v22 = vpop.eup %3008  ;;  %2495 = vst [vmem:[%s4601_s18 + $0x70] sm:$0xff] %v3007_v20  ;;  %3020 = vtanh.f32 %v2390_v35  ;;  %v2844_v19 = vpop.f32.mrb[71].mxu1 }
 0x2b7   : > { %v3011_v63 = vpop.eup %3010  ;;  %2493 = vst [vmem:[%s4601_s18 + $0x60] sm:$0xff] %v3009_v22  ;;  %v2845_v14 = vadd.f32 %v2844_v19, %v2843_v38  ;;  %v2266_v41 = vadd.f32 %v2842_v16, %v2105_v62 }
 0x2b8   : > { %v3013_v7 = vpop.eup %3012  ;;  %2496 = vst [vmem:[%s4601_s18 + $0x78] sm:$0xff] %v3011_v63  ;;  %v2908_v60 = vpop.f32.mrb[68].mxu0 }
 0x2b9   : > { %2494 = vst [vmem:[%s4601_s18 + $0x68] sm:$0xff] %v3013_v7  ;;  %v2411_v29 = vadd.f32 %v2908_v60, %v4627_v21  ;;  %v2402_v58 = vpop.f32.mrb[69].mxu0  ;;  %v2269_v49 = vadd.f32 %v2845_v14, %v2108_v54  ;;  %v2113_v21 = vadd.f32 %v4509_v37, %v4520_v47 }
 0x2ba   : > { %v2403_v8 = vadd.f32 %v2402_v58, %v4611_v40  ;;  %v2909_v36 = vpop.f32.mrb[70].mxu0 }
 0x2bb   : > { %3022 = vtanh.f32 %v2411_v29  ;;  %v2414_v33 = vadd.f32 %v2909_v36, %v4632_v45  ;;  %v2405_v51 = vpop.f32.mrb[71].mxu0  ;;  %v2846_v59 = vpop.f32.mrb[72].mxu1 }
 0x2bc   : > { %3024 = vtanh.f32 %v2403_v8  ;;  %v2406_v61 = vadd.f32 %v2405_v51, %v4616_v46  ;;  %v2847_v28 = vpop.f32.mrb[73].mxu1 }
 0x2bd   : > { %v3015_v57 = vpop.eup %3014  ;;  %3026 = vtanh.f32 %v2414_v33  ;;  %v2848_v9 = vadd.f32 %v2847_v28, %v2846_v59  ;;  %v2849_v40 = vpop.f32.mrb[74].mxu1 }
 0x2be   : > { %v3017_v5 = vpop.eup %3016  ;;  %2499 = vst [vmem:[%s4601_s18 + $0x90] sm:$0xff] %v3015_v57  ;;  %3028 = vtanh.f32 %v2406_v61  ;;  %v2850_v43 = vpop.f32.mrb[75].mxu1 }
 0x2bf   : > { %v3019_v45 = vpop.eup %3018  ;;  %2497 = vst [vmem:[%s4601_s18 + $0x80] sm:$0xff] %v3017_v5  ;;  %v2851_v46 = vadd.f32 %v2850_v43, %v2849_v40  ;;  %v2274_v31 = vadd.f32 %v2848_v9, %v2113_v21 }
 0x2c0   : > { %v3021_v48 = vpop.eup %3020  ;;  %2500 = vst [vmem:[%s4601_s18 + $0x98] sm:$0xff] %v3019_v45  ;;  %v2912_v39 = vpop.f32.mrb[72].mxu0 }
 0x2c1   : > { %2498 = vst [vmem:[%s4601_s18 + $0x88] sm:$0xff] %v3021_v48  ;;  %v2427_v37 = vadd.f32 %v2912_v39, %v2266_v41  ;;  %v2418_v34 = vpop.f32.mrb[73].mxu0  ;;  %v2277_v6 = vadd.f32 %v2851_v46, %v2116_v23 }
 0x2c2   : > { %v2419_v3 = vadd.f32 %v2418_v34, %v4643_v27  ;;  %v2913_v55 = vpop.f32.mrb[74].mxu0 }
 0x2c3   : > { %3030 = vtanh.f32 %v2427_v37  ;;  %v2430_v44 = vadd.f32 %v2913_v55, %v2269_v49  ;;  %v2421_v18 = vpop.f32.mrb[75].mxu0  ;;  %v2852_v12 = vpop.f32.mrb[76].mxu1 }
 0x2c4   : > { %3032 = vtanh.f32 %v2419_v3  ;;  %v2422_v17 = vadd.f32 %v2421_v18, %v4648_v53  ;;  %v2853_v52 = vpop.f32.mrb[77].mxu1 }
 0x2c5   : > { %v3023_v0 = vpop.eup %3022  ;;  %3034 = vtanh.f32 %v2430_v44  ;;  %v2854_v4 = vadd.f32 %v2853_v52, %v2852_v12  ;;  %v2855_v15 = vpop.f32.mrb[78].mxu1 }
 0x2c6   : > { %v3025_v27 = vpop.eup %3024  ;;  %2503 = vst [vmem:[%s4601_s18 + $0xb0] sm:$0xff] %v3023_v0  ;;  %3036 = vtanh.f32 %v2422_v17  ;;  %v2856_v56 = vpop.f32.mrb[79].mxu1 }
 0x2c7   : > { %v3027_v50 = vpop.eup %3026  ;;  %2501 = vst [vmem:[%s4601_s18 + $0xa0] sm:$0xff] %v3025_v27  ;;  %v2282_v42 = vadd.f32 %v2854_v4, %v2121_v32  ;;  %v2857_v53 = vadd.f32 %v2856_v56, %v2855_v15 }
 0x2c8   : > { %v3029_v30 = vpop.eup %3028  ;;  %2504 = vst [vmem:[%s4601_s18 + $0xb8] sm:$0xff] %v3027_v50  ;;  %v2916_v11 = vpop.f32.mrb[76].mxu0 }
 0x2c9   : > { %2502 = vst [vmem:[%s4601_s18 + $0xa8] sm:$0xff] %v3029_v30  ;;  %v2443_v26 = vadd.f32 %v2916_v11, %v2282_v42  ;;  %v2434_v25 = vpop.f32.mrb[77].mxu0  ;;  %v2285_v10 = vadd.f32 %v2857_v53, %v2124_v2 }
 0x2ca   : > { %v2435_v13 = vadd.f32 %v2434_v25, %v2274_v31  ;;  %v2917_v35 = vpop.f32.mrb[78].mxu0 }
 0x2cb   : > { %3038 = vtanh.f32 %v2443_v26  ;;  %v2446_v1 = vadd.f32 %v2917_v35, %v2285_v10  ;;  %v2437_v24 = vpop.f32.mrb[79].mxu0 }
 0x2cc   : > { %3040 = vtanh.f32 %v2435_v13  ;;  %v2438_v47 = vadd.f32 %v2437_v24, %v2277_v6 }
 0x2cd   : > { %v3031_v20 = vpop.eup %3030  ;;  %3042 = vtanh.f32 %v2446_v1 }
 0x2ce   : > { %v3033_v62 = vpop.eup %3032  ;;  %2507 = vst [vmem:[%s4601_s18 + $0xd0] sm:$0xff] %v3031_v20  ;;  %3044 = vtanh.f32 %v2438_v47 }
 0x2cf   : > { %v3035_v16 = vpop.eup %3034  ;;  %2505 = vst [vmem:[%s4601_s18 + $0xc0] sm:$0xff] %v3033_v62 }
 0x2d0   : > { %v3037_v38 = vpop.eup %3036  ;;  %2508 = vst [vmem:[%s4601_s18 + $0xd8] sm:$0xff] %v3035_v16 }
 0x2d1   : > { %2506 = vst [vmem:[%s4601_s18 + $0xc8] sm:$0xff] %v3037_v38 }
 0x2d5   : > { %v3039_v22 = vpop.eup %3038 }
 0x2d6   : > { %v3041_v19 = vpop.eup %3040  ;;  %2511 = vst [vmem:[%s4601_s18 + $0xf0] sm:$0xff] %v3039_v22 }
 0x2d7   : > { %v3043_v63 = vpop.eup %3042  ;;  %2509 = vst [vmem:[%s4601_s18 + $0xe0] sm:$0xff] %v3041_v19 }
 0x2d8   : > { %v3045_v54 = vpop.eup %3044  ;;  %2512 = vst [vmem:[%s4601_s18 + $0xf8] sm:$0xff] %v3043_v63 }
 0x2d9   : > { %2510 = vst [vmem:[%s4601_s18 + $0xe8] sm:$0xff] %v3045_v54 }
 0x2da PF: > { %s16_s21 = sadd.s32 1, %s3052_s21  }
 0x2db   : > { %p13_p4 = scmp.ge.s32.totalorder %s16_s21, 4  }
 0x2dd   :  { %15 = sbr.rel (!%p13_p4) target bundleno = 1 (0x1), region = 74 }

</bundles_post_ra>
